<compile_context>
chip_gen: v5e
topology: v5e:2x2
jax: 0.10.0
libtpu: 0.0.40
codegen_flags: <defaults>
</compile_context>

<pallas_src>
import functools

import jax
import jax.numpy as jnp
from jax.experimental import pallas as pl
from jax.experimental.pallas import tpu as pltpu


def _round_up(v, m):
    return ((v + m - 1) // m) * m


def _fold_bn(gamma, beta, mean, var, eps=1e-5):
    scale = gamma / jnp.sqrt(var + eps)
    bias = beta - mean * scale
    return scale, bias


def _silu(v):
    return v * jax.nn.sigmoid(v)


def _bottleneck_kernel(x_hbm, w1_ref, w2_ref, s1_ref, b1_ref, s2_ref, b2_ref,
                       o_ref, xbuf, acc1, hbuf, acc2,
                       *, H, W, TH, add):
    """One (batch, row-tile) grid step: fused Conv-BN-SiLU x2 (+ residual)."""
    n = pl.program_id(0)
    rt = pl.program_id(1)
    r0 = pl.multiple_of(rt * TH, TH)          # first output row of this tile
    TH2, W2 = TH + 2, W + 2                   # h needs a 1px halo for the second conv

    # ---- fetch (TH+4, W+4, C1p) input slab; 2px halo covers both stacked 3x3 'same' convs.
    pltpu.sync_copy(x_hbm.at[n, pl.ds(r0, TH + 4)], xbuf)

    # ---- cv1: 3x3 conv as 9 accumulated (M, K=C1p) @ (K, Cmp) bf16 matmuls -> f32 VMEM acc.
    acc1[...] = jnp.zeros_like(acc1)
    for kh in range(3):                       # row shift: cheap (leading dim)
        for kw in range(3):                   # col shift: small sublane relayout
            a = xbuf[pl.ds(kh, TH2), pl.ds(kw, W2), :]
            a = a.reshape(TH2 * W2, a.shape[-1]).astype(jnp.bfloat16)
            acc1[...] += jnp.dot(a, w1_ref[kh * 3 + kw],
                                 preferred_element_type=jnp.float32)

    h = _silu(acc1[...] * s1_ref[...] + b1_ref[...])            # folded BN + SiLU (f32)
    h = h.reshape(TH2, W2, -1)
    # h's own 'same'-padding halo must be exactly 0 (not silu(bn(0))): mask boundary rows/cols.
    row = jax.lax.broadcasted_iota(jnp.int32, (TH2, W2, 1), 0) + (r0 - 1)
    col = jax.lax.broadcasted_iota(jnp.int32, (TH2, W2, 1), 1)
    valid = (row >= 0) & (row < H) & (col >= 1) & (col <= W)
    hbuf[...] = jnp.where(valid, h, 0.0).astype(jnp.bfloat16)

    # ---- cv2: same structure over the VMEM-resident h tile.
    acc2[...] = jnp.zeros_like(acc2)
    for kh in range(3):
        for kw in range(3):
            b = hbuf[pl.ds(kh, TH), pl.ds(kw, W), :]
            b = b.reshape(TH * W, b.shape[-1])
            acc2[...] += jnp.dot(b, w2_ref[kh * 3 + kw],
                                 preferred_element_type=jnp.float32)

    y = _silu(acc2[...] * s2_ref[...] + b2_ref[...])
    y = y.reshape(TH, W, -1)
    if add:                                                     # shortcut (c1 == c2)
        y = y + xbuf[pl.ds(2, TH), pl.ds(2, W), :]              # f32 residual from the same slab
    o_ref[0] = y.astype(o_ref.dtype)


def bottleneck_nhwc(x_nhwc, params, shortcut=True):
    """Fused Bottleneck forward, NHWC layout (preferred entry point when chaining blocks)."""
    N, H, W, C1 = x_nhwc.shape
    w1, w2 = params["w1"], params["w2"]
    assert w1.shape[:2] == (3, 3) and w2.shape[:2] == (3, 3), "kernel assumes k=(3, 3)"
    Cm, C2 = w1.shape[-1], w2.shape[-1]
    add = bool(shortcut and C1 == C2)

    # lane-dense channel padding (multiples of 128)
    C1p, Cmp, C2p = _round_up(C1, 128), _round_up(Cm, 128), _round_up(C2, 128)
    if add:
        assert C1p == C2p

    s1, b1 = _fold_bn(*params["bn1"])
    s2, b2 = _fold_bn(*params["bn2"])

    # weights packed as (9, Cin_p, Cout_p) bf16, tap index = kh*3 + kw (resident in VMEM)
    w1p = jnp.pad(w1.astype(jnp.bfloat16),
                  ((0, 0), (0, 0), (0, C1p - C1), (0, Cmp - Cm))).reshape(9, C1p, Cmp)
    w2p = jnp.pad(w2.astype(jnp.bfloat16),
                  ((0, 0), (0, 0), (0, Cmp - Cm), (0, C2p - C2))).reshape(9, Cmp, C2p)

    def _pad_vec(v, cp):
        return jnp.pad(v.astype(jnp.float32), (0, cp - v.shape[0])).reshape(1, cp)

    s1p, b1p = _pad_vec(s1, Cmp), _pad_vec(b1, Cmp)
    s2p, b2p = _pad_vec(s2, C2p), _pad_vec(b2, C2p)

    # 2px spatial zero-pad (halo for two stacked 'same' 3x3 convs) + channel pad; XLA fuses this
    # with the surrounding layout change, so it costs about one relayout pass over x.
    x2 = jnp.pad(x_nhwc.astype(jnp.float32), ((0, 0), (2, 2), (2, 2), (0, C1p - C1)))

    # row tile: largest of these dividing H (bounds per-step VMEM; >=2 tiles feeds both v7x TCs)
    TH = next(t for t in (8, 16, 4, 2, 1) if H % t == 0)
    n_taps = 9

    kern = functools.partial(_bottleneck_kernel, H=H, W=W, TH=TH, add=add)

    out = pl.pallas_call(
        kern,
        out_shape=jax.ShapeDtypeStruct((N, H, W, C2p), jnp.float32),
        grid=(N, H // TH),
        in_specs=[
            pl.BlockSpec(memory_space=pl.ANY),                              # x2 stays in HBM
            pl.BlockSpec((n_taps, C1p, Cmp), lambda n, r: (0, 0, 0)),       # w1 taps
            pl.BlockSpec((n_taps, Cmp, C2p), lambda n, r: (0, 0, 0)),       # w2 taps
            pl.BlockSpec((1, Cmp), lambda n, r: (0, 0)),                    # bn1 scale
            pl.BlockSpec((1, Cmp), lambda n, r: (0, 0)),                    # bn1 bias
            pl.BlockSpec((1, C2p), lambda n, r: (0, 0)),                    # bn2 scale
            pl.BlockSpec((1, C2p), lambda n, r: (0, 0)),                    # bn2 bias
        ],
        out_specs=pl.BlockSpec((1, TH, W, C2p), lambda n, r: (n, r, 0, 0)),  # lane-dense store
        scratch_shapes=[
            pltpu.VMEM((TH + 4, W + 4, C1p), jnp.float32),                  # input slab (+halo)
            pltpu.VMEM(((TH + 2) * (W + 2), Cmp), jnp.float32),             # cv1 accumulator
            pltpu.VMEM((TH + 2, W + 2, Cmp), jnp.bfloat16),                 # h tile (+halo)
            pltpu.VMEM((TH * W, C2p), jnp.float32),                         # cv2 accumulator
        ],
        compiler_params=pltpu.CompilerParams(
            dimension_semantics=("parallel", "parallel"),
            vmem_limit_bytes=32 * 1024 * 1024),
    )(x2, w1p, w2p, s1p, b1p, s2p, b2p)

    return out[..., :C2]


def bottleneck_forward(x_nchw, params, shortcut=True):
    """PyTorch-layout wrapper.  When chaining Bottlenecks, call bottleneck_nhwc directly and keep
    activations NHWC end-to-end to avoid the two transposes per block."""
    x = jnp.transpose(x_nchw, (0, 2, 3, 1))
    y = bottleneck_nhwc(x, params, shortcut=shortcut)
    return jnp.transpose(y, (0, 3, 1, 2))


def init_bottleneck_params(key, c1, c2, k=(3, 3), e=0.5):
    """Deterministic synthetic parameters matching Bottleneck(c1, c2).__init__ shapes."""
    c_ = int(c2 * e)
    k1, k2, k3, k4 = jax.random.split(key, 4)
    params = {}
    # cv1: Conv2d(c1, c_, 3, bias=False) -> weight stored as (KH, KW, Cin, Cout)
    params["w1"] = 0.1 * jax.random.normal(k1, (k[0], k[0], c1, c_), jnp.float32)
    params["bn1"] = (1.0 + 0.05 * jax.random.normal(k2, (c_,), jnp.float32),   # gamma
                     0.02 * jnp.arange(c_, dtype=jnp.float32),                 # beta
                     0.01 * jnp.arange(c_, dtype=jnp.float32),                 # running_mean
                     1.0 + 0.1 * jnp.arange(c_, dtype=jnp.float32))            # running_var
    # cv2: Conv2d(c_, c2, 3, bias=False)
    params["w2"] = 0.1 * jax.random.normal(k3, (k[1], k[1], c_, c2), jnp.float32)
    params["bn2"] = (1.0 + 0.05 * jax.random.normal(k4, (c2,), jnp.float32),
                     -0.02 * jnp.arange(c2, dtype=jnp.float32),
                     0.03 * jnp.arange(c2, dtype=jnp.float32),
                     1.0 + 0.05 * jnp.arange(c2, dtype=jnp.float32))
    return params


# ---------------- pure-JAX reference (f32) for correctness checking ----------------
def _ref_conv_bn_silu(x, w, scale, bias):
    y = jax.lax.conv_general_dilated(x, w, window_strides=(1, 1), padding="SAME",
                                     dimension_numbers=("NHWC", "HWIO", "NHWC"))
    y = y * scale + bias
    return y * jax.nn.sigmoid(y)


def bottleneck_ref_nhwc(x_nhwc, params, shortcut=True):
    s1, b1 = _fold_bn(*params["bn1"])
    s2, b2 = _fold_bn(*params["bn2"])
    h = _ref_conv_bn_silu(x_nhwc, params["w1"], s1, b1)
    y = _ref_conv_bn_silu(h, params["w2"], s2, b2)
    if shortcut and x_nhwc.shape[-1] == params["w2"].shape[-1]:
        y = y + x_nhwc
    return y


if __name__ == "__main__":
    key = jax.random.PRNGKey(0)
    kx, kp = jax.random.split(key)

    N, C, H, W = 2, 4, 16, 16                        # c1 = c2 = 4 -> shortcut active, c_ = 2
    x = jax.random.normal(kx, (N, C, H, W), jnp.float32)
    params = init_bottleneck_params(kp, c1=C, c2=C, k=(3, 3), e=0.5)

    fwd = jax.jit(lambda xx, pp: bottleneck_forward(xx, pp, shortcut=True))
    out = jax.block_until_ready(fwd(x, params))
    assert out.shape == (N, C, H, W)

    # reference check (kernel matmuls are bf16 -> loose tolerance)
    ref = jnp.transpose(
        bottleneck_ref_nhwc(jnp.transpose(x, (0, 2, 3, 1)), params, shortcut=True),
        (0, 3, 1, 2))
    max_err = float(jnp.max(jnp.abs(out - ref)))
    assert max_err < 5e-2, f"kernel/reference mismatch: max abs err = {max_err}"
    print("KERNEL_OK")
</pallas_src>

<mosaic_0001>
module attributes {stable_mosaic.version = 11 : i64} {
  func.func @_bottleneck_kernel(%arg0: i32, %arg1: i32, %arg2: memref<2x20x20x128xf32, #tpu.memory_space<any>>, %arg3: memref<9x128x128xbf16, #tpu.memory_space<vmem>>, %arg4: memref<9x128x128xbf16, #tpu.memory_space<vmem>>, %arg5: memref<1x128xf32, #tpu.memory_space<vmem>>, %arg6: memref<1x128xf32, #tpu.memory_space<vmem>>, %arg7: memref<1x128xf32, #tpu.memory_space<vmem>>, %arg8: memref<1x128xf32, #tpu.memory_space<vmem>>, %arg9: memref<1x8x16x128xf32, #tpu.memory_space<vmem>>, %arg10: memref<12x20x128xf32, #tpu.memory_space<vmem>>, %arg11: memref<180x128xf32, #tpu.memory_space<vmem>>, %arg12: memref<10x18x128xbf16, #tpu.memory_space<vmem>>, %arg13: memref<128x128xf32, #tpu.memory_space<vmem>>) attributes {dimension_semantics = [#tpu.dimension_semantics<parallel>, #tpu.dimension_semantics<parallel>], iteration_bounds = array<i64: 2, 2>, scalar_prefetch = 0 : i64, scratch_operands = 4 : i64, tpu.core_type = #tpu.core_type<tc>, window_params = [{}, {pipeline_mode = #tpu.pipeline_mode<synchronous>, transform_indices = @transform_1, window_bounds = array<i64: 9, 128, 128>}, {pipeline_mode = #tpu.pipeline_mode<synchronous>, transform_indices = @transform_2, window_bounds = array<i64: 9, 128, 128>}, {pipeline_mode = #tpu.pipeline_mode<synchronous>, transform_indices = @transform_3, window_bounds = array<i64: 1, 128>}, {pipeline_mode = #tpu.pipeline_mode<synchronous>, transform_indices = @transform_4, window_bounds = array<i64: 1, 128>}, {pipeline_mode = #tpu.pipeline_mode<synchronous>, transform_indices = @transform_5, window_bounds = array<i64: 1, 128>}, {pipeline_mode = #tpu.pipeline_mode<synchronous>, transform_indices = @transform_6, window_bounds = array<i64: 1, 128>}, {transform_indices = @transform_7, window_bounds = array<i64: 1, 8, 16, 128>}]} {
    %c8_i32 = arith.constant 8 : i32
    %0 = arith.muli %arg1, %c8_i32 : i32
    %1 = tpu.assume_multiple %0, 8 : i32
    "tpu.region"() ({
      %214 = tpu.sem_alloc : memref<!tpu.dma_semaphore, #tpu.memory_space<semaphore_mem>>
      %c0_i32_221 = arith.constant 0 : i32
      %c0_i32_222 = arith.constant 0 : i32
      %215 = tpu.memref_slice %arg2[%arg0, %1, %c0_i32_221, %c0_i32_222] : memref<2x20x20x128xf32, #tpu.memory_space<any>> -> memref<1x12x20x128xf32, #tpu.memory_space<any>>
      %216 = tpu.memref_squeeze %215 : memref<1x12x20x128xf32, #tpu.memory_space<any>> -> memref<12x20x128xf32, #tpu.memory_space<any>>
      tpu.enqueue_dma source(%216 : memref<12x20x128xf32, #tpu.memory_space<any>>) target(%arg10 : memref<12x20x128xf32, #tpu.memory_space<vmem>>) target_semaphore(%214 : memref<!tpu.dma_semaphore, #tpu.memory_space<semaphore_mem>>)
      %c0_i32_223 = arith.constant 0 : i32
      %c0_i32_224 = arith.constant 0 : i32
      %217 = tpu.memref_slice %arg2[%arg0, %1, %c0_i32_223, %c0_i32_224] : memref<2x20x20x128xf32, #tpu.memory_space<any>> -> memref<1x12x20x128xf32, #tpu.memory_space<any>>
      %218 = tpu.memref_squeeze %217 : memref<1x12x20x128xf32, #tpu.memory_space<any>> -> memref<12x20x128xf32, #tpu.memory_space<any>>
      tpu.wait_dma2 semaphore(%214 : memref<!tpu.dma_semaphore, #tpu.memory_space<semaphore_mem>>) src(%218 : memref<12x20x128xf32, #tpu.memory_space<any>>) dst(%arg10 : memref<12x20x128xf32, #tpu.memory_space<vmem>>)
      tpu.yield
    }) : () -> ()
    %cst = arith.constant 0.000000e+00 : f32
    %2 = vector.broadcast %cst : f32 to vector<180x128xf32>
    %c0 = arith.constant 0 : index
    %c0_0 = arith.constant 0 : index
    %3 = vector.load %arg11[%c0, %c0_0] : memref<180x128xf32, #tpu.memory_space<vmem>>, vector<180x128xf32>
    tpu.vector_store %arg11[%c0, %c0_0], %2 {strides = array<i32>} : memref<180x128xf32, #tpu.memory_space<vmem>>, vector<180x128xf32>,
    %c0_1 = arith.constant 0 : index
    %c0_2 = arith.constant 0 : index
    %c0_3 = arith.constant 0 : index
    %4 = vector.load %arg10[%c0_1, %c0_2, %c0_3] : memref<12x20x128xf32, #tpu.memory_space<vmem>>, vector<10x18x128xf32>
    %5 = vector.shape_cast %4 : vector<10x18x128xf32> to vector<180x128xf32>
    %6 = arith.truncf %5 : vector<180x128xf32> to vector<180x128xbf16>
    %c0_4 = arith.constant 0 : index
    %c0_5 = arith.constant 0 : index
    %7 = vector.load %arg11[%c0_4, %c0_5] : memref<180x128xf32, #tpu.memory_space<vmem>>, vector<180x128xf32>
    %c0_6 = arith.constant 0 : index
    %c0_7 = arith.constant 0 : index
    %c0_8 = arith.constant 0 : index
    %8 = vector.load %arg3[%c0_6, %c0_7, %c0_8] : memref<9x128x128xbf16, #tpu.memory_space<vmem>>, vector<1x128x128xbf16>
    %9 = vector.shape_cast %8 : vector<1x128x128xbf16> to vector<128x128xbf16>
    %cst_9 = arith.constant dense<0.000000e+00> : vector<180x128xf32>
    %10 = tpu.matmul %6, %9, %cst_9 {dimension_numbers = #tpu.dot_dimension_numbers<[1], [0], [0], [1], [0, 0, 1, 1], [], []>} : vector<180x128xbf16>, vector<128x128xbf16>, vector<180x128xf32> -> vector<180x128xf32>
    %11 = arith.addf %7, %10 : vector<180x128xf32>
    %c0_10 = arith.constant 0 : index
    %c0_11 = arith.constant 0 : index
    %12 = vector.load %arg11[%c0_10, %c0_11] : memref<180x128xf32, #tpu.memory_space<vmem>>, vector<180x128xf32>
    tpu.vector_store %arg11[%c0_10, %c0_11], %11 {strides = array<i32>} : memref<180x128xf32, #tpu.memory_space<vmem>>, vector<180x128xf32>,
    %c0_12 = arith.constant 0 : index
    %c1 = arith.constant 1 : index
    %c0_13 = arith.constant 0 : index
    %13 = vector.load %arg10[%c0_12, %c1, %c0_13] : memref<12x20x128xf32, #tpu.memory_space<vmem>>, vector<10x18x128xf32>
    %14 = vector.shape_cast %13 : vector<10x18x128xf32> to vector<180x128xf32>
    %15 = arith.truncf %14 : vector<180x128xf32> to vector<180x128xbf16>
    %c0_14 = arith.constant 0 : index
    %c0_15 = arith.constant 0 : index
    %16 = vector.load %arg11[%c0_14, %c0_15] : memref<180x128xf32, #tpu.memory_space<vmem>>, vector<180x128xf32>
    %c1_16 = arith.constant 1 : index
    %c0_17 = arith.constant 0 : index
    %c0_18 = arith.constant 0 : index
    %17 = vector.load %arg3[%c1_16, %c0_17, %c0_18] : memref<9x128x128xbf16, #tpu.memory_space<vmem>>, vector<1x128x128xbf16>
    %18 = vector.shape_cast %17 : vector<1x128x128xbf16> to vector<128x128xbf16>
    %cst_19 = arith.constant dense<0.000000e+00> : vector<180x128xf32>
    %19 = tpu.matmul %15, %18, %cst_19 {dimension_numbers = #tpu.dot_dimension_numbers<[1], [0], [0], [1], [0, 0, 1, 1], [], []>} : vector<180x128xbf16>, vector<128x128xbf16>, vector<180x128xf32> -> vector<180x128xf32>
    %20 = arith.addf %16, %19 : vector<180x128xf32>
    %c0_20 = arith.constant 0 : index
    %c0_21 = arith.constant 0 : index
    %21 = vector.load %arg11[%c0_20, %c0_21] : memref<180x128xf32, #tpu.memory_space<vmem>>, vector<180x128xf32>
    tpu.vector_store %arg11[%c0_20, %c0_21], %20 {strides = array<i32>} : memref<180x128xf32, #tpu.memory_space<vmem>>, vector<180x128xf32>,
    %c0_22 = arith.constant 0 : index
    %c2 = arith.constant 2 : index
    %c0_23 = arith.constant 0 : index
    %22 = vector.load %arg10[%c0_22, %c2, %c0_23] : memref<12x20x128xf32, #tpu.memory_space<vmem>>, vector<10x18x128xf32>
    %23 = vector.shape_cast %22 : vector<10x18x128xf32> to vector<180x128xf32>
    %24 = arith.truncf %23 : vector<180x128xf32> to vector<180x128xbf16>
    %c0_24 = arith.constant 0 : index
    %c0_25 = arith.constant 0 : index
    %25 = vector.load %arg11[%c0_24, %c0_25] : memref<180x128xf32, #tpu.memory_space<vmem>>, vector<180x128xf32>
    %c2_26 = arith.constant 2 : index
    %c0_27 = arith.constant 0 : index
    %c0_28 = arith.constant 0 : index
    %26 = vector.load %arg3[%c2_26, %c0_27, %c0_28] : memref<9x128x128xbf16, #tpu.memory_space<vmem>>, vector<1x128x128xbf16>
    %27 = vector.shape_cast %26 : vector<1x128x128xbf16> to vector<128x128xbf16>
    %cst_29 = arith.constant dense<0.000000e+00> : vector<180x128xf32>
    %28 = tpu.matmul %24, %27, %cst_29 {dimension_numbers = #tpu.dot_dimension_numbers<[1], [0], [0], [1], [0, 0, 1, 1], [], []>} : vector<180x128xbf16>, vector<128x128xbf16>, vector<180x128xf32> -> vector<180x128xf32>
    %29 = arith.addf %25, %28 : vector<180x128xf32>
    %c0_30 = arith.constant 0 : index
    %c0_31 = arith.constant 0 : index
    %30 = vector.load %arg11[%c0_30, %c0_31] : memref<180x128xf32, #tpu.memory_space<vmem>>, vector<180x128xf32>
    tpu.vector_store %arg11[%c0_30, %c0_31], %29 {strides = array<i32>} : memref<180x128xf32, #tpu.memory_space<vmem>>, vector<180x128xf32>,
    %c1_32 = arith.constant 1 : index
    %c0_33 = arith.constant 0 : index
    %c0_34 = arith.constant 0 : index
    %31 = vector.load %arg10[%c1_32, %c0_33, %c0_34] : memref<12x20x128xf32, #tpu.memory_space<vmem>>, vector<10x18x128xf32>
    %32 = vector.shape_cast %31 : vector<10x18x128xf32> to vector<180x128xf32>
    %33 = arith.truncf %32 : vector<180x128xf32> to vector<180x128xbf16>
    %c0_35 = arith.constant 0 : index
    %c0_36 = arith.constant 0 : index
    %34 = vector.load %arg11[%c0_35, %c0_36] : memref<180x128xf32, #tpu.memory_space<vmem>>, vector<180x128xf32>
    %c3 = arith.constant 3 : index
    %c0_37 = arith.constant 0 : index
    %c0_38 = arith.constant 0 : index
    %35 = vector.load %arg3[%c3, %c0_37, %c0_38] : memref<9x128x128xbf16, #tpu.memory_space<vmem>>, vector<1x128x128xbf16>
    %36 = vector.shape_cast %35 : vector<1x128x128xbf16> to vector<128x128xbf16>
    %cst_39 = arith.constant dense<0.000000e+00> : vector<180x128xf32>
    %37 = tpu.matmul %33, %36, %cst_39 {dimension_numbers = #tpu.dot_dimension_numbers<[1], [0], [0], [1], [0, 0, 1, 1], [], []>} : vector<180x128xbf16>, vector<128x128xbf16>, vector<180x128xf32> -> vector<180x128xf32>
    %38 = arith.addf %34, %37 : vector<180x128xf32>
    %c0_40 = arith.constant 0 : index
    %c0_41 = arith.constant 0 : index
    %39 = vector.load %arg11[%c0_40, %c0_41] : memref<180x128xf32, #tpu.memory_space<vmem>>, vector<180x128xf32>
    tpu.vector_store %arg11[%c0_40, %c0_41], %38 {strides = array<i32>} : memref<180x128xf32, #tpu.memory_space<vmem>>, vector<180x128xf32>,
    %c1_42 = arith.constant 1 : index
    %c1_43 = arith.constant 1 : index
    %c0_44 = arith.constant 0 : index
    %40 = vector.load %arg10[%c1_42, %c1_43, %c0_44] : memref<12x20x128xf32, #tpu.memory_space<vmem>>, vector<10x18x128xf32>
    %41 = vector.shape_cast %40 : vector<10x18x128xf32> to vector<180x128xf32>
    %42 = arith.truncf %41 : vector<180x128xf32> to vector<180x128xbf16>
    %c0_45 = arith.constant 0 : index
    %c0_46 = arith.constant 0 : index
    %43 = vector.load %arg11[%c0_45, %c0_46] : memref<180x128xf32, #tpu.memory_space<vmem>>, vector<180x128xf32>
    %c4 = arith.constant 4 : index
    %c0_47 = arith.constant 0 : index
    %c0_48 = arith.constant 0 : index
    %44 = vector.load %arg3[%c4, %c0_47, %c0_48] : memref<9x128x128xbf16, #tpu.memory_space<vmem>>, vector<1x128x128xbf16>
    %45 = vector.shape_cast %44 : vector<1x128x128xbf16> to vector<128x128xbf16>
    %cst_49 = arith.constant dense<0.000000e+00> : vector<180x128xf32>
    %46 = tpu.matmul %42, %45, %cst_49 {dimension_numbers = #tpu.dot_dimension_numbers<[1], [0], [0], [1], [0, 0, 1, 1], [], []>} : vector<180x128xbf16>, vector<128x128xbf16>, vector<180x128xf32> -> vector<180x128xf32>
    %47 = arith.addf %43, %46 : vector<180x128xf32>
    %c0_50 = arith.constant 0 : index
    %c0_51 = arith.constant 0 : index
    %48 = vector.load %arg11[%c0_50, %c0_51] : memref<180x128xf32, #tpu.memory_space<vmem>>, vector<180x128xf32>
    tpu.vector_store %arg11[%c0_50, %c0_51], %47 {strides = array<i32>} : memref<180x128xf32, #tpu.memory_space<vmem>>, vector<180x128xf32>,
    %c1_52 = arith.constant 1 : index
    %c2_53 = arith.constant 2 : index
    %c0_54 = arith.constant 0 : index
    %49 = vector.load %arg10[%c1_52, %c2_53, %c0_54] : memref<12x20x128xf32, #tpu.memory_space<vmem>>, vector<10x18x128xf32>
    %50 = vector.shape_cast %49 : vector<10x18x128xf32> to vector<180x128xf32>
    %51 = arith.truncf %50 : vector<180x128xf32> to vector<180x128xbf16>
    %c0_55 = arith.constant 0 : index
    %c0_56 = arith.constant 0 : index
    %52 = vector.load %arg11[%c0_55, %c0_56] : memref<180x128xf32, #tpu.memory_space<vmem>>, vector<180x128xf32>
    %c5 = arith.constant 5 : index
    %c0_57 = arith.constant 0 : index
    %c0_58 = arith.constant 0 : index
    %53 = vector.load %arg3[%c5, %c0_57, %c0_58] : memref<9x128x128xbf16, #tpu.memory_space<vmem>>, vector<1x128x128xbf16>
    %54 = vector.shape_cast %53 : vector<1x128x128xbf16> to vector<128x128xbf16>
    %cst_59 = arith.constant dense<0.000000e+00> : vector<180x128xf32>
    %55 = tpu.matmul %51, %54, %cst_59 {dimension_numbers = #tpu.dot_dimension_numbers<[1], [0], [0], [1], [0, 0, 1, 1], [], []>} : vector<180x128xbf16>, vector<128x128xbf16>, vector<180x128xf32> -> vector<180x128xf32>
    %56 = arith.addf %52, %55 : vector<180x128xf32>
    %c0_60 = arith.constant 0 : index
    %c0_61 = arith.constant 0 : index
    %57 = vector.load %arg11[%c0_60, %c0_61] : memref<180x128xf32, #tpu.memory_space<vmem>>, vector<180x128xf32>
    tpu.vector_store %arg11[%c0_60, %c0_61], %56 {strides = array<i32>} : memref<180x128xf32, #tpu.memory_space<vmem>>, vector<180x128xf32>,
    %c2_62 = arith.constant 2 : index
    %c0_63 = arith.constant 0 : index
    %c0_64 = arith.constant 0 : index
    %58 = vector.load %arg10[%c2_62, %c0_63, %c0_64] : memref<12x20x128xf32, #tpu.memory_space<vmem>>, vector<10x18x128xf32>
    %59 = vector.shape_cast %58 : vector<10x18x128xf32> to vector<180x128xf32>
    %60 = arith.truncf %59 : vector<180x128xf32> to vector<180x128xbf16>
    %c0_65 = arith.constant 0 : index
    %c0_66 = arith.constant 0 : index
    %61 = vector.load %arg11[%c0_65, %c0_66] : memref<180x128xf32, #tpu.memory_space<vmem>>, vector<180x128xf32>
    %c6 = arith.constant 6 : index
    %c0_67 = arith.constant 0 : index
    %c0_68 = arith.constant 0 : index
    %62 = vector.load %arg3[%c6, %c0_67, %c0_68] : memref<9x128x128xbf16, #tpu.memory_space<vmem>>, vector<1x128x128xbf16>
    %63 = vector.shape_cast %62 : vector<1x128x128xbf16> to vector<128x128xbf16>
    %cst_69 = arith.constant dense<0.000000e+00> : vector<180x128xf32>
    %64 = tpu.matmul %60, %63, %cst_69 {dimension_numbers = #tpu.dot_dimension_numbers<[1], [0], [0], [1], [0, 0, 1, 1], [], []>} : vector<180x128xbf16>, vector<128x128xbf16>, vector<180x128xf32> -> vector<180x128xf32>
    %65 = arith.addf %61, %64 : vector<180x128xf32>
    %c0_70 = arith.constant 0 : index
    %c0_71 = arith.constant 0 : index
    %66 = vector.load %arg11[%c0_70, %c0_71] : memref<180x128xf32, #tpu.memory_space<vmem>>, vector<180x128xf32>
    tpu.vector_store %arg11[%c0_70, %c0_71], %65 {strides = array<i32>} : memref<180x128xf32, #tpu.memory_space<vmem>>, vector<180x128xf32>,
    %c2_72 = arith.constant 2 : index
    %c1_73 = arith.constant 1 : index
    %c0_74 = arith.constant 0 : index
    %67 = vector.load %arg10[%c2_72, %c1_73, %c0_74] : memref<12x20x128xf32, #tpu.memory_space<vmem>>, vector<10x18x128xf32>
    %68 = vector.shape_cast %67 : vector<10x18x128xf32> to vector<180x128xf32>
    %69 = arith.truncf %68 : vector<180x128xf32> to vector<180x128xbf16>
    %c0_75 = arith.constant 0 : index
    %c0_76 = arith.constant 0 : index
    %70 = vector.load %arg11[%c0_75, %c0_76] : memref<180x128xf32, #tpu.memory_space<vmem>>, vector<180x128xf32>
    %c7 = arith.constant 7 : index
    %c0_77 = arith.constant 0 : index
    %c0_78 = arith.constant 0 : index
    %71 = vector.load %arg3[%c7, %c0_77, %c0_78] : memref<9x128x128xbf16, #tpu.memory_space<vmem>>, vector<1x128x128xbf16>
    %72 = vector.shape_cast %71 : vector<1x128x128xbf16> to vector<128x128xbf16>
    %cst_79 = arith.constant dense<0.000000e+00> : vector<180x128xf32>
    %73 = tpu.matmul %69, %72, %cst_79 {dimension_numbers = #tpu.dot_dimension_numbers<[1], [0], [0], [1], [0, 0, 1, 1], [], []>} : vector<180x128xbf16>, vector<128x128xbf16>, vector<180x128xf32> -> vector<180x128xf32>
    %74 = arith.addf %70, %73 : vector<180x128xf32>
    %c0_80 = arith.constant 0 : index
    %c0_81 = arith.constant 0 : index
    %75 = vector.load %arg11[%c0_80, %c0_81] : memref<180x128xf32, #tpu.memory_space<vmem>>, vector<180x128xf32>
    tpu.vector_store %arg11[%c0_80, %c0_81], %74 {strides = array<i32>} : memref<180x128xf32, #tpu.memory_space<vmem>>, vector<180x128xf32>,
    %c2_82 = arith.constant 2 : index
    %c2_83 = arith.constant 2 : index
    %c0_84 = arith.constant 0 : index
    %76 = vector.load %arg10[%c2_82, %c2_83, %c0_84] : memref<12x20x128xf32, #tpu.memory_space<vmem>>, vector<10x18x128xf32>
    %77 = vector.shape_cast %76 : vector<10x18x128xf32> to vector<180x128xf32>
    %78 = arith.truncf %77 : vector<180x128xf32> to vector<180x128xbf16>
    %c0_85 = arith.constant 0 : index
    %c0_86 = arith.constant 0 : index
    %79 = vector.load %arg11[%c0_85, %c0_86] : memref<180x128xf32, #tpu.memory_space<vmem>>, vector<180x128xf32>
    %c8 = arith.constant 8 : index
    %c0_87 = arith.constant 0 : index
    %c0_88 = arith.constant 0 : index
    %80 = vector.load %arg3[%c8, %c0_87, %c0_88] : memref<9x128x128xbf16, #tpu.memory_space<vmem>>, vector<1x128x128xbf16>
    %81 = vector.shape_cast %80 : vector<1x128x128xbf16> to vector<128x128xbf16>
    %cst_89 = arith.constant dense<0.000000e+00> : vector<180x128xf32>
    %82 = tpu.matmul %78, %81, %cst_89 {dimension_numbers = #tpu.dot_dimension_numbers<[1], [0], [0], [1], [0, 0, 1, 1], [], []>} : vector<180x128xbf16>, vector<128x128xbf16>, vector<180x128xf32> -> vector<180x128xf32>
    %83 = arith.addf %79, %82 : vector<180x128xf32>
    %c0_90 = arith.constant 0 : index
    %c0_91 = arith.constant 0 : index
    %84 = vector.load %arg11[%c0_90, %c0_91] : memref<180x128xf32, #tpu.memory_space<vmem>>, vector<180x128xf32>
    tpu.vector_store %arg11[%c0_90, %c0_91], %83 {strides = array<i32>} : memref<180x128xf32, #tpu.memory_space<vmem>>, vector<180x128xf32>,
    %c0_92 = arith.constant 0 : index
    %c0_93 = arith.constant 0 : index
    %85 = vector.load %arg11[%c0_92, %c0_93] : memref<180x128xf32, #tpu.memory_space<vmem>>, vector<180x128xf32>
    %c0_94 = arith.constant 0 : index
    %c0_95 = arith.constant 0 : index
    %86 = vector.load %arg5[%c0_94, %c0_95] : memref<1x128xf32, #tpu.memory_space<vmem>>, vector<1x128xf32>
    %87 = vector.broadcast %86 : vector<1x128xf32> to vector<180x128xf32>
    %88 = arith.mulf %85, %87 : vector<180x128xf32>
    %c0_96 = arith.constant 0 : index
    %c0_97 = arith.constant 0 : index
    %89 = vector.load %arg6[%c0_96, %c0_97] : memref<1x128xf32, #tpu.memory_space<vmem>>, vector<1x128xf32>
    %90 = vector.broadcast %89 : vector<1x128xf32> to vector<180x128xf32>
    %91 = arith.addf %88, %90 : vector<180x128xf32>
    %92 = arith.negf %91 : vector<180x128xf32>
    %93 = math.exp %92 : vector<180x128xf32>
    %cst_98 = arith.constant 1.000000e+00 : f32
    %94 = vector.broadcast %cst_98 : f32 to vector<180x128xf32>
    %95 = arith.addf %94, %93 : vector<180x128xf32>
    %96 = arith.divf %94, %95 : vector<180x128xf32>
    %97 = arith.mulf %91, %96 : vector<180x128xf32>
    %98 = vector.shape_cast %97 : vector<180x128xf32> to vector<10x18x128xf32>
    %99 = tpu.iota {dimensions = array<i32: 0>} : vector<10x18x1xi32>
    %c1_i32 = arith.constant 1 : i32
    %100 = arith.subi %1, %c1_i32 : i32
    %101 = vector.broadcast %100 : i32 to vector<10x18x1xi32>
    %102 = arith.addi %99, %101 : vector<10x18x1xi32>
    %103 = tpu.iota {dimensions = array<i32: 1>} : vector<10x18x1xi32>
    %c0_i32 = arith.constant 0 : i32
    %104 = vector.broadcast %c0_i32 : i32 to vector<10x18x1xi32>
    %105 = arith.cmpi sge, %102, %104 : vector<10x18x1xi32>
    %c16_i32 = arith.constant 16 : i32
    %106 = vector.broadcast %c16_i32 : i32 to vector<10x18x1xi32>
    %107 = arith.cmpi slt, %102, %106 : vector<10x18x1xi32>
    %108 = arith.andi %105, %107 : vector<10x18x1xi1>
    %c1_i32_99 = arith.constant 1 : i32
    %109 = vector.broadcast %c1_i32_99 : i32 to vector<10x18x1xi32>
    %110 = arith.cmpi sge, %103, %109 : vector<10x18x1xi32>
    %111 = arith.andi %108, %110 : vector<10x18x1xi1>
    %c16_i32_100 = arith.constant 16 : i32
    %112 = vector.broadcast %c16_i32_100 : i32 to vector<10x18x1xi32>
    %113 = arith.cmpi sle, %103, %112 : vector<10x18x1xi32>
    %114 = arith.andi %111, %113 : vector<10x18x1xi1>
    %cst_101 = arith.constant 0.000000e+00 : f32
    %115 = vector.shape_cast %114 : vector<10x18x1xi1> to vector<10x18x1xi1>
    %116 = vector.broadcast %115 : vector<10x18x1xi1> to vector<10x18x128xi1>
    %117 = vector.broadcast %cst_101 : f32 to vector<10x18x128xf32>
    %118 = arith.select %116, %98, %117 : vector<10x18x128xi1>, vector<10x18x128xf32>
    %119 = arith.truncf %118 : vector<10x18x128xf32> to vector<10x18x128xbf16>
    %c0_102 = arith.constant 0 : index
    %c0_103 = arith.constant 0 : index
    %c0_104 = arith.constant 0 : index
    %120 = vector.load %arg12[%c0_102, %c0_103, %c0_104] : memref<10x18x128xbf16, #tpu.memory_space<vmem>>, vector<10x18x128xbf16>
    tpu.vector_store %arg12[%c0_102, %c0_103, %c0_104], %119 {strides = array<i32>} : memref<10x18x128xbf16, #tpu.memory_space<vmem>>, vector<10x18x128xbf16>,
    %cst_105 = arith.constant 0.000000e+00 : f32
    %121 = vector.broadcast %cst_105 : f32 to vector<128x128xf32>
    %c0_106 = arith.constant 0 : index
    %c0_107 = arith.constant 0 : index
    %122 = vector.load %arg13[%c0_106, %c0_107] : memref<128x128xf32, #tpu.memory_space<vmem>>, vector<128x128xf32>
    tpu.vector_store %arg13[%c0_106, %c0_107], %121 {strides = array<i32>} : memref<128x128xf32, #tpu.memory_space<vmem>>, vector<128x128xf32>,
    %c0_108 = arith.constant 0 : index
    %c0_109 = arith.constant 0 : index
    %c0_110 = arith.constant 0 : index
    %123 = vector.load %arg12[%c0_108, %c0_109, %c0_110] : memref<10x18x128xbf16, #tpu.memory_space<vmem>>, vector<8x16x128xbf16>
    %124 = vector.shape_cast %123 : vector<8x16x128xbf16> to vector<128x128xbf16>
    %c0_111 = arith.constant 0 : index
    %c0_112 = arith.constant 0 : index
    %125 = vector.load %arg13[%c0_111, %c0_112] : memref<128x128xf32, #tpu.memory_space<vmem>>, vector<128x128xf32>
    %c0_113 = arith.constant 0 : index
    %c0_114 = arith.constant 0 : index
    %c0_115 = arith.constant 0 : index
    %126 = vector.load %arg4[%c0_113, %c0_114, %c0_115] : memref<9x128x128xbf16, #tpu.memory_space<vmem>>, vector<1x128x128xbf16>
    %127 = vector.shape_cast %126 : vector<1x128x128xbf16> to vector<128x128xbf16>
    %cst_116 = arith.constant dense<0.000000e+00> : vector<128x128xf32>
    %128 = tpu.matmul %124, %127, %cst_116 {dimension_numbers = #tpu.dot_dimension_numbers<[1], [0], [0], [1], [0, 0, 1, 1], [], []>} : vector<128x128xbf16>, vector<128x128xbf16>, vector<128x128xf32> -> vector<128x128xf32>
    %129 = arith.addf %125, %128 : vector<128x128xf32>
    %c0_117 = arith.constant 0 : index
    %c0_118 = arith.constant 0 : index
    %130 = vector.load %arg13[%c0_117, %c0_118] : memref<128x128xf32, #tpu.memory_space<vmem>>, vector<128x128xf32>
    tpu.vector_store %arg13[%c0_117, %c0_118], %129 {strides = array<i32>} : memref<128x128xf32, #tpu.memory_space<vmem>>, vector<128x128xf32>,
    %c0_119 = arith.constant 0 : index
    %c1_120 = arith.constant 1 : index
    %c0_121 = arith.constant 0 : index
    %131 = vector.load %arg12[%c0_119, %c1_120, %c0_121] : memref<10x18x128xbf16, #tpu.memory_space<vmem>>, vector<8x16x128xbf16>
    %132 = vector.shape_cast %131 : vector<8x16x128xbf16> to vector<128x128xbf16>
    %c0_122 = arith.constant 0 : index
    %c0_123 = arith.constant 0 : index
    %133 = vector.load %arg13[%c0_122, %c0_123] : memref<128x128xf32, #tpu.memory_space<vmem>>, vector<128x128xf32>
    %c1_124 = arith.constant 1 : index
    %c0_125 = arith.constant 0 : index
    %c0_126 = arith.constant 0 : index
    %134 = vector.load %arg4[%c1_124, %c0_125, %c0_126] : memref<9x128x128xbf16, #tpu.memory_space<vmem>>, vector<1x128x128xbf16>
    %135 = vector.shape_cast %134 : vector<1x128x128xbf16> to vector<128x128xbf16>
    %cst_127 = arith.constant dense<0.000000e+00> : vector<128x128xf32>
    %136 = tpu.matmul %132, %135, %cst_127 {dimension_numbers = #tpu.dot_dimension_numbers<[1], [0], [0], [1], [0, 0, 1, 1], [], []>} : vector<128x128xbf16>, vector<128x128xbf16>, vector<128x128xf32> -> vector<128x128xf32>
    %137 = arith.addf %133, %136 : vector<128x128xf32>
    %c0_128 = arith.constant 0 : index
    %c0_129 = arith.constant 0 : index
    %138 = vector.load %arg13[%c0_128, %c0_129] : memref<128x128xf32, #tpu.memory_space<vmem>>, vector<128x128xf32>
    tpu.vector_store %arg13[%c0_128, %c0_129], %137 {strides = array<i32>} : memref<128x128xf32, #tpu.memory_space<vmem>>, vector<128x128xf32>,
    %c0_130 = arith.constant 0 : index
    %c2_131 = arith.constant 2 : index
    %c0_132 = arith.constant 0 : index
    %139 = vector.load %arg12[%c0_130, %c2_131, %c0_132] : memref<10x18x128xbf16, #tpu.memory_space<vmem>>, vector<8x16x128xbf16>
    %140 = vector.shape_cast %139 : vector<8x16x128xbf16> to vector<128x128xbf16>
    %c0_133 = arith.constant 0 : index
    %c0_134 = arith.constant 0 : index
    %141 = vector.load %arg13[%c0_133, %c0_134] : memref<128x128xf32, #tpu.memory_space<vmem>>, vector<128x128xf32>
    %c2_135 = arith.constant 2 : index
    %c0_136 = arith.constant 0 : index
    %c0_137 = arith.constant 0 : index
    %142 = vector.load %arg4[%c2_135, %c0_136, %c0_137] : memref<9x128x128xbf16, #tpu.memory_space<vmem>>, vector<1x128x128xbf16>
    %143 = vector.shape_cast %142 : vector<1x128x128xbf16> to vector<128x128xbf16>
    %cst_138 = arith.constant dense<0.000000e+00> : vector<128x128xf32>
    %144 = tpu.matmul %140, %143, %cst_138 {dimension_numbers = #tpu.dot_dimension_numbers<[1], [0], [0], [1], [0, 0, 1, 1], [], []>} : vector<128x128xbf16>, vector<128x128xbf16>, vector<128x128xf32> -> vector<128x128xf32>
    %145 = arith.addf %141, %144 : vector<128x128xf32>
    %c0_139 = arith.constant 0 : index
    %c0_140 = arith.constant 0 : index
    %146 = vector.load %arg13[%c0_139, %c0_140] : memref<128x128xf32, #tpu.memory_space<vmem>>, vector<128x128xf32>
    tpu.vector_store %arg13[%c0_139, %c0_140], %145 {strides = array<i32>} : memref<128x128xf32, #tpu.memory_space<vmem>>, vector<128x128xf32>,
    %c1_141 = arith.constant 1 : index
    %c0_142 = arith.constant 0 : index
    %c0_143 = arith.constant 0 : index
    %147 = vector.load %arg12[%c1_141, %c0_142, %c0_143] : memref<10x18x128xbf16, #tpu.memory_space<vmem>>, vector<8x16x128xbf16>
    %148 = vector.shape_cast %147 : vector<8x16x128xbf16> to vector<128x128xbf16>
    %c0_144 = arith.constant 0 : index
    %c0_145 = arith.constant 0 : index
    %149 = vector.load %arg13[%c0_144, %c0_145] : memref<128x128xf32, #tpu.memory_space<vmem>>, vector<128x128xf32>
    %c3_146 = arith.constant 3 : index
    %c0_147 = arith.constant 0 : index
    %c0_148 = arith.constant 0 : index
    %150 = vector.load %arg4[%c3_146, %c0_147, %c0_148] : memref<9x128x128xbf16, #tpu.memory_space<vmem>>, vector<1x128x128xbf16>
    %151 = vector.shape_cast %150 : vector<1x128x128xbf16> to vector<128x128xbf16>
    %cst_149 = arith.constant dense<0.000000e+00> : vector<128x128xf32>
    %152 = tpu.matmul %148, %151, %cst_149 {dimension_numbers = #tpu.dot_dimension_numbers<[1], [0], [0], [1], [0, 0, 1, 1], [], []>} : vector<128x128xbf16>, vector<128x128xbf16>, vector<128x128xf32> -> vector<128x128xf32>
    %153 = arith.addf %149, %152 : vector<128x128xf32>
    %c0_150 = arith.constant 0 : index
    %c0_151 = arith.constant 0 : index
    %154 = vector.load %arg13[%c0_150, %c0_151] : memref<128x128xf32, #tpu.memory_space<vmem>>, vector<128x128xf32>
    tpu.vector_store %arg13[%c0_150, %c0_151], %153 {strides = array<i32>} : memref<128x128xf32, #tpu.memory_space<vmem>>, vector<128x128xf32>,
    %c1_152 = arith.constant 1 : index
    %c1_153 = arith.constant 1 : index
    %c0_154 = arith.constant 0 : index
    %155 = vector.load %arg12[%c1_152, %c1_153, %c0_154] : memref<10x18x128xbf16, #tpu.memory_space<vmem>>, vector<8x16x128xbf16>
    %156 = vector.shape_cast %155 : vector<8x16x128xbf16> to vector<128x128xbf16>
    %c0_155 = arith.constant 0 : index
    %c0_156 = arith.constant 0 : index
    %157 = vector.load %arg13[%c0_155, %c0_156] : memref<128x128xf32, #tpu.memory_space<vmem>>, vector<128x128xf32>
    %c4_157 = arith.constant 4 : index
    %c0_158 = arith.constant 0 : index
    %c0_159 = arith.constant 0 : index
    %158 = vector.load %arg4[%c4_157, %c0_158, %c0_159] : memref<9x128x128xbf16, #tpu.memory_space<vmem>>, vector<1x128x128xbf16>
    %159 = vector.shape_cast %158 : vector<1x128x128xbf16> to vector<128x128xbf16>
    %cst_160 = arith.constant dense<0.000000e+00> : vector<128x128xf32>
    %160 = tpu.matmul %156, %159, %cst_160 {dimension_numbers = #tpu.dot_dimension_numbers<[1], [0], [0], [1], [0, 0, 1, 1], [], []>} : vector<128x128xbf16>, vector<128x128xbf16>, vector<128x128xf32> -> vector<128x128xf32>
    %161 = arith.addf %157, %160 : vector<128x128xf32>
    %c0_161 = arith.constant 0 : index
    %c0_162 = arith.constant 0 : index
    %162 = vector.load %arg13[%c0_161, %c0_162] : memref<128x128xf32, #tpu.memory_space<vmem>>, vector<128x128xf32>
    tpu.vector_store %arg13[%c0_161, %c0_162], %161 {strides = array<i32>} : memref<128x128xf32, #tpu.memory_space<vmem>>, vector<128x128xf32>,
    %c1_163 = arith.constant 1 : index
    %c2_164 = arith.constant 2 : index
    %c0_165 = arith.constant 0 : index
    %163 = vector.load %arg12[%c1_163, %c2_164, %c0_165] : memref<10x18x128xbf16, #tpu.memory_space<vmem>>, vector<8x16x128xbf16>
    %164 = vector.shape_cast %163 : vector<8x16x128xbf16> to vector<128x128xbf16>
    %c0_166 = arith.constant 0 : index
    %c0_167 = arith.constant 0 : index
    %165 = vector.load %arg13[%c0_166, %c0_167] : memref<128x128xf32, #tpu.memory_space<vmem>>, vector<128x128xf32>
    %c5_168 = arith.constant 5 : index
    %c0_169 = arith.constant 0 : index
    %c0_170 = arith.constant 0 : index
    %166 = vector.load %arg4[%c5_168, %c0_169, %c0_170] : memref<9x128x128xbf16, #tpu.memory_space<vmem>>, vector<1x128x128xbf16>
    %167 = vector.shape_cast %166 : vector<1x128x128xbf16> to vector<128x128xbf16>
    %cst_171 = arith.constant dense<0.000000e+00> : vector<128x128xf32>
    %168 = tpu.matmul %164, %167, %cst_171 {dimension_numbers = #tpu.dot_dimension_numbers<[1], [0], [0], [1], [0, 0, 1, 1], [], []>} : vector<128x128xbf16>, vector<128x128xbf16>, vector<128x128xf32> -> vector<128x128xf32>
    %169 = arith.addf %165, %168 : vector<128x128xf32>
    %c0_172 = arith.constant 0 : index
    %c0_173 = arith.constant 0 : index
    %170 = vector.load %arg13[%c0_172, %c0_173] : memref<128x128xf32, #tpu.memory_space<vmem>>, vector<128x128xf32>
    tpu.vector_store %arg13[%c0_172, %c0_173], %169 {strides = array<i32>} : memref<128x128xf32, #tpu.memory_space<vmem>>, vector<128x128xf32>,
    %c2_174 = arith.constant 2 : index
    %c0_175 = arith.constant 0 : index
    %c0_176 = arith.constant 0 : index
    %171 = vector.load %arg12[%c2_174, %c0_175, %c0_176] : memref<10x18x128xbf16, #tpu.memory_space<vmem>>, vector<8x16x128xbf16>
    %172 = vector.shape_cast %171 : vector<8x16x128xbf16> to vector<128x128xbf16>
    %c0_177 = arith.constant 0 : index
    %c0_178 = arith.constant 0 : index
    %173 = vector.load %arg13[%c0_177, %c0_178] : memref<128x128xf32, #tpu.memory_space<vmem>>, vector<128x128xf32>
    %c6_179 = arith.constant 6 : index
    %c0_180 = arith.constant 0 : index
    %c0_181 = arith.constant 0 : index
    %174 = vector.load %arg4[%c6_179, %c0_180, %c0_181] : memref<9x128x128xbf16, #tpu.memory_space<vmem>>, vector<1x128x128xbf16>
    %175 = vector.shape_cast %174 : vector<1x128x128xbf16> to vector<128x128xbf16>
    %cst_182 = arith.constant dense<0.000000e+00> : vector<128x128xf32>
    %176 = tpu.matmul %172, %175, %cst_182 {dimension_numbers = #tpu.dot_dimension_numbers<[1], [0], [0], [1], [0, 0, 1, 1], [], []>} : vector<128x128xbf16>, vector<128x128xbf16>, vector<128x128xf32> -> vector<128x128xf32>
    %177 = arith.addf %173, %176 : vector<128x128xf32>
    %c0_183 = arith.constant 0 : index
    %c0_184 = arith.constant 0 : index
    %178 = vector.load %arg13[%c0_183, %c0_184] : memref<128x128xf32, #tpu.memory_space<vmem>>, vector<128x128xf32>
    tpu.vector_store %arg13[%c0_183, %c0_184], %177 {strides = array<i32>} : memref<128x128xf32, #tpu.memory_space<vmem>>, vector<128x128xf32>,
    %c2_185 = arith.constant 2 : index
    %c1_186 = arith.constant 1 : index
    %c0_187 = arith.constant 0 : index
    %179 = vector.load %arg12[%c2_185, %c1_186, %c0_187] : memref<10x18x128xbf16, #tpu.memory_space<vmem>>, vector<8x16x128xbf16>
    %180 = vector.shape_cast %179 : vector<8x16x128xbf16> to vector<128x128xbf16>
    %c0_188 = arith.constant 0 : index
    %c0_189 = arith.constant 0 : index
    %181 = vector.load %arg13[%c0_188, %c0_189] : memref<128x128xf32, #tpu.memory_space<vmem>>, vector<128x128xf32>
    %c7_190 = arith.constant 7 : index
    %c0_191 = arith.constant 0 : index
    %c0_192 = arith.constant 0 : index
    %182 = vector.load %arg4[%c7_190, %c0_191, %c0_192] : memref<9x128x128xbf16, #tpu.memory_space<vmem>>, vector<1x128x128xbf16>
    %183 = vector.shape_cast %182 : vector<1x128x128xbf16> to vector<128x128xbf16>
    %cst_193 = arith.constant dense<0.000000e+00> : vector<128x128xf32>
    %184 = tpu.matmul %180, %183, %cst_193 {dimension_numbers = #tpu.dot_dimension_numbers<[1], [0], [0], [1], [0, 0, 1, 1], [], []>} : vector<128x128xbf16>, vector<128x128xbf16>, vector<128x128xf32> -> vector<128x128xf32>
    %185 = arith.addf %181, %184 : vector<128x128xf32>
    %c0_194 = arith.constant 0 : index
    %c0_195 = arith.constant 0 : index
    %186 = vector.load %arg13[%c0_194, %c0_195] : memref<128x128xf32, #tpu.memory_space<vmem>>, vector<128x128xf32>
    tpu.vector_store %arg13[%c0_194, %c0_195], %185 {strides = array<i32>} : memref<128x128xf32, #tpu.memory_space<vmem>>, vector<128x128xf32>,
    %c2_196 = arith.constant 2 : index
    %c2_197 = arith.constant 2 : index
    %c0_198 = arith.constant 0 : index
    %187 = vector.load %arg12[%c2_196, %c2_197, %c0_198] : memref<10x18x128xbf16, #tpu.memory_space<vmem>>, vector<8x16x128xbf16>
    %188 = vector.shape_cast %187 : vector<8x16x128xbf16> to vector<128x128xbf16>
    %c0_199 = arith.constant 0 : index
    %c0_200 = arith.constant 0 : index
    %189 = vector.load %arg13[%c0_199, %c0_200] : memref<128x128xf32, #tpu.memory_space<vmem>>, vector<128x128xf32>
    %c8_201 = arith.constant 8 : index
    %c0_202 = arith.constant 0 : index
    %c0_203 = arith.constant 0 : index
    %190 = vector.load %arg4[%c8_201, %c0_202, %c0_203] : memref<9x128x128xbf16, #tpu.memory_space<vmem>>, vector<1x128x128xbf16>
    %191 = vector.shape_cast %190 : vector<1x128x128xbf16> to vector<128x128xbf16>
    %cst_204 = arith.constant dense<0.000000e+00> : vector<128x128xf32>
    %192 = tpu.matmul %188, %191, %cst_204 {dimension_numbers = #tpu.dot_dimension_numbers<[1], [0], [0], [1], [0, 0, 1, 1], [], []>} : vector<128x128xbf16>, vector<128x128xbf16>, vector<128x128xf32> -> vector<128x128xf32>
    %193 = arith.addf %189, %192 : vector<128x128xf32>
    %c0_205 = arith.constant 0 : index
    %c0_206 = arith.constant 0 : index
    %194 = vector.load %arg13[%c0_205, %c0_206] : memref<128x128xf32, #tpu.memory_space<vmem>>, vector<128x128xf32>
    tpu.vector_store %arg13[%c0_205, %c0_206], %193 {strides = array<i32>} : memref<128x128xf32, #tpu.memory_space<vmem>>, vector<128x128xf32>,
    %c0_207 = arith.constant 0 : index
    %c0_208 = arith.constant 0 : index
    %195 = vector.load %arg13[%c0_207, %c0_208] : memref<128x128xf32, #tpu.memory_space<vmem>>, vector<128x128xf32>
    %c0_209 = arith.constant 0 : index
    %c0_210 = arith.constant 0 : index
    %196 = vector.load %arg7[%c0_209, %c0_210] : memref<1x128xf32, #tpu.memory_space<vmem>>, vector<1x128xf32>
    %197 = vector.broadcast %196 : vector<1x128xf32> to vector<128x128xf32>
    %198 = arith.mulf %195, %197 : vector<128x128xf32>
    %c0_211 = arith.constant 0 : index
    %c0_212 = arith.constant 0 : index
    %199 = vector.load %arg8[%c0_211, %c0_212] : memref<1x128xf32, #tpu.memory_space<vmem>>, vector<1x128xf32>
    %200 = vector.broadcast %199 : vector<1x128xf32> to vector<128x128xf32>
    %201 = arith.addf %198, %200 : vector<128x128xf32>
    %202 = arith.negf %201 : vector<128x128xf32>
    %203 = math.exp %202 : vector<128x128xf32>
    %cst_213 = arith.constant 1.000000e+00 : f32
    %204 = vector.broadcast %cst_213 : f32 to vector<128x128xf32>
    %205 = arith.addf %204, %203 : vector<128x128xf32>
    %206 = arith.divf %204, %205 : vector<128x128xf32>
    %207 = arith.mulf %201, %206 : vector<128x128xf32>
    %208 = vector.shape_cast %207 : vector<128x128xf32> to vector<8x16x128xf32>
    %c2_214 = arith.constant 2 : index
    %c2_215 = arith.constant 2 : index
    %c0_216 = arith.constant 0 : index
    %209 = vector.load %arg10[%c2_214, %c2_215, %c0_216] : memref<12x20x128xf32, #tpu.memory_space<vmem>>, vector<8x16x128xf32>
    %210 = arith.addf %208, %209 : vector<8x16x128xf32>
    %c0_217 = arith.constant 0 : index
    %c0_218 = arith.constant 0 : index
    %c0_219 = arith.constant 0 : index
    %c0_220 = arith.constant 0 : index
    %211 = vector.load %arg9[%c0_217, %c0_218, %c0_219, %c0_220] : memref<1x8x16x128xf32, #tpu.memory_space<vmem>>, vector<1x8x16x128xf32>
    %212 = vector.shape_cast %211 : vector<1x8x16x128xf32> to vector<8x16x128xf32>
    %213 = vector.shape_cast %210 : vector<8x16x128xf32> to vector<1x8x16x128xf32>
    tpu.vector_store %arg9[%c0_217, %c0_218, %c0_219, %c0_220], %213 {strides = array<i32>} : memref<1x8x16x128xf32, #tpu.memory_space<vmem>>, vector<1x8x16x128xf32>,
    return
  }
  func.func @transform_1(%arg0: i32, %arg1: i32) -> (i32, i32, i32) {
    %c0_i32 = arith.constant 0 : i32
    %c0_i32_0 = arith.constant 0 : i32
    %c0_i32_1 = arith.constant 0 : i32
    %c0_i32_2 = arith.constant 0 : i32
    return %c0_i32, %c0_i32_0, %c0_i32_1 : i32, i32, i32
  }
  func.func @transform_2(%arg0: i32, %arg1: i32) -> (i32, i32, i32) {
    %c0_i32 = arith.constant 0 : i32
    %c0_i32_0 = arith.constant 0 : i32
    %c0_i32_1 = arith.constant 0 : i32
    %c0_i32_2 = arith.constant 0 : i32
    return %c0_i32, %c0_i32_0, %c0_i32_1 : i32, i32, i32
  }
  func.func @transform_3(%arg0: i32, %arg1: i32) -> (i32, i32) {
    %c0_i32 = arith.constant 0 : i32
    %c0_i32_0 = arith.constant 0 : i32
    %c0_i32_1 = arith.constant 0 : i32
    return %c0_i32, %c0_i32_0 : i32, i32
  }
  func.func @transform_4(%arg0: i32, %arg1: i32) -> (i32, i32) {
    %c0_i32 = arith.constant 0 : i32
    %c0_i32_0 = arith.constant 0 : i32
    %c0_i32_1 = arith.constant 0 : i32
    return %c0_i32, %c0_i32_0 : i32, i32
  }
  func.func @transform_5(%arg0: i32, %arg1: i32) -> (i32, i32) {
    %c0_i32 = arith.constant 0 : i32
    %c0_i32_0 = arith.constant 0 : i32
    %c0_i32_1 = arith.constant 0 : i32
    return %c0_i32, %c0_i32_0 : i32, i32
  }
  func.func @transform_6(%arg0: i32, %arg1: i32) -> (i32, i32) {
    %c0_i32 = arith.constant 0 : i32
    %c0_i32_0 = arith.constant 0 : i32
    %c0_i32_1 = arith.constant 0 : i32
    return %c0_i32, %c0_i32_0 : i32, i32
  }
  func.func @transform_7(%arg0: i32, %arg1: i32) -> (i32, i32, i32, i32) {
    %c0_i32 = arith.constant 0 : i32
    %c0_i32_0 = arith.constant 0 : i32
    %c0_i32_1 = arith.constant 0 : i32
    return %arg0, %arg1, %c0_i32, %c0_i32_0 : i32, i32, i32, i32
  }
}

</mosaic_0001>

<bundles_post_ra>
// kernel: _lambda_.1
= control target key start
LH: loop header
LB: loop body
LE: loop exit
PB: predicated region body
PF: predicated region fallthrough
CT: control target
= control target key end

     0   :  { %s10583_s24 = smov 0   ;;  %s10585_s25 = smov 0   ;;  %s13929_s0 = inlined_call_operand.vmem [shape: f32[2,20,20,128], index: 0, kind: input, shape index: {}]   ;;  %s13930_s1 = inlined_call_operand.vmem [shape: bf16[9,128,128], index: 1, kind: input, shape index: {}]   ;;  %s13931_s2 = inlined_call_operand.vmem [shape: bf16[9,128,128], index: 2, kind: input, shape index: {}]   ;;  %s13932_s3 = inlined_call_operand.vmem [shape: f32[1,128], index: 3, kind: input, shape index: {}]   ;;  %s13933_s4 = inlined_call_operand.vmem [shape: f32[1,128], index: 4, kind: input, shape index: {}]   ;;  %s13934_s5 = inlined_call_operand.vmem [shape: f32[1,128], index: 5, kind: input, shape index: {}]   ;;  %s13935_s6 = inlined_call_operand.vmem [shape: f32[1,128], index: 6, kind: input, shape index: {}]   ;;  %s13936_s7 = inlined_call_operand.vmem [shape: f32[2,16,16,128], index: 7, kind: output, shape index: {}]  }
   0x1   :  { %s10587_s26 = smov 0   ;;  %s10589_s27 = smov 0  }
   0x2   :  { %s10591_s28 = smov 0  }
   0x3 LB: > { %s26_s29 = sadd.s32 1, %s10532_s26  ;;  %s29_s30 = sadd.s32 1, %s10536_s27  ;;  %s10540_s28 = sphi %s10591_s28, %s17_s28   ;;  %s10536_s27 = sphi %s10589_s27, %s14104_s27   ;;  %s10532_s26 = sphi %s10587_s26, %s14103_s26   ;;  %s10528_s25 = sphi %s10585_s25, %s14102_s25   ;;  %s10524_s24 = sphi %s10583_s24, %s14101_s24  }
   0x4   : > { %p27_p0 = scmp.ge.s32.totalorder %s26_s29, 2  ;;  %p9069_p1 = scmp.ge.s32.totalorder %s10540_s28, 1 }
   0x5   : > { %p217_p2 = scmp.lt.s32.totalorder %s10540_s28, 5 }
   0x6   : > { %s14106_s29 = smov (%p27_p0, %s26_s29), 0  ;;  %s14108_s30 = smov (!%p27_p0, %s29_s30), %s10536_s27 }
   0x7   : > { %p218_p3 = pnand %p9069_p1, %p217_p2  ;;  %p31_p4 = scmp.ge.s32.totalorder %s14108_s30, 2 }
   0x9   : > { %s14110_s30 = smov (%p31_p4, %s14108_s30), 0  ;;  %221 = sbr.rel (%p218_p3) target bundleno = 1937 (0x791), region = 44 }
   0xe   : > { %s10616_s8 = sshll.u32 %s10524_s24, 3  ;;  %p248_p5 = scmp.lt.s32.totalorder %s10528_s25, 1 }
   0xf   : > { %p250_p6 = scmp.lt.s32.totalorder %s10616_s8, 15 }
  0x10   : > { %s249_s9 = scalar_select %p248_p5, %s10528_s25, 1 }
  0x11   : > { %s251_s10 = scalar_select %p250_p6, %s10616_s8, 15 }
  0x12   : > { %s9072_s11 = sshll.u32 %s249_s9, 5 }
  0x13   : > { %s9071_s12 = sshll.u32 %s251_s10, 1 }
  0x14   : > { %s254_s13 = sadd.s32 %s9072_s11, %s9071_s12 }
  0x15   : > { %s9073_s14 = sshll.u32 %s254_s13, 3 }
  0x16   : > { %s10623_s17 = scalar_lea.vmem %s13936_s7, %s9073_s14 }
  0x17   : > { %s9075_s18 = smul.u32 192, %s10524_s24 }
  0x18   : > { %s260_s19 = smul.u32 480, %s10528_s25 }
  0x1a   : > { %s261_s20 = sadd.s32 %s9075_s18, %s260_s19 }
  0x1b   : > { %s10629_s23 = scalar_lea.vmem %s13929_s0, %s261_s20 }
  0x1c   : > { %v275_v0 = vld [vmem:[%s10629_s23] sm:$0xff]  ;;  %v277_v1 = vld [vmem:[%s10629_s23 + $0x8] sm:$0xff]  ;;  %v279_v2 = vld [vmem:[%s10629_s23 + $0x18] sm:$0xff] }
  0x1d   : > { %276 = vst [vmem:[#allocation2] sm:$0xff] %v275_v0  ;;  %v281_v3 = vld [vmem:[%s10629_s23 + $0x20] sm:$0xff]  ;;  %v283_v4 = vld [vmem:[%s10629_s23 + $0x30] sm:$0xff]  ;;  %v285_v5 = vld [vmem:[%s10629_s23 + $0x38] sm:$0xff] }
  0x1e   : > { %278 = vst [vmem:[#allocation2 + $0x8] sm:$0xff] %v277_v1  ;;  %v287_v6 = vld [vmem:[%s10629_s23 + $0x48] sm:$0xff]  ;;  %v289_v7 = vld [vmem:[%s10629_s23 + $0x50] sm:$0xff]  ;;  %v291_v8 = vld [vmem:[%s10629_s23 + $0x60] sm:$0xff] }
  0x1f   : > { %280 = vst [vmem:[#allocation2 + $0x18] sm:$0xff] %v279_v2  ;;  %v293_v9 = vld [vmem:[%s10629_s23 + $0x68] sm:$0xff]  ;;  %v295_v10 = vld [vmem:[%s10629_s23 + $0x78] sm:$0xff]  ;;  %v297_v11 = vld [vmem:[%s10629_s23 + $0x80] sm:$0xff] }
  0x20   : > { %282 = vst [vmem:[#allocation2 + $0x20] sm:$0xff] %v281_v3  ;;  %v299_v12 = vld [vmem:[%s10629_s23 + $0x90] sm:$0xff]  ;;  %v301_v13 = vld [vmem:[%s10629_s23 + $0x98] sm:$0xff]  ;;  %v303_v14 = vld [vmem:[%s10629_s23 + $0xa8] sm:$0xff] }
  0x21   : > { %284 = vst [vmem:[#allocation2 + $0x30] sm:$0xff] %v283_v4  ;;  %v305_v15 = vld [vmem:[%s10629_s23 + $0xb0] sm:$0xff]  ;;  %v307_v16 = vld [vmem:[%s10629_s23 + $0xc0] sm:$0xff]  ;;  %v309_v17 = vld [vmem:[%s10629_s23 + $0xc8] sm:$0xff] }
  0x22   : > { %286 = vst [vmem:[#allocation2 + $0x38] sm:$0xff] %v285_v5  ;;  %v311_v18 = vld [vmem:[%s10629_s23 + $0xd8] sm:$0xff]  ;;  %v313_v19 = vld [vmem:[%s10629_s23 + $0xe0] sm:$0xff]  ;;  %v315_v20 = vld [vmem:[%s10629_s23 + $0xf0] sm:$0xff] }
  0x23   : > { %288 = vst [vmem:[#allocation2 + $0x48] sm:$0xff] %v287_v6  ;;  %v317_v21 = vld [vmem:[%s10629_s23 + $0xf8] sm:$0xff]  ;;  %v319_v22 = vld [vmem:[%s10629_s23 + $0x108] sm:$0xff]  ;;  %v321_v23 = vld [vmem:[%s10629_s23 + $0x110] sm:$0xff] }
  0x24   : > { %290 = vst [vmem:[#allocation2 + $0x50] sm:$0xff] %v289_v7  ;;  %v9076_v24 = vld [vmem:[%s10629_s23 + $0x10] sm:$0xf]  ;;  %v9077_v25 = vld [vmem:[%s10629_s23 + $0x28] sm:$0xf] }
  0x25   : > { %292 = vst [vmem:[#allocation2 + $0x60] sm:$0xff] %v291_v8  ;;  %v9078_v26 = vld [vmem:[%s10629_s23 + $0x40] sm:$0xf]  ;;  %v9079_v27 = vld [vmem:[%s10629_s23 + $0x58] sm:$0xf] }
  0x26   : > { %294 = vst [vmem:[#allocation2 + $0x68] sm:$0xff] %v293_v9  ;;  %v9080_v28 = vld [vmem:[%s10629_s23 + $0x70] sm:$0xf]  ;;  %v9081_v29 = vld [vmem:[%s10629_s23 + $0x88] sm:$0xf] }
  0x27   : > { %296 = vst [vmem:[#allocation2 + $0x78] sm:$0xff] %v295_v10  ;;  %v9082_v30 = vld [vmem:[%s10629_s23 + $0xa0] sm:$0xf]  ;;  %v9083_v31 = vld [vmem:[%s10629_s23 + $0xb8] sm:$0xf] }
  0x28   : > { %298 = vst [vmem:[#allocation2 + $0x80] sm:$0xff] %v297_v11  ;;  %v9084_v32 = vld [vmem:[%s10629_s23 + $0xd0] sm:$0xf]  ;;  %v9085_v33 = vld [vmem:[%s10629_s23 + $0xe8] sm:$0xf] }
  0x29   : > { %300 = vst [vmem:[#allocation2 + $0x90] sm:$0xff] %v299_v12  ;;  %v9086_v34 = vld [vmem:[%s10629_s23 + $0x100] sm:$0xf]  ;;  %v9087_v35 = vld [vmem:[%s10629_s23 + $0x118] sm:$0xf] }
  0x2a   : > { %302 = vst [vmem:[#allocation2 + $0x98] sm:$0xff] %v301_v13 }
  0x2b   : > { %304 = vst [vmem:[#allocation2 + $0xa8] sm:$0xff] %v303_v14 }
  0x2c   : > { %306 = vst [vmem:[#allocation2 + $0xb0] sm:$0xff] %v305_v15 }
  0x2d   : > { %308 = vst [vmem:[#allocation2 + $0xc0] sm:$0xff] %v307_v16 }
  0x2e   : > { %310 = vst [vmem:[#allocation2 + $0xc8] sm:$0xff] %v309_v17 }
  0x2f   : > { %312 = vst [vmem:[#allocation2 + $0xd8] sm:$0xff] %v311_v18 }
  0x30   : > { %314 = vst [vmem:[#allocation2 + $0xe0] sm:$0xff] %v313_v19 }
  0x31   : > { %316 = vst [vmem:[#allocation2 + $0xf0] sm:$0xff] %v315_v20 }
  0x32   : > { %318 = vst [vmem:[#allocation2 + $0xf8] sm:$0xff] %v317_v21 }
  0x33   : > { %320 = vst [vmem:[#allocation2 + $0x108] sm:$0xff] %v319_v22 }
  0x34   : > { %322 = vst [vmem:[#allocation2 + $0x110] sm:$0xff] %v321_v23 }
  0x35   : > { %334 = vst [vmem:[#allocation2 + $0x10] sm:$0xf] %v9076_v24 }
  0x36   : > { %336 = vst [vmem:[#allocation2 + $0x28] sm:$0xf] %v9077_v25 }
  0x37   : > { %338 = vst [vmem:[#allocation2 + $0x40] sm:$0xf] %v9078_v26 }
  0x38   : > { %340 = vst [vmem:[#allocation2 + $0x58] sm:$0xf] %v9079_v27 }
  0x39   : > { %342 = vst [vmem:[#allocation2 + $0x70] sm:$0xf] %v9080_v28 }
  0x3a   : > { %344 = vst [vmem:[#allocation2 + $0x88] sm:$0xf] %v9081_v29 }
  0x3b   : > { %346 = vst [vmem:[#allocation2 + $0xa0] sm:$0xf] %v9082_v30 }
  0x3c   : > { %348 = vst [vmem:[#allocation2 + $0xb8] sm:$0xf] %v9083_v31 }
  0x3d   : > { %350 = vst [vmem:[#allocation2 + $0xd0] sm:$0xf] %v9084_v32 }
  0x3e   : > { %352 = vst [vmem:[#allocation2 + $0xe8] sm:$0xf] %v9085_v33 }
  0x3f   : > { %354 = vst [vmem:[#allocation2 + $0x100] sm:$0xf] %v9086_v34 }
  0x40   : > { %356 = vst [vmem:[#allocation2 + $0x118] sm:$0xf] %v9087_v35 }
  0x41   : > { %360 = vsyncadd [#allocation6], 3840 }
  0x42   : > { %10520 = dma.done.wait [#allocation6], 3840 }
  0x43   : > { %10521 = vsyncadd [#allocation6], 4294963456  ;;  %v10089_v36 = vld [vmem:[%s13930_s1 + $0x38] sm:$0xff]  ;;  %v10088_v37 = vld [vmem:[%s13930_s1 + $0x30] sm:$0xff]  ;;  %s9527_s18 = sadd.s32 4294967295, %s10616_s8 }
  0x44   : > { %750 = vmatpush.bf16.msra.mxu0 %v10089_v36  ;;  %v388_v38 = vld [vmem:[#allocation2] sm:$0xff]  ;;  %v389_v39 = vld [vmem:[#allocation2 + $0x8] sm:$0xff]  ;;  %v10097_v44 = vld [vmem:[%s13930_s1 + $0x78] sm:$0xff] }
  0x45   : > { %v448_v40 = vrot.slane %v388_v38, 2  ;;  %v449_v41 = vrot.slane %v388_v38, 4  ;;  %v450_v42 = vrot.slane %v388_v38, 6  ;;  %508 = vst [vmem:[#allocation1] ss:$4 sm:$0xff] %v388_v38  ;;  %v451_v43 = vrot.slane %v389_v39, 2  ;;  %10279 = vmatpush.bf16.msra.mxu3 %v10097_v44  ;;  %1227 = vmatpush.bf16.msra.mxu1 %v10097_v44 }
  0x46   : > { %516 = vst [vmem:[#allocation1 + $0x20] ss:$4 sm:$0xff] %v389_v39  ;;  %v452_v45 = vrot.slane %v389_v39, 4  ;;  %v10087_v46 = vld [vmem:[%s13930_s1 + $0x28] sm:$0xff]  ;;  %v453_v47 = vrot.slane %v389_v39, 6  ;;  %v10086_v48 = vld [vmem:[%s13930_s1 + $0x20] sm:$0xff] }
  0x47   : > { %510 = vst [vmem:[#allocation1 + $0x1] ss:$4 sm:$0xff] %v448_v40  ;;  %v391_v49 = vld [vmem:[#allocation2 + $0x18] sm:$0xff]  ;;  %v390_v50 = vld [vmem:[#allocation2 + $0x10] sm:$0x3]  ;;  %v392_v55 = vld [vmem:[#allocation2 + $0x20] sm:$0xff] }
  0x48   : > { %751 = vmatpush.bf16.msra.mxu0 %v10088_v37  ;;  %512 = vst [vmem:[#allocation1 + $0x2] ss:$4 sm:$0xff] %v449_v41  ;;  %v454_v51 = vrot.slane %v391_v49, 2  ;;  %v10085_v52 = vld [vmem:[%s13930_s1 + $0x18] sm:$0xff]  ;;  %v455_v54 = vrot.slane %v391_v49, 4  ;;  %v456_v56 = vrot.slane %v391_v49, 6 }
  0x49   : > { %514 = vst [vmem:[#allocation1 + $0x3] ss:$4 sm:$0xff] %v450_v42  ;;  %v457_v57 = vrot.slane %v392_v55, 2  ;;  %v10096_v59 = vld [vmem:[%s13930_s1 + $0x70] sm:$0xff]  ;;  %v458_v61 = vrot.slane %v392_v55, 4  ;;  %v10095_v62 = vld [vmem:[%s13930_s1 + $0x68] sm:$0xff] }
  0x4a   : > { %518 = vst [vmem:[#allocation1 + $0x21] ss:$4 sm:$0xff] %v451_v43  ;;  %v10084_v60 = vld [vmem:[%s13930_s1 + $0x10] sm:$0xff]  ;;  %10280 = vmatpush.bf16.msra.mxu3 %v10096_v59  ;;  %1228 = vmatpush.bf16.msra.mxu1 %v10096_v59  ;;  %v10083_v63 = vld [vmem:[%s13930_s1 + $0x8] sm:$0xff]  ;;  %v459_v0 = vrot.slane %v392_v55, 6  ;;  %v394_v1 = vld [vmem:[#allocation2 + $0x30] sm:$0xff] }
  0x4b   : > { %520 = vst [vmem:[#allocation1 + $0x22] ss:$4 sm:$0xff] %v452_v45  ;;  %v10094_v2 = vld [vmem:[%s13930_s1 + $0x60] sm:$0xff]  ;;  %v393_v3 = vld [vmem:[#allocation2 + $0x28] sm:$0x3]  ;;  %v460_v5 = vrot.slane %v394_v1, 2 }
  0x4c   : > { %752 = vmatpush.bf16.msra.mxu0 %v10087_v46  ;;  %522 = vst [vmem:[#allocation1 + $0x23] ss:$4 sm:$0xff] %v453_v47  ;;  %v10082_v6 = vld [vmem:[%s13930_s1] sm:$0xff]  ;;  %v461_v7 = vrot.slane %v394_v1, 4  ;;  %v10093_v8 = vld [vmem:[%s13930_s1 + $0x58] sm:$0xff]  ;;  %v462_v9 = vrot.slane %v394_v1, 6 }
  0x4d   : > { %v395_v10 = vld [vmem:[#allocation2 + $0x38] sm:$0xff]  ;;  %v10092_v14 = vld [vmem:[%s13930_s1 + $0x50] sm:$0xff]  ;;  %v10091_v15 = vld [vmem:[%s13930_s1 + $0x48] sm:$0xff] }
  0x4e   : > { %10281 = vmatpush.bf16.msra.mxu3 %v10095_v62  ;;  %1229 = vmatpush.bf16.msra.mxu1 %v10095_v62  ;;  %v463_v13 = vrot.slane %v395_v10, 2  ;;  %v464_v16 = vrot.slane %v395_v10, 4  ;;  %v465_v18 = vrot.slane %v395_v10, 6  ;;  %v10090_v19 = vld [vmem:[%s13930_s1 + $0x40] sm:$0xff]  ;;  %v396_v20 = vld [vmem:[#allocation2 + $0x40] sm:$0x3] }
  0x4f   : > { %v397_v21 = vld [vmem:[#allocation2 + $0x48] sm:$0xff]  ;;  %v398_v27 = vld [vmem:[#allocation2 + $0x50] sm:$0xff]  ;;  %v400_v30 = vld [vmem:[#allocation2 + $0x60] sm:$0xff] }
  0x50   : > { %753 = vmatpush.bf16.msra.mxu0 %v10086_v48  ;;  %v523_v53 = vld.sshfl [vmem:[#allocation1] sm:$0xff pattern:$0x73625140]  ;;  %v466_v22 = vrot.slane %v397_v21, 2  ;;  %v467_v24 = vrot.slane %v397_v21, 4  ;;  %v468_v25 = vrot.slane %v397_v21, 6 }
  0x51   : > { %525 = vst [vmem:[#allocation1] ss:$4 sm:$0xff] %v390_v50  ;;  %v469_v28 = vrot.slane %v398_v27, 2  ;;  %v470_v29 = vrot.slane %v398_v27, 4  ;;  %v471_v31 = vrot.slane %v398_v27, 6  ;;  %v472_v34 = vrot.slane %v400_v30, 2 }
  0x52   : > { %526 = vst [vmem:[#allocation1 + $0x1] ss:$4 sm:$0xff] %v391_v49  ;;  %10282 = vmatpush.bf16.msra.mxu3 %v10094_v2  ;;  %1230 = vmatpush.bf16.msra.mxu1 %v10094_v2  ;;  %v399_v33 = vld [vmem:[#allocation2 + $0x58] sm:$0x3]  ;;  %v473_v35 = vrot.slane %v400_v30, 4  ;;  %v474_v36 = vrot.slane %v400_v30, 6 }
  0x53   : > { %v524_v58 = vld.sshfl [vmem:[#allocation1 + $0x20] sm:$0xff pattern:$0x73625140]  ;;  %527 = vst [vmem:[#allocation1 + $0x2] ss:$4 sm:$0xff] %v454_v51  ;;  %v401_v38 = vld [vmem:[#allocation2 + $0x68] sm:$0xff] }
  0x54   : > { %754 = vmatpush.bf16.msra.mxu0 %v10085_v52  ;;  %528 = vst [vmem:[#allocation1 + $0x3] ss:$4 sm:$0xff] %v455_v54  ;;  %v651_v11 = vpack.c.bf16 %v524_v58, %v523_v53  ;;  %v475_v39 = vrot.slane %v401_v38, 2  ;;  %v476_v41 = vrot.slane %v401_v38, 4  ;;  %v477_v42 = vrot.slane %v401_v38, 6  ;;  %v403_v45 = vld [vmem:[#allocation2 + $0x78] sm:$0xff] }
  0x55   : > { %529 = vst [vmem:[#allocation1 + $0x20] ss:$4 sm:$0xff] %v456_v56  ;;  %v402_v44 = vld [vmem:[#allocation2 + $0x70] sm:$0x3]  ;;  %v478_v46 = vrot.slane %v403_v45, 2  ;;  %v479_v47 = vrot.slane %v403_v45, 4 }
  0x56   : > { %530 = vst [vmem:[#allocation1 + $0x21] ss:$4 sm:$0xff] %v392_v55  ;;  %10283 = vmatpush.bf16.msra.mxu3 %v10093_v8  ;;  %1231 = vmatpush.bf16.msra.mxu1 %v10093_v8  ;;  %v404_v49 = vld [vmem:[#allocation2 + $0x80] sm:$0xff]  ;;  %v480_v50 = vrot.slane %v403_v45, 6  ;;  %v405_v55 = vld [vmem:[#allocation2 + $0x88] sm:$0x3] }
  0x57   : > { %531 = vst [vmem:[#allocation1 + $0x22] ss:$4 sm:$0xff] %v457_v57  ;;  %v481_v51 = vrot.slane %v404_v49, 2  ;;  %v482_v52 = vrot.slane %v404_v49, 4  ;;  %v483_v54 = vrot.slane %v404_v49, 6  ;;  %v406_v56 = vld [vmem:[#allocation2 + $0x90] sm:$0xff] }
  0x58   : > { %755 = vmatpush.bf16.msra.mxu0 %v10084_v60  ;;  %532 = vst [vmem:[#allocation1 + $0x23] ss:$4 sm:$0xff] %v458_v61  ;;  %v484_v57 = vrot.slane %v406_v56, 2  ;;  %v407_v59 = vld [vmem:[#allocation2 + $0x98] sm:$0xff]  ;;  %v485_v60 = vrot.slane %v406_v56, 4  ;;  %v486_v61 = vrot.slane %v406_v56, 6 }
  0x59   : > { %v487_v62 = vrot.slane %v407_v59, 2  ;;  %v408_v2 = vld [vmem:[#allocation2 + $0xa0] sm:$0x3]  ;;  %v410_v8 = vld [vmem:[#allocation2 + $0xb0] sm:$0xff] }
  0x5a   : > { %10284 = vmatpush.bf16.msra.mxu3 %v10092_v14  ;;  %1232 = vmatpush.bf16.msra.mxu1 %v10092_v14  ;;  %v411_v14 = vld [vmem:[#allocation2 + $0xb8] sm:$0x3] }
  0x5b   : > { %v533_v4 = vld.sshfl [vmem:[#allocation1] sm:$0xff pattern:$0x73625140] }
  0x5c   : > { %756 = vmatpush.bf16.msra.mxu0 %v10083_v63  ;;  %535 = vst [vmem:[#allocation1] ss:$4 sm:$0xff] %v459_v0  ;;  %v488_v0 = vrot.slane %v407_v59, 4 }
  0x5d   : > { %536 = vst [vmem:[#allocation1 + $0x1] ss:$4 sm:$0xff] %v393_v3 }
  0x5e   : > { %537 = vst [vmem:[#allocation1 + $0x2] ss:$4 sm:$0xff] %v394_v1  ;;  %10285 = vmatpush.bf16.msra.mxu3 %v10091_v15  ;;  %1233 = vmatpush.bf16.msra.mxu1 %v10091_v15  ;;  %v489_v1 = vrot.slane %v407_v59, 6  ;;  %v412_v15 = vld [vmem:[#allocation2 + $0xc0] sm:$0xff] }
  0x5f   : > { %v534_v12 = vld.sshfl [vmem:[#allocation1 + $0x20] sm:$0xff pattern:$0x73625140]  ;;  %538 = vst [vmem:[#allocation1 + $0x3] ss:$4 sm:$0xff] %v460_v5 }
  0x60   : > { %757 = vmatpush.bf16.msra.mxu0 %v10082_v6  ;;  %539 = vst [vmem:[#allocation1 + $0x20] ss:$4 sm:$0xff] %v461_v7  ;;  %v652_v26 = vpack.c.bf16 %v534_v12, %v533_v4  ;;  %v409_v4 = vld [vmem:[#allocation2 + $0xa8] sm:$0xff]  ;;  %v495_v12 = vrot.slane %v410_v8, 6 }
  0x61   : > { %540 = vst [vmem:[#allocation1 + $0x21] ss:$4 sm:$0xff] %v462_v9  ;;  %v490_v5 = vrot.slane %v409_v4, 2  ;;  %v491_v6 = vrot.slane %v409_v4, 4  ;;  %v492_v7 = vrot.slane %v409_v4, 6 }
  0x62   : > { %541 = vst [vmem:[#allocation1 + $0x22] ss:$4 sm:$0xff] %v395_v10  ;;  %10286 = vmatpush.bf16.msra.mxu3 %v10090_v19  ;;  %1234 = vmatpush.bf16.msra.mxu1 %v10090_v19  ;;  %v493_v10 = vrot.slane %v410_v8, 2  ;;  %v498_v19 = vrot.slane %v412_v15, 6 }
  0x63   : > { %758 = vmatmul.bf16.vlgmr.msra.gmra.mxu0 %v651_v11  ;;  %542 = vst [vmem:[#allocation1 + $0x23] ss:$4 sm:$0xff] %v463_v13  ;;  %v494_v11 = vrot.slane %v410_v8, 4 }
  0x66   : > { %v543_v17 = vld.sshfl [vmem:[#allocation1] sm:$0xff pattern:$0x73625140] }
  0x67   : > { %545 = vst [vmem:[#allocation1] ss:$4 sm:$0xff] %v464_v16  ;;  %v496_v16 = vrot.slane %v412_v15, 2 }
  0x68   : > { %546 = vst [vmem:[#allocation1 + $0x1] ss:$4 sm:$0xff] %v465_v18  ;;  %v497_v18 = vrot.slane %v412_v15, 4 }
  0x69   : > { %547 = vst [vmem:[#allocation1 + $0x2] ss:$4 sm:$0xff] %v396_v20 }
  0x6a   : > { %v544_v23 = vld.sshfl [vmem:[#allocation1 + $0x20] sm:$0xff pattern:$0x73625140]  ;;  %548 = vst [vmem:[#allocation1 + $0x3] ss:$4 sm:$0xff] %v397_v21 }
  0x6b   : > { %549 = vst [vmem:[#allocation1 + $0x20] ss:$4 sm:$0xff] %v466_v22  ;;  %v653_v40 = vpack.c.bf16 %v544_v23, %v543_v17  ;;  %v413_v17 = vld [vmem:[#allocation2 + $0xc8] sm:$0xff] }
  0x6c   : > { %550 = vst [vmem:[#allocation1 + $0x21] ss:$4 sm:$0xff] %v467_v24  ;;  %v499_v21 = vrot.slane %v413_v17, 2  ;;  %v500_v22 = vrot.slane %v413_v17, 4  ;;  %v501_v23 = vrot.slane %v413_v17, 6 }
  0x6d   : > { %551 = vst [vmem:[#allocation1 + $0x22] ss:$4 sm:$0xff] %v468_v25  ;;  %v415_v25 = vld [vmem:[#allocation2 + $0xd8] sm:$0xff] }
  0x6e   : > { %552 = vst [vmem:[#allocation1 + $0x23] ss:$4 sm:$0xff] %v398_v27  ;;  %v502_v27 = vrot.slane %v415_v25, 2 }
  0x71   : > { %v10715_v32 = vld.sshfl [vmem:[#allocation1] sm:$0xff pattern:$0x73625140] }
  0x72   : > { %555 = vst [vmem:[#allocation1] ss:$4 sm:$0xff] %v469_v28  ;;  %v503_v28 = vrot.slane %v415_v25, 4 }
  0x73   : > { %763 = vmatmul.bf16.gmra.mxu0 %v652_v26  ;;  %556 = vst [vmem:[#allocation1 + $0x1] ss:$4 sm:$0xff] %v470_v29  ;;  %v414_v26 = vld [vmem:[#allocation2 + $0xd0] sm:$0x3] }
  0x74   : > { %557 = vst [vmem:[#allocation1 + $0x2] ss:$4 sm:$0xff] %v471_v31  ;;  %v416_v31 = vld [vmem:[#allocation2 + $0xe0] sm:$0xff] }
  0x75   : > { %v10717_v37 = vld.sshfl [vmem:[#allocation1 + $0x20] sm:$0xff pattern:$0x73625140]  ;;  %558 = vst [vmem:[#allocation1 + $0x3] ss:$4 sm:$0xff] %v399_v33  ;;  %v505_v33 = vrot.slane %v416_v31, 2 }
  0x76   : > { %559 = vst [vmem:[#allocation1 + $0x20] ss:$4 sm:$0xff] %v400_v30  ;;  %v504_v30 = vrot.slane %v415_v25, 6 }
  0x77   : > { %560 = vst [vmem:[#allocation1 + $0x21] ss:$4 sm:$0xff] %v472_v34  ;;  %v506_v34 = vrot.slane %v416_v31, 4 }
  0x78   : > { %561 = vst [vmem:[#allocation1 + $0x22] ss:$4 sm:$0xff] %v473_v35 }
  0x79   : > { %562 = vst [vmem:[#allocation1 + $0x23] ss:$4 sm:$0xff] %v474_v36  ;;  %v507_v36 = vrot.slane %v416_v31, 6 }
  0x7c   : > { %v10719_v43 = vld.sshfl [vmem:[#allocation1] sm:$0xff pattern:$0x73625140] }
  0x7d   : > { %565 = vst [vmem:[#allocation1] ss:$4 sm:$0xff] %v401_v38  ;;  %v417_v38 = vld [vmem:[#allocation2 + $0xe8] sm:$0x3] }
  0x7e   : > { %566 = vst [vmem:[#allocation1 + $0x1] ss:$4 sm:$0xff] %v475_v39  ;;  %v865_v39 = vld [vmem:[#allocation2 + $0x9] sm:$0xff] }
  0x7f   : > { %567 = vst [vmem:[#allocation1 + $0x2] ss:$4 sm:$0xff] %v476_v41  ;;  %v927_v41 = vrot.slane %v865_v39, 2 }
  0x80   : > { %v10721_v48 = vld.sshfl [vmem:[#allocation1 + $0x20] sm:$0xff pattern:$0x73625140]  ;;  %568 = vst [vmem:[#allocation1 + $0x3] ss:$4 sm:$0xff] %v477_v42  ;;  %v928_v42 = vrot.slane %v865_v39, 4 }
  0x81   : > { %569 = vst [vmem:[#allocation1 + $0x20] ss:$4 sm:$0xff] %v402_v44 }
  0x82   : > { %570 = vst [vmem:[#allocation1 + $0x21] ss:$4 sm:$0xff] %v403_v45  ;;  %v864_v45 = vld [vmem:[#allocation2 + $0x1] sm:$0xff] }
  0x83   : > { %768 = vmatmul.bf16.gmra.mxu0 %v653_v40  ;;  %571 = vst [vmem:[#allocation1 + $0x22] ss:$4 sm:$0xff] %v478_v46  ;;  %v929_v46 = vrot.slane %v865_v39, 6 }
  0x84   : > { %572 = vst [vmem:[#allocation1 + $0x23] ss:$4 sm:$0xff] %v479_v47  ;;  %v924_v47 = vrot.slane %v864_v45, 2 }
  0x87   : > { %v10723_v53 = vld.sshfl [vmem:[#allocation1] sm:$0xff pattern:$0x73625140] }
  0x88   : > { %575 = vst [vmem:[#allocation1] ss:$4 sm:$0xff] %v480_v50 }
  0x89   : > { %576 = vst [vmem:[#allocation1 + $0x1] ss:$4 sm:$0xff] %v404_v49  ;;  %v925_v49 = vrot.slane %v864_v45, 4 }
  0x8a   : > { %577 = vst [vmem:[#allocation1 + $0x2] ss:$4 sm:$0xff] %v481_v51  ;;  %v926_v51 = vrot.slane %v864_v45, 6 }
  0x8b   : > { %v10725_v58 = vld.sshfl [vmem:[#allocation1 + $0x20] sm:$0xff pattern:$0x73625140]  ;;  %578 = vst [vmem:[#allocation1 + $0x3] ss:$4 sm:$0xff] %v482_v52 }
  0x8c   : > { %579 = vst [vmem:[#allocation1 + $0x20] ss:$4 sm:$0xff] %v483_v54  ;;  %v867_v52 = vld [vmem:[#allocation2 + $0x19] sm:$0xff] }
  0x8d   : > { %580 = vst [vmem:[#allocation1 + $0x21] ss:$4 sm:$0xff] %v405_v55  ;;  %v932_v54 = vrot.slane %v867_v52, 6  ;;  %v868_v55 = vld [vmem:[#allocation2 + $0x21] sm:$0xff] }
  0x8e   : > { %581 = vst [vmem:[#allocation1 + $0x22] ss:$4 sm:$0xff] %v406_v56  ;;  %v933_v56 = vrot.slane %v868_v55, 2 }
  0x8f   : > { %582 = vst [vmem:[#allocation1 + $0x23] ss:$4 sm:$0xff] %v484_v57  ;;  %v934_v57 = vrot.slane %v868_v55, 4 }
  0x92   : > { %v10727_v63 = vld.sshfl [vmem:[#allocation1] sm:$0xff pattern:$0x73625140] }
  0x93   : > { %585 = vst [vmem:[#allocation1] ss:$4 sm:$0xff] %v485_v60  ;;  %v866_v60 = vld [vmem:[#allocation2 + $0x11] sm:$0x3] }
  0x94   : > { %586 = vst [vmem:[#allocation1 + $0x1] ss:$4 sm:$0xff] %v486_v61  ;;  %v930_v61 = vrot.slane %v867_v52, 2 }
  0x95   : > { %587 = vst [vmem:[#allocation1 + $0x2] ss:$4 sm:$0xff] %v407_v59 }
  0x96   : > { %v10729_v3 = vld.sshfl [vmem:[#allocation1 + $0x20] sm:$0xff pattern:$0x73625140]  ;;  %588 = vst [vmem:[#allocation1 + $0x3] ss:$4 sm:$0xff] %v487_v62  ;;  %v931_v62 = vrot.slane %v867_v52, 4 }
  0x97   : > { %589 = vst [vmem:[#allocation1 + $0x20] ss:$4 sm:$0xff] %v488_v0 }
  0x98   : > { %590 = vst [vmem:[#allocation1 + $0x21] ss:$4 sm:$0xff] %v489_v1  ;;  %v870_v1 = vld [vmem:[#allocation2 + $0x31] sm:$0xff] }
  0x99   : > { %591 = vst [vmem:[#allocation1 + $0x22] ss:$4 sm:$0xff] %v408_v2  ;;  %v937_v2 = vrot.slane %v870_v1, 4 }
  0x9a   : > { %592 = vst [vmem:[#allocation1 + $0x23] ss:$4 sm:$0xff] %v409_v4  ;;  %v938_v4 = vrot.slane %v870_v1, 6 }
  0x9d   : > { %v10731_v9 = vld.sshfl [vmem:[#allocation1] sm:$0xff pattern:$0x73625140] }
  0x9e   : > { %595 = vst [vmem:[#allocation1] ss:$4 sm:$0xff] %v490_v5  ;;  %v871_v5 = vld [vmem:[#allocation2 + $0x39] sm:$0xff] }
  0x9f   : > { %596 = vst [vmem:[#allocation1 + $0x1] ss:$4 sm:$0xff] %v491_v6  ;;  %v939_v6 = vrot.slane %v871_v5, 2 }
  0xa0   : > { %597 = vst [vmem:[#allocation1 + $0x2] ss:$4 sm:$0xff] %v492_v7 }
  0xa1   : > { %v10733_v13 = vld.sshfl [vmem:[#allocation1 + $0x20] sm:$0xff pattern:$0x73625140]  ;;  %598 = vst [vmem:[#allocation1 + $0x3] ss:$4 sm:$0xff] %v410_v8  ;;  %v935_v8 = vrot.slane %v868_v55, 6 }
  0xa2   : > { %599 = vst [vmem:[#allocation1 + $0x20] ss:$4 sm:$0xff] %v493_v10  ;;  %v869_v10 = vld [vmem:[#allocation2 + $0x29] sm:$0x3] }
  0xa3   : > { %600 = vst [vmem:[#allocation1 + $0x21] ss:$4 sm:$0xff] %v494_v11  ;;  %v936_v11 = vrot.slane %v870_v1, 2 }
  0xa4   : > { %601 = vst [vmem:[#allocation1 + $0x22] ss:$4 sm:$0xff] %v495_v12 }
  0xa5   : > { %602 = vst [vmem:[#allocation1 + $0x23] ss:$4 sm:$0xff] %v411_v14  ;;  %v873_v14 = vld [vmem:[#allocation2 + $0x49] sm:$0xff] }
  0xa8   : > { %v10735_v20 = vld.sshfl [vmem:[#allocation1] sm:$0xff pattern:$0x73625140] }
  0xa9   : > { %605 = vst [vmem:[#allocation1] ss:$4 sm:$0xff] %v412_v15  ;;  %v942_v15 = vrot.slane %v873_v14, 2 }
  0xaa   : > { %606 = vst [vmem:[#allocation1 + $0x1] ss:$4 sm:$0xff] %v496_v16  ;;  %v943_v16 = vrot.slane %v873_v14, 4 }
  0xab   : > { %607 = vst [vmem:[#allocation1 + $0x2] ss:$4 sm:$0xff] %v497_v18 }
  0xac   : > { %v10737_v24 = vld.sshfl [vmem:[#allocation1 + $0x20] sm:$0xff pattern:$0x73625140]  ;;  %608 = vst [vmem:[#allocation1 + $0x3] ss:$4 sm:$0xff] %v498_v19  ;;  %v940_v19 = vrot.slane %v871_v5, 4 }
  0xad   : > { %609 = vst [vmem:[#allocation1 + $0x20] ss:$4 sm:$0xff] %v413_v17  ;;  %v944_v17 = vrot.slane %v873_v14, 6 }
  0xae   : > { %610 = vst [vmem:[#allocation1 + $0x21] ss:$4 sm:$0xff] %v499_v21  ;;  %v874_v21 = vld [vmem:[#allocation2 + $0x51] sm:$0xff] }
  0xaf   : > { %611 = vst [vmem:[#allocation1 + $0x22] ss:$4 sm:$0xff] %v500_v22  ;;  %v941_v22 = vrot.slane %v871_v5, 6 }
  0xb0   : > { %612 = vst [vmem:[#allocation1 + $0x23] ss:$4 sm:$0xff] %v501_v23  ;;  %v872_v23 = vld [vmem:[#allocation2 + $0x41] sm:$0x3] }
  0xb3   : > { %v10739_v29 = vld.sshfl [vmem:[#allocation1] sm:$0xff pattern:$0x73625140] }
  0xb4   : > { %615 = vst [vmem:[#allocation1] ss:$4 sm:$0xff] %v414_v26  ;;  %v876_v26 = vld [vmem:[#allocation2 + $0x61] sm:$0xff] }
  0xb5   : > { %616 = vst [vmem:[#allocation1 + $0x1] ss:$4 sm:$0xff] %v415_v25 }
  0xb6   : > { %617 = vst [vmem:[#allocation1 + $0x2] ss:$4 sm:$0xff] %v502_v27  ;;  %v948_v27 = vrot.slane %v876_v26, 2 }
  0xb7   : > { %v10741_v35 = vld.sshfl [vmem:[#allocation1 + $0x20] sm:$0xff pattern:$0x73625140]  ;;  %618 = vst [vmem:[#allocation1 + $0x3] ss:$4 sm:$0xff] %v503_v28  ;;  %v949_v28 = vrot.slane %v876_v26, 4 }
  0xb8   : > { %619 = vst [vmem:[#allocation1 + $0x20] ss:$4 sm:$0xff] %v504_v30  ;;  %v950_v30 = vrot.slane %v876_v26, 6 }
  0xb9   : > { %620 = vst [vmem:[#allocation1 + $0x21] ss:$4 sm:$0xff] %v416_v31 }
  0xba   : > { %621 = vst [vmem:[#allocation1 + $0x22] ss:$4 sm:$0xff] %v505_v33  ;;  %v945_v33 = vrot.slane %v874_v21, 2 }
  0xbb   : > { %622 = vst [vmem:[#allocation1 + $0x23] ss:$4 sm:$0xff] %v506_v34  ;;  %v946_v34 = vrot.slane %v874_v21, 4 }
  0xbe   : > { %v10743_v40 = vld.sshfl [vmem:[#allocation1] sm:$0xff pattern:$0x73625140] }
  0xbf   : > { %625 = vst [vmem:[#allocation1] ss:$4 sm:$0xff] %v507_v36  ;;  %v947_v36 = vrot.slane %v874_v21, 6 }
  0xc0   : > { %626 = vst [vmem:[#allocation1 + $0x1] ss:$4 sm:$0xff] %v417_v38 }
  0xc2   : > { %v10745_v44 = vld.sshfl [vmem:[#allocation1 + $0x20] sm:$0xff pattern:$0x73625140] }
  0xc3   : > { %992 = vst [vmem:[#allocation1 + $0x20] ss:$4 sm:$0xff] %v865_v39  ;;  %v875_v39 = vld [vmem:[#allocation2 + $0x59] sm:$0x3] }
  0xc4   : > { %994 = vst [vmem:[#allocation1 + $0x21] ss:$4 sm:$0xff] %v927_v41  ;;  %v878_v41 = vld [vmem:[#allocation2 + $0x71] sm:$0x3] }
  0xc5   : > { %996 = vst [vmem:[#allocation1 + $0x22] ss:$4 sm:$0xff] %v928_v42  ;;  %v879_v42 = vld [vmem:[#allocation2 + $0x79] sm:$0xff] }
  0xc6   : > { %998 = vst [vmem:[#allocation1 + $0x23] ss:$4 sm:$0xff] %v929_v46  ;;  %v877_v46 = vld [vmem:[#allocation2 + $0x69] sm:$0xff] }
  0xc7   : > { %v10747_v50 = vld.sshfl [vmem:[#allocation1] sm:$0xff pattern:$0x73625140] }
  0xc8   : > { %984 = vst [vmem:[#allocation1] ss:$4 sm:$0xff] %v864_v45  ;;  %v954_v45 = vrot.slane %v879_v42, 2 }
  0xc9   : > { %986 = vst [vmem:[#allocation1 + $0x1] ss:$4 sm:$0xff] %v924_v47  ;;  %v955_v47 = vrot.slane %v879_v42, 4 }
  0xca   : > { %988 = vst [vmem:[#allocation1 + $0x2] ss:$4 sm:$0xff] %v925_v49 }
  0xcb   : > { %990 = vst [vmem:[#allocation1 + $0x3] ss:$4 sm:$0xff] %v926_v51  ;;  %v951_v51 = vrot.slane %v877_v46, 2 }
  0xcd   : > { %v10749_v59 = vld.sshfl [vmem:[#allocation1 + $0x20] sm:$0xff pattern:$0x73625140] }
  0xce   : > { %1005 = vst [vmem:[#allocation1 + $0x20] ss:$4 sm:$0xff] %v932_v54  ;;  %v953_v54 = vrot.slane %v877_v46, 6 }
  0xcf   : > { %1006 = vst [vmem:[#allocation1 + $0x21] ss:$4 sm:$0xff] %v868_v55 }
  0xd0   : > { %1007 = vst [vmem:[#allocation1 + $0x22] ss:$4 sm:$0xff] %v933_v56  ;;  %v880_v56 = vld [vmem:[#allocation2 + $0x81] sm:$0xff] }
  0xd1   : > { %1008 = vst [vmem:[#allocation1 + $0x23] ss:$4 sm:$0xff] %v934_v57  ;;  %v959_v57 = vrot.slane %v880_v56, 6 }
  0xd2   : > { %v10751_v0 = vld.sshfl [vmem:[#allocation1] sm:$0xff pattern:$0x73625140] }
  0xd3   : > { %1001 = vst [vmem:[#allocation1] ss:$4 sm:$0xff] %v866_v60  ;;  %v881_v60 = vld [vmem:[#allocation2 + $0x89] sm:$0x3] }
  0xd4   : > { %1002 = vst [vmem:[#allocation1 + $0x1] ss:$4 sm:$0xff] %v867_v52  ;;  %v952_v52 = vrot.slane %v877_v46, 4 }
  0xd5   : > { %1003 = vst [vmem:[#allocation1 + $0x2] ss:$4 sm:$0xff] %v930_v61  ;;  %v882_v61 = vld [vmem:[#allocation2 + $0x91] sm:$0xff] }
  0xd6   : > { %1004 = vst [vmem:[#allocation1 + $0x3] ss:$4 sm:$0xff] %v931_v62  ;;  %v960_v62 = vrot.slane %v882_v61, 2 }
  0xd8   : > { %v10753_v7 = vld.sshfl [vmem:[#allocation1 + $0x20] sm:$0xff pattern:$0x73625140] }
  0xd9   : > { %1015 = vst [vmem:[#allocation1 + $0x20] ss:$4 sm:$0xff] %v937_v2  ;;  %v956_v2 = vrot.slane %v879_v42, 6 }
  0xda   : > { %1016 = vst [vmem:[#allocation1 + $0x21] ss:$4 sm:$0xff] %v938_v4  ;;  %v957_v4 = vrot.slane %v880_v56, 2 }
  0xdb   : > { %1017 = vst [vmem:[#allocation1 + $0x22] ss:$4 sm:$0xff] %v871_v5  ;;  %v958_v5 = vrot.slane %v880_v56, 4 }
  0xdc   : > { %1018 = vst [vmem:[#allocation1 + $0x23] ss:$4 sm:$0xff] %v939_v6 }
  0xdd   : > { %v10755_v12 = vld.sshfl [vmem:[#allocation1] sm:$0xff pattern:$0x73625140] }
  0xde   : > { %1011 = vst [vmem:[#allocation1] ss:$4 sm:$0xff] %v935_v8  ;;  %v883_v8 = vld [vmem:[#allocation2 + $0x99] sm:$0xff] }
  0xdf   : > { %1012 = vst [vmem:[#allocation1 + $0x1] ss:$4 sm:$0xff] %v869_v10  ;;  %v964_v10 = vrot.slane %v883_v8, 4 }
  0xe0   : > { %1013 = vst [vmem:[#allocation1 + $0x2] ss:$4 sm:$0xff] %v870_v1 }
  0xe1   : > { %1014 = vst [vmem:[#allocation1 + $0x3] ss:$4 sm:$0xff] %v936_v11  ;;  %v965_v11 = vrot.slane %v883_v8, 6 }
  0xe3   : > { %v10757_v18 = vld.sshfl [vmem:[#allocation1 + $0x20] sm:$0xff pattern:$0x73625140] }
  0xe4   : > { %1025 = vst [vmem:[#allocation1 + $0x20] ss:$4 sm:$0xff] %v942_v15 }
  0xe5   : > { %1026 = vst [vmem:[#allocation1 + $0x21] ss:$4 sm:$0xff] %v943_v16  ;;  %v961_v16 = vrot.slane %v882_v61, 4 }
  0xe6   : > { %1027 = vst [vmem:[#allocation1 + $0x22] ss:$4 sm:$0xff] %v944_v17  ;;  %v885_v17 = vld [vmem:[#allocation2 + $0xa9] sm:$0xff] }
  0xe7   : > { %1028 = vst [vmem:[#allocation1 + $0x23] ss:$4 sm:$0xff] %v874_v21  ;;  %v963_v21 = vrot.slane %v883_v8, 2 }
  0xe8   : > { %v10759_v25 = vld.sshfl [vmem:[#allocation1] sm:$0xff pattern:$0x73625140] }
  0xe9   : > { %1021 = vst [vmem:[#allocation1] ss:$4 sm:$0xff] %v940_v19  ;;  %v962_v19 = vrot.slane %v882_v61, 6 }
  0xea   : > { %1022 = vst [vmem:[#allocation1 + $0x1] ss:$4 sm:$0xff] %v941_v22 }
  0xeb   : > { %1023 = vst [vmem:[#allocation1 + $0x2] ss:$4 sm:$0xff] %v872_v23  ;;  %v886_v23 = vld [vmem:[#allocation2 + $0xb1] sm:$0xff] }
  0xec   : > { %1024 = vst [vmem:[#allocation1 + $0x3] ss:$4 sm:$0xff] %v873_v14  ;;  %v884_v14 = vld [vmem:[#allocation2 + $0xa1] sm:$0x3] }
  0xee   : > { %v10761_v31 = vld.sshfl [vmem:[#allocation1 + $0x20] sm:$0xff pattern:$0x73625140] }
  0xef   : > { %1035 = vst [vmem:[#allocation1 + $0x20] ss:$4 sm:$0xff] %v876_v26  ;;  %v969_v26 = vrot.slane %v886_v23, 2 }
  0xf0   : > { %1036 = vst [vmem:[#allocation1 + $0x21] ss:$4 sm:$0xff] %v948_v27  ;;  %v970_v27 = vrot.slane %v886_v23, 4 }
  0xf1   : > { %1037 = vst [vmem:[#allocation1 + $0x22] ss:$4 sm:$0xff] %v949_v28  ;;  %v654_v28 = vpack.c.bf16 %v10717_v37, %v10715_v32  ;;  %v888_v37 = vld [vmem:[#allocation2 + $0xc1] sm:$0xff] }
  0xf2   : > { %1038 = vst [vmem:[#allocation1 + $0x23] ss:$4 sm:$0xff] %v950_v30  ;;  %v971_v30 = vrot.slane %v886_v23, 6 }
  0xf3   : > { %v10763_v38 = vld.sshfl [vmem:[#allocation1] sm:$0xff pattern:$0x73625140]  ;;  %773 = vmatmul.bf16.gmra.mxu0 %v654_v28  ;;  %v1342_v28 = vld [vmem:[#allocation2 + $0xa] sm:$0xff] }
  0xf4   : > { %1031 = vst [vmem:[#allocation1] ss:$4 sm:$0xff] %v945_v33 }
  0xf5   : > { %1032 = vst [vmem:[#allocation1 + $0x1] ss:$4 sm:$0xff] %v946_v34  ;;  %v887_v34 = vld [vmem:[#allocation2 + $0xb9] sm:$0x3] }
  0xf6   : > { %1033 = vst [vmem:[#allocation1 + $0x2] ss:$4 sm:$0xff] %v947_v36  ;;  %v966_v36 = vrot.slane %v885_v17, 2 }
  0xf7   : > { %1034 = vst [vmem:[#allocation1 + $0x3] ss:$4 sm:$0xff] %v875_v39  ;;  %v967_v39 = vrot.slane %v885_v17, 4 }
  0xf9   : > { %v10765_v49 = vld.sshfl [vmem:[#allocation1 + $0x20] sm:$0xff pattern:$0x73625140] }
  0xfa   : > { %1045 = vst [vmem:[#allocation1 + $0x20] ss:$4 sm:$0xff] %v878_v41  ;;  %v968_v41 = vrot.slane %v885_v17, 6 }
  0xfb   : > { %1046 = vst [vmem:[#allocation1 + $0x21] ss:$4 sm:$0xff] %v879_v42 }
  0xfc   : > { %1047 = vst [vmem:[#allocation1 + $0x22] ss:$4 sm:$0xff] %v954_v45  ;;  %v889_v45 = vld [vmem:[#allocation2 + $0xc9] sm:$0xff] }
  0xfd   : > { %1048 = vst [vmem:[#allocation1 + $0x23] ss:$4 sm:$0xff] %v955_v47  ;;  %v976_v32 = vrot.slane %v889_v45, 4  ;;  %v977_v47 = vrot.slane %v889_v45, 6 }
  0xfe   : > { %v10767_v55 = vld.sshfl [vmem:[#allocation1] sm:$0xff pattern:$0x73625140] }
  0xff   : > { %1041 = vst [vmem:[#allocation1] ss:$4 sm:$0xff] %v877_v46  ;;  %v975_v46 = vrot.slane %v889_v45, 2 }
 0x100   : > { %1042 = vst [vmem:[#allocation1 + $0x1] ss:$4 sm:$0xff] %v951_v51 }
 0x101   : > { %1043 = vst [vmem:[#allocation1 + $0x2] ss:$4 sm:$0xff] %v952_v52  ;;  %v972_v52 = vrot.slane %v888_v37, 2 }
 0x102   : > { %1044 = vst [vmem:[#allocation1 + $0x3] ss:$4 sm:$0xff] %v953_v54  ;;  %v973_v54 = vrot.slane %v888_v37, 4 }
 0x104   : > { %v10769_v1 = vld.sshfl [vmem:[#allocation1 + $0x20] sm:$0xff pattern:$0x73625140] }
 0x105   : > { %1055 = vst [vmem:[#allocation1 + $0x20] ss:$4 sm:$0xff] %v959_v57  ;;  %v655_v57 = vpack.c.bf16 %v10721_v48, %v10719_v43  ;;  %v10103_v43 = vld [vmem:[%s13930_s1 + $0xa8] sm:$0xff] }
 0x106   : > { %1056 = vst [vmem:[#allocation1 + $0x21] ss:$4 sm:$0xff] %v881_v60  ;;  %v974_v60 = vrot.slane %v888_v37, 6 }
 0x107   : > { %1057 = vst [vmem:[#allocation1 + $0x22] ss:$4 sm:$0xff] %v882_v61  ;;  %778 = vmatmul.bf16.gmra.mxu0 %v655_v57 }
 0x108   : > { %1058 = vst [vmem:[#allocation1 + $0x23] ss:$4 sm:$0xff] %v960_v62  ;;  %v10104_v62 = vld [vmem:[%s13930_s1 + $0xb0] sm:$0xff] }
 0x109   : > { %v10771_v6 = vld.sshfl [vmem:[#allocation1] sm:$0xff pattern:$0x73625140] }
 0x10a   : > { %1051 = vst [vmem:[#allocation1] ss:$4 sm:$0xff] %v956_v2  ;;  %v891_v2 = vld [vmem:[#allocation2 + $0xd9] sm:$0xff] }
 0x10b   : > { %1052 = vst [vmem:[#allocation1 + $0x1] ss:$4 sm:$0xff] %v880_v56  ;;  %v10105_v56 = vld [vmem:[%s13930_s1 + $0xb8] sm:$0xff] }
 0x10c   : > { %1053 = vst [vmem:[#allocation1 + $0x2] ss:$4 sm:$0xff] %v957_v4  ;;  %10287 = vmatpush.bf16.msrb.mxu3 %v10105_v56  ;;  %1704 = vmatpush.bf16.msra.mxu2 %v10105_v56  ;;  %v980_v4 = vrot.slane %v891_v2, 6  ;;  %v1344_v56 = vld [vmem:[#allocation2 + $0x1a] sm:$0xff] }
 0x10d   : > { %1054 = vst [vmem:[#allocation1 + $0x3] ss:$4 sm:$0xff] %v958_v5  ;;  %v892_v5 = vld [vmem:[#allocation2 + $0xe1] sm:$0xff] }
 0x10f   : > { %v10773_v15 = vld.sshfl [vmem:[#allocation1 + $0x20] sm:$0xff pattern:$0x73625140] }
 0x110   : > { %1065 = vst [vmem:[#allocation1 + $0x20] ss:$4 sm:$0xff] %v964_v10  ;;  %10288 = vmatpush.bf16.msrb.mxu3 %v10104_v62  ;;  %v982_v10 = vrot.slane %v892_v5, 4  ;;  %1705 = vmatpush.bf16.msra.mxu2 %v10104_v62  ;;  %v1345_v62 = vld [vmem:[#allocation2 + $0x22] sm:$0xff] }
 0x111   : > { %1066 = vst [vmem:[#allocation1 + $0x21] ss:$4 sm:$0xff] %v965_v11  ;;  %v890_v11 = vld [vmem:[#allocation2 + $0xd1] sm:$0x3] }
 0x112   : > { %1067 = vst [vmem:[#allocation1 + $0x22] ss:$4 sm:$0xff] %v884_v14  ;;  %v10102_v14 = vld [vmem:[%s13930_s1 + $0xa0] sm:$0xff] }
 0x113   : > { %1068 = vst [vmem:[#allocation1 + $0x23] ss:$4 sm:$0xff] %v885_v17 }
 0x114   : > { %v10775_v22 = vld.sshfl [vmem:[#allocation1] sm:$0xff pattern:$0x73625140]  ;;  %10289 = vmatpush.bf16.msrb.mxu3 %v10103_v43  ;;  %1706 = vmatpush.bf16.msra.mxu2 %v10103_v43  ;;  %v1407_v43 = vrot.slane %v1344_v56, 2 }
 0x115   : > { %1061 = vst [vmem:[#allocation1] ss:$4 sm:$0xff] %v961_v16  ;;  %v978_v16 = vrot.slane %v891_v2, 2 }
 0x116   : > { %1062 = vst [vmem:[#allocation1 + $0x1] ss:$4 sm:$0xff] %v962_v19  ;;  %v979_v19 = vrot.slane %v891_v2, 4 }
 0x117   : > { %1063 = vst [vmem:[#allocation1 + $0x2] ss:$4 sm:$0xff] %v883_v8  ;;  %v981_v8 = vrot.slane %v892_v5, 2 }
 0x118   : > { %1064 = vst [vmem:[#allocation1 + $0x3] ss:$4 sm:$0xff] %v963_v21  ;;  %10290 = vmatpush.bf16.msrb.mxu3 %v10102_v14  ;;  %1707 = vmatpush.bf16.msra.mxu2 %v10102_v14 }
 0x11a   : > { %v10779_v33 = vld.sshfl [vmem:[#allocation1 + $0x20] sm:$0xff pattern:$0x73625140] }
 0x11b   : > { %1075 = vst [vmem:[#allocation1 + $0x20] ss:$4 sm:$0xff] %v969_v26  ;;  %v656_v26 = vpack.c.bf16 %v10725_v58, %v10723_v53  ;;  %v1405_v58 = vrot.slane %v1342_v28, 4 }
 0x11c   : > { %1076 = vst [vmem:[#allocation1 + $0x21] ss:$4 sm:$0xff] %v970_v27  ;;  %v10100_v27 = vld [vmem:[%s13930_s1 + $0x90] sm:$0xff] }
 0x11d   : > { %1077 = vst [vmem:[#allocation1 + $0x22] ss:$4 sm:$0xff] %v971_v30  ;;  %783 = vmatmul.bf16.gmra.mxu0 %v656_v26  ;;  %v983_v30 = vrot.slane %v892_v5, 6  ;;  %v1412_v26 = vrot.slane %v1345_v62, 6 }
 0x11e   : > { %1078 = vst [vmem:[#allocation1 + $0x23] ss:$4 sm:$0xff] %v887_v34  ;;  %v893_v34 = vld [vmem:[#allocation2 + $0xe9] sm:$0x3] }
 0x11f   : > { %v10781_v42 = vld.sshfl [vmem:[#allocation1] sm:$0xff pattern:$0x73625140] }
 0x120   : > { %1071 = vst [vmem:[#allocation1] ss:$4 sm:$0xff] %v966_v36  ;;  %v10099_v36 = vld [vmem:[%s13930_s1 + $0x88] sm:$0xff] }
 0x121   : > { %1072 = vst [vmem:[#allocation1 + $0x1] ss:$4 sm:$0xff] %v967_v39  ;;  %v1404_v39 = vrot.slane %v1342_v28, 2 }
 0x122   : > { %1073 = vst [vmem:[#allocation1 + $0x2] ss:$4 sm:$0xff] %v968_v41 }
 0x123   : > { %1074 = vst [vmem:[#allocation1 + $0x3] ss:$4 sm:$0xff] %v886_v23  ;;  %v10101_v23 = vld [vmem:[%s13930_s1 + $0x98] sm:$0xff] }
 0x124   : > { %10291 = vmatpush.bf16.msrb.mxu3 %v10101_v23  ;;  %1708 = vmatpush.bf16.msra.mxu2 %v10101_v23 }
 0x125   : > { %v10783_v51 = vld.sshfl [vmem:[#allocation1 + $0x20] sm:$0xff pattern:$0x73625140] }
 0x126   : > { %1085 = vst [vmem:[#allocation1 + $0x20] ss:$4 sm:$0xff] %v889_v45  ;;  %v1406_v45 = vrot.slane %v1342_v28, 6 }
 0x127   : > { %1086 = vst [vmem:[#allocation1 + $0x21] ss:$4 sm:$0xff] %v975_v46  ;;  %v10098_v46 = vld [vmem:[%s13930_s1 + $0x80] sm:$0xff] }
 0x128   : > { %1087 = vst [vmem:[#allocation1 + $0x22] ss:$4 sm:$0xff] %v976_v32  ;;  %10292 = vmatpush.bf16.msrb.mxu3 %v10100_v27  ;;  %1709 = vmatpush.bf16.msra.mxu2 %v10100_v27  ;;  %v1346_v27 = vld [vmem:[#allocation2 + $0x2a] sm:$0x3] }
 0x129   : > { %1088 = vst [vmem:[#allocation1 + $0x23] ss:$4 sm:$0xff] %v977_v47 }
 0x12a   : > { %v10790_v61 = vld.sshfl [vmem:[#allocation1] sm:$0xff pattern:$0x73625140] }
 0x12b   : > { %1081 = vst [vmem:[#allocation1] ss:$4 sm:$0xff] %v888_v37  ;;  %v1341_v37 = vld [vmem:[#allocation2 + $0x2] sm:$0xff] }
 0x12c   : > { %1082 = vst [vmem:[#allocation1 + $0x1] ss:$4 sm:$0xff] %v972_v52  ;;  %10293 = vmatpush.bf16.msrb.mxu3 %v10099_v36  ;;  %1710 = vmatpush.bf16.msra.mxu2 %v10099_v36  ;;  %v1401_v47 = vrot.slane %v1341_v37, 2  ;;  %v1402_v52 = vrot.slane %v1341_v37, 4  ;;  %v1403_v57 = vrot.slane %v1341_v37, 6 }
 0x12d   : > { %1083 = vst [vmem:[#allocation1 + $0x2] ss:$4 sm:$0xff] %v973_v54 }
 0x12e   : > { %1084 = vst [vmem:[#allocation1 + $0x3] ss:$4 sm:$0xff] %v974_v60  ;;  %v1409_v60 = vrot.slane %v1344_v56, 6 }
 0x130   : > { %v1090_v48 = vld.sshfl [vmem:[#allocation1 + $0x20] sm:$0xff pattern:$0x73625140]  ;;  %10294 = vmatpush.bf16.msrb.mxu3 %v10098_v46  ;;  %1711 = vmatpush.bf16.msra.mxu2 %v10098_v46 }
 0x131   : > { %1095 = vst [vmem:[#allocation1 + $0x20] ss:$4 sm:$0xff] %v980_v4  ;;  %v1411_v4 = vrot.slane %v1345_v62, 4 }
 0x132   : > { %1096 = vst [vmem:[#allocation1 + $0x21] ss:$4 sm:$0xff] %v892_v5 }
 0x133   : > { %1097 = vst [vmem:[#allocation1 + $0x22] ss:$4 sm:$0xff] %v981_v8  ;;  %v1343_v8 = vld [vmem:[#allocation2 + $0x12] sm:$0x3] }
 0x134   : > { %1098 = vst [vmem:[#allocation1 + $0x23] ss:$4 sm:$0xff] %v982_v10  ;;  %v1347_v10 = vld [vmem:[#allocation2 + $0x32] sm:$0xff] }
 0x135   : > { %v1089_v17 = vld.sshfl [vmem:[#allocation1] sm:$0xff pattern:$0x73625140] }
 0x136   : > { %v1136_v21 = vpack.c.bf16 %v1090_v48, %v1089_v17  ;;  %1091 = vst [vmem:[#allocation1] ss:$4 sm:$0xff] %v890_v11  ;;  %v1408_v11 = vrot.slane %v1344_v56, 4  ;;  %v1415_v17 = vrot.slane %v1347_v10, 6 }
 0x137   : > { %1092 = vst [vmem:[#allocation1 + $0x1] ss:$4 sm:$0xff] %v891_v2  ;;  %v1410_v2 = vrot.slane %v1345_v62, 2 }
 0x138   : > { %1280 = vmatmul.bf16.vlgmr.msra.gmra.mxu3 %v1136_v21  ;;  %1093 = vst [vmem:[#allocation1 + $0x2] ss:$4 sm:$0xff] %v978_v16  ;;  %v1414_v16 = vrot.slane %v1347_v10, 4 }
 0x139   : > { %1094 = vst [vmem:[#allocation1 + $0x3] ss:$4 sm:$0xff] %v979_v19  ;;  %v1348_v19 = vld [vmem:[#allocation2 + $0x3a] sm:$0xff] }
 0x13a   : > { %v1416_v21 = vrot.slane %v1348_v19, 2  ;;  %v1418_v46 = vrot.slane %v1348_v19, 6 }
 0x13b   : > { %v1100_v53 = vld.sshfl [vmem:[#allocation1 + $0x20] sm:$0xff pattern:$0x73625140] }
 0x13c   : > { %1469 = vst [vmem:[#allocation1 + $0x20] ss:$4 sm:$0xff] %v1342_v28  ;;  %v1350_v28 = vld [vmem:[#allocation2 + $0x4a] sm:$0xff] }
 0x13d   : > { %1471 = vst [vmem:[#allocation1 + $0x21] ss:$4 sm:$0xff] %v1404_v39  ;;  %v1419_v36 = vrot.slane %v1350_v28, 2  ;;  %v1420_v39 = vrot.slane %v1350_v28, 4 }
 0x13e   : > { %1473 = vst [vmem:[#allocation1 + $0x22] ss:$4 sm:$0xff] %v1405_v58  ;;  %v1351_v58 = vld [vmem:[#allocation2 + $0x52] sm:$0xff] }
 0x13f   : > { %1475 = vst [vmem:[#allocation1 + $0x23] ss:$4 sm:$0xff] %v1406_v45  ;;  %v1417_v45 = vrot.slane %v1348_v19, 4 }
 0x140   : > { %v1099_v41 = vld.sshfl [vmem:[#allocation1] sm:$0xff pattern:$0x73625140] }
 0x141   : > { %1101 = vst [vmem:[#allocation1] ss:$4 sm:$0xff] %v983_v30  ;;  %v1137_v32 = vpack.c.bf16 %v1100_v53, %v1099_v41  ;;  %v1413_v30 = vrot.slane %v1347_v10, 2  ;;  %v1421_v41 = vrot.slane %v1350_v28, 6 }
 0x142   : > { %1102 = vst [vmem:[#allocation1 + $0x1] ss:$4 sm:$0xff] %v893_v34 }
 0x146   : > { %v10815_v5 = vld.sshfl [vmem:[#allocation1 + $0x20] sm:$0xff pattern:$0x73625140] }
 0x147   : > { %1482 = vst [vmem:[#allocation1 + $0x20] ss:$4 sm:$0xff] %v1409_v60  ;;  %v1422_v60 = vrot.slane %v1351_v58, 2 }
 0x148   : > { %1285 = vmatmul.bf16.gmra.mxu3 %v1137_v32  ;;  %1483 = vst [vmem:[#allocation1 + $0x21] ss:$4 sm:$0xff] %v1345_v62  ;;  %v1353_v32 = vld [vmem:[#allocation2 + $0x62] sm:$0xff]  ;;  %v1423_v62 = vrot.slane %v1351_v58, 4 }
 0x149   : > { %v1103_v54 = vld.sshfl [vmem:[#allocation1] sm:$0xff pattern:$0x73625140]  ;;  %1484 = vst [vmem:[#allocation1 + $0x22] ss:$4 sm:$0xff] %v1410_v2  ;;  %v1424_v2 = vrot.slane %v1351_v58, 6 }
 0x14a   : > { %1461 = vst [vmem:[#allocation1] ss:$4 sm:$0xff] %v1341_v37  ;;  %v1138_v48 = vpack.c.bf16 %v1103_v54, %v1103_v54  ;;  %v1349_v37 = vld [vmem:[#allocation2 + $0x42] sm:$0x3]  ;;  %v1426_v54 = vrot.slane %v1353_v32, 4 }
 0x14b   : > { %1463 = vst [vmem:[#allocation1 + $0x1] ss:$4 sm:$0xff] %v1401_v47 }
 0x14c   : > { %1465 = vst [vmem:[#allocation1 + $0x2] ss:$4 sm:$0xff] %v1402_v52  ;;  %v1425_v52 = vrot.slane %v1353_v32, 2 }
 0x14d   : > { %1467 = vst [vmem:[#allocation1 + $0x3] ss:$4 sm:$0xff] %v1403_v57 }
 0x14e   : > { %1485 = vst [vmem:[#allocation1 + $0x23] ss:$4 sm:$0xff] %v1411_v4 }
 0x154   : > { %v10817_v14 = vld.sshfl [vmem:[#allocation1] sm:$0xff pattern:$0x73625140] }
 0x155   : > { %1478 = vst [vmem:[#allocation1] ss:$4 sm:$0xff] %v1343_v8  ;;  %v10819_v23 = vld.sshfl [vmem:[#allocation1 + $0x20] sm:$0xff pattern:$0x73625140] }
 0x156   : > { %1479 = vst [vmem:[#allocation1 + $0x1] ss:$4 sm:$0xff] %v1344_v56  ;;  %v1427_v56 = vrot.slane %v1353_v32, 6  ;;  %v1352_v8 = vld [vmem:[#allocation2 + $0x5a] sm:$0x3] }
 0x157   : > { %1480 = vst [vmem:[#allocation1 + $0x2] ss:$4 sm:$0xff] %v1407_v43  ;;  %v1355_v43 = vld [vmem:[#allocation2 + $0x72] sm:$0x3] }
 0x158   : > { %1290 = vmatmul.bf16.gmra.mxu3 %v1138_v48  ;;  %1481 = vst [vmem:[#allocation1 + $0x3] ss:$4 sm:$0xff] %v1408_v11  ;;  %v1356_v48 = vld [vmem:[#allocation2 + $0x7a] sm:$0xff] }
 0x159   : > { %1492 = vst [vmem:[#allocation1 + $0x20] ss:$4 sm:$0xff] %v1414_v16  ;;  %v1432_v11 = vrot.slane %v1356_v48, 4 }
 0x15a   : > { %1493 = vst [vmem:[#allocation1 + $0x21] ss:$4 sm:$0xff] %v1415_v17  ;;  %v1354_v17 = vld [vmem:[#allocation2 + $0x6a] sm:$0xff] }
 0x15b   : > { %1494 = vst [vmem:[#allocation1 + $0x22] ss:$4 sm:$0xff] %v1348_v19  ;;  %v1428_v19 = vrot.slane %v1354_v17, 2 }
 0x15c   : > { %1495 = vst [vmem:[#allocation1 + $0x23] ss:$4 sm:$0xff] %v1416_v21  ;;  %v1429_v21 = vrot.slane %v1354_v17, 4 }
 0x15f   : > { %v10821_v34 = vld.sshfl [vmem:[#allocation1] sm:$0xff pattern:$0x73625140] }
 0x160   : > { %1488 = vst [vmem:[#allocation1] ss:$4 sm:$0xff] %v1412_v26  ;;  %v1357_v26 = vld [vmem:[#allocation2 + $0x82] sm:$0xff] }
 0x161   : > { %1489 = vst [vmem:[#allocation1 + $0x1] ss:$4 sm:$0xff] %v1346_v27  ;;  %v1430_v27 = vrot.slane %v1354_v17, 6 }
 0x162   : > { %1490 = vst [vmem:[#allocation1 + $0x2] ss:$4 sm:$0xff] %v1347_v10  ;;  %v1431_v10 = vrot.slane %v1356_v48, 2 }
 0x163   : > { %1491 = vst [vmem:[#allocation1 + $0x3] ss:$4 sm:$0xff] %v1413_v30  ;;  %v10823_v53 = vld.sshfl [vmem:[#allocation1 + $0x20] sm:$0xff pattern:$0x73625140]  ;;  %v1436_v30 = vrot.slane %v1357_v26, 6 }
 0x164   : > { %1502 = vst [vmem:[#allocation1 + $0x20] ss:$4 sm:$0xff] %v1419_v36  ;;  %v1358_v36 = vld [vmem:[#allocation2 + $0x8a] sm:$0x3] }
 0x165   : > { %1503 = vst [vmem:[#allocation1 + $0x21] ss:$4 sm:$0xff] %v1420_v39  ;;  %v1359_v39 = vld [vmem:[#allocation2 + $0x92] sm:$0xff] }
 0x166   : > { %1504 = vst [vmem:[#allocation1 + $0x22] ss:$4 sm:$0xff] %v1421_v41  ;;  %v1437_v41 = vrot.slane %v1359_v39, 2 }
 0x167   : > { %1505 = vst [vmem:[#allocation1 + $0x23] ss:$4 sm:$0xff] %v1351_v58 }
 0x16a   : > { %v10825_v47 = vld.sshfl [vmem:[#allocation1] sm:$0xff pattern:$0x73625140] }
 0x16b   : > { %1498 = vst [vmem:[#allocation1] ss:$4 sm:$0xff] %v1417_v45  ;;  %v1433_v45 = vrot.slane %v1356_v48, 6 }
 0x16c   : > { %1499 = vst [vmem:[#allocation1 + $0x1] ss:$4 sm:$0xff] %v1418_v46  ;;  %v1434_v46 = vrot.slane %v1357_v26, 2 }
 0x16d   : > { %1500 = vst [vmem:[#allocation1 + $0x2] ss:$4 sm:$0xff] %v1349_v37  ;;  %v1435_v37 = vrot.slane %v1357_v26, 4 }
 0x16e   : > { %1501 = vst [vmem:[#allocation1 + $0x3] ss:$4 sm:$0xff] %v1350_v28  ;;  %v10827_v57 = vld.sshfl [vmem:[#allocation1 + $0x20] sm:$0xff pattern:$0x73625140] }
 0x16f   : > { %1512 = vst [vmem:[#allocation1 + $0x20] ss:$4 sm:$0xff] %v1353_v32  ;;  %v1360_v32 = vld [vmem:[#allocation2 + $0x9a] sm:$0xff] }
 0x170   : > { %1513 = vst [vmem:[#allocation1 + $0x21] ss:$4 sm:$0xff] %v1425_v52 }
 0x171   : > { %1514 = vst [vmem:[#allocation1 + $0x22] ss:$4 sm:$0xff] %v1426_v54  ;;  %v1441_v54 = vrot.slane %v1360_v32, 4 }
 0x172   : > { %1515 = vst [vmem:[#allocation1 + $0x23] ss:$4 sm:$0xff] %v1427_v56  ;;  %v1442_v56 = vrot.slane %v1360_v32, 6 }
 0x175   : > { %v10829_v4 = vld.sshfl [vmem:[#allocation1] sm:$0xff pattern:$0x73625140] }
 0x176   : > { %1508 = vst [vmem:[#allocation1] ss:$4 sm:$0xff] %v1422_v60  ;;  %v1361_v60 = vld [vmem:[#allocation2 + $0xa2] sm:$0x3] }
 0x177   : > { %1509 = vst [vmem:[#allocation1 + $0x1] ss:$4 sm:$0xff] %v1423_v62 }
 0x178   : > { %1510 = vst [vmem:[#allocation1 + $0x2] ss:$4 sm:$0xff] %v1424_v2  ;;  %v1362_v2 = vld [vmem:[#allocation2 + $0xaa] sm:$0xff] }
 0x179   : > { %1511 = vst [vmem:[#allocation1 + $0x3] ss:$4 sm:$0xff] %v1352_v8  ;;  %v10831_v16 = vld.sshfl [vmem:[#allocation1 + $0x20] sm:$0xff pattern:$0x73625140]  ;;  %v1438_v8 = vrot.slane %v1359_v39, 4 }
 0x17a   : > { %1522 = vst [vmem:[#allocation1 + $0x20] ss:$4 sm:$0xff] %v1355_v43  ;;  %v1439_v43 = vrot.slane %v1359_v39, 6 }
 0x17b   : > { %1523 = vst [vmem:[#allocation1 + $0x21] ss:$4 sm:$0xff] %v1356_v48  ;;  %v1363_v48 = vld [vmem:[#allocation2 + $0xb2] sm:$0xff] }
 0x17c   : > { %1524 = vst [vmem:[#allocation1 + $0x22] ss:$4 sm:$0xff] %v1431_v10  ;;  %v1440_v10 = vrot.slane %v1360_v32, 2 }
 0x17d   : > { %1525 = vst [vmem:[#allocation1 + $0x23] ss:$4 sm:$0xff] %v1432_v11 }
 0x180   : > { %v10833_v28 = vld.sshfl [vmem:[#allocation1] sm:$0xff pattern:$0x73625140] }
 0x181   : > { %1518 = vst [vmem:[#allocation1] ss:$4 sm:$0xff] %v1354_v17  ;;  %v1446_v17 = vrot.slane %v1363_v48, 2 }
 0x182   : > { %1519 = vst [vmem:[#allocation1 + $0x1] ss:$4 sm:$0xff] %v1428_v19  ;;  %v1447_v19 = vrot.slane %v1363_v48, 4 }
 0x183   : > { %1520 = vst [vmem:[#allocation1 + $0x2] ss:$4 sm:$0xff] %v1429_v21  ;;  %v1448_v21 = vrot.slane %v1363_v48, 6 }
 0x184   : > { %1521 = vst [vmem:[#allocation1 + $0x3] ss:$4 sm:$0xff] %v1430_v27  ;;  %v10835_v58 = vld.sshfl [vmem:[#allocation1 + $0x20] sm:$0xff pattern:$0x73625140]  ;;  %v657_v27 = vpack.c.bf16 %v10729_v3, %v10727_v63  ;;  %v1365_v3 = vld [vmem:[#allocation2 + $0xc2] sm:$0xff] }
 0x185   : > { %1532 = vst [vmem:[#allocation1 + $0x20] ss:$4 sm:$0xff] %v1436_v30  ;;  %v1364_v30 = vld [vmem:[#allocation2 + $0xba] sm:$0x3] }
 0x186   : > { %1533 = vst [vmem:[#allocation1 + $0x21] ss:$4 sm:$0xff] %v1358_v36  ;;  %788 = vmatmul.bf16.gmra.mxu0 %v657_v27  ;;  %v1443_v36 = vrot.slane %v1362_v2, 2 }
 0x187   : > { %1534 = vst [vmem:[#allocation1 + $0x22] ss:$4 sm:$0xff] %v1359_v39  ;;  %v1444_v39 = vrot.slane %v1362_v2, 4 }
 0x188   : > { %1535 = vst [vmem:[#allocation1 + $0x23] ss:$4 sm:$0xff] %v1437_v41  ;;  %v1366_v41 = vld [vmem:[#allocation2 + $0xca] sm:$0xff] }
 0x18b   : > { %v10837_v52 = vld.sshfl [vmem:[#allocation1] sm:$0xff pattern:$0x73625140] }
 0x18c   : > { %1528 = vst [vmem:[#allocation1] ss:$4 sm:$0xff] %v1433_v45  ;;  %v1445_v45 = vrot.slane %v1362_v2, 6 }
 0x18d   : > { %1529 = vst [vmem:[#allocation1 + $0x1] ss:$4 sm:$0xff] %v1357_v26 }
 0x18e   : > { %1530 = vst [vmem:[#allocation1 + $0x2] ss:$4 sm:$0xff] %v1434_v46 }
 0x18f   : > { %1531 = vst [vmem:[#allocation1 + $0x3] ss:$4 sm:$0xff] %v1435_v37  ;;  %v10839_v62 = vld.sshfl [vmem:[#allocation1 + $0x20] sm:$0xff pattern:$0x73625140]  ;;  %v1453_v37 = vrot.slane %v1366_v41, 4 }
 0x190   : > { %1542 = vst [vmem:[#allocation1 + $0x20] ss:$4 sm:$0xff] %v1441_v54  ;;  %v1454_v54 = vrot.slane %v1366_v41, 6 }
 0x191   : > { %1543 = vst [vmem:[#allocation1 + $0x21] ss:$4 sm:$0xff] %v1442_v56  ;;  %v1449_v56 = vrot.slane %v1365_v3, 2 }
 0x192   : > { %1544 = vst [vmem:[#allocation1 + $0x22] ss:$4 sm:$0xff] %v1361_v60  ;;  %v1450_v60 = vrot.slane %v1365_v3, 4 }
 0x193   : > { %1545 = vst [vmem:[#allocation1 + $0x23] ss:$4 sm:$0xff] %v1362_v2  ;;  %v10113_v2 = vld [vmem:[%s13930_s1 + $0xf8] sm:$0xff] }
 0x194   : > { %2182 = vmatpush.bf16.msra.mxu3 %v10113_v2 }
 0x196   : > { %v10841_v11 = vld.sshfl [vmem:[#allocation1] sm:$0xff pattern:$0x73625140] }
 0x197   : > { %1538 = vst [vmem:[#allocation1] ss:$4 sm:$0xff] %v1438_v8  ;;  %v658_v8 = vpack.c.bf16 %v10733_v13, %v10731_v9  ;;  %v10111_v9 = vld [vmem:[%s13930_s1 + $0xe8] sm:$0xff]  ;;  %v1367_v13 = vld [vmem:[#allocation2 + $0xd2] sm:$0x3] }
 0x198   : > { %1539 = vst [vmem:[#allocation1 + $0x1] ss:$4 sm:$0xff] %v1439_v43  ;;  %v1451_v43 = vrot.slane %v1365_v3, 6 }
 0x199   : > { %1540 = vst [vmem:[#allocation1 + $0x2] ss:$4 sm:$0xff] %v1360_v32  ;;  %v1452_v32 = vrot.slane %v1366_v41, 2  ;;  %793 = vmatmul.bf16.gmra.mxu0 %v658_v8 }
 0x19a   : > { %1541 = vst [vmem:[#allocation1 + $0x3] ss:$4 sm:$0xff] %v1440_v10  ;;  %v10843_v26 = vld.sshfl [vmem:[#allocation1 + $0x20] sm:$0xff pattern:$0x73625140] }
 0x19b   : > { %1552 = vst [vmem:[#allocation1 + $0x20] ss:$4 sm:$0xff] %v1446_v17 }
 0x19c   : > { %1553 = vst [vmem:[#allocation1 + $0x21] ss:$4 sm:$0xff] %v1447_v19  ;;  %v10112_v19 = vld [vmem:[%s13930_s1 + $0xf0] sm:$0xff] }
 0x19d   : > { %1554 = vst [vmem:[#allocation1 + $0x22] ss:$4 sm:$0xff] %v1448_v21  ;;  %v1369_v21 = vld [vmem:[#allocation2 + $0xe2] sm:$0xff]  ;;  %2183 = vmatpush.bf16.msra.mxu3 %v10112_v19 }
 0x19e   : > { %1555 = vst [vmem:[#allocation1 + $0x23] ss:$4 sm:$0xff] %v1364_v30  ;;  %v1458_v27 = vrot.slane %v1369_v21, 2 }
 0x1a1   : > { %v10847_v46 = vld.sshfl [vmem:[#allocation1] sm:$0xff pattern:$0x73625140]  ;;  %2184 = vmatpush.bf16.msra.mxu3 %v10111_v9  ;;  %v1822_v9 = vld [vmem:[#allocation2 + $0x30] sm:$0xff] }
 0x1a2   : > { %1548 = vst [vmem:[#allocation1] ss:$4 sm:$0xff] %v1443_v36  ;;  %v1459_v36 = vrot.slane %v1369_v21, 4 }
 0x1a3   : > { %1549 = vst [vmem:[#allocation1 + $0x1] ss:$4 sm:$0xff] %v1444_v39  ;;  %v10110_v39 = vld [vmem:[%s13930_s1 + $0xe0] sm:$0xff] }
 0x1a4   : > { %1550 = vst [vmem:[#allocation1 + $0x2] ss:$4 sm:$0xff] %v1445_v45 }
 0x1a5   : > { %1551 = vst [vmem:[#allocation1 + $0x3] ss:$4 sm:$0xff] %v1363_v48  ;;  %v10849_v63 = vld.sshfl [vmem:[#allocation1 + $0x20] sm:$0xff pattern:$0x73625140]  ;;  %2185 = vmatpush.bf16.msra.mxu3 %v10110_v39  ;;  %v1887_v39 = vrot.slane %v1822_v9, 6 }
 0x1a6   : > { %1562 = vst [vmem:[#allocation1 + $0x20] ss:$4 sm:$0xff] %v1366_v41  ;;  %v1368_v48 = vld [vmem:[#allocation2 + $0xda] sm:$0xff] }
 0x1a7   : > { %1563 = vst [vmem:[#allocation1 + $0x21] ss:$4 sm:$0xff] %v1452_v32  ;;  %v1457_v17 = vrot.slane %v1368_v48, 6  ;;  %v1455_v41 = vrot.slane %v1368_v48, 2  ;;  %v1456_v32 = vrot.slane %v1368_v48, 4 }
 0x1a8   : > { %1564 = vst [vmem:[#allocation1 + $0x22] ss:$4 sm:$0xff] %v1453_v37 }
 0x1a9   : > { %1565 = vst [vmem:[#allocation1 + $0x23] ss:$4 sm:$0xff] %v1454_v54  ;;  %v1820_v54 = vld [vmem:[#allocation2 + $0x20] sm:$0xff] }
 0x1aa   : > { %v1882_v8 = vrot.slane %v1820_v54, 2  ;;  %v1884_v19 = vrot.slane %v1820_v54, 6 }
 0x1ac   : > { %v10856_v10 = vld.sshfl [vmem:[#allocation1] sm:$0xff pattern:$0x73625140] }
 0x1ad   : > { %1558 = vst [vmem:[#allocation1] ss:$4 sm:$0xff] %v1365_v3  ;;  %v759_v3 = vpop.f32.mrf.mxu0 }
 0x1ae   : > { %1559 = vst [vmem:[#allocation1 + $0x1] ss:$4 sm:$0xff] %v1449_v56  ;;  %v10109_v56 = vld [vmem:[%s13930_s1 + $0xd8] sm:$0xff] }
 0x1af   : > { %1560 = vst [vmem:[#allocation1 + $0x2] ss:$4 sm:$0xff] %v1450_v60  ;;  %v659_v60 = vpack.c.bf16 %v10737_v24, %v10735_v20  ;;  %2186 = vmatpush.bf16.msra.mxu3 %v10109_v56  ;;  %v10107_v20 = vld [vmem:[%s13930_s1 + $0xc8] sm:$0xff] }
 0x1b0   : > { %1561 = vst [vmem:[#allocation1 + $0x3] ss:$4 sm:$0xff] %v1451_v43  ;;  %v1567_v30 = vld.sshfl [vmem:[#allocation1 + $0x20] sm:$0xff pattern:$0x73625140]  ;;  %v10542_v43 = vmov 0.0  }
 0x1b1   : > { %1572 = vst [vmem:[#allocation1 + $0x20] ss:$4 sm:$0xff] %v1457_v17  ;;  %v1883_v17 = vrot.slane %v1820_v54, 4  ;;  %798 = vmatmul.bf16.gmra.mxu0 %v659_v60  ;;  %v660_v60 = vpack.c.bf16 %v10741_v35, %v10739_v29  ;;  %v1821_v29 = vld [vmem:[#allocation2 + $0x28] sm:$0x3]  ;;  %v1885_v35 = vrot.slane %v1822_v9, 2 }
 0x1b2   : > { %1573 = vst [vmem:[#allocation1 + $0x21] ss:$4 sm:$0xff] %v1369_v21 }
 0x1b3   : > { %1574 = vst [vmem:[#allocation1 + $0x22] ss:$4 sm:$0xff] %v1458_v27  ;;  %v1460_v27 = vrot.slane %v1369_v21, 6  ;;  %v10106_v21 = vld [vmem:[%s13930_s1 + $0xc0] sm:$0xff] }
 0x1b4   : > { %1575 = vst [vmem:[#allocation1 + $0x23] ss:$4 sm:$0xff] %v1459_v36 }
 0x1b5   : > { %387 = vst [vmem:[#allocation3 + $0x8] sm:$0xf] %v10542_v43  ;;  %v761_v36 = vpop.f32.mrf.mxu0 }
 0x1b6   : > { %841 = vst [vmem:[#allocation3 + $0xb0] sm:$0xff] %v759_v3 }
 0x1b7   : > { %v1566_v45 = vld.sshfl [vmem:[#allocation1] sm:$0xff pattern:$0x73625140]  ;;  %842 = vst [vmem:[#allocation3] sm:$0xff] %v761_v36 }
 0x1b8   : > { %v1613_v37 = vpack.c.bf16 %v1567_v30, %v1566_v45  ;;  %1568 = vst [vmem:[#allocation1] ss:$4 sm:$0xff] %v1367_v13  ;;  %v1370_v30 = vld [vmem:[#allocation2 + $0xea] sm:$0x3]  ;;  %v10878_v13 = vld [vmem:[#allocation2 + $0x38] sm:$0xff] }
 0x1b9   : > { %1569 = vst [vmem:[#allocation1 + $0x1] ss:$4 sm:$0xff] %v1368_v48  ;;  %v10108_v48 = vld [vmem:[%s13930_s1 + $0xd0] sm:$0xff]  ;;  %v1819_v45 = vld [vmem:[#allocation2 + $0x18] sm:$0xff] }
 0x1ba   : > { %1757 = vmatmul.bf16.vlgmr.msrb.gmra.mxu3 %v1613_v37  ;;  %1570 = vst [vmem:[#allocation1 + $0x2] ss:$4 sm:$0xff] %v1455_v41  ;;  %v1880_v3 = vrot.slane %v1819_v45, 4  ;;  %v1881_v43 = vrot.slane %v1819_v45, 6 }
 0x1bb   : > { %1571 = vst [vmem:[#allocation1 + $0x3] ss:$4 sm:$0xff] %v1456_v32  ;;  %v1577_v2 = vld.sshfl [vmem:[#allocation1 + $0x20] sm:$0xff pattern:$0x73625140]  ;;  %2187 = vmatpush.bf16.msra.mxu3 %v10108_v48  ;;  %v1888_v32 = vrot.slane %v10878_v13, 2 }
 0x1bc   : > { %1947 = vst [vmem:[#allocation1 + $0x20] ss:$4 sm:$0xff] %v1820_v54  ;;  %v1879_v54 = vrot.slane %v1819_v45, 2 }
 0x1bd   : > { %1949 = vst [vmem:[#allocation1 + $0x21] ss:$4 sm:$0xff] %v1882_v8  ;;  %v764_v56 = vpop.f32.mrf.mxu0  ;;  %v1127_v8 = vpack.c.bf16 %v10749_v59, %v10751_v0 }
 0x1be   : > { %1951 = vst [vmem:[#allocation1 + $0x22] ss:$4 sm:$0xff] %v1883_v17  ;;  %v1889_v17 = vrot.slane %v10878_v13, 4 }
 0x1bf   : > { %1953 = vst [vmem:[#allocation1 + $0x23] ss:$4 sm:$0xff] %v1884_v19  ;;  %2188 = vmatpush.bf16.msra.mxu3 %v10107_v20  ;;  %1235 = vmatmul.bf16.vlgmr.msra.gmra.mxu1 %v1127_v8  ;;  %v1886_v19 = vrot.slane %v1822_v9, 4 }
 0x1c0   : > { %843 = vst [vmem:[#allocation3 + $0x10] sm:$0xff] %v764_v56  ;;  %v1828_v56 = vld [vmem:[#allocation2 + $0x60] sm:$0xff] }
 0x1c1   : > { %803 = vmatmul.bf16.gmra.mxu0 %v660_v60  ;;  %v1897_v60 = vrot.slane %v1828_v56, 2  ;;  %v1898_v8 = vrot.slane %v1828_v56, 4 }
 0x1c2   : > { %v1576_v24 = vld.sshfl [vmem:[#allocation1] sm:$0xff pattern:$0x73625140] }
 0x1c3   : > { %1578 = vst [vmem:[#allocation1] ss:$4 sm:$0xff] %v1460_v27  ;;  %v1614_v41 = vpack.c.bf16 %v1577_v2, %v1576_v24  ;;  %2189 = vmatpush.bf16.msra.mxu3 %v10106_v21  ;;  %v1825_v27 = vld [vmem:[#allocation2 + $0x48] sm:$0xff] }
 0x1c4   : > { %1579 = vst [vmem:[#allocation1 + $0x1] ss:$4 sm:$0xff] %v1370_v30  ;;  %v1826_v30 = vld [vmem:[#allocation2 + $0x50] sm:$0xff]  ;;  %v1892_v20 = vrot.slane %v1825_v27, 4  ;;  %v1893_v36 = vrot.slane %v1825_v27, 6 }
 0x1c5   : > { %v766_v48 = vpop.f32.mrf.mxu0 }
 0x1c6   : > { %v10884_v37 = vld.sshfl [vmem:[#allocation1 + $0x20] sm:$0xff pattern:$0x73625140]  ;;  %844 = vst [vmem:[#allocation3 + $0x48] sm:$0xff] %v766_v48  ;;  %v1895_v48 = vrot.slane %v1826_v30, 4 }
 0x1c7   : > { %1960 = vst [vmem:[#allocation1 + $0x20] ss:$4 sm:$0xff] %v1887_v39  ;;  %v661_v39 = vpack.c.bf16 %v10745_v44, %v10743_v40  ;;  %v1890_v40 = vrot.slane %v10878_v13, 6  ;;  %v10119_v44 = vld [vmem:[%s13930_s1 + $0x128] sm:$0xff] }
 0x1c8   : > { %1961 = vst [vmem:[#allocation1 + $0x21] ss:$4 sm:$0xff] %v10878_v13  ;;  %v1899_v13 = vrot.slane %v1828_v56, 6 }
 0x1c9   : > { %1962 = vst [vmem:[#allocation1 + $0x22] ss:$4 sm:$0xff] %v1888_v32  ;;  %v1894_v32 = vrot.slane %v1826_v30, 2 }
 0x1ca   : > { %1762 = vmatmul.bf16.gmra.mxu3 %v1614_v41  ;;  %1963 = vst [vmem:[#allocation1 + $0x23] ss:$4 sm:$0xff] %v1889_v17  ;;  %v1128_v41 = vpack.c.bf16 %v10753_v7, %v10755_v12  ;;  %v1824_v7 = vld [vmem:[#allocation2 + $0x40] sm:$0x3]  ;;  %v1829_v17 = vld [vmem:[#allocation2 + $0x68] sm:$0xff] }
 0x1cb   : > { %v1580_v2 = vld.sshfl [vmem:[#allocation1] sm:$0xff pattern:$0x73625140] }
 0x1cc   : > { %1939 = vst [vmem:[#allocation1] ss:$4 sm:$0xff] %v1819_v45  ;;  %v1615_v59 = vpack.c.bf16 %v1580_v2, %v1580_v2  ;;  %v10121_v45 = vld [vmem:[%s13930_s1 + $0x138] sm:$0xff] }
 0x1cd   : > { %1941 = vst [vmem:[#allocation1 + $0x1] ss:$4 sm:$0xff] %v1879_v54  ;;  %v769_v21 = vpop.f32.mrf.mxu0  ;;  %2659 = vmatpush.bf16.msrb.mxu0 %v10121_v45  ;;  %v1900_v45 = vrot.slane %v1829_v17, 2 }
 0x1ce   : > { %1943 = vst [vmem:[#allocation1 + $0x2] ss:$4 sm:$0xff] %v1880_v3  ;;  %v1891_v3 = vrot.slane %v1825_v27, 2 }
 0x1cf   : > { %1945 = vst [vmem:[#allocation1 + $0x3] ss:$4 sm:$0xff] %v1881_v43  ;;  %1240 = vmatmul.bf16.gmra.mxu1 %v1128_v41  ;;  %v10115_v41 = vld [vmem:[%s13930_s1 + $0x108] sm:$0xff] }
 0x1d0   : > { %845 = vst [vmem:[#allocation3 + $0x60] sm:$0xff] %v769_v21 }
 0x1d1   : > { %v10892_v24 = vld.sshfl [vmem:[#allocation1 + $0x20] sm:$0xff pattern:$0x73625140]  ;;  %808 = vmatmul.bf16.gmra.mxu0 %v661_v39 }
 0x1d2   : > { %1970 = vst [vmem:[#allocation1 + $0x20] ss:$4 sm:$0xff] %v1892_v20 }
 0x1d3   : > { %1971 = vst [vmem:[#allocation1 + $0x21] ss:$4 sm:$0xff] %v1893_v36  ;;  %v1831_v36 = vld [vmem:[#allocation2 + $0x78] sm:$0xff] }
 0x1d4   : > { %1972 = vst [vmem:[#allocation1 + $0x22] ss:$4 sm:$0xff] %v1826_v30  ;;  %v1904_v21 = vrot.slane %v1831_v36, 4  ;;  %v1905_v39 = vrot.slane %v1831_v36, 6 }
 0x1d5   : > { %1973 = vst [vmem:[#allocation1 + $0x23] ss:$4 sm:$0xff] %v1894_v32  ;;  %v771_v54 = vpop.f32.mrf.mxu0 }
 0x1d6   : > { %v1954_v0 = vld.sshfl [vmem:[#allocation1] sm:$0xff pattern:$0x73625140]  ;;  %846 = vst [vmem:[#allocation3 + $0x28] sm:$0xff] %v771_v54 }
 0x1d7   : > { %1956 = vst [vmem:[#allocation1] ss:$4 sm:$0xff] %v1821_v29  ;;  %v2082_v2 = vpack.c.bf16 %v10884_v37, %v1954_v0  ;;  %v1129_v37 = vpack.c.bf16 %v10757_v18, %v10759_v25  ;;  %v1896_v0 = vrot.slane %v1826_v30, 6  ;;  %v1903_v18 = vrot.slane %v1831_v36, 2  ;;  %v10114_v54 = vld [vmem:[%s13930_s1 + $0x100] sm:$0xff] }
 0x1d8   : > { %1957 = vst [vmem:[#allocation1 + $0x1] ss:$4 sm:$0xff] %v1822_v9  ;;  %v10120_v9 = vld [vmem:[%s13930_s1 + $0x130] sm:$0xff] }
 0x1d9   : > { %1958 = vst [vmem:[#allocation1 + $0x2] ss:$4 sm:$0xff] %v1885_v35  ;;  %2660 = vmatpush.bf16.msrb.mxu0 %v10120_v9  ;;  %v10118_v35 = vld [vmem:[%s13930_s1 + $0x120] sm:$0xff]  ;;  %v1901_v9 = vrot.slane %v1829_v17, 4 }
 0x1da   : > { %1767 = vmatmul.bf16.gmra.mxu3 %v1615_v59  ;;  %1959 = vst [vmem:[#allocation1 + $0x3] ss:$4 sm:$0xff] %v1886_v19  ;;  %v662_v59 = vpack.c.bf16 %v10747_v50, %v10747_v50  ;;  %v10117_v19 = vld [vmem:[%s13930_s1 + $0x118] sm:$0xff]  ;;  %v10116_v50 = vld [vmem:[%s13930_s1 + $0x110] sm:$0xff] }
 0x1dc   : > { %v10909_v43 = vld.sshfl [vmem:[#allocation1 + $0x20] sm:$0xff pattern:$0x73625140] }
 0x1dd   : > { %2661 = vmatpush.bf16.msrb.mxu0 %v10119_v44  ;;  %1980 = vst [vmem:[#allocation1 + $0x20] ss:$4 sm:$0xff] %v1897_v60  ;;  %v774_v29 = vpop.f32.mrf.mxu0  ;;  %v1832_v60 = vld [vmem:[#allocation2 + $0x80] sm:$0xff] }
 0x1de   : > { %1981 = vst [vmem:[#allocation1 + $0x21] ss:$4 sm:$0xff] %v1898_v8 }
 0x1df   : > { %1982 = vst [vmem:[#allocation1 + $0x22] ss:$4 sm:$0xff] %v1899_v13  ;;  %1245 = vmatmul.bf16.gmra.mxu1 %v1129_v37 }
 0x1e0   : > { %1983 = vst [vmem:[#allocation1 + $0x23] ss:$4 sm:$0xff] %v1829_v17 }
 0x1e1   : > { %v1964_v12 = vld.sshfl [vmem:[#allocation1] sm:$0xff pattern:$0x73625140]  ;;  %2662 = vmatpush.bf16.msrb.mxu0 %v10118_v35  ;;  %847 = vst [vmem:[#allocation3 + $0x40] sm:$0xff] %v774_v29  ;;  %v1908_v29 = vrot.slane %v1832_v60, 6 }
 0x1e2   : > { %1966 = vst [vmem:[#allocation1] ss:$4 sm:$0xff] %v1890_v40  ;;  %813 = vmatmul.bf16.gmra.mxu0 %v662_v59  ;;  %v2083_v32 = vpack.c.bf16 %v10892_v24, %v1964_v12  ;;  %v1902_v40 = vrot.slane %v1829_v17, 6  ;;  %v1834_v24 = vld [vmem:[#allocation2 + $0x90] sm:$0xff]  ;;  %v1833_v12 = vld [vmem:[#allocation2 + $0x88] sm:$0x3] }
 0x1e3   : > { %1967 = vst [vmem:[#allocation1 + $0x1] ss:$4 sm:$0xff] %v1824_v7  ;;  %v1909_v8 = vrot.slane %v1834_v24, 2  ;;  %v1910_v13 = vrot.slane %v1834_v24, 4  ;;  %v1906_v17 = vrot.slane %v1832_v60, 2  ;;  %v1835_v35 = vld [vmem:[#allocation2 + $0x98] sm:$0xff] }
 0x1e4   : > { %1968 = vst [vmem:[#allocation1 + $0x2] ss:$4 sm:$0xff] %v1825_v27  ;;  %v1827_v27 = vld [vmem:[#allocation2 + $0x58] sm:$0x3]  ;;  %v1837_v59 = vld [vmem:[#allocation2 + $0xa8] sm:$0xff]  ;;  %v1914_v37 = vrot.slane %v1835_v35, 6 }
 0x1e5   : > { %1969 = vst [vmem:[#allocation1 + $0x3] ss:$4 sm:$0xff] %v1891_v3  ;;  %2663 = vmatpush.bf16.msrb.mxu0 %v10117_v19  ;;  %v776_v30 = vpop.f32.mrf.mxu0  ;;  %v1130_v3 = vpack.c.bf16 %v10761_v31, %v10763_v38  ;;  %v1915_v19 = vrot.slane %v1837_v59, 2 }
 0x1e6   : > { %848 = vst [vmem:[#allocation3 + $0x78] sm:$0xff] %v776_v30 }
 0x1e7   : > { %v10924_v25 = vld.sshfl [vmem:[#allocation1 + $0x20] sm:$0xff pattern:$0x73625140] }
 0x1e8   : > { %1990 = vst [vmem:[#allocation1 + $0x20] ss:$4 sm:$0xff] %v1831_v36  ;;  %v1911_v36 = vrot.slane %v1834_v24, 6 }
 0x1e9   : > { %2664 = vmatpush.bf16.msrb.mxu0 %v10116_v50  ;;  %1991 = vst [vmem:[#allocation1 + $0x21] ss:$4 sm:$0xff] %v1903_v18  ;;  %v1912_v50 = vrot.slane %v1835_v35, 2  ;;  %v1913_v18 = vrot.slane %v1835_v35, 4 }
 0x1ea   : > { %2190 = vmatmul.bf16.vlgmr.msra.gmra.mxu3 %v2082_v2  ;;  %1992 = vst [vmem:[#allocation1 + $0x22] ss:$4 sm:$0xff] %v1904_v21 }
 0x1eb   : > { %1993 = vst [vmem:[#allocation1 + $0x23] ss:$4 sm:$0xff] %v1905_v39 }
 0x1ec   : > { %v1974_v20 = vld.sshfl [vmem:[#allocation1] sm:$0xff pattern:$0x73625140] }
 0x1ed   : > { %1976 = vst [vmem:[#allocation1] ss:$4 sm:$0xff] %v1895_v48  ;;  %2665 = vmatpush.bf16.msrb.mxu0 %v10115_v41  ;;  %v779_v7 = vpop.f32.mrf.mxu0  ;;  %v1907_v48 = vrot.slane %v1832_v60, 4  ;;  %v2084_v38 = vpack.c.bf16 %v10909_v43, %v1974_v20  ;;  %v1838_v43 = vld [vmem:[#allocation2 + $0xb0] sm:$0xff]  ;;  %v1839_v41 = vld [vmem:[#allocation2 + $0xb8] sm:$0x3] }
 0x1ee   : > { %1977 = vst [vmem:[#allocation1 + $0x1] ss:$4 sm:$0xff] %v1896_v0  ;;  %v1836_v0 = vld [vmem:[#allocation2 + $0xa0] sm:$0x3]  ;;  %v1919_v20 = vrot.slane %v1838_v43, 4  ;;  %v1920_v21 = vrot.slane %v1838_v43, 6 }
 0x1ef   : > { %1978 = vst [vmem:[#allocation1 + $0x2] ss:$4 sm:$0xff] %v1827_v27  ;;  %1250 = vmatmul.bf16.gmra.mxu1 %v1130_v3  ;;  %v1841_v3 = vld [vmem:[#allocation2 + $0xc8] sm:$0xff] }
 0x1f0   : > { %1979 = vst [vmem:[#allocation1 + $0x3] ss:$4 sm:$0xff] %v1828_v56  ;;  %v1830_v56 = vld [vmem:[#allocation2 + $0x70] sm:$0x3] }
 0x1f1   : > { %2666 = vmatpush.bf16.msrb.mxu0 %v10114_v54  ;;  %849 = vst [vmem:[#allocation3 + $0x88] sm:$0xff] %v779_v7  ;;  %v1918_v7 = vrot.slane %v1838_v43, 2 }
 0x1f2   : > { %v10935_v2 = vld.sshfl [vmem:[#allocation1 + $0x20] sm:$0xff pattern:$0x73625140] }
 0x1f3   : > { %2000 = vst [vmem:[#allocation1 + $0x20] ss:$4 sm:$0xff] %v1833_v12 }
 0x1f4   : > { %2001 = vst [vmem:[#allocation1 + $0x21] ss:$4 sm:$0xff] %v1834_v24  ;;  %v1926_v24 = vrot.slane %v1841_v3, 6 }
 0x1f5   : > { %2002 = vst [vmem:[#allocation1 + $0x22] ss:$4 sm:$0xff] %v1909_v8 }
 0x1f6   : > { %2003 = vst [vmem:[#allocation1 + $0x23] ss:$4 sm:$0xff] %v1910_v13 }
 0x1f7   : > { %v1984_v44 = vld.sshfl [vmem:[#allocation1] sm:$0xff pattern:$0x73625140] }
 0x1f8   : > { %1986 = vst [vmem:[#allocation1] ss:$4 sm:$0xff] %v1900_v45  ;;  %v2085_v39 = vpack.c.bf16 %v10924_v25, %v1984_v44  ;;  %v1924_v25 = vrot.slane %v1841_v3, 2  ;;  %v1925_v44 = vrot.slane %v1841_v3, 4 }
 0x1f9   : > { %1987 = vst [vmem:[#allocation1 + $0x1] ss:$4 sm:$0xff] %v1901_v9  ;;  %v1917_v9 = vrot.slane %v1837_v59, 6 }
 0x1fa   : > { %2195 = vmatmul.bf16.gmra.mxu3 %v2083_v32  ;;  %1988 = vst [vmem:[#allocation1 + $0x2] ss:$4 sm:$0xff] %v1902_v40  ;;  %v1916_v32 = vrot.slane %v1837_v59, 4  ;;  %v1840_v40 = vld [vmem:[#allocation2 + $0xc0] sm:$0xff] }
 0x1fb   : > { %1989 = vst [vmem:[#allocation1 + $0x3] ss:$4 sm:$0xff] %v1830_v56  ;;  %v10949_v56 = vpop.f32.mrf.mxu3  ;;  %v1921_v8 = vrot.slane %v1840_v40, 2  ;;  %v1922_v13 = vrot.slane %v1840_v40, 4 }
 0x1fd   : > { %v10940_v27 = vld.sshfl [vmem:[#allocation1 + $0x20] sm:$0xff pattern:$0x73625140] }
 0x1fe   : > { %2010 = vst [vmem:[#allocation1 + $0x20] ss:$4 sm:$0xff] %v1914_v37 }
 0x1ff   : > { %2011 = vst [vmem:[#allocation1 + $0x21] ss:$4 sm:$0xff] %v1836_v0 }
 0x200   : > { %2012 = vst [vmem:[#allocation1 + $0x22] ss:$4 sm:$0xff] %v1837_v59  ;;  %v1843_v59 = vld [vmem:[#allocation2 + $0xd8] sm:$0xff] }
 0x201   : > { %2013 = vst [vmem:[#allocation1 + $0x23] ss:$4 sm:$0xff] %v1915_v19 }
 0x202   : > { %v10937_v31 = vld.sshfl [vmem:[#allocation1] sm:$0xff pattern:$0x73625140] }
 0x203   : > { %1996 = vst [vmem:[#allocation1] ss:$4 sm:$0xff] %v1832_v60  ;;  %v1842_v60 = vld [vmem:[#allocation2 + $0xd0] sm:$0x3] }
 0x204   : > { %1997 = vst [vmem:[#allocation1 + $0x1] ss:$4 sm:$0xff] %v1906_v17  ;;  %v1923_v17 = vrot.slane %v1840_v40, 6 }
 0x205   : > { %1998 = vst [vmem:[#allocation1 + $0x2] ss:$4 sm:$0xff] %v1907_v48 }
 0x206   : > { %1999 = vst [vmem:[#allocation1 + $0x3] ss:$4 sm:$0xff] %v1908_v29  ;;  %v1844_v29 = vld [vmem:[#allocation2 + $0xe0] sm:$0xff] }
 0x207   : > { %v1931_v37 = vrot.slane %v1844_v29, 4  ;;  %v1932_v0 = vrot.slane %v1844_v29, 6 }
 0x208   : > { %v10945_v45 = vld.sshfl [vmem:[#allocation1 + $0x20] sm:$0xff pattern:$0x73625140] }
 0x209   : > { %2020 = vst [vmem:[#allocation1 + $0x20] ss:$4 sm:$0xff] %v1919_v20  ;;  %v1604_v20 = vpack.c.bf16 %v10815_v5, %v10817_v14 }
 0x20a   : > { %2200 = vmatmul.bf16.gmra.mxu3 %v2084_v38  ;;  %2021 = vst [vmem:[#allocation1 + $0x21] ss:$4 sm:$0xff] %v1920_v21  ;;  %v10955_v38 = vpop.f32.mrf.mxu3 }
 0x20b   : > { %2022 = vst [vmem:[#allocation1 + $0x22] ss:$4 sm:$0xff] %v1839_v41  ;;  %v1847_v41 = vld [vmem:[#allocation2 + $0xf8] sm:$0xff]  ;;  %1712 = vmatmul.bf16.vlgmr.msra.gmra.mxu2 %v1604_v20 }
 0x20c   : > { %2023 = vst [vmem:[#allocation1 + $0x23] ss:$4 sm:$0xff] %v1840_v40  ;;  %v1937_v40 = vrot.slane %v1847_v41, 4 }
 0x20d   : > { %v10942_v30 = vld.sshfl [vmem:[#allocation1] sm:$0xff pattern:$0x73625140] }
 0x20e   : > { %2006 = vst [vmem:[#allocation1] ss:$4 sm:$0xff] %v1911_v36  ;;  %v1927_v36 = vrot.slane %v1843_v59, 2 }
 0x20f   : > { %2007 = vst [vmem:[#allocation1 + $0x1] ss:$4 sm:$0xff] %v1835_v35  ;;  %v1930_v35 = vrot.slane %v1844_v29, 2 }
 0x210   : > { %2008 = vst [vmem:[#allocation1 + $0x2] ss:$4 sm:$0xff] %v1912_v50  ;;  %v1928_v50 = vrot.slane %v1843_v59, 4 }
 0x211   : > { %2009 = vst [vmem:[#allocation1 + $0x3] ss:$4 sm:$0xff] %v1913_v18  ;;  %v1929_v18 = vrot.slane %v1843_v59, 6 }
 0x212   : > { %v10963_v21 = vpop.f32.mrf.mxu3 }
 0x213   : > { %v10951_v12 = vld.sshfl [vmem:[#allocation1 + $0x20] sm:$0xff pattern:$0x73625140] }
 0x214   : > { %2030 = vst [vmem:[#allocation1 + $0x20] ss:$4 sm:$0xff] %v1924_v25 }
 0x215   : > { %2031 = vst [vmem:[#allocation1 + $0x21] ss:$4 sm:$0xff] %v1925_v44 }
 0x216   : > { %2032 = vst [vmem:[#allocation1 + $0x22] ss:$4 sm:$0xff] %v1926_v24  ;;  %v2297_v24 = vld [vmem:[#allocation2 + $0x21] sm:$0xff] }
 0x217   : > { %2033 = vst [vmem:[#allocation1 + $0x23] ss:$4 sm:$0xff] %v1842_v60  ;;  %v10971_v60 = vpop.f32.mrf.mxu0 }
 0x218   : > { %v10947_v54 = vld.sshfl [vmem:[#allocation1] sm:$0xff pattern:$0x73625140]  ;;  %13937 = vst [vmem:[#allocation9_spill] sm:$0xff] %v10971_v60 }
 0x219   : > { %2016 = vst [vmem:[#allocation1] ss:$4 sm:$0xff] %v1916_v32 }
 0x21a   : > { %2205 = vmatmul.bf16.gmra.mxu3 %v2085_v39  ;;  %2017 = vst [vmem:[#allocation1 + $0x1] ss:$4 sm:$0xff] %v1917_v9  ;;  %v1846_v39 = vld [vmem:[#allocation2 + $0xf0] sm:$0xff]  ;;  %v1936_v9 = vrot.slane %v1847_v41, 2  ;;  %v10969_v14 = vpop.f32.mrf.mxu3 }
 0x21b   : > { %2018 = vst [vmem:[#allocation1 + $0x2] ss:$4 sm:$0xff] %v1838_v43  ;;  %v1935_v32 = vrot.slane %v1846_v39, 6  ;;  %v1933_v25 = vrot.slane %v1846_v39, 2  ;;  %v1934_v44 = vrot.slane %v1846_v39, 4 }
 0x21c   : > { %2019 = vst [vmem:[#allocation1 + $0x3] ss:$4 sm:$0xff] %v1918_v7 }
 0x21e   : > { %v10957_v19 = vld.sshfl [vmem:[#allocation1 + $0x20] sm:$0xff pattern:$0x73625140] }
 0x21f   : > { %2040 = vst [vmem:[#allocation1 + $0x20] ss:$4 sm:$0xff] %v1844_v29  ;;  %v2360_v29 = vrot.slane %v2297_v24, 4 }
 0x220   : > { %2041 = vst [vmem:[#allocation1 + $0x21] ss:$4 sm:$0xff] %v1930_v35 }
 0x221   : > { %2042 = vst [vmem:[#allocation1 + $0x22] ss:$4 sm:$0xff] %v1931_v37  ;;  %v1938_v37 = vrot.slane %v1847_v41, 6 }
 0x222   : > { %2043 = vst [vmem:[#allocation1 + $0x23] ss:$4 sm:$0xff] %v1932_v0  ;;  %v10979_v0 = vpop.f32.mrf.mxu3 }
 0x223   : > { %v10953_v48 = vld.sshfl [vmem:[#allocation1] sm:$0xff pattern:$0x73625140] }
 0x224   : > { %2026 = vst [vmem:[#allocation1] ss:$4 sm:$0xff] %v1921_v8  ;;  %v2086_v8 = vpack.c.bf16 %v10935_v2, %v10937_v31  ;;  %v1605_v2 = vpack.c.bf16 %v10819_v23, %v10821_v34  ;;  %v1848_v31 = vld [vmem:[#allocation2 + $0x100] sm:$0x3]  ;;  %v2087_v23 = vpack.c.bf16 %v10940_v27, %v10942_v30  ;;  %v1132_v34 = vpack.c.bf16 %v10769_v1, %v10771_v6  ;;  %v2298_v1 = vld [vmem:[#allocation2 + $0x29] sm:$0x3] }
 0x225   : > { %2027 = vst [vmem:[#allocation1 + $0x1] ss:$4 sm:$0xff] %v1922_v13  ;;  %v1131_v13 = vpack.c.bf16 %v10765_v49, %v10767_v55  ;;  %v10983_v49 = vpop.f32.mrf.mxu0  ;;  %v1606_v6 = vpack.c.bf16 %v10823_v53, %v10825_v47  ;;  %v2088_v53 = vpack.c.bf16 %v10945_v45, %v10947_v54  ;;  %v1133_v47 = vpack.c.bf16 %v10773_v15, %v10775_v22  ;;  %v2305_v45 = vld [vmem:[#allocation2 + $0x61] sm:$0xff] }
 0x226   : > { %2028 = vst [vmem:[#allocation1 + $0x2] ss:$4 sm:$0xff] %v1923_v17  ;;  %v2359_v17 = vrot.slane %v2297_v24, 2  ;;  %1717 = vmatmul.bf16.gmra.mxu2 %v1605_v2  ;;  %v2374_v15 = vrot.slane %v2305_v45, 2  ;;  %v2375_v22 = vrot.slane %v2305_v45, 4 }
 0x227   : > { %2029 = vst [vmem:[#allocation1 + $0x3] ss:$4 sm:$0xff] %v1841_v3  ;;  %v1845_v3 = vld [vmem:[#allocation2 + $0xe8] sm:$0x3]  ;;  %1255 = vmatmul.bf16.gmra.mxu1 %v1131_v13 }
 0x229   : > { %v10965_v7 = vld.sshfl [vmem:[#allocation1 + $0x20] sm:$0xff pattern:$0x73625140] }
 0x22a   : > { %2050 = vst [vmem:[#allocation1 + $0x20] ss:$4 sm:$0xff] %v1935_v32  ;;  %2210 = vmatmul.bf16.gmra.mxu3 %v2086_v8  ;;  %v1293_v20 = vpop.f32.mrf.mxu3  ;;  %v2300_v32 = vld [vmem:[#allocation2 + $0x39] sm:$0xff] }
 0x22b   : > { %2051 = vst [vmem:[#allocation1 + $0x21] ss:$4 sm:$0xff] %v1847_v41 }
 0x22c   : > { %2052 = vst [vmem:[#allocation1 + $0x22] ss:$4 sm:$0xff] %v1936_v9 }
 0x22d   : > { %2053 = vst [vmem:[#allocation1 + $0x23] ss:$4 sm:$0xff] %v1937_v40  ;;  %v786_v9 = vpop.f32.mrf.mxu0 }
 0x22e   : > { %v10959_v43 = vld.sshfl [vmem:[#allocation1] sm:$0xff pattern:$0x73625140]  ;;  %852 = vst [vmem:[#allocation3 + $0x98] sm:$0xff] %v786_v9 }
 0x22f   : > { %2036 = vst [vmem:[#allocation1] ss:$4 sm:$0xff] %v1843_v59  ;;  %v2361_v59 = vrot.slane %v2297_v24, 6 }
 0x230   : > { %2037 = vst [vmem:[#allocation1 + $0x1] ss:$4 sm:$0xff] %v1927_v36  ;;  %v2299_v36 = vld [vmem:[#allocation2 + $0x31] sm:$0xff] }
 0x231   : > { %2038 = vst [vmem:[#allocation1 + $0x2] ss:$4 sm:$0xff] %v1928_v50  ;;  %v2296_v50 = vld [vmem:[#allocation2 + $0x19] sm:$0xff]  ;;  %v2362_v30 = vrot.slane %v2299_v36, 2 }
 0x232   : > { %2039 = vst [vmem:[#allocation1 + $0x3] ss:$4 sm:$0xff] %v1929_v18  ;;  %v2364_v18 = vrot.slane %v2299_v36, 6  ;;  %v2357_v40 = vrot.slane %v2296_v50, 4 }
 0x234   : > { %v10977_v35 = vld.sshfl [vmem:[#allocation1 + $0x20] sm:$0xff pattern:$0x73625140] }
 0x235   : > { %2424 = vst [vmem:[#allocation1 + $0x20] ss:$4 sm:$0xff] %v2297_v24  ;;  %v2366_v24 = vrot.slane %v2300_v32, 4  ;;  %v789_v27 = vpop.f32.mrf.mxu0 }
 0x236   : > { %2426 = vst [vmem:[#allocation1 + $0x21] ss:$4 sm:$0xff] %v2359_v17  ;;  %v2363_v17 = vrot.slane %v2299_v36, 4  ;;  %1722 = vmatmul.bf16.gmra.mxu2 %v1606_v6 }
 0x237   : > { %2428 = vst [vmem:[#allocation1 + $0x22] ss:$4 sm:$0xff] %v2360_v29  ;;  %1260 = vmatmul.bf16.gmra.mxu1 %v1132_v34  ;;  %v2302_v29 = vld [vmem:[#allocation2 + $0x49] sm:$0xff] }
 0x238   : > { %2430 = vst [vmem:[#allocation1 + $0x23] ss:$4 sm:$0xff] %v2361_v59  ;;  %v2369_v2 = vrot.slane %v2302_v29, 4 }
 0x239   : > { %v10967_v5 = vld.sshfl [vmem:[#allocation1] sm:$0xff pattern:$0x73625140]  ;;  %853 = vst [vmem:[#allocation3 + $0x38] sm:$0xff] %v789_v27  ;;  %v2306_v27 = vld [vmem:[#allocation2 + $0x69] sm:$0xff] }
 0x23a   : > { %2046 = vst [vmem:[#allocation1] ss:$4 sm:$0xff] %v1845_v3  ;;  %2215 = vmatmul.bf16.gmra.mxu3 %v2087_v23  ;;  %v2368_v23 = vrot.slane %v2302_v29, 2 }
 0x23b   : > { %2047 = vst [vmem:[#allocation1 + $0x1] ss:$4 sm:$0xff] %v1846_v39  ;;  %v2356_v39 = vrot.slane %v2296_v50, 2 }
 0x23c   : > { %2048 = vst [vmem:[#allocation1 + $0x2] ss:$4 sm:$0xff] %v1933_v25  ;;  %v2358_v25 = vrot.slane %v2296_v50, 6 }
 0x23d   : > { %2049 = vst [vmem:[#allocation1 + $0x3] ss:$4 sm:$0xff] %v1934_v44  ;;  %v2365_v44 = vrot.slane %v2300_v32, 2  ;;  %v10993_v8 = vpop.f32.mrf.mxu3 }
 0x23f   : > { %v2432_v41 = vld.sshfl [vmem:[#allocation1 + $0x20] sm:$0xff pattern:$0x73625140] }
 0x240   : > { %2437 = vst [vmem:[#allocation1 + $0x20] ss:$4 sm:$0xff] %v2364_v18  ;;  %v791_v18 = vpop.f32.mrf.mxu0 }
 0x241   : > { %2438 = vst [vmem:[#allocation1 + $0x21] ss:$4 sm:$0xff] %v2300_v32 }
 0x242   : > { %2439 = vst [vmem:[#allocation1 + $0x22] ss:$4 sm:$0xff] %v2365_v44  ;;  %v2376_v44 = vrot.slane %v2305_v45, 6 }
 0x243   : > { %2440 = vst [vmem:[#allocation1 + $0x23] ss:$4 sm:$0xff] %v2366_v24 }
 0x244   : > { %v10985_v55 = vld.sshfl [vmem:[#allocation1] sm:$0xff pattern:$0x73625140]  ;;  %854 = vst [vmem:[#allocation3 + $0x50] sm:$0xff] %v791_v18  ;;  %v2379_v18 = vrot.slane %v2306_v27, 6 }
 0x245   : > { %2056 = vst [vmem:[#allocation1] ss:$4 sm:$0xff] %v1938_v37  ;;  %v2303_v37 = vld [vmem:[#allocation2 + $0x51] sm:$0xff]  ;;  %v10997_v20 = vpop.f32.mrf.mxu3 }
 0x246   : > { %2057 = vst [vmem:[#allocation1 + $0x1] ss:$4 sm:$0xff] %v1848_v31  ;;  %v2372_v24 = vrot.slane %v2303_v37, 4 }
 0x247   : > { %13938 = vst [vmem:[#allocation10_spill] sm:$0xff] %v10997_v20  ;;  %1265 = vmatmul.bf16.gmra.mxu1 %v1133_v47  ;;  %v2307_v47 = vld [vmem:[#allocation2 + $0x71] sm:$0x3] }
 0x248   : > { %v794_v34 = vpop.f32.mrf.mxu0 }
 0x249   : > { %855 = vst [vmem:[#allocation3 + $0x70] sm:$0xff] %v794_v34  ;;  %v1135_v34 = vpack.c.bf16 %v10783_v51, %v10790_v61  ;;  %v10127_v51 = vld [vmem:[%s13930_s1 + $0x168] sm:$0xff] }
 0x24a   : > { %v2442_v31 = vld.sshfl [vmem:[#allocation1 + $0x20] sm:$0xff pattern:$0x73625140]  ;;  %2220 = vmatmul.bf16.gmra.mxu3 %v2088_v53 }
 0x24b   : > { %2447 = vst [vmem:[#allocation1 + $0x20] ss:$4 sm:$0xff] %v2369_v2 }
 0x24c   : > { %2449 = vst [vmem:[#allocation1 + $0x22] ss:$4 sm:$0xff] %v2303_v37 }
 0x24d   : > { %v10991_v3 = vld.sshfl [vmem:[#allocation1] sm:$0xff pattern:$0x73625140] }
 0x24e   : > { %2416 = vst [vmem:[#allocation1] ss:$4 sm:$0xff] %v2296_v50  ;;  %v2370_v50 = vrot.slane %v2302_v29, 6 }
 0x24f   : > { %2418 = vst [vmem:[#allocation1 + $0x1] ss:$4 sm:$0xff] %v2356_v39  ;;  %v2371_v39 = vrot.slane %v2303_v37, 2 }
 0x250   : > { %2420 = vst [vmem:[#allocation1 + $0x2] ss:$4 sm:$0xff] %v2357_v40  ;;  %v11003_v40 = vpop.f32.mrf.mxu3 }
 0x251   : > { %2422 = vst [vmem:[#allocation1 + $0x3] ss:$4 sm:$0xff] %v2358_v25 }
 0x252   : > { %2448 = vst [vmem:[#allocation1 + $0x21] ss:$4 sm:$0xff] %v2370_v50  ;;  %v2378_v50 = vrot.slane %v2306_v27, 4 }
 0x253   : > { %2450 = vst [vmem:[#allocation1 + $0x23] ss:$4 sm:$0xff] %v2371_v39  ;;  %v10129_v39 = vld [vmem:[%s13930_s1 + $0x178] sm:$0xff] }
 0x254   : > { %3136 = vmatpush.bf16.msrb.mxu1 %v10129_v39 }
 0x258   : > { %v2431_v13 = vld.sshfl [vmem:[#allocation1] sm:$0xff pattern:$0x73625140]  ;;  %v11007_v6 = vpop.f32.mrf.mxu3 }
 0x259   : > { %v2559_v59 = vpack.c.bf16 %v2432_v41, %v2431_v13  ;;  %2433 = vst [vmem:[#allocation1] ss:$4 sm:$0xff] %v2298_v1  ;;  %v2301_v41 = vld [vmem:[#allocation2 + $0x41] sm:$0x3]  ;;  %v796_v1 = vpop.f32.mrf.mxu0  ;;  %v1134_v13 = vpack.c.bf16 %v10779_v33, %v10781_v42 }
 0x25a   : > { %2434 = vst [vmem:[#allocation1 + $0x1] ss:$4 sm:$0xff] %v2299_v36  ;;  %v2367_v36 = vrot.slane %v2300_v32, 6  ;;  %v2452_v25 = vld.sshfl [vmem:[#allocation1 + $0x20] sm:$0xff pattern:$0x73625140]  ;;  %v1607_v32 = vpack.c.bf16 %v10827_v57, %v10829_v4 }
 0x25b   : > { %2667 = vmatmul.bf16.vlgmr.msrb.gmra.mxu0 %v2559_v59  ;;  %2435 = vst [vmem:[#allocation1 + $0x2] ss:$4 sm:$0xff] %v2362_v30  ;;  %v2089_v30 = vpack.c.bf16 %v10951_v12, %v10953_v48  ;;  %1270 = vmatmul.bf16.gmra.mxu1 %v1134_v13  ;;  %v2308_v4 = vld [vmem:[#allocation2 + $0x79] sm:$0xff]  ;;  %v2314_v13 = vld [vmem:[#allocation2 + $0xa9] sm:$0xff] }
 0x25c   : > { %2436 = vst [vmem:[#allocation1 + $0x3] ss:$4 sm:$0xff] %v2363_v17  ;;  %v2373_v17 = vrot.slane %v2303_v37, 6  ;;  %1727 = vmatmul.bf16.gmra.mxu2 %v1607_v32  ;;  %v2380_v59 = vrot.slane %v2308_v4, 2  ;;  %v2381_v33 = vrot.slane %v2308_v4, 4  ;;  %v2382_v42 = vrot.slane %v2308_v4, 6 }
 0x25d   : > { %2457 = vst [vmem:[#allocation1 + $0x20] ss:$4 sm:$0xff] %v2374_v15  ;;  %2225 = vmatmul.bf16.gmra.mxu3 %v2089_v30  ;;  %v2377_v37 = vrot.slane %v2306_v27, 2  ;;  %v10128_v15 = vld [vmem:[%s13930_s1 + $0x170] sm:$0xff]  ;;  %v10126_v32 = vld [vmem:[%s13930_s1 + $0x160] sm:$0xff] }
 0x25e   : > { %2458 = vst [vmem:[#allocation1 + $0x21] ss:$4 sm:$0xff] %v2375_v22  ;;  %v2310_v22 = vld [vmem:[#allocation2 + $0x89] sm:$0x3]  ;;  %3137 = vmatpush.bf16.msrb.mxu1 %v10128_v15 }
 0x25f   : > { %2459 = vst [vmem:[#allocation1 + $0x22] ss:$4 sm:$0xff] %v2376_v44 }
 0x260   : > { %2460 = vst [vmem:[#allocation1 + $0x23] ss:$4 sm:$0xff] %v2306_v27  ;;  %v11015_v48 = vpop.f32.mrf.mxu3 }
 0x261   : > { %856 = vst [vmem:[#allocation3 + $0xa0] sm:$0xff] %v796_v1  ;;  %v799_v12 = vpop.f32.mrf.mxu0  ;;  %v2312_v1 = vld [vmem:[#allocation2 + $0x99] sm:$0xff] }
 0x262   : > { %857 = vst [vmem:[#allocation3 + $0xa8] sm:$0xff] %v799_v12  ;;  %3138 = vmatpush.bf16.msrb.mxu1 %v10127_v51  ;;  %v1609_v12 = vpack.c.bf16 %v10835_v58, %v10837_v52  ;;  %v2390_v58 = vrot.slane %v2312_v1, 4  ;;  %v10123_v52 = vld [vmem:[%s13930_s1 + $0x148] sm:$0xff]  ;;  %v2319_v51 = vld [vmem:[#allocation2 + $0xd1] sm:$0x3] }
 0x263   : > { %v2441_v9 = vld.sshfl [vmem:[#allocation1] sm:$0xff pattern:$0x73625140] }
 0x264   : > { %2443 = vst [vmem:[#allocation1] ss:$4 sm:$0xff] %v2367_v36  ;;  %v2560_v54 = vpack.c.bf16 %v2442_v31, %v2441_v9 }
 0x265   : > { %2444 = vst [vmem:[#allocation1 + $0x1] ss:$4 sm:$0xff] %v2301_v41  ;;  %v1608_v41 = vpack.c.bf16 %v10831_v16, %v10833_v28 }
 0x266   : > { %2445 = vst [vmem:[#allocation1 + $0x2] ss:$4 sm:$0xff] %v2302_v29  ;;  %v2304_v29 = vld [vmem:[#allocation2 + $0x59] sm:$0x3]  ;;  %3139 = vmatpush.bf16.msrb.mxu1 %v10126_v32 }
 0x267   : > { %2446 = vst [vmem:[#allocation1 + $0x3] ss:$4 sm:$0xff] %v2368_v23  ;;  %v11013_v2 = vld.sshfl [vmem:[#allocation1 + $0x20] sm:$0xff pattern:$0x73625140]  ;;  %v2090_v23 = vpack.c.bf16 %v10957_v19, %v10959_v43  ;;  %v2309_v19 = vld [vmem:[#allocation2 + $0x81] sm:$0xff] }
 0x268   : > { %2467 = vst [vmem:[#allocation1 + $0x20] ss:$4 sm:$0xff] %v2308_v4  ;;  %v1770_v9 = vpop.f32.mrf.mxu3  ;;  %v2383_v61 = vrot.slane %v2309_v19, 2  ;;  %v2392_v4 = vrot.slane %v2314_v13, 2 }
 0x269   : > { %2468 = vst [vmem:[#allocation1 + $0x21] ss:$4 sm:$0xff] %v2380_v59  ;;  %v801_v36 = vpop.f32.mrf.mxu0  ;;  %v10125_v59 = vld [vmem:[%s13930_s1 + $0x158] sm:$0xff]  ;;  %v2393_v9 = vrot.slane %v2314_v13, 4 }
 0x26a   : > { %2469 = vst [vmem:[#allocation1 + $0x22] ss:$4 sm:$0xff] %v2381_v33  ;;  %3140 = vmatpush.bf16.msrb.mxu1 %v10125_v59 }
 0x26b   : > { %2672 = vmatmul.bf16.gmra.mxu0 %v2560_v54  ;;  %2470 = vst [vmem:[#allocation1 + $0x23] ss:$4 sm:$0xff] %v2382_v42  ;;  %1275 = vmatmul.bf16.gmra.mxu1 %v1135_v34  ;;  %v10124_v42 = vld [vmem:[%s13930_s1 + $0x150] sm:$0xff]  ;;  %v2394_v34 = vrot.slane %v2314_v13, 6 }
 0x26c   : > { %1732 = vmatmul.bf16.gmra.mxu2 %v1608_v41  ;;  %858 = vst [vmem:[#allocation3 + $0x68] sm:$0xff] %v801_v36  ;;  %v2316_v36 = vld [vmem:[#allocation2 + $0xb9] sm:$0x3] }
 0x26d   : > { %2230 = vmatmul.bf16.gmra.mxu3 %v2090_v23  ;;  %v2317_v23 = vld [vmem:[#allocation2 + $0xc1] sm:$0xff] }
 0x26e   : > { %v2451_v57 = vld.sshfl [vmem:[#allocation1] sm:$0xff pattern:$0x73625140]  ;;  %3141 = vmatpush.bf16.msrb.mxu1 %v10124_v42 }
 0x26f   : > { %2453 = vst [vmem:[#allocation1] ss:$4 sm:$0xff] %v2372_v24  ;;  %v2561_v31 = vpack.c.bf16 %v2452_v25, %v2451_v57  ;;  %v2384_v25 = vrot.slane %v2309_v19, 4  ;;  %v2385_v24 = vrot.slane %v2309_v19, 6  ;;  %v2324_v42 = vld [vmem:[#allocation2 + $0xf9] sm:$0xff] }
 0x270   : > { %2454 = vst [vmem:[#allocation1 + $0x1] ss:$4 sm:$0xff] %v2373_v17  ;;  %v2391_v17 = vrot.slane %v2312_v1, 6 }
 0x271   : > { %2455 = vst [vmem:[#allocation1 + $0x2] ss:$4 sm:$0xff] %v2304_v29  ;;  %v804_v54 = vpop.f32.mrf.mxu0  ;;  %v2313_v29 = vld [vmem:[#allocation2 + $0xa1] sm:$0x3] }
 0x272   : > { %2456 = vst [vmem:[#allocation1 + $0x3] ss:$4 sm:$0xff] %v2305_v45  ;;  %v2311_v45 = vld [vmem:[#allocation2 + $0x91] sm:$0xff]  ;;  %v1313_v27 = vadd.f32 %v10949_v56, %v804_v54  ;;  %3142 = vmatpush.bf16.msrb.mxu1 %v10123_v52  ;;  %v2399_v54 = vrot.slane %v2317_v23, 4  ;;  %v2414_v52 = vrot.slane %v2324_v42, 4 }
 0x273   : > { %v2386_v16 = vrot.slane %v2311_v45, 2  ;;  %v11029_v28 = vld.sshfl [vmem:[#allocation1 + $0x20] sm:$0xff pattern:$0x73625140]  ;;  %v2387_v43 = vrot.slane %v2311_v45, 4  ;;  %v2388_v33 = vrot.slane %v2311_v45, 6 }
 0x274   : > { %2477 = vst [vmem:[#allocation1 + $0x20] ss:$4 sm:$0xff] %v2310_v22  ;;  %v2318_v22 = vld [vmem:[#allocation2 + $0xc9] sm:$0xff] }
 0x275   : > { %2478 = vst [vmem:[#allocation1 + $0x21] ss:$4 sm:$0xff] %v2311_v45 }
 0x276   : > { %2479 = vst [vmem:[#allocation1 + $0x22] ss:$4 sm:$0xff] %v2386_v16  ;;  %v2402_v16 = vrot.slane %v2318_v22, 4 }
 0x277   : > { %2480 = vst [vmem:[#allocation1 + $0x23] ss:$4 sm:$0xff] %v2387_v43 }
 0x278   : > { %1336 = vst [vmem:[#allocation3 + $0x30] sm:$0xff] %v1313_v27  ;;  %v11069_v27 = vpop.f32.mrf.mxu3 }
 0x279   : > { %v2461_v53 = vld.sshfl [vmem:[#allocation1] sm:$0xff pattern:$0x73625140]  ;;  %v806_v56 = vpop.f32.mrf.mxu0 }
 0x27a   : > { %2463 = vst [vmem:[#allocation1] ss:$4 sm:$0xff] %v2377_v37  ;;  %v2562_v30 = vpack.c.bf16 %v11013_v2, %v2461_v53  ;;  %v2091_v2 = vpack.c.bf16 %v10965_v7, %v10967_v5  ;;  %v1314_v37 = vadd.f32 %v10955_v38, %v806_v56  ;;  %v2315_v7 = vld [vmem:[#allocation2 + $0xb1] sm:$0xff] }
 0x27b   : > { %2677 = vmatmul.bf16.gmra.mxu0 %v2561_v31  ;;  %2464 = vst [vmem:[#allocation1 + $0x1] ss:$4 sm:$0xff] %v2378_v50  ;;  %v2389_v31 = vrot.slane %v2312_v1, 2  ;;  %v2396_v5 = vrot.slane %v2315_v7, 4  ;;  %v2397_v53 = vrot.slane %v2315_v7, 6  ;;  %v10122_v38 = vld [vmem:[%s13930_s1 + $0x140] sm:$0xff] }
 0x27c   : > { %2465 = vst [vmem:[#allocation1 + $0x2] ss:$4 sm:$0xff] %v2379_v18  ;;  %1737 = vmatmul.bf16.gmra.mxu2 %v1609_v12  ;;  %3143 = vmatpush.bf16.msrb.mxu1 %v10122_v38  ;;  %v2395_v45 = vrot.slane %v2315_v7, 2 }
 0x27d   : > { %2466 = vst [vmem:[#allocation1 + $0x3] ss:$4 sm:$0xff] %v2307_v47  ;;  %2235 = vmatmul.bf16.gmra.mxu3 %v2091_v2 }
 0x27e   : > { %v11039_v57 = vld.sshfl [vmem:[#allocation1 + $0x20] sm:$0xff pattern:$0x73625140]  ;;  %1337 = vst [vmem:[#allocation3 + $0x58] sm:$0xff] %v1314_v37 }
 0x27f   : > { %2487 = vst [vmem:[#allocation1 + $0x20] ss:$4 sm:$0xff] %v2391_v17  ;;  %v2320_v17 = vld [vmem:[#allocation2 + $0xd9] sm:$0xff] }
 0x280   : > { %2488 = vst [vmem:[#allocation1 + $0x21] ss:$4 sm:$0xff] %v2313_v29  ;;  %v2404_v59 = vrot.slane %v2320_v17, 2  ;;  %v2406_v56 = vrot.slane %v2320_v17, 6  ;;  %v11077_v2 = vpop.f32.mrf.mxu3 }
 0x281   : > { %2489 = vst [vmem:[#allocation1 + $0x22] ss:$4 sm:$0xff] %v2314_v13  ;;  %v809_v18 = vpop.f32.mrf.mxu0 }
 0x282   : > { %2490 = vst [vmem:[#allocation1 + $0x23] ss:$4 sm:$0xff] %v2392_v4  ;;  %v1315_v39 = vadd.f32 %v10963_v21, %v809_v18  ;;  %v2401_v21 = vrot.slane %v2318_v22, 2  ;;  %v1610_v18 = vpack.c.bf16 %v10839_v62, %v10841_v11 }
 0x284   : > { %v2471_v44 = vld.sshfl [vmem:[#allocation1] sm:$0xff pattern:$0x73625140]  ;;  %1338 = vst [vmem:[#allocation3 + $0x80] sm:$0xff] %v1315_v39 }
 0x285   : > { %2473 = vst [vmem:[#allocation1] ss:$4 sm:$0xff] %v2309_v19  ;;  %v2563_v41 = vpack.c.bf16 %v11029_v28, %v2471_v44  ;;  %v11062_v19 = vpop.f32.mrf.mxu1  ;;  %v2403_v28 = vrot.slane %v2318_v22, 6 }
 0x286   : > { %2474 = vst [vmem:[#allocation1 + $0x1] ss:$4 sm:$0xff] %v2383_v61  ;;  %v2398_v61 = vrot.slane %v2317_v23, 2 }
 0x287   : > { %2475 = vst [vmem:[#allocation1 + $0x2] ss:$4 sm:$0xff] %v2384_v25  ;;  %v2400_v25 = vrot.slane %v2317_v23, 6 }
 0x288   : > { %2476 = vst [vmem:[#allocation1 + $0x3] ss:$4 sm:$0xff] %v2385_v24  ;;  %v2321_v24 = vld [vmem:[#allocation2 + $0xe1] sm:$0xff] }
 0x289   : > { %v11058_v47 = vld.sshfl [vmem:[#allocation1 + $0x20] sm:$0xff pattern:$0x73625140]  ;;  %v2408_v13 = vrot.slane %v2321_v24, 4  ;;  %v2409_v29 = vrot.slane %v2321_v24, 6 }
 0x28a   : > { %2497 = vst [vmem:[#allocation1 + $0x20] ss:$4 sm:$0xff] %v2396_v5  ;;  %v2322_v5 = vld [vmem:[#allocation2 + $0xe9] sm:$0x3] }
 0x28b   : > { %2682 = vmatmul.bf16.gmra.mxu0 %v2562_v30  ;;  %2498 = vst [vmem:[#allocation1 + $0x21] ss:$4 sm:$0xff] %v2397_v53  ;;  %v2407_v30 = vrot.slane %v2321_v24, 2 }
 0x28c   : > { %2499 = vst [vmem:[#allocation1 + $0x22] ss:$4 sm:$0xff] %v2316_v36  ;;  %1742 = vmatmul.bf16.gmra.mxu2 %v1610_v18  ;;  %v11088_v36 = vpop.f32.mrf.mxu3 }
 0x28d   : > { %2500 = vst [vmem:[#allocation1 + $0x23] ss:$4 sm:$0xff] %v2317_v23  ;;  %v2092_v23 = vpack.c.bf16 %v10977_v35, %v10985_v55 }
 0x28f   : > { %v2481_v50 = vld.sshfl [vmem:[#allocation1] sm:$0xff pattern:$0x73625140]  ;;  %2240 = vmatmul.bf16.gmra.mxu3 %v2092_v23  ;;  %v2779_v23 = vld [vmem:[#allocation2 + $0x4a] sm:$0xff] }
 0x290   : > { %2483 = vst [vmem:[#allocation1] ss:$4 sm:$0xff] %v2388_v33  ;;  %v2564_v32 = vpack.c.bf16 %v11039_v57, %v2481_v50  ;;  %v2405_v57 = vrot.slane %v2320_v17, 4  ;;  %v2323_v33 = vld [vmem:[#allocation2 + $0xf1] sm:$0xff]  ;;  %v2413_v50 = vrot.slane %v2324_v42, 2 }
 0x291   : > { %2484 = vst [vmem:[#allocation1 + $0x1] ss:$4 sm:$0xff] %v2312_v1  ;;  %v11071_v1 = vpop.f32.mrf.mxu1  ;;  %v2410_v53 = vrot.slane %v2323_v33, 2  ;;  %v2411_v38 = vrot.slane %v2323_v33, 4 }
 0x292   : > { %2485 = vst [vmem:[#allocation1 + $0x2] ss:$4 sm:$0xff] %v2389_v31  ;;  %v2412_v31 = vrot.slane %v2323_v33, 6 }
 0x293   : > { %2486 = vst [vmem:[#allocation1 + $0x3] ss:$4 sm:$0xff] %v2390_v58 }
 0x294   : > { %v11064_v43 = vld.sshfl [vmem:[#allocation1 + $0x20] sm:$0xff pattern:$0x73625140] }
 0x295   : > { %2507 = vst [vmem:[#allocation1 + $0x20] ss:$4 sm:$0xff] %v2401_v21  ;;  %v685_v21 = vld [vmem:[#allocation3 + $0x8] sm:$0xf] }
 0x296   : > { %2508 = vst [vmem:[#allocation1 + $0x21] ss:$4 sm:$0xff] %v2402_v16  ;;  %v2325_v16 = vld [vmem:[#allocation2 + $0x101] sm:$0x3] }
 0x297   : > { %2509 = vst [vmem:[#allocation1 + $0x22] ss:$4 sm:$0xff] %v2403_v28 }
 0x298   : > { %2510 = vst [vmem:[#allocation1 + $0x23] ss:$4 sm:$0xff] %v2319_v51 }
 0x299   : > { %v11079_v37 = vpop.f32.mrf.mxu1 }
 0x29a   : > { %v2491_v15 = vld.sshfl [vmem:[#allocation1] sm:$0xff pattern:$0x73625140] }
 0x29b   : > { %2687 = vmatmul.bf16.gmra.mxu0 %v2563_v41  ;;  %2493 = vst [vmem:[#allocation1] ss:$4 sm:$0xff] %v2393_v9  ;;  %v2565_v58 = vpack.c.bf16 %v11058_v47, %v2491_v15  ;;  %v2774_v47 = vld [vmem:[#allocation2 + $0x22] sm:$0xff]  ;;  %v811_v41 = vpop.f32.mrf.mxu0 }
 0x29c   : > { %2494 = vst [vmem:[#allocation1 + $0x1] ss:$4 sm:$0xff] %v2394_v34  ;;  %v2836_v62 = vrot.slane %v2774_v47, 2  ;;  %v2837_v11 = vrot.slane %v2774_v47, 4  ;;  %v1316_v15 = vadd.f32 %v10969_v14, %v811_v41  ;;  %v2776_v14 = vld [vmem:[#allocation2 + $0x32] sm:$0xff] }
 0x29d   : > { %2495 = vst [vmem:[#allocation1 + $0x2] ss:$4 sm:$0xff] %v2315_v7 }
 0x29e   : > { %2496 = vst [vmem:[#allocation1 + $0x3] ss:$4 sm:$0xff] %v2395_v45  ;;  %v2838_v45 = vrot.slane %v2774_v47, 6 }
 0x29f   : > { %v11073_v4 = vld.sshfl [vmem:[#allocation1 + $0x20] sm:$0xff pattern:$0x73625140]  ;;  %1339 = vst [vmem:[#allocation3 + $0x20] sm:$0xff] %v1316_v15 }
 0x2a0   : > { %2517 = vst [vmem:[#allocation1 + $0x20] ss:$4 sm:$0xff] %v2321_v24  ;;  %v2773_v24 = vld [vmem:[#allocation2 + $0x1a] sm:$0xff] }
 0x2a1   : > { %2518 = vst [vmem:[#allocation1 + $0x21] ss:$4 sm:$0xff] %v2407_v30  ;;  %v11090_v9 = vpop.f32.mrf.mxu1 }
 0x2a2   : > { %2519 = vst [vmem:[#allocation1 + $0x22] ss:$4 sm:$0xff] %v2408_v13 }
 0x2a3   : > { %2520 = vst [vmem:[#allocation1 + $0x23] ss:$4 sm:$0xff] %v2409_v29  ;;  %v814_v28 = vpop.f32.mrf.mxu0 }
 0x2a4   : > { %v840_v55 = vadd.f32 %v814_v28, %v685_v21  ;;  %v1713_v21 = vpop.f32.mrf.mxu2 }
 0x2a5   : > { %v11066_v44 = vld.sshfl [vmem:[#allocation1] sm:$0xff pattern:$0x73625140] }
 0x2a6   : > { %2503 = vst [vmem:[#allocation1] ss:$4 sm:$0xff] %v2398_v61  ;;  %v2566_v61 = vpack.c.bf16 %v11064_v43, %v11066_v44  ;;  %v1611_v43 = vpack.c.bf16 %v10843_v26, %v10847_v46  ;;  %v2834_v44 = vrot.slane %v2773_v24, 4 }
 0x2a7   : > { %2504 = vst [vmem:[#allocation1 + $0x1] ss:$4 sm:$0xff] %v2399_v54  ;;  %v11103_v54 = vpop.f32.mrf.mxu3 }
 0x2a8   : > { %2505 = vst [vmem:[#allocation1 + $0x2] ss:$4 sm:$0xff] %v2400_v25  ;;  %v11105_v25 = vld [vmem:[#allocation2 + $0x3a] sm:$0xff]  ;;  %1747 = vmatmul.bf16.gmra.mxu2 %v1611_v43 }
 0x2a9   : > { %2506 = vst [vmem:[#allocation1 + $0x3] ss:$4 sm:$0xff] %v2318_v22  ;;  %v2415_v22 = vrot.slane %v2324_v42, 6  ;;  %v11097_v51 = vpop.f32.mrf.mxu1  ;;  %v2842_v30 = vrot.slane %v11105_v25, 2  ;;  %v2844_v28 = vrot.slane %v11105_v25, 6 }
 0x2aa   : > { %v11082_v7 = vld.sshfl [vmem:[#allocation1 + $0x20] sm:$0xff pattern:$0x73625140]  ;;  %13939 = vst [vmem:[#allocation11_spill] sm:$0xff] %v11103_v54 }
 0x2ab   : > { %2692 = vmatmul.bf16.gmra.mxu0 %v2564_v32  ;;  %2527 = vst [vmem:[#allocation1 + $0x20] ss:$4 sm:$0xff] %v2412_v31  ;;  %v2841_v32 = vrot.slane %v2776_v14, 6  ;;  %v816_v29 = vpop.f32.mrf.mxu0 }
 0x2ac   : > { %2528 = vst [vmem:[#allocation1 + $0x21] ss:$4 sm:$0xff] %v2324_v42  ;;  %v11144_v43 = vpop.f32.mrf.mxu2 }
 0x2ad   : > { %2529 = vst [vmem:[#allocation1 + $0x22] ss:$4 sm:$0xff] %v2413_v50  ;;  %v2843_v50 = vrot.slane %v11105_v25, 4 }
 0x2ae   : > { %2530 = vst [vmem:[#allocation1 + $0x23] ss:$4 sm:$0xff] %v2414_v52  ;;  %v2775_v52 = vld [vmem:[#allocation2 + $0x2a] sm:$0x3] }
 0x2af   : > { %863 = vst [vmem:[#allocation3 + $0x8] sm:$0xf] %v840_v55  ;;  %v11116_v31 = vpop.f32.mrf.mxu3  ;;  %v2778_v55 = vld [vmem:[#allocation2 + $0x42] sm:$0x3] }
 0x2b0   : > { %v11075_v12 = vld.sshfl [vmem:[#allocation1] sm:$0xff pattern:$0x73625140] }
 0x2b1   : > { %2513 = vst [vmem:[#allocation1] ss:$4 sm:$0xff] %v2320_v17  ;;  %v2833_v17 = vrot.slane %v2773_v24, 2  ;;  %v2567_v46 = vpack.c.bf16 %v11073_v4, %v11075_v12  ;;  %v2847_v12 = vrot.slane %v2779_v23, 6 }
 0x2b2   : > { %2514 = vst [vmem:[#allocation1 + $0x1] ss:$4 sm:$0xff] %v2404_v59  ;;  %v11108_v59 = vpop.f32.mrf.mxu1 }
 0x2b3   : > { %2515 = vst [vmem:[#allocation1 + $0x2] ss:$4 sm:$0xff] %v2405_v57 }
 0x2b4   : > { %2516 = vst [vmem:[#allocation1 + $0x3] ss:$4 sm:$0xff] %v2406_v56  ;;  %v2835_v56 = vrot.slane %v2773_v24, 6 }
 0x2b5   : > { %v11094_v34 = vld.sshfl [vmem:[#allocation1 + $0x20] sm:$0xff pattern:$0x73625140]  ;;  %13940 = vst [vmem:[#allocation12_spill] sm:$0xff] %v11108_v59 }
 0x2b6   : > { %2901 = vst [vmem:[#allocation1 + $0x20] ss:$4 sm:$0xff] %v2774_v47  ;;  %v2840_v47 = vrot.slane %v2776_v14, 4 }
 0x2b7   : > { %2903 = vst [vmem:[#allocation1 + $0x21] ss:$4 sm:$0xff] %v2836_v62  ;;  %v11124_v41 = vpop.f32.mrf.mxu3 }
 0x2b8   : > { %2905 = vst [vmem:[#allocation1 + $0x22] ss:$4 sm:$0xff] %v2837_v11  ;;  %v2780_v11 = vld [vmem:[#allocation2 + $0x52] sm:$0xff] }
 0x2b9   : > { %2907 = vst [vmem:[#allocation1 + $0x23] ss:$4 sm:$0xff] %v2838_v45  ;;  %v2846_v45 = vrot.slane %v2779_v23, 4 }
 0x2ba   : > { %v11119_v26 = vpop.f32.mrf.mxu1  ;;  %13941 = vst [vmem:[#allocation13_spill] sm:$0xff] %v11124_v41 }
 0x2bb   : > { %2697 = vmatmul.bf16.gmra.mxu0 %v2565_v58  ;;  %v11086_v39 = vld.sshfl [vmem:[#allocation1] sm:$0xff pattern:$0x73625140]  ;;  %v1139_v58 = vld [vmem:[#allocation3 + $0xb0] sm:$0xff] }
 0x2bc   : > { %2523 = vst [vmem:[#allocation1] ss:$4 sm:$0xff] %v2322_v5  ;;  %v2839_v5 = vrot.slane %v2776_v14, 2  ;;  %v1295_v18 = vadd.f32 %v11062_v19, %v1139_v58  ;;  %v2093_v19 = vpack.c.bf16 %v10991_v3, %v10991_v3  ;;  %v2785_v58 = vld [vmem:[#allocation2 + $0x7a] sm:$0xff] }
 0x2bd   : > { %2524 = vst [vmem:[#allocation1 + $0x1] ss:$4 sm:$0xff] %v2323_v33  ;;  %v1161_v33 = vld [vmem:[#allocation3 + $0x8] sm:$0xf] }
 0x2be   : > { %2525 = vst [vmem:[#allocation1 + $0x2] ss:$4 sm:$0xff] %v2410_v53  ;;  %v1317_v42 = vadd.f32 %v10979_v0, %v1161_v33  ;;  %2245 = vmatmul.bf16.gmra.mxu3 %v2093_v19 }
 0x2bf   : > { %2526 = vst [vmem:[#allocation1 + $0x3] ss:$4 sm:$0xff] %v2411_v38  ;;  %v11136_v3 = vpop.f32.mrf.mxu3 }
 0x2c0   : > { %v2909_v13 = vld.sshfl [vmem:[#allocation1 + $0x20] sm:$0xff pattern:$0x73625140]  ;;  %1340 = vst [vmem:[#allocation3 + $0x8] sm:$0xf] %v1317_v42  ;;  %v2850_v42 = vrot.slane %v2780_v11, 6 }
 0x2c1   : > { %2914 = vst [vmem:[#allocation1 + $0x20] ss:$4 sm:$0xff] %v2841_v32  ;;  %v2568_v32 = vpack.c.bf16 %v11082_v7, %v11086_v39  ;;  %v2849_v39 = vrot.slane %v2780_v11, 4 }
 0x2c2   : > { %2915 = vst [vmem:[#allocation1 + $0x21] ss:$4 sm:$0xff] %v11105_v25  ;;  %v11129_v15 = vpop.f32.mrf.mxu1 }
 0x2c3   : > { %2916 = vst [vmem:[#allocation1 + $0x22] ss:$4 sm:$0xff] %v2842_v30 }
 0x2c4   : > { %2917 = vst [vmem:[#allocation1 + $0x23] ss:$4 sm:$0xff] %v2843_v50 }
 0x2c5   : > { %13942 = vst [vmem:[#allocation14_spill] sm:$0xff] %v11129_v15 }
 0x2c6   : > { %v11099_v35 = vld.sshfl [vmem:[#allocation1] sm:$0xff pattern:$0x73625140] }
 0x2c7   : > { %2533 = vst [vmem:[#allocation1] ss:$4 sm:$0xff] %v2415_v22  ;;  %v1638_v38 = vld [vmem:[#allocation3 + $0x8] sm:$0xf]  ;;  %v1612_v22 = vpack.c.bf16 %v10849_v63, %v10856_v10  ;;  %v11149_v50 = vpop.f32.mrf.mxu3 }
 0x2c8   : > { %2534 = vst [vmem:[#allocation1 + $0x1] ss:$4 sm:$0xff] %v2325_v16  ;;  %v1794_v62 = vadd.f32 %v11015_v48, %v1638_v38  ;;  %v11133_v16 = vadd.f32 %v1713_v21, %v1295_v18  ;;  %v2848_v48 = vrot.slane %v2780_v11, 2  ;;  %v1718_v18 = vpop.f32.mrf.mxu2  ;;  %v2858_v38 = vrot.slane %v2785_v58, 4 }
 0x2c9   : > { %1752 = vmatmul.bf16.gmra.mxu2 %v1612_v22  ;;  %13944 = vst [vmem:[#allocation16_spill] sm:$0xff] %v11149_v50 }
 0x2ca   : > { %1817 = vst [vmem:[#allocation3 + $0x8] sm:$0xf] %v1794_v62  ;;  %v2859_v62 = vrot.slane %v2785_v58, 6 }
 0x2cb   : > { %2702 = vmatmul.bf16.gmra.mxu0 %v2566_v61  ;;  %v2919_v4 = vld.sshfl [vmem:[#allocation1 + $0x20] sm:$0xff pattern:$0x73625140]  ;;  %v11138_v61 = vpop.f32.mrf.mxu1 }
 0x2cc   : > { %2924 = vst [vmem:[#allocation1 + $0x20] ss:$4 sm:$0xff] %v2846_v45  ;;  %v2569_v45 = vpack.c.bf16 %v11094_v34, %v11099_v35  ;;  %v2784_v34 = vld [vmem:[#allocation2 + $0x72] sm:$0x3] }
 0x2cd   : > { %2925 = vst [vmem:[#allocation1 + $0x21] ss:$4 sm:$0xff] %v2847_v12  ;;  %v10137_v35 = vld [vmem:[%s13930_s1 + $0x1b8] sm:$0xff] }
 0x2ce   : > { %2926 = vst [vmem:[#allocation1 + $0x22] ss:$4 sm:$0xff] %v2780_v11  ;;  %3614 = vmatpush.bf16.msrb.mxu2 %v10137_v35 }
 0x2cf   : > { %v11113_v57 = vld.sshfl [vmem:[#allocation1] sm:$0xff pattern:$0x73625140]  ;;  %2927 = vst [vmem:[#allocation1 + $0x23] ss:$4 sm:$0xff] %v2848_v48  ;;  %v11163_v12 = vpop.f32.mrf.mxu3 }
 0x2d0   : > { %2893 = vst [vmem:[#allocation1] ss:$4 sm:$0xff] %v2773_v24  ;;  %v2782_v24 = vld [vmem:[#allocation2 + $0x62] sm:$0xff]  ;;  %v11167_v48 = vpop.f32.mrf.mxu2 }
 0x2d1   : > { %2895 = vst [vmem:[#allocation1 + $0x1] ss:$4 sm:$0xff] %v2833_v17  ;;  %v2851_v30 = vrot.slane %v2782_v24, 2  ;;  %v2853_v25 = vrot.slane %v2782_v24, 6 }
 0x2d2   : > { %2897 = vst [vmem:[#allocation1 + $0x2] ss:$4 sm:$0xff] %v2834_v44  ;;  %v1141_v44 = vld [vmem:[#allocation3 + $0x10] sm:$0xff] }
 0x2d3   : > { %2899 = vst [vmem:[#allocation1 + $0x3] ss:$4 sm:$0xff] %v2835_v56  ;;  %v2783_v56 = vld [vmem:[#allocation2 + $0x6a] sm:$0xff]  ;;  %v11146_v7 = vpop.f32.mrf.mxu1  ;;  %v1297_v33 = vadd.f32 %v11079_v37, %v1141_v44  ;;  %v10135_v44 = vld [vmem:[%s13930_s1 + $0x1a8] sm:$0xff] }
 0x2d4   : > { %13943 = vst [vmem:[#allocation15_spill] sm:$0xff] %v11146_v7  ;;  %v2854_v19 = vrot.slane %v2783_v56, 2  ;;  %v2856_v21 = vrot.slane %v2783_v56, 6  ;;  %v11353_v7 = vld [vmem:[#allocation2 + $0x68] sm:$0xff] }
 0x2d5   : > { %13945 = vst [vmem:[#allocation17_spill] sm:$0xff] %v11167_v48 }
 0x2d6   : > { %v2929_v29 = vld.sshfl [vmem:[#allocation1 + $0x20] sm:$0xff pattern:$0x73625140] }
 0x2d7   : > { %2934 = vst [vmem:[#allocation1 + $0x20] ss:$4 sm:$0xff] %v2851_v30 }
 0x2d8   : > { %v11140_v10 = vpop.f32.mrf.mxu0  ;;  %2936 = vst [vmem:[#allocation1 + $0x22] ss:$4 sm:$0xff] %v2853_v25  ;;  %v11183_v25 = vpop.f32.mrf.mxu3 }
 0x2d9   : > { %2937 = vst [vmem:[#allocation1 + $0x23] ss:$4 sm:$0xff] %v2783_v56 }
 0x2da   : > { %v2908_v53 = vld.sshfl [vmem:[#allocation1] sm:$0xff pattern:$0x73625140]  ;;  %13946 = vst [vmem:[#allocation18_spill] sm:$0xff] %v11183_v25 }
 0x2db   : > { %2707 = vmatmul.bf16.gmra.mxu0 %v2567_v46  ;;  %v3036_v0 = vpack.c.bf16 %v2909_v13, %v2908_v53  ;;  %2910 = vst [vmem:[#allocation1] ss:$4 sm:$0xff] %v2775_v52  ;;  %v2852_v13 = vrot.slane %v2782_v24, 4  ;;  %v1774_v53 = vadd.f32 %v1718_v18, %v1297_v33 }
 0x2dc   : > { %2911 = vst [vmem:[#allocation1 + $0x1] ss:$4 sm:$0xff] %v2776_v14  ;;  %v2845_v14 = vrot.slane %v2779_v23, 2 }
 0x2dd   : > { %3144 = vmatmul.bf16.vlgmr.msrb.gmra.mxu1 %v3036_v0  ;;  %2912 = vst [vmem:[#allocation1 + $0x2] ss:$4 sm:$0xff] %v2839_v5  ;;  %v2781_v5 = vld [vmem:[#allocation2 + $0x5a] sm:$0x3]  ;;  %v2857_v0 = vrot.slane %v2785_v58, 2  ;;  %v11156_v37 = vadd.f32 %v11088_v36, %v1774_v53  ;;  %v2855_v36 = vrot.slane %v2783_v56, 4 }
 0x2de   : > { %2913 = vst [vmem:[#allocation1 + $0x3] ss:$4 sm:$0xff] %v2840_v47  ;;  %v2789_v53 = vld [vmem:[#allocation2 + $0x9a] sm:$0xff] }
 0x2df   : > { %2935 = vst [vmem:[#allocation1 + $0x21] ss:$4 sm:$0xff] %v2852_v13  ;;  %v2866_v35 = vrot.slane %v2789_v53, 2 }
 0x2e0   : > { %v11151_v46 = vpop.f32.mrf.mxu0 }
 0x2e5   : > { %v2918_v63 = vld.sshfl [vmem:[#allocation1] sm:$0xff pattern:$0x73625140] }
 0x2e6   : > { %2920 = vst [vmem:[#allocation1] ss:$4 sm:$0xff] %v2844_v28  ;;  %v3037_v17 = vpack.c.bf16 %v2919_v4, %v2918_v63  ;;  %v11153_v47 = vld.sshfl [vmem:[#allocation1 + $0x20] sm:$0xff pattern:$0x73625140] }
 0x2e7   : > { %2921 = vst [vmem:[#allocation1 + $0x1] ss:$4 sm:$0xff] %v2778_v55  ;;  %v11169_v28 = vld [vmem:[#allocation2 + $0x92] sm:$0xff]  ;;  %v1143_v55 = vld [vmem:[#allocation3 + $0x60] sm:$0xff]  ;;  %v2787_v63 = vld [vmem:[#allocation2 + $0x8a] sm:$0x3] }
 0x2e8   : > { %2922 = vst [vmem:[#allocation1 + $0x2] ss:$4 sm:$0xff] %v2779_v23  ;;  %v1261_v23 = vpop.f32.mrf.mxu1  ;;  %v11165_v22 = vpop.f32.mrf.mxu0  ;;  %v2864_v13 = vrot.slane %v11169_v28, 4 }
 0x2e9   : > { %2923 = vst [vmem:[#allocation1 + $0x3] ss:$4 sm:$0xff] %v2845_v14  ;;  %v11159_v11 = vadd.f32 %v1261_v23, %v10983_v49  ;;  %v10136_v14 = vld [vmem:[%s13930_s1 + $0x1b0] sm:$0xff] }
 0x2ea   : > { %2944 = vst [vmem:[#allocation1 + $0x20] ss:$4 sm:$0xff] %v2785_v58  ;;  %3615 = vmatpush.bf16.msrb.mxu2 %v10136_v14 }
 0x2eb   : > { %2712 = vmatmul.bf16.gmra.mxu0 %v2568_v32  ;;  %2945 = vst [vmem:[#allocation1 + $0x21] ss:$4 sm:$0xff] %v2857_v0  ;;  %v2863_v32 = vrot.slane %v11169_v28, 2  ;;  %v11200_v0 = vld [vmem:[#allocation2 + $0xaa] sm:$0xff] }
 0x2ec   : > { %2946 = vst [vmem:[#allocation1 + $0x22] ss:$4 sm:$0xff] %v2858_v38  ;;  %v2868_v38 = vrot.slane %v2789_v53, 6 }
 0x2ed   : > { %3149 = vmatmul.bf16.gmra.mxu1 %v3037_v17  ;;  %2947 = vst [vmem:[#allocation1 + $0x23] ss:$4 sm:$0xff] %v2859_v62  ;;  %v2786_v17 = vld [vmem:[#allocation2 + $0x82] sm:$0xff]  ;;  %v2869_v62 = vrot.slane %v11200_v0, 2 }
 0x2ee   : > { %v2861_v58 = vrot.slane %v2786_v17, 4  ;;  %3616 = vmatpush.bf16.msrb.mxu2 %v10135_v44  ;;  %v2862_v18 = vrot.slane %v2786_v17, 6 }
 0x2f0   : > { %v2928_v52 = vld.sshfl [vmem:[#allocation1] sm:$0xff pattern:$0x73625140]  ;;  %v11188_v56 = vpop.f32.mrf.mxu0 }
 0x2f1   : > { %2930 = vst [vmem:[#allocation1] ss:$4 sm:$0xff] %v2849_v39  ;;  %v3038_v4 = vpack.c.bf16 %v2929_v29, %v2928_v52  ;;  %v1723_v29 = vpop.f32.mrf.mxu2  ;;  %v2860_v39 = vrot.slane %v2786_v17, 2 }
 0x2f2   : > { %2931 = vst [vmem:[#allocation1 + $0x1] ss:$4 sm:$0xff] %v2850_v42  ;;  %v2570_v42 = vpack.c.bf16 %v11113_v57, %v11113_v57  ;;  %v2790_v57 = vld [vmem:[#allocation2 + $0xa2] sm:$0x3] }
 0x2f3   : > { %2932 = vst [vmem:[#allocation1 + $0x2] ss:$4 sm:$0xff] %v2781_v5  ;;  %v10134_v5 = vld [vmem:[%s13930_s1 + $0x1a0] sm:$0xff] }
 0x2f4   : > { %2933 = vst [vmem:[#allocation1 + $0x3] ss:$4 sm:$0xff] %v2782_v24  ;;  %v1299_v24 = vadd.f32 %v11097_v51, %v1143_v55  ;;  %v11179_v30 = vld.sshfl [vmem:[#allocation1 + $0x20] sm:$0xff pattern:$0x73625140]  ;;  %3617 = vmatpush.bf16.msrb.mxu2 %v10134_v5  ;;  %v2865_v55 = vrot.slane %v11169_v28, 6 }
 0x2f5   : > { %2954 = vst [vmem:[#allocation1 + $0x20] ss:$4 sm:$0xff] %v2787_v63 }
 0x2f6   : > { %2955 = vst [vmem:[#allocation1 + $0x21] ss:$4 sm:$0xff] %v11169_v28  ;;  %v1776_v51 = vadd.f32 %v1723_v29, %v1299_v24  ;;  %v10131_v28 = vld [vmem:[%s13930_s1 + $0x188] sm:$0xff]  ;;  %v2793_v29 = vld [vmem:[#allocation2 + $0xba] sm:$0x3] }
 0x2f7   : > { %2956 = vst [vmem:[#allocation1 + $0x22] ss:$4 sm:$0xff] %v2863_v32 }
 0x2f8   : > { %13947 = vst [vmem:[#allocation19_spill] sm:$0xff] %v11188_v56  ;;  %v11191_v33 = vadd.f32 %v11116_v31, %v1776_v51  ;;  %v11433_v56 = vld [vmem:[#allocation2 + $0xa8] sm:$0xff] }
 0x2f9   : > { %2957 = vst [vmem:[#allocation1 + $0x23] ss:$4 sm:$0xff] %v2864_v13 }
 0x2fb   : > { %2717 = vmatmul.bf16.gmra.mxu0 %v2569_v45  ;;  %v2938_v49 = vld.sshfl [vmem:[#allocation1] sm:$0xff pattern:$0x73625140]  ;;  %v11206_v45 = vpop.f32.mrf.mxu3 }
 0x2fc   : > { %2940 = vst [vmem:[#allocation1] ss:$4 sm:$0xff] %v2854_v19  ;;  %v3039_v31 = vpack.c.bf16 %v11153_v47, %v2938_v49  ;;  %v11211_v19 = vpop.f32.mrf.mxu2  ;;  %v10133_v47 = vld [vmem:[%s13930_s1 + $0x198] sm:$0xff]  ;;  %v1145_v49 = vld [vmem:[#allocation3 + $0x40] sm:$0xff] }
 0x2fd   : > { %3154 = vmatmul.bf16.gmra.mxu1 %v3038_v4  ;;  %2941 = vst [vmem:[#allocation1 + $0x1] ss:$4 sm:$0xff] %v2855_v36  ;;  %v10145_v4 = vld [vmem:[%s13930_s1 + $0x1f8] sm:$0xff]  ;;  %v2250_v36 = vadd.f32 %v11069_v27, %v11133_v16  ;;  %3618 = vmatpush.bf16.msrb.mxu2 %v10133_v47  ;;  %v1301_v63 = vadd.f32 %v11119_v26, %v1145_v49  ;;  %v2867_v16 = vrot.slane %v2789_v53, 4 }
 0x2fe   : > { %2942 = vst [vmem:[#allocation1 + $0x2] ss:$4 sm:$0xff] %v2856_v21  ;;  %v11218_v21 = vpop.f32.mrf.mxu0  ;;  %4091 = vmatpush.bf16.msrb.mxu3 %v10145_v4  ;;  %v2792_v27 = vld [vmem:[#allocation2 + $0xb2] sm:$0xff] }
 0x2ff   : > { %2943 = vst [vmem:[#allocation1 + $0x3] ss:$4 sm:$0xff] %v2784_v34  ;;  %v10132_v34 = vld [vmem:[%s13930_s1 + $0x190] sm:$0xff]  ;;  %v11229_v32 = vadd.f32 %v11140_v10, %v2250_v36  ;;  %v2873_v24 = vrot.slane %v2792_v27, 4  ;;  %v2874_v13 = vrot.slane %v2792_v27, 6  ;;  %v10130_v10 = vld [vmem:[%s13930_s1 + $0x180] sm:$0xff] }
 0x300   : > { %v11203_v23 = vld.sshfl [vmem:[#allocation1 + $0x20] sm:$0xff pattern:$0x73625140]  ;;  %13948 = vst [vmem:[#allocation20_spill] sm:$0xff] %v11211_v19 }
 0x301   : > { %2964 = vst [vmem:[#allocation1 + $0x20] ss:$4 sm:$0xff] %v2868_v38  ;;  %3619 = vmatpush.bf16.msrb.mxu2 %v10132_v34  ;;  %v2871_v38 = vrot.slane %v11200_v0, 6  ;;  %v11264_v34 = vadd.f32 %v11165_v22, %v11156_v37 }
 0x302   : > { %2965 = vst [vmem:[#allocation1 + $0x21] ss:$4 sm:$0xff] %v2790_v57 }
 0x303   : > { %2966 = vst [vmem:[#allocation1 + $0x22] ss:$4 sm:$0xff] %v11200_v0  ;;  %v11236_v51 = vpop.f32.mrf.mxu3 }
 0x304   : > { %2967 = vst [vmem:[#allocation1 + $0x23] ss:$4 sm:$0xff] %v2869_v62  ;;  %v2795_v62 = vld [vmem:[#allocation2 + $0xca] sm:$0xff] }
 0x305   : > { %3620 = vmatpush.bf16.msrb.mxu2 %v10131_v28  ;;  %v2879_v4 = vrot.slane %v2795_v62, 4  ;;  %v2880_v47 = vrot.slane %v2795_v62, 6 }
 0x306   : > { %v11195_v52 = vld.sshfl [vmem:[#allocation1] sm:$0xff pattern:$0x73625140] }
 0x307   : > { %2950 = vst [vmem:[#allocation1] ss:$4 sm:$0xff] %v2786_v17  ;;  %v1728_v17 = vpop.f32.mrf.mxu2  ;;  %v3040_v5 = vpack.c.bf16 %v11179_v30, %v11195_v52 }
 0x308   : > { %2951 = vst [vmem:[#allocation1 + $0x1] ss:$4 sm:$0xff] %v2860_v39  ;;  %v1778_v26 = vadd.f32 %v1728_v17, %v1301_v63  ;;  %v11241_v39 = vpop.f32.mrf.mxu1 }
 0x309   : > { %2952 = vst [vmem:[#allocation1 + $0x2] ss:$4 sm:$0xff] %v2861_v58  ;;  %3621 = vmatpush.bf16.msrb.mxu2 %v10130_v10  ;;  %v2797_v10 = vld [vmem:[#allocation2 + $0xda] sm:$0xff] }
 0x30a   : > { %2953 = vst [vmem:[#allocation1 + $0x3] ss:$4 sm:$0xff] %v2862_v18  ;;  %v11246_v58 = vadd.f32 %v11136_v3, %v1778_v26  ;;  %v2794_v18 = vld [vmem:[#allocation2 + $0xc2] sm:$0xff]  ;;  %v2878_v3 = vrot.slane %v2795_v62, 2 }
 0x30b   : > { %2722 = vmatmul.bf16.gmra.mxu0 %v2570_v42  ;;  %v11234_v44 = vld.sshfl [vmem:[#allocation1 + $0x20] sm:$0xff pattern:$0x73625140]  ;;  %v11243_v42 = vpop.f32.mrf.mxu0  ;;  %v11254_v30 = vpop.f32.mrf.mxu3  ;;  %v2877_v63 = vrot.slane %v2794_v18, 6 }
 0x30c   : > { %2974 = vst [vmem:[#allocation1 + $0x20] ss:$4 sm:$0xff] %v2873_v24 }
 0x30d   : > { %3159 = vmatmul.bf16.gmra.mxu1 %v3039_v31  ;;  %13949 = vst [vmem:[#allocation21_spill] sm:$0xff] %v11243_v42  ;;  %v2872_v31 = vrot.slane %v2792_v27, 2 }
 0x30e   : > { %2975 = vst [vmem:[#allocation1 + $0x21] ss:$4 sm:$0xff] %v2874_v13 }
 0x30f   : > { %2976 = vst [vmem:[#allocation1 + $0x22] ss:$4 sm:$0xff] %v2793_v29 }
 0x310   : > { %2977 = vst [vmem:[#allocation1 + $0x23] ss:$4 sm:$0xff] %v2794_v18  ;;  %v11258_v36 = vpop.f32.mrf.mxu1 }
 0x311   : > { %v11226_v14 = vld.sshfl [vmem:[#allocation1] sm:$0xff pattern:$0x73625140] }
 0x312   : > { %2960 = vst [vmem:[#allocation1] ss:$4 sm:$0xff] %v2865_v55  ;;  %v2875_v55 = vrot.slane %v2794_v18, 2  ;;  %v3041_v28 = vpack.c.bf16 %v11203_v23, %v11226_v14  ;;  %v2881_v23 = vrot.slane %v2797_v10, 2  ;;  %v2882_v14 = vrot.slane %v2797_v10, 4 }
 0x313   : > { %2961 = vst [vmem:[#allocation1 + $0x1] ss:$4 sm:$0xff] %v2789_v53  ;;  %v2870_v53 = vrot.slane %v11200_v0, 4  ;;  %v11260_v49 = vpop.f32.mrf.mxu0  ;;  %v2796_v0 = vld [vmem:[#allocation2 + $0xd2] sm:$0x3]  ;;  %v11270_v13 = vpop.f32.mrf.mxu3 }
 0x314   : > { %2962 = vst [vmem:[#allocation1 + $0x2] ss:$4 sm:$0xff] %v2866_v35  ;;  %v2876_v35 = vrot.slane %v2794_v18, 4  ;;  %v2801_v18 = vld [vmem:[#allocation2 + $0xfa] sm:$0xff] }
 0x315   : > { %2963 = vst [vmem:[#allocation1 + $0x3] ss:$4 sm:$0xff] %v2867_v16 }
 0x317   : > { %v11256_v52 = vld.sshfl [vmem:[#allocation1 + $0x20] sm:$0xff pattern:$0x73625140] }
 0x318   : > { %2984 = vst [vmem:[#allocation1 + $0x20] ss:$4 sm:$0xff] %v2878_v3  ;;  %v11272_v29 = vpop.f32.mrf.mxu1 }
 0x319   : > { %2985 = vst [vmem:[#allocation1 + $0x21] ss:$4 sm:$0xff] %v2879_v4 }
 0x31a   : > { %2986 = vst [vmem:[#allocation1 + $0x22] ss:$4 sm:$0xff] %v2880_v47 }
 0x31b   : > { %2987 = vst [vmem:[#allocation1 + $0x23] ss:$4 sm:$0xff] %v2796_v0  ;;  %v11274_v26 = vpop.f32.mrf.mxu0  ;;  %v11280_v3 = vpop.f32.mrf.mxu3  ;;  %v2890_v0 = vrot.slane %v2801_v18, 2 }
 0x31c   : > { %v11252_v57 = vld.sshfl [vmem:[#allocation1] sm:$0xff pattern:$0x73625140]  ;;  %13950 = vst [vmem:[#allocation22_spill] sm:$0xff] %v11274_v26 }
 0x31d   : > { %3164 = vmatmul.bf16.gmra.mxu1 %v3040_v5  ;;  %2970 = vst [vmem:[#allocation1] ss:$4 sm:$0xff] %v2870_v53  ;;  %v2800_v5 = vld [vmem:[#allocation2 + $0xf2] sm:$0xff]  ;;  %v2883_v53 = vrot.slane %v2797_v10, 6 }
 0x31e   : > { %2971 = vst [vmem:[#allocation1 + $0x1] ss:$4 sm:$0xff] %v2871_v38 }
 0x31f   : > { %2972 = vst [vmem:[#allocation1 + $0x2] ss:$4 sm:$0xff] %v2792_v27  ;;  %v2798_v27 = vld [vmem:[#allocation2 + $0xe2] sm:$0xff] }
 0x320   : > { %2973 = vst [vmem:[#allocation1 + $0x3] ss:$4 sm:$0xff] %v2872_v31  ;;  %v2884_v24 = vrot.slane %v2798_v27, 2  ;;  %v2885_v17 = vrot.slane %v2798_v27, 4  ;;  %v2886_v37 = vrot.slane %v2798_v27, 6  ;;  %v2889_v31 = vrot.slane %v2800_v5, 6  ;;  %v11284_v4 = vpop.f32.mrf.mxu1 }
 0x322   : > { %v11276_v22 = vld.sshfl [vmem:[#allocation1 + $0x20] sm:$0xff pattern:$0x73625140] }
 0x323   : > { %2994 = vst [vmem:[#allocation1 + $0x20] ss:$4 sm:$0xff] %v2798_v27  ;;  %v11286_v47 = vpop.f32.mrf.mxu0  ;;  %v3042_v27 = vpack.c.bf16 %v11234_v44, %v11252_v57 }
 0x324   : > { %2995 = vst [vmem:[#allocation1 + $0x21] ss:$4 sm:$0xff] %v2884_v24 }
 0x325   : > { %2996 = vst [vmem:[#allocation1 + $0x22] ss:$4 sm:$0xff] %v2885_v17  ;;  %v2799_v17 = vld [vmem:[#allocation2 + $0xea] sm:$0x3] }
 0x326   : > { %2997 = vst [vmem:[#allocation1 + $0x23] ss:$4 sm:$0xff] %v2886_v37  ;;  %v2887_v37 = vrot.slane %v2800_v5, 2 }
 0x327   : > { %v11266_v16 = vld.sshfl [vmem:[#allocation1] sm:$0xff pattern:$0x73625140] }
 0x328   : > { %2980 = vst [vmem:[#allocation1] ss:$4 sm:$0xff] %v2875_v55  ;;  %v2891_v55 = vrot.slane %v2801_v18, 4 }
 0x329   : > { %2981 = vst [vmem:[#allocation1 + $0x1] ss:$4 sm:$0xff] %v2876_v35 }
 0x32a   : > { %2982 = vst [vmem:[#allocation1 + $0x2] ss:$4 sm:$0xff] %v2877_v63  ;;  %v1147_v63 = vld [vmem:[#allocation3 + $0x88] sm:$0xff] }
 0x32b   : > { %2983 = vst [vmem:[#allocation1 + $0x3] ss:$4 sm:$0xff] %v2795_v62  ;;  %v11282_v62 = vpop.f32.mrf.mxu2  ;;  %v1303_v24 = vadd.f32 %v11138_v61, %v1147_v63  ;;  %v11306_v61 = vpop.f32.mrf.mxu0 }
 0x32c   : > { %13951 = vst [vmem:[#allocation23_spill] sm:$0xff] %v11282_v62 }
 0x32d   : > { %3169 = vmatmul.bf16.gmra.mxu1 %v3041_v28  ;;  %v11288_v35 = vld.sshfl [vmem:[#allocation1 + $0x20] sm:$0xff pattern:$0x73625140]  ;;  %v11294_v28 = vadd.f32 %v11218_v21, %v11191_v33  ;;  %v10153_v33 = vld [vmem:[%s13930_s1 + $0x238] sm:$0xff]  ;;  %v11304_v21 = vpop.f32.mrf.mxu1  ;;  %13952 = vst [vmem:[#allocation24_spill] sm:$0xff] %v11306_v61 }
 0x32e   : > { %3004 = vst [vmem:[#allocation1 + $0x20] ss:$4 sm:$0xff] %v2889_v31  ;;  %v10144_v31 = vld [vmem:[%s13930_s1 + $0x1f0] sm:$0xff]  ;;  %4568 = vmatpush.bf16.msra.mxu0 %v10153_v33  ;;  %v2802_v61 = vld [vmem:[#allocation2 + $0x102] sm:$0x3] }
 0x32f   : > { %3005 = vst [vmem:[#allocation1 + $0x21] ss:$4 sm:$0xff] %v2801_v18  ;;  %4092 = vmatpush.bf16.msrb.mxu3 %v10144_v31  ;;  %v3251_v31 = vld [vmem:[#allocation2 + $0x30] sm:$0xff] }
 0x330   : > { %3006 = vst [vmem:[#allocation1 + $0x22] ss:$4 sm:$0xff] %v2890_v0 }
 0x331   : > { %3007 = vst [vmem:[#allocation1 + $0x23] ss:$4 sm:$0xff] %v2891_v55 }
 0x332   : > { %v11278_v38 = vld.sshfl [vmem:[#allocation1] sm:$0xff pattern:$0x73625140] }
 0x333   : > { %2990 = vst [vmem:[#allocation1] ss:$4 sm:$0xff] %v2797_v10  ;;  %v3252_v10 = vld [vmem:[#allocation2 + $0x38] sm:$0xff]  ;;  %v1733_v44 = vpop.f32.mrf.mxu2  ;;  %v11317_v25 = vpop.f32.mrf.mxu0 }
 0x334   : > { %2991 = vst [vmem:[#allocation1 + $0x1] ss:$4 sm:$0xff] %v2881_v23  ;;  %v2888_v23 = vrot.slane %v2800_v5, 4  ;;  %v3314_v57 = vrot.slane %v3252_v10, 2  ;;  %v1780_v0 = vadd.f32 %v1733_v44, %v1303_v24  ;;  %v3315_v55 = vrot.slane %v3252_v10, 4  ;;  %v11325_v44 = vld [vmem:[#allocation2 + $0x50] sm:$0xff] }
 0x335   : > { %2992 = vst [vmem:[#allocation1 + $0x2] ss:$4 sm:$0xff] %v2882_v14  ;;  %v11315_v26 = vpop.f32.mrf.mxu1  ;;  %v3320_v33 = vrot.slane %v11325_v44, 2 }
 0x336   : > { %2993 = vst [vmem:[#allocation1 + $0x3] ss:$4 sm:$0xff] %v2883_v53  ;;  %v11299_v53 = vpop.f32.mrf.mxu3 }
 0x338   : > { %v11311_v63 = vld.sshfl [vmem:[#allocation1 + $0x20] sm:$0xff pattern:$0x73625140] }
 0x339   : > { %3379 = vst [vmem:[#allocation1 + $0x20] ss:$4 sm:$0xff] %v3252_v10 }
 0x33a   : > { %3381 = vst [vmem:[#allocation1 + $0x21] ss:$4 sm:$0xff] %v3314_v57  ;;  %v11332_v57 = vadd.f32 %v11260_v49, %v11246_v58  ;;  %v10152_v58 = vld [vmem:[%s13930_s1 + $0x230] sm:$0xff]  ;;  %v3312_v49 = vrot.slane %v3251_v31, 4 }
 0x33b   : > { %3383 = vst [vmem:[#allocation1 + $0x22] ss:$4 sm:$0xff] %v3315_v55  ;;  %4569 = vmatpush.bf16.msra.mxu0 %v10152_v58  ;;  %v3326_v58 = vrot.slane %v11353_v7, 2 }
 0x33d   : > { %3174 = vmatmul.bf16.gmra.mxu1 %v3042_v27  ;;  %v11297_v14 = vld.sshfl [vmem:[#allocation1] sm:$0xff pattern:$0x73625140]  ;;  %v2892_v27 = vrot.slane %v2801_v18, 6 }
 0x33e   : > { %3000 = vst [vmem:[#allocation1] ss:$4 sm:$0xff] %v2799_v17  ;;  %v11313_v17 = vpop.f32.mrf.mxu3 }
 0x33f   : > { %3001 = vst [vmem:[#allocation1 + $0x1] ss:$4 sm:$0xff] %v2800_v5  ;;  %v3316_v5 = vrot.slane %v3252_v10, 6  ;;  %v11327_v10 = vpop.f32.mrf.mxu2 }
 0x340   : > { %3002 = vst [vmem:[#allocation1 + $0x2] ss:$4 sm:$0xff] %v2887_v37  ;;  %v3043_v37 = vpack.c.bf16 %v11256_v52, %v11266_v16  ;;  %v3321_v52 = vrot.slane %v11325_v44, 4  ;;  %v3311_v16 = vrot.slane %v3251_v31, 2 }
 0x341   : > { %3003 = vst [vmem:[#allocation1 + $0x3] ss:$4 sm:$0xff] %v2888_v23  ;;  %v11323_v23 = vld [vmem:[#allocation2 + $0x48] sm:$0xff] }
 0x342   : > { %3385 = vst [vmem:[#allocation1 + $0x23] ss:$4 sm:$0xff] %v3316_v5  ;;  %v3319_v18 = vrot.slane %v11323_v23, 6  ;;  %v11337_v5 = vpop.f32.mrf.mxu1  ;;  %v3317_v15 = vrot.slane %v11323_v23, 2 }
 0x343   : > { %13953 = vst [vmem:[#allocation25_spill] sm:$0xff] %v11327_v10 }
 0x348   : > { %v11319_v24 = vld.sshfl [vmem:[#allocation1] sm:$0xff pattern:$0x73625140] }
 0x349   : > { %3010 = vst [vmem:[#allocation1] ss:$4 sm:$0xff] %v2892_v27  ;;  %v3387_v55 = vld.sshfl [vmem:[#allocation1 + $0x20] sm:$0xff pattern:$0x73625140]  ;;  %v11339_v27 = vpop.f32.mrf.mxu0 }
 0x34a   : > { %3011 = vst [vmem:[#allocation1 + $0x1] ss:$4 sm:$0xff] %v2802_v61  ;;  %v11344_v61 = vpop.f32.mrf.mxu3 }
 0x34b   : > { %3392 = vst [vmem:[#allocation1 + $0x20] ss:$4 sm:$0xff] %v3319_v18  ;;  %v3313_v18 = vrot.slane %v3251_v31, 6 }
 0x34c   : > { %3393 = vst [vmem:[#allocation1 + $0x21] ss:$4 sm:$0xff] %v11325_v44 }
 0x34d   : > { %3179 = vmatmul.bf16.gmra.mxu1 %v3043_v37  ;;  %3394 = vst [vmem:[#allocation1 + $0x22] ss:$4 sm:$0xff] %v3320_v33  ;;  %v1738_v37 = vpop.f32.mrf.mxu2  ;;  %v11351_v33 = vld [vmem:[#allocation2 + $0x60] sm:$0xff] }
 0x34e   : > { %3395 = vst [vmem:[#allocation1 + $0x23] ss:$4 sm:$0xff] %v3321_v52  ;;  %v11349_v50 = vadd.f32 %v1738_v37, %v11159_v11  ;;  %v3324_v60 = vrot.slane %v11351_v33, 4  ;;  %v3325_v52 = vrot.slane %v11351_v33, 6  ;;  %v2258_v11 = vadd.f32 %v11163_v12, %v1780_v0 }
 0x34f   : > { %13954 = vst [vmem:[#allocation26_spill] sm:$0xff] %v11344_v61  ;;  %v3318_v12 = vrot.slane %v11323_v23, 4 }
 0x351   : > { %v11346_v10 = vld.sshfl [vmem:[#allocation1] sm:$0xff pattern:$0x73625140]  ;;  %v11359_v42 = vpop.f32.mrf.mxu0 }
 0x352   : > { %3371 = vst [vmem:[#allocation1] ss:$4 sm:$0xff] %v3251_v31  ;;  %v3044_v31 = vpack.c.bf16 %v11276_v22, %v11278_v38  ;;  %v11374_v22 = vadd.f32 %v11286_v47, %v2258_v11  ;;  %v10143_v38 = vld [vmem:[%s13930_s1 + $0x1e8] sm:$0xff]  ;;  %v1151_v47 = vld [vmem:[#allocation3 + $0x38] sm:$0xff]  ;;  %v3047_v54 = vpack.c.bf16 %v11346_v10, %v11346_v10 }
 0x353   : > { %3373 = vst [vmem:[#allocation1 + $0x1] ss:$4 sm:$0xff] %v3311_v16  ;;  %4093 = vmatpush.bf16.msrb.mxu3 %v10143_v38  ;;  %v1307_v11 = vadd.f32 %v11258_v36, %v1151_v47  ;;  %v3323_v38 = vrot.slane %v11351_v33, 2  ;;  %v3045_v36 = vpack.c.bf16 %v11288_v35, %v11297_v14  ;;  %v3327_v35 = vrot.slane %v11353_v7, 4 }
 0x354   : > { %3375 = vst [vmem:[#allocation1 + $0x2] ss:$4 sm:$0xff] %v3312_v49  ;;  %v3253_v49 = vld [vmem:[#allocation2 + $0x40] sm:$0x3] }
 0x355   : > { %3377 = vst [vmem:[#allocation1 + $0x3] ss:$4 sm:$0xff] %v3313_v18  ;;  %v11357_v62 = vld.sshfl [vmem:[#allocation1 + $0x20] sm:$0xff pattern:$0x73625140]  ;;  %v11368_v18 = vpop.f32.mrf.mxu3  ;;  %v11382_v0 = vpop.f32.mrf.mxu2 }
 0x356   : > { %3402 = vst [vmem:[#allocation1 + $0x20] ss:$4 sm:$0xff] %v3324_v60 }
 0x357   : > { %3403 = vst [vmem:[#allocation1 + $0x21] ss:$4 sm:$0xff] %v3325_v52 }
 0x358   : > { %3404 = vst [vmem:[#allocation1 + $0x22] ss:$4 sm:$0xff] %v11353_v7 }
 0x359   : > { %3405 = vst [vmem:[#allocation1 + $0x23] ss:$4 sm:$0xff] %v3326_v58  ;;  %v11384_v52 = vpop.f32.mrf.mxu0 }
 0x35a   : > { %v3145_v16 = vpop.f32.mrf.mxu1 }
 0x35b   : > { %v11366_v37 = vadd.f32 %v3145_v16, %v11229_v32  ;;  %v11377_v32 = vld [vmem:[#allocation2 + $0x78] sm:$0xff] }
 0x35c   : > { %v3386_v20 = vld.sshfl [vmem:[#allocation1] sm:$0xff pattern:$0x73625140]  ;;  %v3329_v58 = vrot.slane %v11377_v32, 2 }
 0x35d   : > { %3184 = vmatmul.bf16.gmra.mxu1 %v3044_v31  ;;  %v3514_v60 = vpack.c.bf16 %v3387_v55, %v3386_v20  ;;  %3388 = vst [vmem:[#allocation1] ss:$4 sm:$0xff] %v3253_v49  ;;  %v3330_v20 = vrot.slane %v11377_v32, 4  ;;  %v3331_v55 = vrot.slane %v11377_v32, 6  ;;  %v3322_v31 = vrot.slane %v11325_v44, 6  ;;  %v11395_v16 = vpop.f32.mrf.mxu3  ;;  %v11397_v49 = vld [vmem:[#allocation2 + $0x80] sm:$0xff]  ;;  %v1743_v41 = vpop.f32.mrf.mxu2 }
 0x35e   : > { %3389 = vst [vmem:[#allocation1 + $0x1] ss:$4 sm:$0xff] %v11323_v23  ;;  %v3263_v44 = vld [vmem:[#allocation2 + $0x90] sm:$0xff] }
 0x35f   : > { %3622 = vmatmul.bf16.vlgmr.msrb.gmra.mxu2 %v3514_v60  ;;  %3390 = vst [vmem:[#allocation1 + $0x2] ss:$4 sm:$0xff] %v3317_v15  ;;  %v3336_v59 = vrot.slane %v3263_v44, 4 }
 0x360   : > { %3391 = vst [vmem:[#allocation1 + $0x3] ss:$4 sm:$0xff] %v3318_v12  ;;  %v11391_v15 = vld.sshfl [vmem:[#allocation1 + $0x20] sm:$0xff pattern:$0x73625140] }
 0x361   : > { %3412 = vst [vmem:[#allocation1 + $0x20] ss:$4 sm:$0xff] %v3329_v58  ;;  %v3256_v12 = vld [vmem:[#allocation2 + $0x58] sm:$0x3]  ;;  %v11401_v19 = vpop.f32.mrf.mxu0  ;;  %v11403_v58 = vadd.f32 %v1743_v41, %v1307_v11  ;;  %v3337_v41 = vrot.slane %v3263_v44, 6 }
 0x362   : > { %v11388_v23 = vpop.f32.mrf.mxu1  ;;  %13955 = vst [vmem:[#allocation27_spill] sm:$0xff] %v11395_v16  ;;  %v3335_v16 = vrot.slane %v3263_v44, 2 }
 0x363   : > { %3413 = vst [vmem:[#allocation1 + $0x21] ss:$4 sm:$0xff] %v3330_v20  ;;  %v2262_v10 = vadd.f32 %v11254_v30, %v11403_v58  ;;  %v10140_v30 = vld [vmem:[%s13930_s1 + $0x1d0] sm:$0xff] }
 0x364   : > { %3414 = vst [vmem:[#allocation1 + $0x22] ss:$4 sm:$0xff] %v3331_v55 }
 0x365   : > { %3415 = vst [vmem:[#allocation1 + $0x23] ss:$4 sm:$0xff] %v11397_v49  ;;  %v11414_v11 = vpop.f32.mrf.mxu3  ;;  %v11420_v14 = vpop.f32.mrf.mxu2 }
 0x367   : > { %v3396_v60 = vld.sshfl [vmem:[#allocation1] sm:$0xff pattern:$0x73625140] }
 0x368   : > { %3398 = vst [vmem:[#allocation1] ss:$4 sm:$0xff] %v3322_v31  ;;  %v3515_v55 = vpack.c.bf16 %v11357_v62, %v3396_v60  ;;  %v1153_v60 = vld [vmem:[#allocation3 + $0x70] sm:$0xff] }
 0x369   : > { %3399 = vst [vmem:[#allocation1 + $0x1] ss:$4 sm:$0xff] %v3256_v12  ;;  %v11422_v62 = vpop.f32.mrf.mxu0  ;;  %v3328_v12 = vrot.slane %v11353_v7, 6 }
 0x36a   : > { %v3150_v20 = vpop.f32.mrf.mxu1  ;;  %3400 = vst [vmem:[#allocation1 + $0x2] ss:$4 sm:$0xff] %v11351_v33  ;;  %v10142_v33 = vld [vmem:[%s13930_s1 + $0x1e0] sm:$0xff] }
 0x36b   : > { %v11409_v47 = vadd.f32 %v3150_v20, %v11264_v34  ;;  %3401 = vst [vmem:[#allocation1 + $0x3] ss:$4 sm:$0xff] %v3323_v38  ;;  %v10151_v34 = vld [vmem:[%s13930_s1 + $0x228] sm:$0xff]  ;;  %4094 = vmatpush.bf16.msrb.mxu3 %v10142_v33  ;;  %v2260_v20 = vadd.f32 %v11206_v45, %v11349_v50  ;;  %v3046_v45 = vpack.c.bf16 %v11311_v63, %v11319_v24  ;;  %v3333_v63 = vrot.slane %v11397_v49, 4 }
 0x36c   : > { %v11412_v31 = vld.sshfl [vmem:[#allocation1 + $0x20] sm:$0xff pattern:$0x73625140]  ;;  %4570 = vmatpush.bf16.msra.mxu0 %v10151_v34  ;;  %v3334_v24 = vrot.slane %v11397_v49, 6 }
 0x36d   : > { %3189 = vmatmul.bf16.gmra.mxu1 %v3045_v36  ;;  %3422 = vst [vmem:[#allocation1 + $0x20] ss:$4 sm:$0xff] %v3263_v44  ;;  %v3259_v44 = vld [vmem:[#allocation2 + $0x70] sm:$0x3]  ;;  %v1748_v7 = vpop.f32.mrf.mxu2  ;;  %v11440_v34 = vadd.f32 %v11317_v25, %v2260_v20  ;;  %v11442_v33 = vpop.f32.mrf.mxu3 }
 0x36e   : > { %3423 = vst [vmem:[#allocation1 + $0x21] ss:$4 sm:$0xff] %v3335_v16 }
 0x36f   : > { %3627 = vmatmul.bf16.gmra.mxu2 %v3515_v55  ;;  %3424 = vst [vmem:[#allocation1 + $0x22] ss:$4 sm:$0xff] %v3336_v59  ;;  %v1309_v55 = vadd.f32 %v11284_v4, %v1153_v60  ;;  %v3265_v59 = vld [vmem:[#allocation2 + $0xa0] sm:$0x3] }
 0x370   : > { %3425 = vst [vmem:[#allocation1 + $0x23] ss:$4 sm:$0xff] %v3337_v41  ;;  %v3341_v41 = vrot.slane %v11433_v56, 2 }
 0x371   : > { %v11436_v16 = vpop.f32.mrf.mxu0  ;;  %v1786_v50 = vadd.f32 %v1748_v7, %v1309_v55  ;;  %v3262_v55 = vld [vmem:[#allocation2 + $0x88] sm:$0x3] }
 0x372   : > { %v11428_v38 = vpop.f32.mrf.mxu1  ;;  %v3406_v36 = vld.sshfl [vmem:[#allocation1] sm:$0xff pattern:$0x73625140]  ;;  %v2116_v7 = vld [vmem:[#allocation3 + $0x8] sm:$0xf] }
 0x373   : > { %13956 = vst [vmem:[#allocation28_spill] sm:$0xff] %v11428_v38  ;;  %v11451_v60 = vadd.f32 %v11280_v3, %v1786_v50 }
 0x374   : > { %3408 = vst [vmem:[#allocation1] ss:$4 sm:$0xff] %v3327_v35  ;;  %v3342_v35 = vrot.slane %v11433_v56, 4 }
 0x375   : > { %3409 = vst [vmem:[#allocation1 + $0x1] ss:$4 sm:$0xff] %v3328_v12  ;;  %v3332_v12 = vrot.slane %v11397_v49, 2  ;;  %v11460_v3 = vpop.f32.mrf.mxu2  ;;  %v11467_v49 = vld [vmem:[#allocation2 + $0xb0] sm:$0xff] }
 0x376   : > { %3410 = vst [vmem:[#allocation1 + $0x2] ss:$4 sm:$0xff] %v3259_v44  ;;  %v3516_v44 = vpack.c.bf16 %v11391_v15, %v3406_v36  ;;  %v10150_v15 = vld [vmem:[%s13930_s1 + $0x220] sm:$0xff]  ;;  %v2246_v36 = vpop.f32.mrf.mxu3 }
 0x377   : > { %3411 = vst [vmem:[#allocation1 + $0x3] ss:$4 sm:$0xff] %v11377_v32  ;;  %v11446_v4 = vld.sshfl [vmem:[#allocation1 + $0x20] sm:$0xff pattern:$0x73625140]  ;;  %4571 = vmatpush.bf16.msra.mxu0 %v10150_v15 }
 0x378   : > { %3432 = vst [vmem:[#allocation1 + $0x20] ss:$4 sm:$0xff] %v3265_v59  ;;  %v1634_v59 = vld [vmem:[#allocation3 + $0x30] sm:$0xff] }
 0x379   : > { %3433 = vst [vmem:[#allocation1 + $0x21] ss:$4 sm:$0xff] %v11433_v56 }
 0x37a   : > { %v3155_v32 = vpop.f32.mrf.mxu1  ;;  %3434 = vst [vmem:[#allocation1 + $0x22] ss:$4 sm:$0xff] %v3341_v41  ;;  %v1155_v41 = vld [vmem:[#allocation3 + $0xa8] sm:$0xff] }
 0x37b   : > { %v11454_v25 = vadd.f32 %v3155_v32, %v11294_v28  ;;  %3435 = vst [vmem:[#allocation1 + $0x23] ss:$4 sm:$0xff] %v3342_v35  ;;  %v11462_v28 = vpop.f32.mrf.mxu0  ;;  %v11471_v35 = vld [vmem:[#allocation2 + $0xc0] sm:$0xff]  ;;  %v3346_v32 = vrot.slane %v11467_v49, 6 }
 0x37c   : > { %13957 = vst [vmem:[#allocation29_spill] sm:$0xff] %v11462_v28  ;;  %v3347_v28 = vrot.slane %v11471_v35, 2 }
 0x37d   : > { %3194 = vmatmul.bf16.gmra.mxu1 %v3046_v45  ;;  %v2272_v45 = vadd.f32 %v2246_v36, %v2116_v7  ;;  %v1753_v15 = vpop.f32.mrf.mxu2 }
 0x37e   : > { %v3416_v20 = vld.sshfl [vmem:[#allocation1] sm:$0xff pattern:$0x73625140] }
 0x37f   : > { %3418 = vst [vmem:[#allocation1] ss:$4 sm:$0xff] %v3332_v12  ;;  %3632 = vmatmul.bf16.gmra.mxu2 %v3516_v44  ;;  %v1790_v12 = vadd.f32 %v10993_v8, %v1634_v59  ;;  %v3268_v44 = vld [vmem:[#allocation2 + $0xb8] sm:$0x3] }
 0x380   : > { %3419 = vst [vmem:[#allocation1 + $0x1] ss:$4 sm:$0xff] %v3333_v63  ;;  %v3264_v63 = vld [vmem:[#allocation2 + $0x98] sm:$0xff] }
 0x381   : > { %3420 = vst [vmem:[#allocation1 + $0x2] ss:$4 sm:$0xff] %v3334_v24  ;;  %v1311_v24 = vadd.f32 %v11315_v26, %v1155_v41  ;;  %v3338_v7 = vrot.slane %v3264_v63, 2  ;;  %v3340_v26 = vrot.slane %v3264_v63, 6  ;;  %v2248_v41 = vpop.f32.mrf.mxu3 }
 0x382   : > { %3421 = vst [vmem:[#allocation1 + $0x3] ss:$4 sm:$0xff] %v3262_v55  ;;  %v11469_v50 = vpop.f32.mrf.mxu1  ;;  %v11475_v38 = vld.sshfl [vmem:[#allocation1 + $0x20] sm:$0xff pattern:$0x73625140]  ;;  %v2268_v55 = vadd.f32 %v11368_v18, %v1790_v12 }
 0x383   : > { %13958 = vst [vmem:[#allocation30_spill] sm:$0xff] %v11469_v50  ;;  %v2713_v36 = vpop.f32.mrf.mxu0  ;;  %v3339_v50 = vrot.slane %v3264_v63, 4  ;;  %v1788_v59 = vadd.f32 %v1753_v15, %v1311_v24  ;;  %v3270_v24 = vld [vmem:[#allocation2 + $0xc8] sm:$0xff]  ;;  %v1636_v15 = vld [vmem:[#allocation3 + $0x80] sm:$0xff]  ;;  %v3272_v41 = vld [vmem:[#allocation2 + $0xd8] sm:$0xff] }
 0x384   : > { %2295 = vst [vmem:[#allocation3 + $0x8] sm:$0xf] %v2272_v45  ;;  %v11481_v45 = vadd.f32 %v2713_v36, %v2268_v55  ;;  %v3351_v55 = vrot.slane %v3270_v24, 4  ;;  %v1792_v58 = vadd.f32 %v11003_v40, %v1636_v15  ;;  %v3345_v36 = vrot.slane %v11467_v49, 4 }
 0x385   : > { %3442 = vst [vmem:[#allocation1 + $0x20] ss:$4 sm:$0xff] %v3346_v32  ;;  %v11486_v18 = vadd.f32 %v11313_v17, %v1788_v59  ;;  %v10141_v17 = vld [vmem:[%s13930_s1 + $0x1d8] sm:$0xff]  ;;  %v10139_v59 = vld [vmem:[%s13930_s1 + $0x1c8] sm:$0xff]  ;;  %v3350_v15 = vrot.slane %v3270_v24, 2 }
 0x386   : > { %3443 = vst [vmem:[#allocation1 + $0x21] ss:$4 sm:$0xff] %v3268_v44  ;;  %v3517_v44 = vpack.c.bf16 %v11412_v31, %v3416_v20  ;;  %v3271_v31 = vld [vmem:[#allocation2 + $0xd0] sm:$0x3]  ;;  %4095 = vmatpush.bf16.msrb.mxu3 %v10141_v17  ;;  %v2270_v40 = vadd.f32 %v11414_v11, %v1792_v58  ;;  %v3348_v11 = vrot.slane %v11471_v35, 4 }
 0x387   : > { %3444 = vst [vmem:[#allocation1 + $0x22] ss:$4 sm:$0xff] %v11471_v35 }
 0x388   : > { %3445 = vst [vmem:[#allocation1 + $0x23] ss:$4 sm:$0xff] %v3347_v28  ;;  %v3352_v28 = vrot.slane %v3270_v24, 6 }
 0x389   : > { %v3426_v8 = vld.sshfl [vmem:[#allocation1] sm:$0xff pattern:$0x73625140] }
 0x38a   : > { %v3160_v32 = vpop.f32.mrf.mxu1  ;;  %3428 = vst [vmem:[#allocation1] ss:$4 sm:$0xff] %v3264_v63  ;;  %v3343_v63 = vrot.slane %v11433_v56, 6  ;;  %4096 = vmatpush.bf16.msrb.mxu3 %v10140_v30 }
 0x38b   : > { %v11489_v12 = vadd.f32 %v3160_v32, %v11332_v57  ;;  %3429 = vst [vmem:[#allocation1 + $0x1] ss:$4 sm:$0xff] %v3338_v7  ;;  %v11497_v57 = vpop.f32.mrf.mxu0  ;;  %v11510_v7 = vadd.f32 %v11359_v42, %v2262_v10  ;;  %v3349_v10 = vrot.slane %v11471_v35, 6  ;;  %v11533_v35 = vadd.f32 %v11401_v19, %v11451_v60  ;;  %v3275_v19 = vld [vmem:[#allocation2 + $0xf0] sm:$0xff] }
 0x38c   : > { %3430 = vst [vmem:[#allocation1 + $0x2] ss:$4 sm:$0xff] %v3339_v50  ;;  %v3344_v50 = vrot.slane %v11467_v49, 2  ;;  %v3359_v60 = vrot.slane %v3275_v19, 2 }
 0x38d   : > { %3199 = vmatmul.bf16.gmra.mxu1 %v3047_v54  ;;  %3431 = vst [vmem:[#allocation1 + $0x3] ss:$4 sm:$0xff] %v3340_v26 }
 0x38e   : > { %13959 = vst [vmem:[#allocation31_spill] sm:$0xff] %v11497_v57  ;;  %4097 = vmatpush.bf16.msrb.mxu3 %v10139_v59 }
 0x38f   : > { %3637 = vmatmul.bf16.gmra.mxu2 %v3517_v44  ;;  %v11500_v20 = vld.sshfl [vmem:[#allocation1 + $0x20] sm:$0xff pattern:$0x73625140] }
 0x390   : > { %3452 = vst [vmem:[#allocation1 + $0x20] ss:$4 sm:$0xff] %v3351_v55  ;;  %v10138_v44 = vld [vmem:[%s13930_s1 + $0x1c0] sm:$0xff] }
 0x391   : > { %3453 = vst [vmem:[#allocation1 + $0x21] ss:$4 sm:$0xff] %v3352_v28  ;;  %v3273_v28 = vld [vmem:[#allocation2 + $0xe0] sm:$0xff] }
 0x392   : > { %v11502_v54 = vpop.f32.mrf.mxu1  ;;  %3454 = vst [vmem:[#allocation1 + $0x22] ss:$4 sm:$0xff] %v3271_v31  ;;  %4098 = vmatpush.bf16.msrb.mxu3 %v10138_v44  ;;  %v3357_v31 = vrot.slane %v3273_v28, 4  ;;  %v3358_v58 = vrot.slane %v3273_v28, 6 }
 0x393   : > { %13960 = vst [vmem:[#allocation32_spill] sm:$0xff] %v11502_v54  ;;  %v2718_v26 = vpop.f32.mrf.mxu0 }
 0x394   : > { %v3436_v56 = vld.sshfl [vmem:[#allocation1] sm:$0xff pattern:$0x73625140]  ;;  %v11518_v42 = vadd.f32 %v2718_v26, %v2270_v40  ;;  %3455 = vst [vmem:[#allocation1 + $0x23] ss:$4 sm:$0xff] %v3272_v41 }
 0x395   : > { %3438 = vst [vmem:[#allocation1] ss:$4 sm:$0xff] %v3343_v63  ;;  %v3356_v63 = vrot.slane %v3273_v28, 2  ;;  %v3519_v40 = vpack.c.bf16 %v11475_v38, %v3436_v56  ;;  %v3279_v38 = vld [vmem:[#allocation2 + $0x110] sm:$0xff]  ;;  %v3361_v56 = vrot.slane %v3275_v19, 6 }
 0x396   : > { %3439 = vst [vmem:[#allocation1 + $0x1] ss:$4 sm:$0xff] %v11467_v49  ;;  %v3518_v49 = vpack.c.bf16 %v11446_v4, %v3426_v8  ;;  %v3353_v4 = vrot.slane %v3272_v41, 2  ;;  %v3354_v8 = vrot.slane %v3272_v41, 4 }
 0x397   : > { %3440 = vst [vmem:[#allocation1 + $0x2] ss:$4 sm:$0xff] %v3344_v50  ;;  %v3355_v50 = vrot.slane %v3272_v41, 6  ;;  %v3360_v41 = vrot.slane %v3275_v19, 4 }
 0x398   : > { %3441 = vst [vmem:[#allocation1 + $0x3] ss:$4 sm:$0xff] %v3345_v36  ;;  %v3276_v36 = vld [vmem:[#allocation2 + $0xf8] sm:$0xff] }
 0x399   : > { %v3363_v26 = vrot.slane %v3276_v36, 4  ;;  %v3364_v44 = vrot.slane %v3276_v36, 6 }
 0x39a   : > { %v3165_v32 = vpop.f32.mrf.mxu1 }
 0x39b   : > { %v11524_v55 = vadd.f32 %v3165_v32, %v11374_v22  ;;  %v11529_v30 = vld.sshfl [vmem:[#allocation1 + $0x20] sm:$0xff pattern:$0x73625140]  ;;  %v3274_v22 = vld [vmem:[#allocation2 + $0xe8] sm:$0x3] }
 0x39c   : > { %3462 = vst [vmem:[#allocation1 + $0x20] ss:$4 sm:$0xff] %v3356_v63 }
 0x39d   : > { %3463 = vst [vmem:[#allocation1 + $0x21] ss:$4 sm:$0xff] %v3357_v31  ;;  %v11546_v31 = vadd.f32 %v11436_v16, %v11486_v18  ;;  %v11554_v16 = vpop.f32.mrf.mxu0 }
 0x39e   : > { %3464 = vst [vmem:[#allocation1 + $0x22] ss:$4 sm:$0xff] %v3358_v58 }
 0x39f   : > { %v3446_v17 = vld.sshfl [vmem:[#allocation1] sm:$0xff pattern:$0x73625140]  ;;  %3642 = vmatmul.bf16.gmra.mxu2 %v3518_v49  ;;  %3465 = vst [vmem:[#allocation1 + $0x23] ss:$4 sm:$0xff] %v3274_v22 }
 0x3a0   : > { %3448 = vst [vmem:[#allocation1] ss:$4 sm:$0xff] %v3348_v11  ;;  %v3278_v11 = vld [vmem:[#allocation2 + $0x108] sm:$0xff]  ;;  %v3520_v58 = vpack.c.bf16 %v11500_v20, %v3446_v17  ;;  %v3277_v22 = vld [vmem:[#allocation2 + $0x100] sm:$0x3] }
 0x3a1   : > { %3449 = vst [vmem:[#allocation1 + $0x1] ss:$4 sm:$0xff] %v3349_v10  ;;  %v3367_v10 = vrot.slane %v3278_v11, 6 }
 0x3a2   : > { %3450 = vst [vmem:[#allocation1 + $0x2] ss:$4 sm:$0xff] %v3270_v24  ;;  %v3362_v24 = vrot.slane %v3276_v36, 2  ;;  %v11556_v18 = vpop.f32.mrf.mxu1 }
 0x3a3   : > { %3451 = vst [vmem:[#allocation1 + $0x3] ss:$4 sm:$0xff] %v3350_v15  ;;  %v3369_v15 = vrot.slane %v3279_v38, 4 }
 0x3a4   : > { %13961 = vst [vmem:[#allocation33_spill] sm:$0xff] %v11556_v18  ;;  %v3737_v18 = vld [vmem:[#allocation2 + $0x79] sm:$0xff] }
 0x3a6   : > { %v11538_v32 = vld.sshfl [vmem:[#allocation1 + $0x20] sm:$0xff pattern:$0x73625140] }
 0x3a7   : > { %3472 = vst [vmem:[#allocation1 + $0x20] ss:$4 sm:$0xff] %v3276_v36 }
 0x3a8   : > { %3473 = vst [vmem:[#allocation1 + $0x21] ss:$4 sm:$0xff] %v3362_v24  ;;  %v10149_v24 = vld [vmem:[%s13930_s1 + $0x218] sm:$0xff] }
 0x3a9   : > { %3474 = vst [vmem:[#allocation1 + $0x22] ss:$4 sm:$0xff] %v3363_v26  ;;  %4572 = vmatpush.bf16.msra.mxu0 %v10149_v24 }
 0x3aa   : > { %v11535_v59 = vld.sshfl [vmem:[#allocation1] sm:$0xff pattern:$0x73625140]  ;;  %3475 = vst [vmem:[#allocation1 + $0x23] ss:$4 sm:$0xff] %v3364_v44  ;;  %v3370_v44 = vrot.slane %v3279_v38, 6 }
 0x3ab   : > { %3458 = vst [vmem:[#allocation1] ss:$4 sm:$0xff] %v3353_v4  ;;  %v3365_v4 = vrot.slane %v3278_v11, 2 }
 0x3ac   : > { %3459 = vst [vmem:[#allocation1 + $0x1] ss:$4 sm:$0xff] %v3354_v8  ;;  %v3729_v8 = vld [vmem:[#allocation2 + $0x39] sm:$0xff] }
 0x3ad   : > { %3460 = vst [vmem:[#allocation1 + $0x2] ss:$4 sm:$0xff] %v3355_v50  ;;  %v3366_v50 = vrot.slane %v3278_v11, 4  ;;  %v3792_v20 = vrot.slane %v3729_v8, 4  ;;  %v3793_v26 = vrot.slane %v3729_v8, 6 }
 0x3ae   : > { %3461 = vst [vmem:[#allocation1 + $0x3] ss:$4 sm:$0xff] %v3273_v28  ;;  %v3368_v28 = vrot.slane %v3279_v38, 2 }
 0x3af   : > { %3647 = vmatmul.bf16.gmra.mxu2 %v3519_v40  ;;  %v3791_v40 = vrot.slane %v3729_v8, 2 }
 0x3b1   : > { %v11542_v63 = vld.sshfl [vmem:[#allocation1 + $0x20] sm:$0xff pattern:$0x73625140] }
 0x3b2   : > { %3482 = vst [vmem:[#allocation1 + $0x20] ss:$4 sm:$0xff] %v3367_v10 }
 0x3b3   : > { %3483 = vst [vmem:[#allocation1 + $0x21] ss:$4 sm:$0xff] %v3279_v38 }
 0x3b4   : > { %3484 = vst [vmem:[#allocation1 + $0x22] ss:$4 sm:$0xff] %v3368_v28 }
 0x3b5   : > { %v11540_v49 = vld.sshfl [vmem:[#allocation1] sm:$0xff pattern:$0x73625140]  ;;  %3485 = vst [vmem:[#allocation1 + $0x23] ss:$4 sm:$0xff] %v3369_v15  ;;  %v3731_v15 = vld [vmem:[#allocation2 + $0x49] sm:$0xff] }
 0x3b6   : > { %3468 = vst [vmem:[#allocation1] ss:$4 sm:$0xff] %v3275_v19  ;;  %v3280_v19 = vld [vmem:[#allocation2 + $0x118] sm:$0x3] }
 0x3b7   : > { %3469 = vst [vmem:[#allocation1 + $0x1] ss:$4 sm:$0xff] %v3359_v60  ;;  %v2593_v60 = vld [vmem:[#allocation3 + $0x8] sm:$0xf] }
 0x3b8   : > { %3470 = vst [vmem:[#allocation1 + $0x2] ss:$4 sm:$0xff] %v3360_v41  ;;  %v2723_v41 = vpop.f32.mrf.mxu0 }
 0x3b9   : > { %3471 = vst [vmem:[#allocation1 + $0x3] ss:$4 sm:$0xff] %v3361_v56  ;;  %v2749_v10 = vadd.f32 %v2723_v41, %v2593_v60  ;;  %v11579_v60 = vld [vmem:[#allocation2 + $0x69] sm:$0xff] }
 0x3bb   : > { %2772 = vst [vmem:[#allocation3 + $0x8] sm:$0xf] %v2749_v10 }
 0x3bc   : > { %v11558_v17 = vld.sshfl [vmem:[#allocation1 + $0x20] sm:$0xff pattern:$0x73625140] }
 0x3bd   : > { %3856 = vst [vmem:[#allocation1 + $0x20] ss:$4 sm:$0xff] %v3729_v8  ;;  %v3728_v8 = vld [vmem:[#allocation2 + $0x31] sm:$0xff] }
 0x3be   : > { %3858 = vst [vmem:[#allocation1 + $0x21] ss:$4 sm:$0xff] %v3791_v40 }
 0x3bf   : > { %3652 = vmatmul.bf16.gmra.mxu2 %v3520_v58  ;;  %3860 = vst [vmem:[#allocation1 + $0x22] ss:$4 sm:$0xff] %v3792_v20  ;;  %v11565_v58 = vld [vmem:[#allocation2 + $0x51] sm:$0xff]  ;;  %v3789_v20 = vrot.slane %v3728_v8, 4 }
 0x3c0   : > { %v11549_v36 = vld.sshfl [vmem:[#allocation1] sm:$0xff pattern:$0x73625140]  ;;  %3862 = vst [vmem:[#allocation1 + $0x23] ss:$4 sm:$0xff] %v3793_v26  ;;  %v3797_v38 = vrot.slane %v11565_v58, 2 }
 0x3c1   : > { %3478 = vst [vmem:[#allocation1] ss:$4 sm:$0xff] %v3277_v22  ;;  %v3521_v22 = vpack.c.bf16 %v11529_v30, %v11535_v59  ;;  %v3798_v40 = vrot.slane %v11565_v58, 4  ;;  %v10148_v30 = vld [vmem:[%s13930_s1 + $0x210] sm:$0xff]  ;;  %v2725_v59 = vpop.f32.mrf.mxu0 }
 0x3c2   : > { %3479 = vst [vmem:[#allocation1 + $0x1] ss:$4 sm:$0xff] %v3278_v11  ;;  %v3170_v11 = vpop.f32.mrf.mxu1  ;;  %4573 = vmatpush.bf16.msra.mxu0 %v10148_v30  ;;  %v3794_v30 = vrot.slane %v3731_v15, 2 }
 0x3c3   : > { %3480 = vst [vmem:[#allocation1 + $0x2] ss:$4 sm:$0xff] %v3365_v4  ;;  %v11563_v28 = vadd.f32 %v3170_v11, %v11440_v34  ;;  %v3796_v4 = vrot.slane %v3731_v15, 6  ;;  %v3788_v34 = vrot.slane %v3728_v8, 2 }
 0x3c4   : > { %3481 = vst [vmem:[#allocation1 + $0x3] ss:$4 sm:$0xff] %v3366_v50 }
 0x3c7   : > { %v3864_v50 = vld.sshfl [vmem:[#allocation1 + $0x20] sm:$0xff pattern:$0x73625140] }
 0x3c8   : > { %3869 = vst [vmem:[#allocation1 + $0x20] ss:$4 sm:$0xff] %v3796_v4  ;;  %v3803_v4 = vrot.slane %v11579_v60, 2 }
 0x3c9   : > { %3870 = vst [vmem:[#allocation1 + $0x21] ss:$4 sm:$0xff] %v11565_v58 }
 0x3ca   : > { %3871 = vst [vmem:[#allocation1 + $0x22] ss:$4 sm:$0xff] %v3797_v38  ;;  %v11572_v24 = vpop.f32.mrf.mxu1  ;;  %v11582_v38 = vpop.f32.mrf.mxu2 }
 0x3cb   : > { %v11560_v56 = vld.sshfl [vmem:[#allocation1] sm:$0xff pattern:$0x73625140]  ;;  %3872 = vst [vmem:[#allocation1 + $0x23] ss:$4 sm:$0xff] %v3798_v40 }
 0x3cc   : > { %3488 = vst [vmem:[#allocation1] ss:$4 sm:$0xff] %v3370_v44  ;;  %v3790_v44 = vrot.slane %v3728_v8, 6 }
 0x3cd   : > { %3489 = vst [vmem:[#allocation1 + $0x1] ss:$4 sm:$0xff] %v3280_v19  ;;  %v3734_v19 = vld [vmem:[#allocation2 + $0x61] sm:$0xff] }
 0x3ce   : > { %v3801_v41 = vrot.slane %v3734_v19, 4  ;;  %v3802_v11 = vrot.slane %v3734_v19, 6 }
 0x3cf   : > { %3657 = vmatmul.bf16.gmra.mxu2 %v3521_v22 }
 0x3d2   : > { %v3874_v10 = vld.sshfl [vmem:[#allocation1 + $0x20] sm:$0xff pattern:$0x73625140]  ;;  %v3175_v22 = vpop.f32.mrf.mxu1 }
 0x3d3   : > { %v11585_v40 = vadd.f32 %v3175_v22, %v11510_v7  ;;  %3879 = vst [vmem:[#allocation1 + $0x20] ss:$4 sm:$0xff] %v3801_v41  ;;  %v3806_v41 = vrot.slane %v3737_v18, 2  ;;  %v3808_v22 = vrot.slane %v3737_v18, 6 }
 0x3d4   : > { %v11577_v26 = vld.sshfl [vmem:[#allocation1] sm:$0xff pattern:$0x73625140]  ;;  %3880 = vst [vmem:[#allocation1 + $0x21] ss:$4 sm:$0xff] %v3802_v11 }
 0x3d5   : > { %3848 = vst [vmem:[#allocation1] ss:$4 sm:$0xff] %v3728_v8  ;;  %v3522_v8 = vpack.c.bf16 %v11538_v32, %v11540_v49  ;;  %v3807_v49 = vrot.slane %v3737_v18, 4 }
 0x3d6   : > { %3850 = vst [vmem:[#allocation1 + $0x1] ss:$4 sm:$0xff] %v3788_v34  ;;  %v3730_v34 = vld [vmem:[#allocation2 + $0x41] sm:$0x3] }
 0x3d7   : > { %3852 = vst [vmem:[#allocation1 + $0x2] ss:$4 sm:$0xff] %v3789_v20  ;;  %v3795_v20 = vrot.slane %v3731_v15, 4 }
 0x3d8   : > { %3854 = vst [vmem:[#allocation1 + $0x3] ss:$4 sm:$0xff] %v3790_v44 }
 0x3d9   : > { %3881 = vst [vmem:[#allocation1 + $0x22] ss:$4 sm:$0xff] %v11579_v60 }
 0x3da   : > { %3882 = vst [vmem:[#allocation1 + $0x23] ss:$4 sm:$0xff] %v3803_v4  ;;  %v11590_v7 = vpop.f32.mrf.mxu1 }
 0x3df   : > { %v3863_v59 = vld.sshfl [vmem:[#allocation1] sm:$0xff pattern:$0x73625140]  ;;  %3662 = vmatmul.bf16.gmra.mxu2 %v3522_v8 }
 0x3e0   : > { %v3991_v44 = vpack.c.bf16 %v3864_v50, %v3863_v59  ;;  %3865 = vst [vmem:[#allocation1] ss:$4 sm:$0xff] %v3730_v34  ;;  %v3799_v50 = vrot.slane %v11565_v58, 6  ;;  %v3733_v8 = vld [vmem:[#allocation2 + $0x59] sm:$0x3]  ;;  %v3523_v58 = vpack.c.bf16 %v11542_v63, %v11549_v36  ;;  %v3805_v63 = vrot.slane %v11579_v60, 6 }
 0x3e1   : > { %3866 = vst [vmem:[#allocation1 + $0x1] ss:$4 sm:$0xff] %v3731_v15  ;;  %v11595_v4 = vld.sshfl [vmem:[#allocation1 + $0x20] sm:$0xff pattern:$0x73625140]  ;;  %v11598_v15 = vld [vmem:[#allocation2 + $0x81] sm:$0xff] }
 0x3e2   : > { %4099 = vmatmul.bf16.vlgmr.msrb.gmra.mxu3 %v3991_v44  ;;  %3867 = vst [vmem:[#allocation1 + $0x2] ss:$4 sm:$0xff] %v3794_v30  ;;  %v3623_v32 = vpop.f32.mrf.mxu2  ;;  %v3800_v30 = vrot.slane %v3734_v19, 2  ;;  %v3180_v59 = vpop.f32.mrf.mxu1  ;;  %v3740_v44 = vld [vmem:[#allocation2 + $0x91] sm:$0xff] }
 0x3e3   : > { %3868 = vst [vmem:[#allocation1 + $0x3] ss:$4 sm:$0xff] %v3795_v20  ;;  %v11593_v11 = vadd.f32 %v3623_v32, %v11366_v37  ;;  %v11604_v37 = vadd.f32 %v3180_v59, %v11533_v35  ;;  %v3812_v32 = vrot.slane %v3740_v44, 2  ;;  %v3814_v54 = vrot.slane %v3740_v44, 6  ;;  %v10147_v35 = vld [vmem:[%s13930_s1 + $0x208] sm:$0xff] }
 0x3e4   : > { %3889 = vst [vmem:[#allocation1 + $0x20] ss:$4 sm:$0xff] %v3806_v41  ;;  %4574 = vmatpush.bf16.msra.mxu0 %v10147_v35  ;;  %v3742_v59 = vld [vmem:[#allocation2 + $0xa1] sm:$0x3] }
 0x3e5   : > { %3890 = vst [vmem:[#allocation1 + $0x21] ss:$4 sm:$0xff] %v3807_v49  ;;  %v3813_v49 = vrot.slane %v3740_v44, 4 }
 0x3e6   : > { %3891 = vst [vmem:[#allocation1 + $0x22] ss:$4 sm:$0xff] %v3808_v22 }
 0x3e7   : > { %3892 = vst [vmem:[#allocation1 + $0x23] ss:$4 sm:$0xff] %v11598_v15 }
 0x3ea   : > { %v3873_v34 = vld.sshfl [vmem:[#allocation1] sm:$0xff pattern:$0x73625140]  ;;  %v11601_v20 = vpop.f32.mrf.mxu2 }
 0x3eb   : > { %3875 = vst [vmem:[#allocation1] ss:$4 sm:$0xff] %v3799_v50  ;;  %v3992_v41 = vpack.c.bf16 %v3874_v10, %v3873_v34  ;;  %v3804_v50 = vrot.slane %v11579_v60, 4  ;;  %v3736_v34 = vld [vmem:[#allocation2 + $0x71] sm:$0x3] }
 0x3ec   : > { %3876 = vst [vmem:[#allocation1 + $0x1] ss:$4 sm:$0xff] %v3733_v8  ;;  %v11614_v8 = vpop.f32.mrf.mxu1 }
 0x3ed   : > { %3877 = vst [vmem:[#allocation1 + $0x2] ss:$4 sm:$0xff] %v3734_v19 }
 0x3ee   : > { %3878 = vst [vmem:[#allocation1 + $0x3] ss:$4 sm:$0xff] %v3800_v30  ;;  %v11608_v22 = vld.sshfl [vmem:[#allocation1 + $0x20] sm:$0xff pattern:$0x73625140]  ;;  %v11620_v30 = vld [vmem:[#allocation2 + $0xa9] sm:$0xff] }
 0x3ef   : > { %3667 = vmatmul.bf16.gmra.mxu2 %v3523_v58  ;;  %3899 = vst [vmem:[#allocation1 + $0x20] ss:$4 sm:$0xff] %v3740_v44  ;;  %v3818_v58 = vrot.slane %v11620_v30, 2 }
 0x3f0   : > { %3900 = vst [vmem:[#allocation1 + $0x21] ss:$4 sm:$0xff] %v3812_v32  ;;  %v3524_v32 = vpack.c.bf16 %v11558_v17, %v11560_v56  ;;  %v10146_v56 = vld [vmem:[%s13930_s1 + $0x200] sm:$0xff] }
 0x3f1   : > { %3901 = vst [vmem:[#allocation1 + $0x22] ss:$4 sm:$0xff] %v3813_v49  ;;  %v3809_v49 = vrot.slane %v11598_v15, 2  ;;  %4575 = vmatpush.bf16.msra.mxu0 %v10146_v56  ;;  %v3525_v56 = vpack.c.bf16 %v11577_v26, %v11577_v26 }
 0x3f2   : > { %4104 = vmatmul.bf16.gmra.mxu3 %v3992_v41  ;;  %v3628_v36 = vpop.f32.mrf.mxu2  ;;  %3902 = vst [vmem:[#allocation1 + $0x23] ss:$4 sm:$0xff] %v3814_v54  ;;  %v3819_v54 = vrot.slane %v11620_v30, 4 }
 0x3f3   : > { %v11618_v19 = vadd.f32 %v3628_v36, %v11409_v47  ;;  %v3744_v36 = vld [vmem:[#allocation2 + $0xb1] sm:$0xff] }
 0x3f4   : > { %v3185_v44 = vpop.f32.mrf.mxu1 }
 0x3f5   : > { %v3883_v10 = vld.sshfl [vmem:[#allocation1] sm:$0xff pattern:$0x73625140]  ;;  %v11626_v41 = vadd.f32 %v3185_v44, %v11546_v31  ;;  %v3811_v31 = vrot.slane %v11598_v15, 6 }
 0x3f6   : > { %3885 = vst [vmem:[#allocation1] ss:$4 sm:$0xff] %v3804_v50  ;;  %v3810_v50 = vrot.slane %v11598_v15, 4  ;;  %v3741_v44 = vld [vmem:[#allocation2 + $0x99] sm:$0xff] }
 0x3f7   : > { %3886 = vst [vmem:[#allocation1 + $0x1] ss:$4 sm:$0xff] %v3805_v63  ;;  %v3739_v63 = vld [vmem:[#allocation2 + $0x89] sm:$0x3] }
 0x3f8   : > { %3887 = vst [vmem:[#allocation1 + $0x2] ss:$4 sm:$0xff] %v3736_v34  ;;  %v3823_v34 = vrot.slane %v3744_v36, 6 }
 0x3f9   : > { %3888 = vst [vmem:[#allocation1 + $0x3] ss:$4 sm:$0xff] %v3737_v18  ;;  %v11628_v47 = vld.sshfl [vmem:[#allocation1 + $0x20] sm:$0xff pattern:$0x73625140]  ;;  %v3993_v18 = vpack.c.bf16 %v11595_v4, %v3883_v10  ;;  %v11643_v10 = vld [vmem:[#allocation2 + $0xc1] sm:$0xff] }
 0x3fa   : > { %v11623_v60 = vpop.f32.mrf.mxu2  ;;  %3909 = vst [vmem:[#allocation1 + $0x20] ss:$4 sm:$0xff] %v3742_v59  ;;  %v3745_v59 = vld [vmem:[#allocation2 + $0xb9] sm:$0x3] }
 0x3fb   : > { %13962 = vst [vmem:[#allocation34_spill] sm:$0xff] %v11623_v60 }
 0x3fc   : > { %3910 = vst [vmem:[#allocation1 + $0x21] ss:$4 sm:$0xff] %v11620_v30  ;;  %v11638_v17 = vpop.f32.mrf.mxu1 }
 0x3fd   : > { %3911 = vst [vmem:[#allocation1 + $0x22] ss:$4 sm:$0xff] %v3818_v58 }
 0x3fe   : > { %3912 = vst [vmem:[#allocation1 + $0x23] ss:$4 sm:$0xff] %v3819_v54  ;;  %v3824_v54 = vrot.slane %v11643_v10, 2 }
 0x3ff   : > { %3672 = vmatmul.bf16.gmra.mxu2 %v3524_v32  ;;  %13963 = vst [vmem:[#allocation35_spill] sm:$0xff] %v11638_v17  ;;  %v3815_v32 = vrot.slane %v3741_v44, 2 }
 0x400   : > { %v3893_v35 = vld.sshfl [vmem:[#allocation1] sm:$0xff pattern:$0x73625140] }
 0x401   : > { %3895 = vst [vmem:[#allocation1] ss:$4 sm:$0xff] %v3809_v49 }
 0x402   : > { %4109 = vmatmul.bf16.gmra.mxu3 %v3993_v18  ;;  %3896 = vst [vmem:[#allocation1 + $0x1] ss:$4 sm:$0xff] %v3810_v50  ;;  %v3633_v4 = vpop.f32.mrf.mxu2  ;;  %v3816_v18 = vrot.slane %v3741_v44, 4 }
 0x403   : > { %3897 = vst [vmem:[#allocation1 + $0x2] ss:$4 sm:$0xff] %v3811_v31  ;;  %v11646_v15 = vadd.f32 %v3633_v4, %v11454_v25  ;;  %v3994_v4 = vpack.c.bf16 %v11608_v22, %v3893_v35  ;;  %v3821_v22 = vrot.slane %v3744_v36, 2  ;;  %v3749_v35 = vld [vmem:[#allocation2 + $0xd9] sm:$0xff] }
 0x404   : > { %3898 = vst [vmem:[#allocation1 + $0x3] ss:$4 sm:$0xff] %v3739_v63  ;;  %v3190_v49 = vpop.f32.mrf.mxu1  ;;  %v3817_v63 = vrot.slane %v3741_v44, 6 }
 0x405   : > { %v11648_v58 = vld.sshfl [vmem:[#allocation1 + $0x20] sm:$0xff pattern:$0x73625140]  ;;  %v11655_v25 = vadd.f32 %v3190_v49, %v11481_v45  ;;  %v3748_v45 = vld [vmem:[#allocation2 + $0xd1] sm:$0x3]  ;;  %v3820_v49 = vrot.slane %v11620_v30, 6 }
 0x406   : > { %3919 = vst [vmem:[#allocation1 + $0x20] ss:$4 sm:$0xff] %v3823_v34  ;;  %v3747_v34 = vld [vmem:[#allocation2 + $0xc9] sm:$0xff] }
 0x407   : > { %3920 = vst [vmem:[#allocation1 + $0x21] ss:$4 sm:$0xff] %v3745_v59  ;;  %v3828_v59 = vrot.slane %v3747_v34, 4 }
 0x408   : > { %3921 = vst [vmem:[#allocation1 + $0x22] ss:$4 sm:$0xff] %v11643_v10 }
 0x409   : > { %3922 = vst [vmem:[#allocation1 + $0x23] ss:$4 sm:$0xff] %v3824_v54  ;;  %v3829_v54 = vrot.slane %v3747_v34, 6 }
 0x40a   : > { %v11652_v31 = vpop.f32.mrf.mxu2 }
 0x40b   : > { %v3903_v50 = vld.sshfl [vmem:[#allocation1] sm:$0xff pattern:$0x73625140]  ;;  %13964 = vst [vmem:[#allocation36_spill] sm:$0xff] %v11652_v31 }
 0x40c   : > { %3905 = vst [vmem:[#allocation1] ss:$4 sm:$0xff] %v3741_v44  ;;  %v11662_v31 = vpop.f32.mrf.mxu1 }
 0x40d   : > { %3906 = vst [vmem:[#allocation1 + $0x1] ss:$4 sm:$0xff] %v3815_v32  ;;  %v3822_v32 = vrot.slane %v3744_v36, 4 }
 0x40e   : > { %3907 = vst [vmem:[#allocation1 + $0x2] ss:$4 sm:$0xff] %v3816_v18  ;;  %v3750_v18 = vld [vmem:[#allocation2 + $0xe1] sm:$0xff] }
 0x40f   : > { %3908 = vst [vmem:[#allocation1 + $0x3] ss:$4 sm:$0xff] %v3817_v63  ;;  %3677 = vmatmul.bf16.gmra.mxu2 %v3525_v56  ;;  %v3833_v56 = vrot.slane %v3750_v18, 2 }
 0x410   : > { %v11660_v57 = vld.sshfl [vmem:[#allocation1 + $0x20] sm:$0xff pattern:$0x73625140]  ;;  %13965 = vst [vmem:[#allocation37_spill] sm:$0xff] %v11662_v31 }
 0x411   : > { %3929 = vst [vmem:[#allocation1 + $0x20] ss:$4 sm:$0xff] %v3828_v59  ;;  %v3995_v59 = vpack.c.bf16 %v11628_v47, %v3903_v50  ;;  %v3832_v47 = vrot.slane %v3749_v35, 6 }
 0x412   : > { %4114 = vmatmul.bf16.gmra.mxu3 %v3994_v4  ;;  %v3638_v60 = vpop.f32.mrf.mxu2  ;;  %3930 = vst [vmem:[#allocation1 + $0x21] ss:$4 sm:$0xff] %v3829_v54  ;;  %v3834_v4 = vrot.slane %v3750_v18, 4  ;;  %v3825_v54 = vrot.slane %v11643_v10, 4 }
 0x413   : > { %v11666_v26 = vadd.f32 %v3638_v60, %v11489_v12  ;;  %3931 = vst [vmem:[#allocation1 + $0x22] ss:$4 sm:$0xff] %v3748_v45  ;;  %v3835_v12 = vrot.slane %v3750_v18, 6  ;;  %v3826_v45 = vrot.slane %v11643_v10, 6 }
 0x414   : > { %3932 = vst [vmem:[#allocation1 + $0x23] ss:$4 sm:$0xff] %v3749_v35  ;;  %v3195_v63 = vpop.f32.mrf.mxu1 }
 0x415   : > { %v11669_v30 = vadd.f32 %v3195_v63, %v11518_v42  ;;  %v3751_v42 = vld [vmem:[#allocation2 + $0xe9] sm:$0x3]  ;;  %v3753_v63 = vld [vmem:[#allocation2 + $0xf9] sm:$0xff] }
 0x416   : > { %v3913_v44 = vld.sshfl [vmem:[#allocation1] sm:$0xff pattern:$0x73625140] }
 0x417   : > { %3915 = vst [vmem:[#allocation1] ss:$4 sm:$0xff] %v3820_v49  ;;  %v3827_v49 = vrot.slane %v3747_v34, 2  ;;  %v3996_v10 = vpack.c.bf16 %v11648_v58, %v3913_v44 }
 0x418   : > { %3916 = vst [vmem:[#allocation1 + $0x1] ss:$4 sm:$0xff] %v3744_v36 }
 0x419   : > { %3917 = vst [vmem:[#allocation1 + $0x2] ss:$4 sm:$0xff] %v3821_v22  ;;  %v3830_v22 = vrot.slane %v3749_v35, 2 }
 0x41a   : > { %3918 = vst [vmem:[#allocation1 + $0x3] ss:$4 sm:$0xff] %v3822_v32  ;;  %v3831_v32 = vrot.slane %v3749_v35, 4 }
 0x41b   : > { %v11671_v60 = vld.sshfl [vmem:[#allocation1 + $0x20] sm:$0xff pattern:$0x73625140] }
 0x41c   : > { %3939 = vst [vmem:[#allocation1 + $0x20] ss:$4 sm:$0xff] %v3833_v56  ;;  %v3839_v56 = vrot.slane %v3753_v63, 2 }
 0x41d   : > { %3940 = vst [vmem:[#allocation1 + $0x21] ss:$4 sm:$0xff] %v3834_v4 }
 0x41e   : > { %3941 = vst [vmem:[#allocation1 + $0x22] ss:$4 sm:$0xff] %v3835_v12  ;;  %v3840_v12 = vrot.slane %v3753_v63, 4 }
 0x41f   : > { %3942 = vst [vmem:[#allocation1 + $0x23] ss:$4 sm:$0xff] %v3751_v42 }
 0x421   : > { %v3923_v36 = vld.sshfl [vmem:[#allocation1] sm:$0xff pattern:$0x73625140] }
 0x422   : > { %4119 = vmatmul.bf16.gmra.mxu3 %v3995_v59  ;;  %3925 = vst [vmem:[#allocation1] ss:$4 sm:$0xff] %v3825_v54  ;;  %v3841_v59 = vrot.slane %v3753_v63, 6 }
 0x423   : > { %3926 = vst [vmem:[#allocation1 + $0x1] ss:$4 sm:$0xff] %v3826_v45  ;;  %v3755_v45 = vld [vmem:[#allocation2 + $0x109] sm:$0xff] }
 0x424   : > { %3927 = vst [vmem:[#allocation1 + $0x2] ss:$4 sm:$0xff] %v3747_v34  ;;  %v3752_v34 = vld [vmem:[#allocation2 + $0xf1] sm:$0xff]  ;;  %v3844_v44 = vrot.slane %v3755_v45, 6 }
 0x425   : > { %3928 = vst [vmem:[#allocation1 + $0x3] ss:$4 sm:$0xff] %v3827_v49  ;;  %v3836_v35 = vrot.slane %v3752_v34, 2  ;;  %v3837_v54 = vrot.slane %v3752_v34, 4  ;;  %v3756_v49 = vld [vmem:[#allocation2 + $0x111] sm:$0xff]  ;;  %v3838_v42 = vrot.slane %v3752_v34, 6 }
 0x426   : > { %v11679_v4 = vld.sshfl [vmem:[#allocation1 + $0x20] sm:$0xff pattern:$0x73625140] }
 0x427   : > { %3949 = vst [vmem:[#allocation1 + $0x20] ss:$4 sm:$0xff] %v3753_v63 }
 0x428   : > { %3950 = vst [vmem:[#allocation1 + $0x21] ss:$4 sm:$0xff] %v3839_v56  ;;  %v3842_v56 = vrot.slane %v3755_v45, 2 }
 0x429   : > { %3951 = vst [vmem:[#allocation1 + $0x22] ss:$4 sm:$0xff] %v3840_v12  ;;  %v4206_v12 = vld [vmem:[#allocation2 + $0x3a] sm:$0xff] }
 0x42a   : > { %3952 = vst [vmem:[#allocation1 + $0x23] ss:$4 sm:$0xff] %v3841_v59  ;;  %v3843_v59 = vrot.slane %v3755_v45, 4 }
 0x42c   : > { %v11676_v50 = vld.sshfl [vmem:[#allocation1] sm:$0xff pattern:$0x73625140] }
 0x42d   : > { %3935 = vst [vmem:[#allocation1] ss:$4 sm:$0xff] %v3830_v22  ;;  %v11683_v22 = vpop.f32.mrf.mxu2 }
 0x42e   : > { %3936 = vst [vmem:[#allocation1 + $0x1] ss:$4 sm:$0xff] %v3831_v32  ;;  %v3845_v32 = vrot.slane %v3756_v49, 2 }
 0x42f   : > { %3937 = vst [vmem:[#allocation1 + $0x2] ss:$4 sm:$0xff] %v3832_v47  ;;  %v3997_v47 = vpack.c.bf16 %v11660_v57, %v3923_v36  ;;  %v4270_v36 = vrot.slane %v4206_v12, 6 }
 0x430   : > { %3938 = vst [vmem:[#allocation1 + $0x3] ss:$4 sm:$0xff] %v3750_v18  ;;  %v3846_v18 = vrot.slane %v3756_v49, 4 }
 0x431   : > { %13966 = vst [vmem:[#allocation38_spill] sm:$0xff] %v11683_v22  ;;  %v11685_v63 = vld.sshfl [vmem:[#allocation1 + $0x20] sm:$0xff pattern:$0x73625140] }
 0x432   : > { %4124 = vmatmul.bf16.gmra.mxu3 %v3996_v10  ;;  %3959 = vst [vmem:[#allocation1 + $0x20] ss:$4 sm:$0xff] %v3844_v44  ;;  %v3754_v10 = vld [vmem:[#allocation2 + $0x101] sm:$0x3]  ;;  %v4269_v44 = vrot.slane %v4206_v12, 4 }
 0x433   : > { %3960 = vst [vmem:[#allocation1 + $0x21] ss:$4 sm:$0xff] %v3756_v49 }
 0x434   : > { %3961 = vst [vmem:[#allocation1 + $0x22] ss:$4 sm:$0xff] %v3845_v32  ;;  %v3847_v32 = vrot.slane %v3756_v49, 6 }
 0x435   : > { %3962 = vst [vmem:[#allocation1 + $0x23] ss:$4 sm:$0xff] %v3846_v18  ;;  %v4208_v18 = vld [vmem:[#allocation2 + $0x4a] sm:$0xff] }
 0x437   : > { %v11681_v58 = vld.sshfl [vmem:[#allocation1] sm:$0xff pattern:$0x73625140] }
 0x438   : > { %3945 = vst [vmem:[#allocation1] ss:$4 sm:$0xff] %v3752_v34 }
 0x439   : > { %3946 = vst [vmem:[#allocation1 + $0x1] ss:$4 sm:$0xff] %v3836_v35  ;;  %v4268_v35 = vrot.slane %v4206_v12, 2 }
 0x43a   : > { %3947 = vst [vmem:[#allocation1 + $0x2] ss:$4 sm:$0xff] %v3837_v54  ;;  %v3643_v54 = vpop.f32.mrf.mxu2 }
 0x43b   : > { %3948 = vst [vmem:[#allocation1 + $0x3] ss:$4 sm:$0xff] %v3838_v42  ;;  %v11690_v42 = vpop.f32.mrf.mxu1  ;;  %v11693_v22 = vadd.f32 %v3643_v54, %v11524_v55  ;;  %v11701_v55 = vld [vmem:[#allocation2 + $0x52] sm:$0xff] }
 0x43c   : > { %v11695_v57 = vld.sshfl [vmem:[#allocation1 + $0x20] sm:$0xff pattern:$0x73625140]  ;;  %v4274_v49 = vrot.slane %v11701_v55, 2 }
 0x43d   : > { %4333 = vst [vmem:[#allocation1 + $0x20] ss:$4 sm:$0xff] %v4206_v12  ;;  %v4273_v12 = vrot.slane %v4208_v18, 6 }
 0x43e   : > { %4335 = vst [vmem:[#allocation1 + $0x21] ss:$4 sm:$0xff] %v4268_v35  ;;  %v4205_v35 = vld [vmem:[#allocation2 + $0x32] sm:$0xff] }
 0x43f   : > { %4337 = vst [vmem:[#allocation1 + $0x22] ss:$4 sm:$0xff] %v4269_v44  ;;  %v4275_v44 = vrot.slane %v11701_v55, 4 }
 0x440   : > { %4339 = vst [vmem:[#allocation1 + $0x23] ss:$4 sm:$0xff] %v4270_v36 }
 0x442   : > { %4129 = vmatmul.bf16.gmra.mxu3 %v3997_v47  ;;  %v11688_v34 = vld.sshfl [vmem:[#allocation1] sm:$0xff pattern:$0x73625140]  ;;  %v11697_v47 = vpop.f32.mrf.mxu2 }
 0x443   : > { %3955 = vst [vmem:[#allocation1] ss:$4 sm:$0xff] %v3754_v10  ;;  %v3070_v10 = vld [vmem:[#allocation3 + $0x8] sm:$0xf]  ;;  %v3200_v31 = vpop.f32.mrf.mxu1 }
 0x444   : > { %3956 = vst [vmem:[#allocation1 + $0x1] ss:$4 sm:$0xff] %v3755_v45  ;;  %v3757_v45 = vld [vmem:[#allocation2 + $0x119] sm:$0x3]  ;;  %v3226_v17 = vadd.f32 %v3200_v31, %v3070_v10  ;;  %v4265_v31 = vrot.slane %v4205_v35, 2  ;;  %v4266_v10 = vrot.slane %v4205_v35, 4 }
 0x445   : > { %3957 = vst [vmem:[#allocation1 + $0x2] ss:$4 sm:$0xff] %v3842_v56 }
 0x446   : > { %3958 = vst [vmem:[#allocation1 + $0x3] ss:$4 sm:$0xff] %v3843_v59  ;;  %v3998_v59 = vpack.c.bf16 %v11671_v60, %v11676_v50  ;;  %v4267_v50 = vrot.slane %v4205_v35, 6 }
 0x447   : > { %13967 = vst [vmem:[#allocation39_spill] sm:$0xff] %v11697_v47  ;;  %v4341_v54 = vld.sshfl [vmem:[#allocation1 + $0x20] sm:$0xff pattern:$0x73625140] }
 0x448   : > { %3249 = vst [vmem:[#allocation3 + $0x8] sm:$0xf] %v3226_v17 }
 0x449   : > { %4346 = vst [vmem:[#allocation1 + $0x20] ss:$4 sm:$0xff] %v4273_v12 }
 0x44a   : > { %4347 = vst [vmem:[#allocation1 + $0x21] ss:$4 sm:$0xff] %v11701_v55  ;;  %v3648_v36 = vpop.f32.mrf.mxu2 }
 0x44b   : > { %4348 = vst [vmem:[#allocation1 + $0x22] ss:$4 sm:$0xff] %v4274_v49  ;;  %v11709_v60 = vadd.f32 %v3648_v36, %v11563_v28  ;;  %v3999_v28 = vpack.c.bf16 %v11679_v4, %v11681_v58  ;;  %v4207_v36 = vld [vmem:[#allocation2 + $0x42] sm:$0x3]  ;;  %v10169_v4 = vld [vmem:[%s13931_s2 + $0x38] sm:$0xff] }
 0x44c   : > { %4349 = vst [vmem:[#allocation1 + $0x23] ss:$4 sm:$0xff] %v4275_v44  ;;  %5887 = vmatpush.bf16.msra.mxu1 %v10169_v4 }
 0x44d   : > { %v11699_v56 = vld.sshfl [vmem:[#allocation1] sm:$0xff pattern:$0x73625140] }
 0x44e   : > { %3965 = vst [vmem:[#allocation1] ss:$4 sm:$0xff] %v3847_v32  ;;  %v3202_v32 = vpop.f32.mrf.mxu1 }
 0x44f   : > { %3966 = vst [vmem:[#allocation1 + $0x1] ss:$4 sm:$0xff] %v3757_v45  ;;  %v4211_v45 = vld [vmem:[#allocation2 + $0x62] sm:$0xff]  ;;  %v4272_v32 = vrot.slane %v4208_v18, 4 }
 0x450   : > { %v4278_v12 = vrot.slane %v4211_v45, 4  ;;  %v4279_v47 = vrot.slane %v4211_v45, 6 }
 0x452   : > { %4134 = vmatmul.bf16.gmra.mxu3 %v3998_v59  ;;  %v11713_v59 = vld [vmem:[#allocation2 + $0x6a] sm:$0xff]  ;;  %v11715_v61 = vpop.f32.mrf.mxu2 }
 0x453   : > { %v4351_v49 = vld.sshfl [vmem:[#allocation1 + $0x20] sm:$0xff pattern:$0x73625140]  ;;  %v4280_v44 = vrot.slane %v11713_v59, 2 }
 0x454   : > { %4356 = vst [vmem:[#allocation1 + $0x20] ss:$4 sm:$0xff] %v4278_v12  ;;  %v10177_v12 = vld [vmem:[%s13931_s2 + $0x78] sm:$0xff] }
 0x455   : > { %4357 = vst [vmem:[#allocation1 + $0x21] ss:$4 sm:$0xff] %v4279_v47  ;;  %6300 = vmatpush.bf16.msra.mxu2 %v10177_v12  ;;  %v4000_v12 = vpack.c.bf16 %v11685_v63, %v11688_v34 }
 0x456   : > { %v11711_v17 = vld.sshfl [vmem:[#allocation1] sm:$0xff pattern:$0x73625140]  ;;  %4358 = vst [vmem:[#allocation1 + $0x22] ss:$4 sm:$0xff] %v11713_v59 }
 0x457   : > { %4325 = vst [vmem:[#allocation1] ss:$4 sm:$0xff] %v4205_v35  ;;  %v4271_v35 = vrot.slane %v4208_v18, 2 }
 0x458   : > { %4327 = vst [vmem:[#allocation1 + $0x1] ss:$4 sm:$0xff] %v4265_v31 }
 0x459   : > { %4329 = vst [vmem:[#allocation1 + $0x2] ss:$4 sm:$0xff] %v4266_v10 }
 0x45a   : > { %4331 = vst [vmem:[#allocation1 + $0x3] ss:$4 sm:$0xff] %v4267_v50  ;;  %v3653_v50 = vpop.f32.mrf.mxu2 }
 0x45b   : > { %4359 = vst [vmem:[#allocation1 + $0x23] ss:$4 sm:$0xff] %v4280_v44  ;;  %v11728_v58 = vadd.f32 %v3653_v50, %v11585_v40  ;;  %v4277_v50 = vrot.slane %v4211_v45, 2 }
 0x461   : > { %v4340_v31 = vld.sshfl [vmem:[#allocation1] sm:$0xff pattern:$0x73625140] }
 0x462   : > { %v4468_v10 = vpack.c.bf16 %v4341_v54, %v4340_v31  ;;  %4342 = vst [vmem:[#allocation1] ss:$4 sm:$0xff] %v4207_v36  ;;  %4139 = vmatmul.bf16.gmra.mxu3 %v3999_v28  ;;  %v4214_v54 = vld [vmem:[#allocation2 + $0x7a] sm:$0xff]  ;;  %v4215_v31 = vld [vmem:[#allocation2 + $0x82] sm:$0xff]  ;;  %v11734_v48 = vpop.f32.mrf.mxu2 }
 0x463   : > { %4343 = vst [vmem:[#allocation1 + $0x1] ss:$4 sm:$0xff] %v4208_v18  ;;  %v4283_v18 = vrot.slane %v4214_v54, 2  ;;  %v4284_v28 = vrot.slane %v4214_v54, 4  ;;  %v4285_v36 = vrot.slane %v4214_v54, 6 }
 0x464   : > { %4576 = vmatmul.bf16.vlgmr.msra.gmra.mxu0 %v4468_v10  ;;  %4344 = vst [vmem:[#allocation1 + $0x2] ss:$4 sm:$0xff] %v4271_v35  ;;  %v4361_v35 = vld.sshfl [vmem:[#allocation1 + $0x20] sm:$0xff pattern:$0x73625140]  ;;  %v4276_v10 = vrot.slane %v11701_v55, 6 }
 0x465   : > { %4345 = vst [vmem:[#allocation1 + $0x3] ss:$4 sm:$0xff] %v4272_v32  ;;  %v4100_v47 = vpop.f32.mrf.mxu3  ;;  %v4210_v32 = vld [vmem:[#allocation2 + $0x5a] sm:$0x3]  ;;  %v4281_v55 = vrot.slane %v11713_v59, 4 }
 0x466   : > { %v11731_v44 = vadd.f32 %v4100_v47, %v11593_v11  ;;  %4366 = vst [vmem:[#allocation1 + $0x20] ss:$4 sm:$0xff] %v4283_v18 }
 0x467   : > { %4367 = vst [vmem:[#allocation1 + $0x21] ss:$4 sm:$0xff] %v4284_v28  ;;  %v10176_v28 = vld [vmem:[%s13931_s2 + $0x70] sm:$0xff] }
 0x468   : > { %4368 = vst [vmem:[#allocation1 + $0x22] ss:$4 sm:$0xff] %v4285_v36  ;;  %v4217_v36 = vld [vmem:[#allocation2 + $0x92] sm:$0xff]  ;;  %6301 = vmatpush.bf16.msra.mxu2 %v10176_v28  ;;  %v4287_v28 = vrot.slane %v4215_v31, 4 }
 0x469   : > { %4369 = vst [vmem:[#allocation1 + $0x23] ss:$4 sm:$0xff] %v4215_v31  ;;  %v4289_v34 = vrot.slane %v4217_v36, 2 }
 0x46a   : > { %v3658_v18 = vpop.f32.mrf.mxu2 }
 0x46c   : > { %v4350_v40 = vld.sshfl [vmem:[#allocation1] sm:$0xff pattern:$0x73625140] }
 0x46d   : > { %4352 = vst [vmem:[#allocation1] ss:$4 sm:$0xff] %v4276_v10  ;;  %v11736_v11 = vpop.f32.mrf.mxu3  ;;  %v4469_v4 = vpack.c.bf16 %v4351_v49, %v4350_v40  ;;  %v4282_v10 = vrot.slane %v11713_v59, 6 }
 0x46e   : > { %4353 = vst [vmem:[#allocation1 + $0x1] ss:$4 sm:$0xff] %v4210_v32  ;;  %v11748_v32 = vadd.f32 %v3658_v18, %v11604_v37 }
 0x46f   : > { %4354 = vst [vmem:[#allocation1 + $0x2] ss:$4 sm:$0xff] %v4211_v45  ;;  %v4213_v45 = vld [vmem:[#allocation2 + $0x72] sm:$0x3] }
 0x470   : > { %4355 = vst [vmem:[#allocation1 + $0x3] ss:$4 sm:$0xff] %v4277_v50  ;;  %v11741_v47 = vld.sshfl [vmem:[#allocation1 + $0x20] sm:$0xff pattern:$0x73625140]  ;;  %v4290_v50 = vrot.slane %v4217_v36, 4 }
 0x471   : > { %4376 = vst [vmem:[#allocation1 + $0x20] ss:$4 sm:$0xff] %v4217_v36 }
 0x472   : > { %4144 = vmatmul.bf16.gmra.mxu3 %v4000_v12  ;;  %4377 = vst [vmem:[#allocation1 + $0x21] ss:$4 sm:$0xff] %v4289_v34  ;;  %v4291_v12 = vrot.slane %v4217_v36, 6  ;;  %v11753_v59 = vpop.f32.mrf.mxu2 }
 0x473   : > { %4378 = vst [vmem:[#allocation1 + $0x22] ss:$4 sm:$0xff] %v4290_v50 }
 0x474   : > { %4581 = vmatmul.bf16.gmra.mxu0 %v4469_v4  ;;  %4379 = vst [vmem:[#allocation1 + $0x23] ss:$4 sm:$0xff] %v4291_v12  ;;  %v4001_v4 = vpack.c.bf16 %v11695_v57, %v11699_v56  ;;  %v4219_v56 = vld [vmem:[#allocation2 + $0xa2] sm:$0x3]  ;;  %v4218_v12 = vld [vmem:[#allocation2 + $0x9a] sm:$0xff] }
 0x475   : > { %v4105_v63 = vpop.f32.mrf.mxu3 }
 0x476   : > { %v11751_v49 = vadd.f32 %v4105_v63, %v11618_v19  ;;  %v4286_v19 = vrot.slane %v4215_v31, 2  ;;  %v4288_v63 = vrot.slane %v4215_v31, 6 }
 0x477   : > { %v4360_v40 = vld.sshfl [vmem:[#allocation1] sm:$0xff pattern:$0x73625140] }
 0x478   : > { %4362 = vst [vmem:[#allocation1] ss:$4 sm:$0xff] %v4281_v55  ;;  %v4470_v18 = vpack.c.bf16 %v4361_v35, %v4360_v40  ;;  %v4216_v55 = vld [vmem:[#allocation2 + $0x8a] sm:$0x3] }
 0x479   : > { %4363 = vst [vmem:[#allocation1 + $0x1] ss:$4 sm:$0xff] %v4282_v10  ;;  %v4220_v35 = vld [vmem:[#allocation2 + $0xaa] sm:$0xff] }
 0x47a   : > { %4364 = vst [vmem:[#allocation1 + $0x2] ss:$4 sm:$0xff] %v4213_v45  ;;  %v3663_v36 = vpop.f32.mrf.mxu2  ;;  %v4295_v40 = vrot.slane %v4220_v35, 2  ;;  %v4296_v50 = vrot.slane %v4220_v35, 4 }
 0x47b   : > { %4365 = vst [vmem:[#allocation1 + $0x3] ss:$4 sm:$0xff] %v4214_v54  ;;  %v10168_v54 = vld [vmem:[%s13931_s2 + $0x30] sm:$0xff]  ;;  %v11763_v10 = vadd.f32 %v3663_v36, %v11626_v41  ;;  %v4381_v31 = vld.sshfl [vmem:[#allocation1 + $0x20] sm:$0xff pattern:$0x73625140] }
 0x47c   : > { %5888 = vmatpush.bf16.msra.mxu1 %v10168_v54  ;;  %4386 = vst [vmem:[#allocation1 + $0x20] ss:$4 sm:$0xff] %v4219_v56  ;;  %v4293_v41 = vrot.slane %v4218_v12, 4  ;;  %v4297_v54 = vrot.slane %v4220_v35, 6  ;;  %v10167_v56 = vld [vmem:[%s13931_s2 + $0x28] sm:$0xff] }
 0x47d   : > { %v11755_v37 = vpop.f32.mrf.mxu3  ;;  %4387 = vst [vmem:[#allocation1 + $0x21] ss:$4 sm:$0xff] %v4220_v35 }
 0x47e   : > { %4388 = vst [vmem:[#allocation1 + $0x22] ss:$4 sm:$0xff] %v4295_v40  ;;  %v4221_v40 = vld [vmem:[#allocation2 + $0xb2] sm:$0xff] }
 0x47f   : > { %4389 = vst [vmem:[#allocation1 + $0x23] ss:$4 sm:$0xff] %v4296_v50 }
 0x480   : > { %5889 = vmatpush.bf16.msra.mxu1 %v10167_v56 }
 0x482   : > { %v4370_v34 = vld.sshfl [vmem:[#allocation1] sm:$0xff pattern:$0x73625140]  ;;  %4149 = vmatmul.bf16.gmra.mxu3 %v4001_v4  ;;  %v4292_v4 = vrot.slane %v4218_v12, 2 }
 0x483   : > { %4372 = vst [vmem:[#allocation1] ss:$4 sm:$0xff] %v4286_v19  ;;  %v11768_v19 = vpop.f32.mrf.mxu2 }
 0x484   : > { %4586 = vmatmul.bf16.gmra.mxu0 %v4470_v18  ;;  %4373 = vst [vmem:[#allocation1 + $0x1] ss:$4 sm:$0xff] %v4287_v28 }
 0x485   : > { %4374 = vst [vmem:[#allocation1 + $0x2] ss:$4 sm:$0xff] %v4288_v63  ;;  %v4110_v57 = vpop.f32.mrf.mxu3  ;;  %v4294_v63 = vrot.slane %v4218_v12, 6 }
 0x486   : > { %4375 = vst [vmem:[#allocation1 + $0x3] ss:$4 sm:$0xff] %v4216_v55  ;;  %v11766_v45 = vadd.f32 %v4110_v57, %v11646_v15  ;;  %v4002_v55 = vpack.c.bf16 %v11711_v17, %v11711_v17  ;;  %v4471_v15 = vpack.c.bf16 %v11741_v47, %v4370_v34  ;;  %v10175_v57 = vld [vmem:[%s13931_s2 + $0x68] sm:$0xff]  ;;  %v11781_v17 = vld.sshfl [vmem:[#allocation1 + $0x20] sm:$0xff pattern:$0x73625140] }
 0x487   : > { %v4222_v34 = vld [vmem:[#allocation2 + $0xba] sm:$0x3]  ;;  %6302 = vmatpush.bf16.msra.mxu2 %v10175_v57 }
 0x488   : > { %4397 = vst [vmem:[#allocation1 + $0x21] ss:$4 sm:$0xff] %v4222_v34 }
 0x48b   : > { %v3668_v36 = vpop.f32.mrf.mxu2 }
 0x48c   : > { %v11784_v50 = vadd.f32 %v3668_v36, %v11655_v25 }
 0x48d   : > { %v4380_v18 = vld.sshfl [vmem:[#allocation1] sm:$0xff pattern:$0x73625140]  ;;  %v11770_v28 = vpop.f32.mrf.mxu3 }
 0x48e   : > { %4382 = vst [vmem:[#allocation1] ss:$4 sm:$0xff] %v4218_v12  ;;  %v4300_v12 = vrot.slane %v4221_v40, 6  ;;  %v4472_v57 = vpack.c.bf16 %v4381_v31, %v4380_v18  ;;  %v4224_v18 = vld [vmem:[#allocation2 + $0xca] sm:$0xff] }
 0x48f   : > { %4383 = vst [vmem:[#allocation1 + $0x1] ss:$4 sm:$0xff] %v4292_v4  ;;  %v4223_v4 = vld [vmem:[#allocation2 + $0xc2] sm:$0xff] }
 0x490   : > { %4384 = vst [vmem:[#allocation1 + $0x2] ss:$4 sm:$0xff] %v4293_v41  ;;  %v4298_v41 = vrot.slane %v4221_v40, 2  ;;  %v4302_v56 = vrot.slane %v4223_v4, 4 }
 0x491   : > { %4385 = vst [vmem:[#allocation1 + $0x3] ss:$4 sm:$0xff] %v4294_v63 }
 0x492   : > { %4154 = vmatmul.bf16.gmra.mxu3 %v4002_v55  ;;  %4396 = vst [vmem:[#allocation1 + $0x20] ss:$4 sm:$0xff] %v4300_v12  ;;  %v4299_v55 = vrot.slane %v4221_v40, 4 }
 0x493   : > { %4398 = vst [vmem:[#allocation1 + $0x22] ss:$4 sm:$0xff] %v4223_v4  ;;  %v11789_v25 = vpop.f32.mrf.mxu2 }
 0x494   : > { %4591 = vmatmul.bf16.gmra.mxu0 %v4471_v15  ;;  %v4301_v15 = vrot.slane %v4223_v4, 2 }
 0x495   : > { %v4115_v47 = vpop.f32.mrf.mxu3 }
 0x496   : > { %v11787_v35 = vadd.f32 %v4115_v47, %v11666_v26  ;;  %4399 = vst [vmem:[#allocation1 + $0x23] ss:$4 sm:$0xff] %v4301_v15  ;;  %v1637_v26 = vld [vmem:[#allocation3 + $0x20] sm:$0xff]  ;;  %v4303_v47 = vrot.slane %v4223_v4, 6  ;;  %v4225_v4 = vld [vmem:[#allocation2 + $0xd2] sm:$0x3] }
 0x497   : > { %v1793_v34 = vadd.f32 %v11007_v6, %v1637_v26  ;;  %v4305_v15 = vrot.slane %v4224_v18, 4  ;;  %v4306_v26 = vrot.slane %v4224_v18, 6 }
 0x498   : > { %13968 = vst [vmem:[#allocation40_spill] sm:$0xff] %v11787_v35  ;;  %v4390_v63 = vld.sshfl [vmem:[#allocation1] sm:$0xff pattern:$0x73625140] }
 0x499   : > { %4392 = vst [vmem:[#allocation1] ss:$4 sm:$0xff] %v4297_v54 }
 0x49a   : > { %4393 = vst [vmem:[#allocation1 + $0x1] ss:$4 sm:$0xff] %v4221_v40  ;;  %v10174_v40 = vld [vmem:[%s13931_s2 + $0x60] sm:$0xff] }
 0x49b   : > { %4394 = vst [vmem:[#allocation1 + $0x2] ss:$4 sm:$0xff] %v4298_v41  ;;  %v3673_v54 = vpop.f32.mrf.mxu2  ;;  %6303 = vmatpush.bf16.msra.mxu2 %v10174_v40 }
 0x49c   : > { %4395 = vst [vmem:[#allocation1 + $0x3] ss:$4 sm:$0xff] %v4299_v55  ;;  %v11802_v41 = vadd.f32 %v3673_v54, %v11669_v30  ;;  %v4304_v55 = vrot.slane %v4224_v18, 2 }
 0x49d   : > { %v11791_v36 = vpop.f32.mrf.mxu3  ;;  %v11796_v35 = vld.sshfl [vmem:[#allocation1 + $0x20] sm:$0xff pattern:$0x73625140] }
 0x49e   : > { %13969 = vst [vmem:[#allocation41_spill] sm:$0xff] %v11791_v36 }
 0x49f   : > { %4408 = vst [vmem:[#allocation1 + $0x22] ss:$4 sm:$0xff] %v4225_v4 }
 0x4a0   : > { %4406 = vst [vmem:[#allocation1 + $0x20] ss:$4 sm:$0xff] %v4305_v15 }
 0x4a1   : > { %4407 = vst [vmem:[#allocation1 + $0x21] ss:$4 sm:$0xff] %v4306_v26 }
 0x4a3   : > { %v11794_v12 = vld.sshfl [vmem:[#allocation1] sm:$0xff pattern:$0x73625140]  ;;  %v3675_v40 = vpop.f32.mrf.mxu2 }
 0x4a4   : > { %4596 = vmatmul.bf16.gmra.mxu0 %v4472_v57  ;;  %4402 = vst [vmem:[#allocation1] ss:$4 sm:$0xff] %v4302_v56  ;;  %v2271_v57 = vadd.f32 %v11442_v33, %v1793_v34  ;;  %v4226_v56 = vld [vmem:[#allocation2 + $0xda] sm:$0xff] }
 0x4a5   : > { %4403 = vst [vmem:[#allocation1 + $0x1] ss:$4 sm:$0xff] %v4303_v47  ;;  %v4120_v31 = vpop.f32.mrf.mxu3  ;;  %v1150_v47 = vld [vmem:[#allocation3 + $0x98] sm:$0xff]  ;;  %v4309_v33 = vrot.slane %v4226_v56, 6 }
 0x4a6   : > { %v11805_v6 = vadd.f32 %v4120_v31, %v11693_v22  ;;  %4404 = vst [vmem:[#allocation1 + $0x2] ss:$4 sm:$0xff] %v4224_v18  ;;  %v2748_v30 = vadd.f32 %v11554_v16, %v2271_v57  ;;  %v1306_v22 = vadd.f32 %v11241_v39, %v1150_v47  ;;  %v4307_v31 = vrot.slane %v4226_v56, 2  ;;  %v10166_v39 = vld [vmem:[%s13931_s2 + $0x20] sm:$0xff] }
 0x4a7   : > { %4405 = vst [vmem:[#allocation1 + $0x3] ss:$4 sm:$0xff] %v4304_v55  ;;  %v4308_v18 = vrot.slane %v4226_v56, 4  ;;  %v4473_v16 = vpack.c.bf16 %v11781_v17, %v4390_v63  ;;  %v3548_v55 = vld [vmem:[#allocation3 + $0x8] sm:$0xf]  ;;  %5890 = vmatpush.bf16.msra.mxu1 %v10166_v39  ;;  %v4229_v39 = vld [vmem:[#allocation2 + $0xf2] sm:$0xff] }
 0x4a8   : > { %13970 = vst [vmem:[#allocation42_spill] sm:$0xff] %v11805_v6  ;;  %v3225_v54 = vadd.f32 %v11690_v42, %v2748_v30  ;;  %v1783_v4 = vadd.f32 %v11382_v0, %v1306_v22  ;;  %v4227_v0 = vld [vmem:[#allocation2 + $0xe2] sm:$0xff]  ;;  %v1152_v22 = vld [vmem:[#allocation3 + $0x50] sm:$0xff] }
 0x4a9   : > { %4409 = vst [vmem:[#allocation1 + $0x23] ss:$4 sm:$0xff] %v4226_v56  ;;  %v4310_v63 = vrot.slane %v4227_v0, 2  ;;  %v4311_v56 = vrot.slane %v4227_v0, 4 }
 0x4aa   : > { %v3703_v6 = vadd.f32 %v3675_v40, %v3225_v54  ;;  %v2261_v42 = vadd.f32 %v11236_v51, %v1783_v4  ;;  %v4312_v51 = vrot.slane %v4227_v0, 6  ;;  %v4228_v54 = vld [vmem:[#allocation2 + $0xea] sm:$0x3] }
 0x4ab   : > { %v3678_v15 = vpop.f32.mrf.mxu2 }
 0x4ac   : > { %3726 = vst [vmem:[#allocation3 + $0x20] sm:$0xff] %v3703_v6  ;;  %v3704_v26 = vadd.f32 %v3678_v15, %v3548_v55  ;;  %v2738_v17 = vadd.f32 %v11339_v27, %v2261_v42  ;;  %v4230_v55 = vld [vmem:[#allocation2 + $0xfa] sm:$0xff] }
 0x4ad   : > { %v11811_v36 = vpop.f32.mrf.mxu3 }
 0x4ae   : > { %v11813_v34 = vld.sshfl [vmem:[#allocation1] sm:$0xff pattern:$0x73625140]  ;;  %3727 = vst [vmem:[#allocation3 + $0x8] sm:$0xf] %v3704_v26  ;;  %v3215_v30 = vadd.f32 %v11572_v24, %v2738_v17  ;;  %v4314_v26 = vrot.slane %v4229_v39, 4 }
 0x4af   : > { %4412 = vst [vmem:[#allocation1] ss:$4 sm:$0xff] %v4307_v31 }
 0x4b0   : > { %4413 = vst [vmem:[#allocation1 + $0x1] ss:$4 sm:$0xff] %v4308_v18  ;;  %v4411_v47 = vld.sshfl [vmem:[#allocation1 + $0x20] sm:$0xff pattern:$0x73625140]  ;;  %v3693_v40 = vadd.f32 %v11715_v61, %v3215_v30  ;;  %v1308_v18 = vadd.f32 %v11272_v29, %v1152_v22  ;;  %v4313_v29 = vrot.slane %v4229_v39, 2 }
 0x4b1   : > { %4414 = vst [vmem:[#allocation1 + $0x2] ss:$4 sm:$0xff] %v4309_v33  ;;  %v4474_v33 = vpack.c.bf16 %v11796_v35, %v11794_v12  ;;  %v1154_v12 = vld [vmem:[#allocation3 + $0xa0] sm:$0xff] }
 0x4b2   : > { %4415 = vst [vmem:[#allocation1 + $0x3] ss:$4 sm:$0xff] %v4227_v0  ;;  %v1785_v4 = vadd.f32 %v11420_v14, %v1308_v18  ;;  %v4316_v14 = vrot.slane %v4230_v55, 2 }
 0x4b3   : > { %4416 = vst [vmem:[#allocation1 + $0x20] ss:$4 sm:$0xff] %v4310_v63  ;;  %v4318_v63 = vrot.slane %v4230_v55, 6 }
 0x4b4   : > { %4601 = vmatmul.bf16.gmra.mxu0 %v4473_v16  ;;  %4417 = vst [vmem:[#allocation1 + $0x21] ss:$4 sm:$0xff] %v4311_v56  ;;  %v2263_v24 = vadd.f32 %v11270_v13, %v1785_v4  ;;  %v4317_v13 = vrot.slane %v4230_v55, 4  ;;  %v4475_v56 = vpack.c.bf16 %v4411_v47, %v11813_v34 }
 0x4b5   : > { %v4125_v6 = vpop.f32.mrf.mxu3  ;;  %4418 = vst [vmem:[#allocation1 + $0x22] ss:$4 sm:$0xff] %v4312_v51 }
 0x4b6   : > { %v11822_v57 = vadd.f32 %v4125_v6, %v11709_v60  ;;  %v3680_v60 = vpop.f32.mrf.mxu2  ;;  %4419 = vst [vmem:[#allocation1 + $0x23] ss:$4 sm:$0xff] %v4228_v54  ;;  %v2740_v15 = vadd.f32 %v11384_v52, %v2263_v24  ;;  %v4315_v6 = vrot.slane %v4229_v39, 6  ;;  %v1310_v52 = vadd.f32 %v11304_v21, %v1154_v12 }
 0x4b8   : > { %v3217_v35 = vadd.f32 %v11590_v7, %v2740_v15  ;;  %v1140_v7 = vld [vmem:[#allocation3] sm:$0xff]  ;;  %v1787_v30 = vadd.f32 %v11460_v3, %v1310_v52  ;;  %v4233_v3 = vld [vmem:[#allocation2 + $0x112] sm:$0xff] }
 0x4b9   : > { %v11833_v61 = vld.sshfl [vmem:[#allocation1] sm:$0xff pattern:$0x73625140]  ;;  %v4322_v4 = vrot.slane %v4233_v3, 2  ;;  %v4323_v24 = vrot.slane %v4233_v3, 4 }
 0x4ba   : > { %4422 = vst [vmem:[#allocation1] ss:$4 sm:$0xff] %v4229_v39  ;;  %v2265_v54 = vadd.f32 %v11299_v53, %v1787_v30  ;;  %v13972_v52 = vld [vmem:[#allocation26_spill] sm:$0xff]  ;;  %v13973_v30 = vld [vmem:[#allocation11_spill] sm:$0xff] }
 0x4bb   : > { %4423 = vst [vmem:[#allocation1 + $0x1] ss:$4 sm:$0xff] %v4313_v29  ;;  %v1142_v29 = vld [vmem:[#allocation3 + $0x48] sm:$0xff] }
 0x4bc   : > { %4424 = vst [vmem:[#allocation1 + $0x2] ss:$4 sm:$0xff] %v4314_v26  ;;  %v4324_v26 = vrot.slane %v4233_v3, 6 }
 0x4bd   : > { %v4127_v31 = vpop.f32.mrf.mxu3  ;;  %v4421_v0 = vld.sshfl [vmem:[#allocation1 + $0x20] sm:$0xff pattern:$0x73625140]  ;;  %4425 = vst [vmem:[#allocation1 + $0x3] ss:$4 sm:$0xff] %v4315_v6 }
 0x4be   : > { %v4170_v27 = vadd.f32 %v4127_v31, %v3693_v40  ;;  %4426 = vst [vmem:[#allocation1 + $0x20] ss:$4 sm:$0xff] %v4230_v55  ;;  %v4232_v40 = vld [vmem:[#allocation2 + $0x10a] sm:$0xff]  ;;  %v4231_v31 = vld [vmem:[#allocation2 + $0x102] sm:$0x3] }
 0x4bf   : > { %4427 = vst [vmem:[#allocation1 + $0x21] ss:$4 sm:$0xff] %v4316_v14  ;;  %v4319_v47 = vrot.slane %v4232_v40, 2  ;;  %v4320_v18 = vrot.slane %v4232_v40, 4 }
 0x4c0   : > { %4193 = vst [vmem:[#allocation3 + $0x98] sm:$0xff] %v4170_v27  ;;  %v2742_v27 = vadd.f32 %v11422_v62, %v2265_v54  ;;  %v11856_v62 = vld [vmem:[%s13932_s3] ss:$0 sm:$0xff] }
 0x4c1   : > { %4428 = vst [vmem:[#allocation1 + $0x22] ss:$4 sm:$0xff] %v4317_v13  ;;  %v10173_v13 = vld [vmem:[%s13931_s2 + $0x58] sm:$0xff] }
 0x4c2   : > { %4429 = vst [vmem:[#allocation1 + $0x23] ss:$4 sm:$0xff] %v4318_v63  ;;  %v3219_v53 = vadd.f32 %v11614_v8, %v2742_v27  ;;  %6304 = vmatpush.bf16.msra.mxu2 %v10173_v13 }
 0x4c4   : > { %4606 = vmatmul.bf16.gmra.mxu0 %v4474_v33  ;;  %v11844_v21 = vld.sshfl [vmem:[#allocation1] sm:$0xff pattern:$0x73625140]  ;;  %v4321_v33 = vrot.slane %v4232_v40, 6 }
 0x4c5   : > { %v4130_v16 = vpop.f32.mrf.mxu3  ;;  %4433 = vst [vmem:[#allocation1 + $0x1] ss:$4 sm:$0xff] %v4232_v40  ;;  %v1144_v40 = vld [vmem:[#allocation3 + $0x28] sm:$0xff] }
 0x4c6   : > { %v4171_v42 = vadd.f32 %v4130_v16, %v11728_v58  ;;  %v3695_v58 = vadd.f32 %v11734_v48, %v3217_v35  ;;  %v1296_v48 = vadd.f32 %v11071_v1, %v1140_v7  ;;  %4432 = vst [vmem:[#allocation1] ss:$4 sm:$0xff] %v4231_v31  ;;  %v4476_v16 = vpack.c.bf16 %v4421_v0, %v11833_v61 }
 0x4c7   : > { %4434 = vst [vmem:[#allocation1 + $0x2] ss:$4 sm:$0xff] %v4319_v47 }
 0x4c8   : > { %4194 = vst [vmem:[#allocation3 + $0x38] sm:$0xff] %v4171_v42  ;;  %v1773_v60 = vadd.f32 %v11144_v43, %v1296_v48 }
 0x4c9   : > { %v11850_v43 = vld.sshfl [vmem:[#allocation1 + $0x20] sm:$0xff pattern:$0x73625140]  ;;  %4435 = vst [vmem:[#allocation1 + $0x3] ss:$4 sm:$0xff] %v4320_v18 }
 0x4ca   : > { %v2251_v1 = vadd.f32 %v11077_v2, %v1773_v60  ;;  %4436 = vst [vmem:[#allocation1 + $0x20] ss:$4 sm:$0xff] %v4321_v33  ;;  %v1156_v2 = vld [vmem:[#allocation3 + $0x68] sm:$0xff]  ;;  %v13974_v60 = vld [vmem:[#allocation29_spill] sm:$0xff]  ;;  %v4477_v31 = vpack.c.bf16 %v11850_v43, %v11844_v21 }
 0x4cb   : > { %4437 = vst [vmem:[#allocation1 + $0x21] ss:$4 sm:$0xff] %v4233_v3  ;;  %v1312_v61 = vadd.f32 %v11337_v5, %v1156_v2  ;;  %v13975_v3 = vld [vmem:[#allocation19_spill] sm:$0xff]  ;;  %v10185_v43 = vld [vmem:[%s13931_s2 + $0xb8] sm:$0xff] }
 0x4cc   : > { %v2728_v39 = vadd.f32 %v11151_v46, %v2251_v1  ;;  %4438 = vst [vmem:[#allocation1 + $0x22] ss:$4 sm:$0xff] %v4322_v4  ;;  %v4234_v46 = vld [vmem:[#allocation2 + $0x11a] sm:$0x3]  ;;  %v13977_v4 = vld [vmem:[#allocation12_spill] sm:$0xff]  ;;  %6601 = vmatpush.bf16.msra.mxu3 %v10185_v43 }
 0x4cd   : > { %v4132_v17 = vpop.f32.mrf.mxu3  ;;  %4439 = vst [vmem:[#allocation1 + $0x23] ss:$4 sm:$0xff] %v4323_v24  ;;  %v1300_v24 = vadd.f32 %v13977_v4, %v1144_v40 }
 0x4ce   : > { %v4172_v51 = vadd.f32 %v4132_v17, %v3695_v58  ;;  %v3205_v6 = vadd.f32 %v11388_v23, %v2728_v39  ;;  %v1789_v23 = vadd.f32 %v11582_v38, %v1312_v61 }
 0x4d0   : > { %4195 = vst [vmem:[#allocation3 + $0x50] sm:$0xff] %v4172_v51  ;;  %v3683_v14 = vadd.f32 %v11601_v20, %v3205_v6  ;;  %v11877_v5 = vld.sshfl [vmem:[#allocation1] sm:$0xff pattern:$0x73625140]  ;;  %v13971_v20 = vld [vmem:[#allocation17_spill] sm:$0xff] }
 0x4d1   : > { %4442 = vst [vmem:[#allocation1] ss:$4 sm:$0xff] %v4324_v26 }
 0x4d2   : > { %v4160_v58 = vadd.f32 %v11736_v11, %v3683_v14  ;;  %4443 = vst [vmem:[#allocation1 + $0x1] ss:$4 sm:$0xff] %v4234_v46  ;;  %v10165_v11 = vld [vmem:[%s13931_s2 + $0x18] sm:$0xff]  ;;  %v10184_v14 = vld [vmem:[%s13931_s2 + $0xb0] sm:$0xff] }
 0x4d3   : > { %5891 = vmatpush.bf16.msra.mxu1 %v10165_v11  ;;  %6602 = vmatpush.bf16.msra.mxu3 %v10184_v14 }
 0x4d4   : > { %4611 = vmatmul.bf16.gmra.mxu0 %v4475_v56  ;;  %v2267_v56 = vadd.f32 %v13972_v52, %v1789_v23  ;;  %v4441_v52 = vld.sshfl [vmem:[#allocation1 + $0x20] sm:$0xff pattern:$0x73625140] }
 0x4d5   : > { %v4135_v22 = vpop.f32.mrf.mxu3 }
 0x4d6   : > { %v4173_v34 = vadd.f32 %v4135_v22, %v11748_v32  ;;  %v3697_v32 = vadd.f32 %v11753_v59, %v3219_v53  ;;  %v11864_v59 = vld [vmem:[%s13933_s4] ss:$0 sm:$0xff]  ;;  %v13976_v53 = vld [vmem:[#allocation35_spill] sm:$0xff] }
 0x4d8   : > { %4196 = vst [vmem:[#allocation3 + $0x70] sm:$0xff] %v4173_v34  ;;  %v2744_v34 = vadd.f32 %v13974_v60, %v2267_v56  ;;  %v13983_v60 = vld [vmem:[#allocation14_spill] sm:$0xff] }
 0x4d9   : > { %v11969_v14 = vld.sshfl [vmem:[#allocation1] sm:$0xff pattern:$0x73625140] }
 0x4da   : > { %v3221_v33 = vadd.f32 %v13976_v53, %v2744_v34 }
 0x4dc   : > { %v3699_v2 = vadd.f32 %v11768_v19, %v3221_v33  ;;  %v1635_v19 = vld [vmem:[#allocation3 + $0x58] sm:$0xff] }
 0x4dd   : > { %v4137_v8 = vpop.f32.mrf.mxu3 }
 0x4de   : > { %v4174_v15 = vadd.f32 %v4137_v8, %v3697_v32  ;;  %v13978_v32 = vld [vmem:[#allocation28_spill] sm:$0xff]  ;;  %v13979_v8 = vld [vmem:[#allocation34_spill] sm:$0xff] }
 0x4e0   : > { %4197 = vst [vmem:[#allocation3 + $0xa0] sm:$0xff] %v4174_v15  ;;  %v13980_v15 = vld [vmem:[#allocation20_spill] sm:$0xff] }
 0x4e1   : > { %v4577_v42 = vpop.f32.mrf.mxu0 }
 0x4e2   : > { %v4636_v55 = vadd.f32 %v4577_v42, %v11731_v44  ;;  %v1298_v44 = vadd.f32 %v11090_v9, %v1142_v29  ;;  %v1777_v29 = vadd.f32 %v13980_v15, %v1300_v24  ;;  %v13989_v15 = vld [vmem:[#allocation37_spill] sm:$0xff] }
 0x4e4   : > { %4659 = vst [vmem:[#allocation3 + $0xb0] sm:$0xff] %v4636_v55  ;;  %v4709_v35 = vmul.f32 %v11856_v62, %v4636_v55  ;;  %4616 = vmatmul.bf16.gmra.mxu0 %v4476_v16  ;;  %v1775_v17 = vadd.f32 %v13971_v20, %v1298_v44 }
 0x4e5   : > { %v4140_v7 = vpop.f32.mrf.mxu3 }
 0x4e6   : > { %v11872_v12 = vadd.f32 %v11864_v59, %v4709_v35  ;;  %v2253_v48 = vadd.f32 %v13973_v30, %v1775_v17  ;;  %v4175_v54 = vadd.f32 %v4140_v7, %v11763_v10  ;;  %v10164_v7 = vld [vmem:[%s13931_s2 + $0x10] sm:$0xff] }
 0x4e7   : > { %5892 = vmatpush.bf16.msra.mxu1 %v10164_v7  ;;  %v5320_v7 = vlaneseq }
 0x4e8   : > { %v9504_v0 = vmul.f32 -1.442695, %v11872_v12  ;;  %4198 = vst [vmem:[#allocation3 + $0xa8] sm:$0xff] %v4175_v54  ;;  %v2730_v1 = vadd.f32 %v13975_v3, %v2253_v48  ;;  %v10183_v48 = vld [vmem:[%s13931_s2 + $0xa8] sm:$0xff] }
 0x4e9   : > { %v4579_v9 = vpop.f32.mrf.mxu0  ;;  %6603 = vmatpush.bf16.msra.mxu3 %v10183_v48  ;;  %v13993_v48 = vld [vmem:[#allocation16_spill] sm:$0xff] }
 0x4ea   : > { %10340 = vpow2.f32 %v9504_v0  ;;  %v4637_v63 = vadd.f32 %v4579_v9, %v4160_v58  ;;  %v3207_v16 = vadd.f32 %v13978_v32, %v2730_v1  ;;  %v13981_v58 = vld [vmem:[#allocation13_spill] sm:$0xff]  ;;  %v13982_v9 = vld [vmem:[#allocation10_spill] sm:$0xff]  ;;  %v13987_v32 = vld [vmem:[#allocation31_spill] sm:$0xff] }
 0x4eb   : > { %v2255_v0 = vadd.f32 %v13981_v58, %v1777_v29  ;;  %v1791_v20 = vadd.f32 %v13982_v9, %v1635_v19  ;;  %v13990_v19 = vld [vmem:[#allocation36_spill] sm:$0xff] }
 0x4ec   : > { %4660 = vst [vmem:[#allocation3] sm:$0xff] %v4637_v63  ;;  %v4710_v51 = vmul.f32 %v11856_v62, %v4637_v63  ;;  %v3685_v39 = vadd.f32 %v13979_v8, %v3207_v16 }
 0x4ed   : > { %v4142_v42 = vpop.f32.mrf.mxu3 }
 0x4ee   : > { %v11887_v38 = vadd.f32 %v11864_v59, %v4710_v51  ;;  %v4176_v55 = vadd.f32 %v4142_v42, %v3699_v2  ;;  %v4162_v61 = vadd.f32 %v11755_v37, %v3685_v39  ;;  %v1146_v37 = vld [vmem:[#allocation3 + $0x78] sm:$0xff]  ;;  %v13988_v39 = vld [vmem:[#allocation23_spill] sm:$0xff] }
 0x4ef   : > { %v1302_v34 = vadd.f32 %v13983_v60, %v1146_v37 }
 0x4f0   : > { %v10341_v22 = vpop.eup %10340  ;;  %v9505_v47 = vmul.f32 -1.442695, %v11887_v38  ;;  %4199 = vst [vmem:[#allocation3 + $0x68] sm:$0xff] %v4176_v55 }
 0x4f1   : > { %v11897_v18 = vadd.f32 1.0, %v10341_v22  ;;  %v4582_v27 = vpop.f32.mrf.mxu0  ;;  %v10172_v22 = vld [vmem:[%s13931_s2 + $0x50] sm:$0xff]  ;;  %v1779_v55 = vadd.f32 %v13988_v39, %v1302_v34 }
 0x4f2   : > { %10342 = vpow2.f32 %v9505_v47  ;;  %v4638_v10 = vadd.f32 %v4582_v27, %v11751_v49  ;;  %v13984_v47 = vld [vmem:[#allocation27_spill] sm:$0xff]  ;;  %v13985_v27 = vld [vmem:[#allocation21_spill] sm:$0xff]  ;;  %6305 = vmatpush.bf16.msra.mxu2 %v10172_v22 }
 0x4f3   : > { %10344 = vrcp.f32 %v11897_v18  ;;  %v4860_v56 = vand.u32 2147483647, %v11897_v18  ;;  %v4862_v51 = vand.u32 2147483648, %v11897_v18  ;;  %v2732_v3 = vadd.f32 %v13985_v27, %v2255_v0 }
 0x4f4   : > { %4661 = vst [vmem:[#allocation3 + $0x10] sm:$0xff] %v4638_v10  ;;  %v4711_v21 = vmul.f32 %v11856_v62, %v4638_v10  ;;  %4621 = vmatmul.bf16.gmra.mxu0 %v4477_v31  ;;  %v2269_v31 = vadd.f32 %v13984_v47, %v1791_v20  ;;  %vm4856_vm1 = vweird.f32 %v11897_v18  ;;  %v4478_v10 = vpack.c.bf16 %v4441_v52, %v11877_v5  ;;  %v10182_v5 = vld [vmem:[%s13931_s2 + $0xa0] sm:$0xff] }
 0x4f5   : > { %v4145_v30 = vpop.f32.mrf.mxu3  ;;  %v4863_v2 = vor.u32 1.1754944e-38, %v4862_v51  ;;  %vm4861_vm3 = vcmp.eq.f32.partialorder %v4860_v56, 8.507059e+37  ;;  %6604 = vmatpush.bf16.msra.mxu3 %v10182_v5 }
 0x4f6   : > { %v11912_v49 = vadd.f32 %v11864_v59, %v4711_v21  ;;  %v4177_v40 = vadd.f32 %v4145_v30, %v11784_v50  ;;  %v13986_v50 = vld [vmem:[#allocation30_spill] sm:$0xff]  ;;  %v2746_v16 = vadd.f32 %v13987_v32, %v2269_v31 }
 0x4f7   : > { %v3209_v24 = vadd.f32 %v13986_v50, %v2732_v3  ;;  %v11999_v3 = vstv %s9527_s18 }
 0x4f8   : > { %v10343_v26 = vpop.eup %10342  ;;  %v9506_v6 = vmul.f32 -1.442695, %v11912_v49  ;;  %4200 = vst [vmem:[#allocation3 + $0x30] sm:$0xff] %v4177_v40  ;;  %v3223_v29 = vadd.f32 %v13989_v15, %v2746_v16  ;;  %vm5324_vm9 = vcmp.ge.s32.totalorder %v11999_v3, 0  ;;  %vm5334_vm10 = vcmp.lt.s32.totalorder %v11999_v3, 16 }
 0x4f9   : > { %v10345_v35 = vpop.eup %10344  ;;  %v11917_v46 = vadd.f32 1.0, %v10343_v26  ;;  %v4584_v44 = vpop.f32.mrf.mxu0  ;;  %vm12067_vm15 = vmand %vm5324_vm9, %vm5334_vm10 }
 0x4fa   : > { %v4852_v13 = vmul.f32 %v10345_v35, %v11897_v18  ;;  %10346 = vpow2.f32 %v9506_v6  ;;  %v4639_v23 = vadd.f32 %v4584_v44, %v4162_v61  ;;  %vm4857_vm0 = vweird.f32 %v10345_v35  ;;  %v10163_v18 = vld [vmem:[%s13931_s2 + $0x8] sm:$0xff] }
 0x4fb   : > { %10348 = vrcp.f32 %v11917_v46  ;;  %vm4858_vm2 = vmor %vm4856_vm1, %vm4857_vm0  ;;  %5893 = vmatpush.bf16.msra.mxu1 %v10163_v18  ;;  %v3687_v61 = vadd.f32 %v13990_v19, %v3209_v24  ;;  %v4877_v58 = vand.u32 2147483648, %v11917_v46  ;;  %vm4871_vm5 = vweird.f32 %v11917_v46 }
 0x4fc   : > { %v4853_v17 = vsub.f32 1.0, %v4852_v13  ;;  %4662 = vst [vmem:[#allocation3 + $0x48] sm:$0xff] %v4639_v23  ;;  %v4712_v63 = vmul.f32 %v11856_v62, %v4639_v23  ;;  %v3701_v13 = vadd.f32 %v11789_v25, %v3223_v29  ;;  %v4875_v23 = vand.u32 2147483647, %v11917_v46  ;;  %v10171_v29 = vld [vmem:[%s13931_s2 + $0x48] sm:$0xff] }
 0x4fd   : > { %v4147_v0 = vpop.f32.mrf.mxu3  ;;  %v4164_v22 = vadd.f32 %v11770_v28, %v3687_v61  ;;  %v4878_v34 = vor.u32 1.1754944e-38, %v4877_v58  ;;  %v10180_v28 = vld [vmem:[%s13931_s2 + $0x90] sm:$0xff]  ;;  %v12009_v24 = vshrl.u32 %v5320_v7, 7  ;;  %6306 = vmatpush.bf16.msra.mxu2 %v10171_v29 }
 0x4fe   : > { %v4854_v11 = vmul.f32 %v10345_v35, %v4853_v17  ;;  %v11936_v54 = vadd.f32 %v11864_v59, %v4712_v63  ;;  %v13991_v17 = vld [vmem:[#allocation9_spill] sm:$0xff]  ;;  %v13992_v63 = vld [vmem:[#allocation15_spill] sm:$0xff]  ;;  %v4178_v51 = vadd.f32 %v4147_v0, %v3701_v13  ;;  %vm4876_vm7 = vcmp.eq.f32.partialorder %v4875_v23, 8.507059e+37  ;;  %v13996_v23 = vld [vmem:[#allocation22_spill] sm:$0xff] }
 0x4ff   : > { %v1304_v52 = vadd.f32 %v13992_v63, %v13991_v17  ;;  %vm5354_vm14 = vcmp.ge.s32.totalorder %v12009_v24, 1  ;;  %v10170_v63 = vld [vmem:[%s13931_s2 + $0x40] sm:$0xff]  ;;  %v12059_v7 = vadd.s32 16, %v12009_v24 }
 0x500   : > { %v10347_v1 = vpop.eup %10346  ;;  %v4855_v53 = vadd.f32 %v10345_v35, %v4854_v11  ;;  %v9507_v33 = vmul.f32 -1.442695, %v11936_v54  ;;  %v2257_v11 = vadd.f32 %v13993_v48, %v1779_v55  ;;  %4201 = vst [vmem:[#allocation3 + $0x58] sm:$0xff] %v4178_v51 }
 0x501   : > { %v11948_v4 = vpop.eup %10348  ;;  %v11953_v21 = vadd.f32 1.0, %v10347_v1  ;;  %v4587_v43 = vpop.f32.mrf.mxu0  ;;  %6307 = vmatpush.bf16.msra.mxu2 %v10170_v63 }
 0x502   : > { %v4859_v42 = vsel %vm4858_vm2, %v10345_v35, %v4855_v53  ;;  %v4867_v8 = vmul.f32 %v11948_v4, %v11917_v46  ;;  %10350 = vpow2.f32 %v9507_v33  ;;  %v4640_v35 = vadd.f32 %v4587_v43, %v11766_v45  ;;  %v10162_v45 = vld [vmem:[%s13931_s2] sm:$0xff]  ;;  %v13994_v33 = vld [vmem:[#allocation25_spill] sm:$0xff]  ;;  %vm12087_vm2 = vmand %vm12067_vm15, %vm5354_vm14 }
 0x503   : > { %v4864_v26 = vsel %vm4861_vm3, %v4863_v2, %v4859_v42  ;;  %10352 = vrcp.f32 %v11953_v21  ;;  %vm4872_vm4 = vweird.f32 %v11948_v4  ;;  %5894 = vmatpush.bf16.msra.mxu1 %v10162_v45  ;;  %v4890_v43 = vand.u32 2147483647, %v11953_v21  ;;  %v10179_v42 = vld [vmem:[%s13931_s2 + $0x88] sm:$0xff] }
 0x504   : > { %v5196_v6 = vmul.f32 %v4864_v26, %v11872_v12  ;;  %v4868_v44 = vsub.f32 1.0, %v4867_v8  ;;  %4626 = vmatmul.bf16.gmra.mxu0 %v4478_v10  ;;  %v10181_v12 = vld [vmem:[%s13931_s2 + $0x98] sm:$0xff]  ;;  %4663 = vst [vmem:[#allocation3 + $0x60] sm:$0xff] %v4640_v35  ;;  %v4713_v56 = vmul.f32 %v11856_v62, %v4640_v35  ;;  %vm4873_vm6 = vmor %vm4871_vm5, %vm4872_vm4  ;;  %v1781_v10 = vadd.f32 %v13994_v33, %v1304_v52  ;;  %v13995_v35 = vld [vmem:[#allocation18_spill] sm:$0xff] }
 0x505   : > { %6605 = vmatpush.bf16.msra.mxu3 %v10181_v12  ;;  %v4150_v5 = vpop.f32.mrf.mxu3  ;;  %vm4886_vm11 = vweird.f32 %v11953_v21  ;;  %v2734_v58 = vadd.f32 %v13996_v23, %v2257_v11  ;;  %vm4891_vm13 = vcmp.eq.f32.partialorder %v4890_v43, 8.507059e+37  ;;  %vm5389_vm3 = vcmp.le.s32.totalorder %v12059_v7, 16 }
 0x506   : > { %v5242_v9 = vrot.slane %v5196_v6, 2  ;;  %v5243_v20 = vrot.slane %v5196_v6, 4  ;;  %v5244_v37 = vrot.slane %v5196_v6, 6  ;;  %v4869_v25 = vmul.f32 %v11948_v4, %v4868_v44  ;;  %5480 = vst [vmem:[#allocation1] ss:$4 sm:$0xff] %v5196_v6 }
 0x507   : > { %v11997_v31 = vadd.f32 %v11864_v59, %v4713_v56  ;;  %v4179_v26 = vadd.f32 %v4150_v5, %v11802_v41  ;;  %v4479_v6 = vpack.c.bf16 %v11969_v14, %v11969_v14  ;;  %v2259_v13 = vadd.f32 %v13995_v35, %v1781_v10  ;;  %v10233_v14 = vld [vmem:[%s13931_s2 + $0x1b8] sm:$0xff] }
 0x508   : > { %v10351_v30 = vpop.eup %10350  ;;  %v4870_v40 = vadd.f32 %v11948_v4, %v4869_v25  ;;  %5482 = vst [vmem:[#allocation1 + $0x1] ss:$4 sm:$0xff] %v5242_v9  ;;  %v13997_v9 = vld [vmem:[#allocation40_spill] sm:$0xff]  ;;  %7763 = vmatpush.bf16.msrb.mxu0 %v10233_v14 }
 0x509   : > { %v11990_v60 = vpop.eup %10352  ;;  %v11994_v47 = vadd.f32 1.0, %v10351_v30  ;;  %v4589_v27 = vpop.f32.mrf.mxu0  ;;  %5484 = vst [vmem:[#allocation1 + $0x2] ss:$4 sm:$0xff] %v5243_v20  ;;  %6606 = vmatpush.bf16.msra.mxu3 %v10180_v28  ;;  %v9508_v2 = vmul.f32 -1.442695, %v11997_v31 }
 0x50a   : > { %v4874_v46 = vsel %vm4873_vm6, %v11948_v4, %v4870_v40  ;;  %v4882_v1 = vmul.f32 %v11990_v60, %v11953_v21  ;;  %v4641_v53 = vadd.f32 %v4589_v27, %v4164_v22  ;;  %5486 = vst [vmem:[#allocation1 + $0x3] ss:$4 sm:$0xff] %v5244_v37  ;;  %v4892_v4 = vand.u32 2147483648, %v11953_v21  ;;  %v10178_v21 = vld [vmem:[%s13931_s2 + $0x80] sm:$0xff]  ;;  %v13998_v37 = vld [vmem:[#allocation32_spill] sm:$0xff]  ;;  %vm12108_vm6 = vmand %vm12067_vm15, %vm5389_vm3 }
 0x50b   : > { %v4879_v50 = vsel %vm4876_vm7, %v4878_v34, %v4874_v46  ;;  %10354 = vrcp.f32 %v11994_v47  ;;  %vm4887_vm8 = vweird.f32 %v11990_v60  ;;  %v3211_v25 = vadd.f32 %v13998_v37, %v2734_v58  ;;  %4202 = vst [vmem:[#allocation3 + $0x80] sm:$0xff] %v4179_v26  ;;  %v14002_v46 = vld [vmem:[#allocation24_spill] sm:$0xff] }
 0x50c   : > { %v5197_v32 = vmul.f32 %v4879_v50, %v11887_v38  ;;  %v4883_v16 = vsub.f32 1.0, %v4882_v1  ;;  %4664 = vst [vmem:[#allocation3 + $0x28] sm:$0xff] %v4641_v53  ;;  %v4714_v18 = vmul.f32 %v11856_v62, %v4641_v53  ;;  %10356 = vpow2.f32 %v9508_v2  ;;  %vm4888_vm12 = vmor %vm4886_vm11, %vm4887_vm8  ;;  %v14003_v50 = vld [vmem:[#allocation41_spill] sm:$0xff]  ;;  %v4025_v14 = vld [vmem:[#allocation3 + $0x8] sm:$0xf] }
 0x50d   : > { %6607 = vmatpush.bf16.msra.mxu3 %v10179_v42  ;;  %v4893_v61 = vor.u32 1.1754944e-38, %v4892_v4  ;;  %v4905_v48 = vand.u32 2147483647, %v11994_v47  ;;  %v4907_v11 = vand.u32 2147483648, %v11994_v47  ;;  %v4152_v40 = vpop.f32.mrf.mxu3  ;;  %v2736_v1 = vadd.f32 %v14002_v46, %v2259_v13 }
 0x50e   : > { %v5245_v38 = vrot.slane %v5197_v32, 2  ;;  %v5246_v8 = vrot.slane %v5197_v32, 4  ;;  %v5247_v39 = vrot.slane %v5197_v32, 6  ;;  %v4884_v55 = vmul.f32 %v11990_v60, %v4883_v16  ;;  %5488 = vst [vmem:[#allocation1 + $0x20] ss:$4 sm:$0xff] %v5197_v32 }
 0x50f   : > { %v12023_v15 = vadd.f32 %v11864_v59, %v4714_v18  ;;  %vm4901_vm1 = vweird.f32 %v11994_v47  ;;  %vm4906_vm5 = vcmp.eq.f32.partialorder %v4905_v48, 8.507059e+37  ;;  %v4908_v18 = vor.u32 1.1754944e-38, %v4907_v11 }
 0x510   : > { %v4885_v19 = vadd.f32 %v11990_v60, %v4884_v55  ;;  %5490 = vst [vmem:[#allocation1 + $0x21] ss:$4 sm:$0xff] %v5245_v38  ;;  %v14006_v55 = vld [vmem:[#allocation33_spill] sm:$0xff]  ;;  %vm6429_vm7 = vcmask 1042432   ;;  %vm6430_vm11 = vcmask 1046532  }
 0x511   : > { %v12034_v44 = vpop.eup %10354  ;;  %5492 = vst [vmem:[#allocation1 + $0x22] ss:$4 sm:$0xff] %v5246_v8  ;;  %v9509_v41 = vmul.f32 -1.442695, %v12023_v15  ;;  %v4592_v0 = vpop.f32.mrf.mxu0  ;;  %6608 = vmatpush.bf16.msra.mxu3 %v10178_v21  ;;  %v3213_v29 = vadd.f32 %v14006_v55, %v2736_v1 }
 0x512   : > { %v4889_v12 = vsel %vm4888_vm12, %v11990_v60, %v4885_v19  ;;  %v4897_v45 = vmul.f32 %v12034_v44, %v11994_v47  ;;  %5494 = vst [vmem:[#allocation1 + $0x23] ss:$4 sm:$0xff] %v5247_v39  ;;  %v4642_v20 = vadd.f32 %v4592_v0, %v13997_v9  ;;  %v10357_v30 = vpop.eup %10356  ;;  %v14001_v60 = vld [vmem:[#allocation38_spill] sm:$0xff]  ;;  %vm4902_vm0 = vweird.f32 %v12034_v44  ;;  %v14009_v0 = vld [vmem:[#allocation39_spill] sm:$0xff] }
 0x513   : > { %v4894_v17 = vsel %vm4891_vm13, %v4893_v61, %v4889_v12  ;;  %10358 = vpow2.f32 %v9509_v41  ;;  %v3689_v34 = vadd.f32 %v14001_v60, %v3211_v25  ;;  %v12075_v33 = vadd.f32 1.0, %v10357_v30  ;;  %vm4903_vm4 = vmor %vm4901_vm1, %vm4902_vm0  ;;  %v4024_v61 = vld [vmem:[#allocation3 + $0x20] sm:$0xff] }
 0x514   : > { %v5198_v52 = vmul.f32 %v4894_v17, %v11912_v49  ;;  %v4898_v56 = vsub.f32 1.0, %v4897_v45  ;;  %4665 = vst [vmem:[#allocation3 + $0x40] sm:$0xff] %v4642_v20  ;;  %v4715_v51 = vmul.f32 %v11856_v62, %v4642_v20  ;;  %4631 = vmatmul.bf16.gmra.mxu0 %v4479_v6  ;;  %v5495_v49 = vld.sshfl [vmem:[#allocation1] sm:$0xff pattern:$0x73625140]  ;;  %v4180_v13 = vadd.f32 %v4152_v40, %v4024_v61 }
 0x515   : > { %v4166_v32 = vadd.f32 %v14003_v50, %v3689_v34  ;;  %10360 = vrcp.f32 %v12075_v33  ;;  %v5637_v35 = vsel %vm12087_vm2, %v5495_v49, 0.0  ;;  %v4155_v58 = vpop.f32.mrf.mxu3  ;;  %v3691_v21 = vadd.f32 %v14009_v0, %v3213_v29  ;;  %v14010_v49 = vld [vmem:[#allocation42_spill] sm:$0xff]  ;;  %vm12177_vm2 = vmor %vm6429_vm7, %vm6430_vm11 }
 0x516   : > { %v5248_v27 = vrot.slane %v5198_v52, 2  ;;  %v4899_v28 = vmul.f32 %v12034_v44, %v4898_v56  ;;  %5497 = vst [vmem:[#allocation1] ss:$4 sm:$0xff] %v5198_v52  ;;  %v5249_v53 = vrot.slane %v5198_v52, 4  ;;  %v12078_v10 = vadd.f32 %v11864_v59, %v4715_v51 }
 0x517   : > { %v5250_v43 = vrot.slane %v5198_v52, 6  ;;  %v4181_v20 = vadd.f32 %v4155_v58, %v4025_v14  ;;  %v4920_v17 = vand.u32 2147483647, %v12075_v33  ;;  %4203 = vst [vmem:[#allocation3 + $0x20] sm:$0xff] %v4180_v13  ;;  %v4168_v52 = vadd.f32 %v11811_v36, %v3691_v21 }
 0x518   : > { %v4900_v16 = vadd.f32 %v12034_v44, %v4899_v28  ;;  %v9510_v8 = vmul.f32 -1.442695, %v12078_v10  ;;  %v4922_v22 = vand.u32 2147483648, %v12075_v33  ;;  %vm4916_vm9 = vweird.f32 %v12075_v33 }
 0x519   : > { %v10359_v2 = vpop.eup %10358  ;;  %v4594_v5 = vpop.f32.mrf.mxu0  ;;  %v5496_v42 = vld.sshfl [vmem:[#allocation1 + $0x20] sm:$0xff pattern:$0x73625140]  ;;  %4204 = vst [vmem:[#allocation3 + $0x8] sm:$0xf] %v4181_v20  ;;  %vm12140_vm10 = vcmp.eq.f32.partialorder %v4920_v17, 8.507059e+37 }
 0x51a   : > { %v4904_v47 = vsel %vm4903_vm4, %v12034_v44, %v4900_v16  ;;  %v12094_v38 = vadd.f32 1.0, %v10359_v2  ;;  %v4643_v39 = vadd.f32 %v4594_v5, %v4166_v32  ;;  %5499 = vst [vmem:[#allocation1 + $0x20] ss:$4 sm:$0xff] %v5248_v27  ;;  %v5638_v19 = vsel %vm12067_vm15, %v5496_v42, 0.0  ;;  %v10232_v32 = vld [vmem:[%s13931_s2 + $0x1b0] sm:$0xff] }
 0x51b   : > { %v4909_v26 = vsel %vm4906_vm5, %v4908_v18, %v4904_v47  ;;  %5500 = vst [vmem:[#allocation1 + $0x21] ss:$4 sm:$0xff] %v5249_v53  ;;  %v10361_v12 = vpop.eup %10360  ;;  %v4923_v2 = vor.u32 1.1754944e-38, %v4922_v22  ;;  %7764 = vmatpush.bf16.msrb.mxu0 %v10232_v32  ;;  %vm5992_vm7 = vsmask.f32 3328 }
 0x51c   : > { %v12101_v6 = vmul.f32 %v4909_v26, %v11936_v54  ;;  %10362 = vrcp.f32 %v12094_v38  ;;  %4666 = vst [vmem:[#allocation3 + $0x78] sm:$0xff] %v4643_v39  ;;  %v4716_v23 = vmul.f32 %v11856_v62, %v4643_v39  ;;  %v10253_v54 = vpack.c.bf16 %v5638_v19, %v5637_v35 }
 0x51d   : > { %10364 = vpow2.f32 %v9510_v8  ;;  %5501 = vst [vmem:[#allocation1 + $0x22] ss:$4 sm:$0xff] %v5250_v43  ;;  %v5498_v41 = vld.sshfl [vmem:[#allocation1] sm:$0xff pattern:$0x73625140]  ;;  %v4912_v25 = vmul.f32 %v10361_v12, %v12075_v33  ;;  %v4937_v27 = vand.u32 2147483648, %v12094_v38  ;;  %vm4917_vm8 = vweird.f32 %v10361_v12  ;;  %v4157_v16 = vpop.f32.mrf.mxu3 }
 0x51e   : > { %5502 = vst [vmem:[#allocation1 + $0x23] ss:$4 sm:$0xff] %v12101_v6  ;;  %v5251_v45 = vrot.slane %v12101_v6, 2  ;;  %v12119_v9 = vadd.f32 %v11864_v59, %v4716_v23  ;;  %v5639_v37 = vsel %vm12108_vm6, %v5498_v41, 0.0  ;;  %v5252_v56 = vrot.slane %v12101_v6, 4  ;;  %vm4918_vm13 = vmor %vm4916_vm9, %vm4917_vm8  ;;  %v10231_v23 = vld [vmem:[%s13931_s2 + $0x1a8] sm:$0xff] }
 0x51f   : > { %10254 = vst [vmem:[#allocation4] sm:$0xff] %v10253_v54   ;;  %v5669_v63 = vpack.c.bf16 %v5639_v37, %v5639_v37  ;;  %v4913_v11 = vsub.f32 1.0, %v4912_v25  ;;  %v5253_v34 = vrot.slane %v12101_v6, 6  ;;  %vm4931_vm12 = vweird.f32 %v12094_v38  ;;  %7765 = vmatpush.bf16.msrb.mxu0 %v10231_v23 }
 0x520   : > { %v9511_v51 = vmul.f32 -1.442695, %v12119_v9  ;;  %5504 = vst [vmem:[#allocation1] ss:$4 sm:$0xff] %v5251_v45  ;;  %v4935_v5 = vand.u32 2147483647, %v12094_v38 }
 0x521   : > { %v4597_v30 = vpop.f32.mrf.mxu0  ;;  %5699 = vst [vmem:[#allocation4 + $0x8] sm:$0x1] %v5669_v63  ;;  %v4914_v28 = vmul.f32 %v10361_v12, %v4913_v11  ;;  %v4938_v39 = vor.u32 1.1754944e-38, %v4937_v27  ;;  %v10230_v63 = vld [vmem:[%s13931_s2 + $0x1a0] sm:$0xff]  ;;  %vm5993_vm8 = vsmask.f32 7440 }
 0x522   : > { %v12128_v48 = vpop.eup %10362  ;;  %v4644_v40 = vadd.f32 %v4597_v30, %v14010_v49  ;;  %10366 = vpow2.f32 %v9511_v51  ;;  %5505 = vst [vmem:[#allocation1 + $0x1] ss:$4 sm:$0xff] %v5252_v56  ;;  %vm4936_vm1 = vcmp.eq.f32.partialorder %v4935_v5, 8.507059e+37 }
 0x523   : > { %v10365_v60 = vpop.eup %10364  ;;  %v4927_v36 = vmul.f32 %v12128_v48, %v12094_v38  ;;  %v4915_v4 = vadd.f32 %v10361_v12, %v4914_v28  ;;  %vm4932_vm15 = vweird.f32 %v12128_v48  ;;  %5506 = vst [vmem:[#allocation1 + $0x2] ss:$4 sm:$0xff] %v5253_v34  ;;  %7766 = vmatpush.bf16.msrb.mxu0 %v10230_v63 }
 0x524   : > { %v12136_v46 = vadd.f32 1.0, %v10365_v60  ;;  %4667 = vst [vmem:[#allocation3 + $0x88] sm:$0xff] %v4644_v40  ;;  %v4717_v1 = vmul.f32 %v11856_v62, %v4644_v40  ;;  %vm4933_vm0 = vmor %vm4931_vm12, %vm4932_vm15 }
 0x525   : > { %v4928_v50 = vsub.f32 1.0, %v4927_v36  ;;  %v4919_v8 = vsel %vm4918_vm13, %v10361_v12, %v4915_v4 }
 0x526   : > { %10368 = vrcp.f32 %v12136_v46  ;;  %v10154_v43 = vld [vmem:[#allocation4] sm:$0xff]  ;;  %v12154_v42 = vadd.f32 %v11864_v59, %v4717_v1  ;;  %v4950_v55 = vand.u32 2147483647, %v12136_v46  ;;  %v4952_v29 = vand.u32 2147483648, %v12136_v46 }
 0x527   : > { %v6381_v33 = vld [vmem:[#allocation4] sm:$0xe]  ;;  %v4929_v18 = vmul.f32 %v12128_v48, %v4928_v50  ;;  %v6382_v47 = vld [vmem:[#allocation4 + $0x4] sm:$0xf]  ;;  %5895 = vmatmul.bf16.vlgmr.msra.gmra.mxu1 %v10154_v43  ;;  %v4924_v19 = vsel %vm12140_vm10, %v4923_v2, %v4919_v8  ;;  %vm4946_vm4 = vweird.f32 %v12136_v46 }
 0x528   : > { %v10367_v26 = vpop.eup %10366  ;;  %v9512_v6 = vmul.f32 -1.442695, %v12154_v42  ;;  %v6383_v35 = vld [vmem:[#allocation4 + $0x8] sm:$0x1]  ;;  %v9640_v13 = vrot.slane %v6381_v33, 9  ;;  %v12166_v54 = vmul.f32 %v4924_v19, %v11997_v31  ;;  %v6434_v0 = vrot.slane %v6382_v47, 5 }
 0x529   : > { %v4930_v61 = vadd.f32 %v12128_v48, %v4929_v18  ;;  %v4599_v44 = vpop.f32.mrf.mxu0  ;;  %v12172_v58 = vadd.f32 1.0, %v10367_v26  ;;  %v12182_v31 = vadd.s32 1, %v11999_v3  ;;  %v4953_v20 = vor.u32 1.1754944e-38, %v4952_v29  ;;  %v5968_v11 = vld [vmem:[#allocation4] sm:$0xf] }
 0x52a   : > { %v4645_v41 = vadd.f32 %v4599_v44, %v4168_v52  ;;  %10370 = vpow2.f32 %v9512_v6  ;;  %v5254_v12 = vrot.slane %v12166_v54, 2  ;;  %v6437_v37 = vrot.slane %v6383_v35, 5  ;;  %5507 = vst [vmem:[#allocation1 + $0x3] ss:$4 sm:$0xff] %v12166_v54  ;;  %v5969_v43 = vld [vmem:[#allocation4 + $0x4] sm:$0xf] }
 0x52b   : > { %v4934_v21 = vsel %vm4933_vm0, %v12128_v48, %v4930_v61  ;;  %vm12187_vm5 = vcmp.eq.f32.partialorder %v4950_v55, 8.507059e+37  ;;  %10372 = vrcp.f32 %v12172_v58  ;;  %v12196_v52 = vld.sshfl [vmem:[#allocation1 + $0x20] sm:$0xff pattern:$0x73625140]  ;;  %v5255_v56 = vrot.slane %v12166_v54, 4 }
 0x52c   : > { %v10369_v38 = vpop.eup %10368  ;;  %v4939_v45 = vsel %vm4936_vm1, %v4938_v39, %v4934_v21  ;;  %v4718_v51 = vmul.f32 %v11856_v62, %v4645_v41  ;;  %v6435_v30 = vsel %vm12177_vm2, %v9640_v13, %v6434_v0  ;;  %v6436_v48 = vrot.slane %v6434_v0, 4  ;;  %5508 = vst [vmem:[#allocation1 + $0x20] ss:$4 sm:$0xff] %v5254_v12  ;;  %v5970_v13 = vld [vmem:[#allocation4 + $0x8] sm:$0x1]  ;;  %v4491_v12 = vld [vmem:[#allocation3 + $0x98] sm:$0xff]  ;;  %vm12268_vm1 = vmor %vm5992_vm7, %vm5993_vm8 }
 0x52d   : > { %v4942_v25 = vmul.f32 %v10369_v38, %v12136_v46  ;;  %v5256_v22 = vrot.slane %v12166_v54, 6  ;;  %v12204_v49 = vmul.f32 %v4939_v45, %v12023_v15  ;;  %vm4947_vm6 = vweird.f32 %v10369_v38  ;;  %v10226_v61 = vld [vmem:[%s13931_s2 + $0x180] sm:$0xff] }
 0x52e   : > { %v4965_v60 = vand.u32 2147483647, %v12172_v58  ;;  %v4967_v34 = vand.u32 2147483648, %v12172_v58  ;;  %v12209_v36 = vadd.f32 %v11864_v59, %v4718_v51  ;;  %v6438_v27 = vsel %vm12177_vm2, %v6436_v48, %v6437_v37  ;;  %vm4948_vm11 = vmor %vm4946_vm4, %vm4947_vm6 }
 0x52f   : > { %v4943_v40 = vsub.f32 1.0, %v4942_v25  ;;  %v6521_v50 = vunpack.c.l.b16 %v6435_v30  ;;  %v6522_v32 = vunpack.c.l.b16 %v6438_v27  ;;  %v5996_v15 = vshrl.u32 %v5968_v11, 16 }
 0x530   : > { %v10371_v28 = vpop.eup %10370  ;;  %v9513_v4 = vmul.f32 -1.442695, %v12209_v36  ;;  %v5999_v33 = vshll.u32 %v5968_v11, 16  ;;  %v5257_v5 = vrot.slane %v12204_v49, 2  ;;  %v5258_v47 = vrot.slane %v12204_v49, 4 }
 0x531   : > { %v4944_v1 = vmul.f32 %v10369_v38, %v4943_v40  ;;  %v4602_v53 = vpop.f32.mrf.mxu0  ;;  %v12213_v16 = vadd.f32 1.0, %v10371_v28  ;;  %v12217_v18 = vpop.eup %10372  ;;  %v6537_v39 = vpack.c.b16 %v6522_v32, %v6521_v50  ;;  %vm5325_vm9 = vcmp.ge.s32.totalorder %v12182_v31, 0  ;;  %v12230_v26 = vld.sshfl [vmem:[#allocation1] sm:$0xff pattern:$0x73625140] }
 0x532   : > { %v4646_v2 = vadd.f32 %v4602_v53, %v11822_v57  ;;  %vm5335_vm10 = vcmp.lt.s32.totalorder %v12182_v31, 16  ;;  %v5259_v55 = vrot.slane %v12204_v49, 6  ;;  %v4957_v57 = vmul.f32 %v12217_v18, %v12172_v58  ;;  %5511 = vst [vmem:[#allocation1] ss:$4 sm:$0xff] %v5255_v56 }
 0x533   : > { %v4945_v8 = vadd.f32 %v10369_v38, %v4944_v1  ;;  %10374 = vrcp.f32 %v12213_v16  ;;  %v5998_v29 = vrot.slane %v5996_v15, 4  ;;  %vm12232_vm12 = vcmp.eq.f32.partialorder %v4965_v60, 8.507059e+37  ;;  %6609 = vmatmul.bf16.vlgmr.msra.gmra.mxu3 %v6537_v39  ;;  %v12243_v0 = vld.sshfl [vmem:[#allocation1 + $0x20] sm:$0xff pattern:$0x73625140]  ;;  %v10229_v1 = vld [vmem:[%s13931_s2 + $0x198] sm:$0xff] }
 0x534   : > { %10376 = vpow2.f32 %v9513_v4  ;;  %v6005_v6 = vshll.u32 %v5969_v43, 16  ;;  %v4958_v44 = vsub.f32 1.0, %v4957_v57  ;;  %v4719_v35 = vmul.f32 %v11856_v62, %v4646_v2  ;;  %5512 = vst [vmem:[#allocation1 + $0x1] ss:$4 sm:$0xff] %v5256_v22  ;;  %7767 = vmatpush.bf16.msrb.mxu0 %v10229_v1 }
 0x535   : > { %v4949_v19 = vsel %vm4948_vm11, %v10369_v38, %v4945_v8  ;;  %v6001_v23 = vrot.slane %v5999_v33, 5  ;;  %vm4962_vm13 = vweird.f32 %v12217_v18  ;;  %v4968_v41 = vor.u32 1.1754944e-38, %v4967_v34  ;;  %5513 = vst [vmem:[#allocation1 + $0x2] ss:$4 sm:$0xff] %v12204_v49  ;;  %v10228_v8 = vld [vmem:[%s13931_s2 + $0x190] sm:$0xff] }
 0x536   : > { %v4954_v46 = vsel %vm12187_vm5, %v4953_v20, %v4949_v19  ;;  %v4959_v21 = vmul.f32 %v12217_v18, %v4958_v44  ;;  %v12247_v38 = vadd.f32 %v11864_v59, %v4719_v35  ;;  %v6009_v20 = vshrl.u32 %v5969_v43, 16  ;;  %5514 = vst [vmem:[#allocation1 + $0x3] ss:$4 sm:$0xff] %v5257_v5  ;;  %vm12285_vm5 = vmand %vm5325_vm9, %vm5335_vm10 }
 0x537   : > { %v12240_v54 = vmul.f32 %v4954_v46, %v12078_v10  ;;  %v6002_v45 = vor.u32 %v6001_v23, %v5998_v29  ;;  %vm4961_vm15 = vweird.f32 %v12172_v58  ;;  %v4980_v10 = vand.u32 2147483647, %v12213_v16  ;;  %5515 = vst [vmem:[#allocation1 + $0x20] ss:$4 sm:$0xff] %v5258_v47  ;;  %v4492_v47 = vld [vmem:[#allocation3 + $0x38] sm:$0xff]  ;;  %vm12314_vm8 = vmand %vm12285_vm5, %vm5354_vm14 }
 0x538   : > { %v6007_v25 = vrot.slane %v6005_v6, 5  ;;  %v6015_v17 = vshll.u32 %v5970_v13, 16  ;;  %v4960_v51 = vadd.f32 %v12217_v18, %v4959_v21  ;;  %v9514_v30 = vmul.f32 -1.442695, %v12247_v38  ;;  %vm4963_vm0 = vmor %vm4961_vm15, %vm4962_vm13  ;;  %5516 = vst [vmem:[#allocation1 + $0x21] ss:$4 sm:$0xff] %v5259_v55  ;;  %7768 = vmatpush.bf16.msrb.mxu0 %v10228_v8 }
 0x539   : > { %v4604_v37 = vpop.f32.mrf.mxu0  ;;  %v12252_v63 = vpop.eup %10374  ;;  %v5260_v56 = vrot.slane %v12240_v54, 2  ;;  %v4982_v22 = vand.u32 2147483648, %v12213_v16  ;;  %v6003_v49 = vrot.slane %v6002_v45, 4  ;;  %v6011_v40 = vrot.slane %v6009_v20, 4  ;;  %5517 = vst [vmem:[#allocation1 + $0x22] ss:$4 sm:$0xff] %v12240_v54  ;;  %vm12337_vm10 = vmand %vm12285_vm5, %vm5389_vm3 }
 0x53a   : > { %v4647_v48 = vadd.f32 %v4604_v37, %v4491_v12  ;;  %v10377_v11 = vpop.eup %10376  ;;  %v4972_v58 = vmul.f32 %v12252_v63, %v12213_v16  ;;  %v4964_v60 = vsel %vm4963_vm0, %v12217_v18, %v4960_v51  ;;  %10378 = vpow2.f32 %v9514_v30  ;;  %v12348_v37 = vld [vmem:[%s13932_s3] ss:$0 sm:$0xff] }
 0x53b   : > { %v12263_v34 = vadd.f32 1.0, %v10377_v11  ;;  %v4969_v53 = vsel %vm12232_vm12, %v4968_v41, %v4964_v60  ;;  %v6012_v32 = vor.u32 %v6011_v40, %v6007_v25  ;;  %v6017_v15 = vrot.slane %v6015_v17, 5  ;;  %5518 = vst [vmem:[#allocation1 + $0x23] ss:$4 sm:$0xff] %v5260_v56  ;;  %v12363_v51 = vld [vmem:[%s13933_s4] ss:$0 sm:$0xff] }
 0x53c   : > { %4670 = vst [vmem:[#allocation3 + $0x98] sm:$0xff] %v4647_v48  ;;  %v4720_v27 = vmul.f32 %v11856_v62, %v4647_v48  ;;  %v4973_v50 = vsub.f32 1.0, %v4972_v58  ;;  %v5261_v62 = vrot.slane %v12240_v54, 4  ;;  %vm4977_vm4 = vweird.f32 %v12252_v63 }
 0x53d   : > { %10380 = vrcp.f32 %v12263_v34  ;;  %v6008_v33 = vsel %vm12268_vm1, %v6003_v49, %v6007_v25  ;;  %v6013_v18 = vrot.slane %v6012_v32, 4  ;;  %v12296_v5 = vmul.f32 %v4969_v53, %v12119_v9  ;;  %v12318_v29 = vld.sshfl [vmem:[#allocation1] sm:$0xff pattern:$0x73625140] }
 0x53e   : > { %v4974_v2 = vmul.f32 %v12252_v63, %v4973_v50  ;;  %v12291_v43 = vadd.f32 %v11864_v59, %v4720_v27  ;;  %vm4976_vm6 = vweird.f32 %v12213_v16  ;;  %vm12299_vm7 = vcmp.eq.f32.partialorder %v4980_v10, 8.507059e+37  ;;  %5521 = vst [vmem:[#allocation1] ss:$4 sm:$0xff] %v5261_v62  ;;  %v4493_v50 = vld [vmem:[#allocation3 + $0x50] sm:$0xff] }
 0x53f   : > { %v4983_v39 = vor.u32 1.1754944e-38, %v4982_v22  ;;  %v6018_v9 = vsel %vm12268_vm1, %v6013_v18, %v6017_v15  ;;  %vm12322_vm9 = vmor %vm4976_vm6, %vm4977_vm4  ;;  %v4995_v6 = vand.u32 2147483647, %v12263_v34  ;;  %v6220_v46 = vunpack.c.l.b16 %v6008_v33  ;;  %v10227_v33 = vld [vmem:[%s13931_s2 + $0x188] sm:$0xff] }
 0x540   : > { %v4975_v59 = vadd.f32 %v12252_v63, %v4974_v2  ;;  %v9515_v55 = vmul.f32 -1.442695, %v12291_v43  ;;  %v10379_v19 = vpop.eup %10378  ;;  %v6221_v44 = vunpack.c.l.b16 %v6018_v9  ;;  %v4997_v23 = vand.u32 2147483648, %v12263_v34  ;;  %7769 = vmatpush.bf16.msrb.mxu0 %v10227_v33 }
 0x541   : > { %v4607_v57 = vpop.f32.mrf.mxu0  ;;  %v12331_v41 = vadd.f32 1.0, %v10379_v19  ;;  %v5262_v45 = vrot.slane %v12240_v54, 6  ;;  %v5263_v20 = vrot.slane %v12296_v5, 2  ;;  %v5640_v54 = vsel %vm12314_vm8, %v12196_v52, 0.0  ;;  %v10209_v52 = vld [vmem:[%s13931_s2 + $0x138] sm:$0xff] }
 0x542   : > { %v4648_v35 = vadd.f32 %v4607_v57, %v4492_v47  ;;  %v4979_v13 = vsel %vm12322_vm9, %v12252_v63, %v4975_v59  ;;  %10382 = vpow2.f32 %v9515_v55  ;;  %v6236_v10 = vpack.c.b16 %v6221_v44, %v6220_v46  ;;  %7238 = vmatpush.bf16.msrb.mxu2 %v10209_v52  ;;  %v12400_v8 = vld.sshfl [vmem:[#allocation1 + $0x20] sm:$0xff pattern:$0x73625140] }
 0x543   : > { %v12341_v12 = vpop.eup %10380  ;;  %v4984_v17 = vsel %vm12299_vm7, %v4983_v39, %v4979_v13  ;;  %10384 = vrcp.f32 %v12331_v41  ;;  %v5264_v56 = vrot.slane %v12296_v5, 4  ;;  %v5641_v48 = vsel %vm12285_vm5, %v12230_v26, 0.0  ;;  %5523 = vst [vmem:[#allocation1 + $0x20] ss:$4 sm:$0xff] %v5262_v45 }
 0x544   : > { %4671 = vst [vmem:[#allocation3 + $0x38] sm:$0xff] %v4648_v35  ;;  %v4721_v25 = vmul.f32 %v12348_v37, %v4648_v35  ;;  %v4987_v63 = vmul.f32 %v12341_v12, %v12263_v34  ;;  %6308 = vmatmul.bf16.vlgmr.msra.gmra.mxu2 %v6236_v10  ;;  %v5642_v11 = vsel %vm12337_vm10, %v12243_v0, 0.0  ;;  %v5265_v58 = vrot.slane %v12296_v5, 6  ;;  %7770 = vmatpush.bf16.msrb.mxu0 %v10226_v61 }
 0x545   : > { %vm12378_vm11 = vcmp.eq.f32.partialorder %v4995_v6, 8.507059e+37  ;;  %v4998_v40 = vor.u32 1.1754944e-38, %v4997_v23  ;;  %v12383_v60 = vmul.f32 %v4984_v17, %v12154_v42  ;;  %vm4992_vm12 = vweird.f32 %v12341_v12  ;;  %5524 = vst [vmem:[#allocation1 + $0x21] ss:$4 sm:$0xff] %v12296_v5  ;;  %v4494_v17 = vld [vmem:[#allocation3 + $0x70] sm:$0xff] }
 0x546   : > { %v12366_v30 = vadd.f32 %v12363_v51, %v4721_v25  ;;  %v4988_v22 = vsub.f32 1.0, %v4987_v63  ;;  %v5670_v0 = vpack.c.bf16 %v5640_v54, %v5640_v54  ;;  %v5671_v53 = vpack.c.bf16 %v5641_v48, %v5641_v48  ;;  %v10201_v25 = vld [vmem:[%s13931_s2 + $0xf8] sm:$0xff]  ;;  %5525 = vst [vmem:[#allocation1 + $0x22] ss:$4 sm:$0xff] %v5263_v20 }
 0x547   : > { %v5672_v15 = vpack.c.bf16 %v5642_v11, %v5642_v11  ;;  %v5312_v62 = vadd.s32 2, %v11999_v3  ;;  %v5010_v4 = vand.u32 2147483647, %v12331_v41  ;;  %vm4991_vm13 = vweird.f32 %v12263_v34  ;;  %v5522_v52 = vld.sshfl [vmem:[#allocation1] sm:$0xff pattern:$0x73625140]  ;;  %6828 = vmatpush.bf16.msrb.mxu1 %v10201_v25 }
 0x548   : > { %v9516_v26 = vmul.f32 -1.442695, %v12366_v30  ;;  %v10383_v27 = vpop.eup %10382  ;;  %v4989_v1 = vmul.f32 %v12341_v12, %v4988_v22  ;;  %5700 = vst [vmem:[#allocation4 + $0xc] sm:$0xf] %v5670_v0  ;;  %v5012_v47 = vand.u32 2147483648, %v12331_v41  ;;  %vm12404_vm15 = vmor %vm4991_vm13, %vm4992_vm12  ;;  %v5266_v34 = vrot.slane %v12383_v60, 2 }
 0x549   : > { %v4609_v32 = vpop.f32.mrf.mxu0  ;;  %v12390_v2 = vadd.f32 1.0, %v10383_v27  ;;  %v12395_v18 = vpop.eup %10384  ;;  %5701 = vst [vmem:[#allocation4 + $0x10] sm:$0xf] %v5671_v53  ;;  %vm5326_vm0 = vcmp.ge.s32.totalorder %v5312_v62, 0  ;;  %vm5336_vm4 = vcmp.lt.s32.totalorder %v5312_v62, 16  ;;  %vm5006_vm5 = vweird.f32 %v12331_v41 }
 0x54a   : > { %10386 = vpow2.f32 %v9516_v26  ;;  %v4649_v42 = vadd.f32 %v4609_v32, %v4493_v50  ;;  %v4990_v31 = vadd.f32 %v12341_v12, %v4989_v1  ;;  %v5002_v39 = vmul.f32 %v12395_v18, %v12331_v41  ;;  %5702 = vst [vmem:[#allocation4 + $0x14] sm:$0x1] %v5672_v15  ;;  %vm12433_vm8 = vmand %vm5326_vm0, %vm5336_vm4 }
 0x54b   : > { %10388 = vrcp.f32 %v12390_v2  ;;  %v5267_v57 = vrot.slane %v12383_v60, 4  ;;  %v5268_v16 = vrot.slane %v12383_v60, 6  ;;  %vm5007_vm6 = vweird.f32 %v12395_v18  ;;  %vm12492_vm13 = vmand %vm12433_vm8, %vm5389_vm3  ;;  %5526 = vst [vmem:[#allocation1 + $0x23] ss:$4 sm:$0xff] %v5264_v56 }
 0x54c   : > { %4672 = vst [vmem:[#allocation3 + $0x50] sm:$0xff] %v4649_v42  ;;  %v4994_v55 = vsel %vm12404_vm15, %v12341_v12, %v4990_v31  ;;  %v4722_v9 = vmul.f32 %v12348_v37, %v4649_v42  ;;  %v5003_v19 = vsub.f32 1.0, %v5002_v39  ;;  %vm12423_vm7 = vcmp.eq.f32.partialorder %v5010_v4, 8.507059e+37  ;;  %vm12454_vm9 = vmor %vm5006_vm5, %vm5007_vm6 }
 0x54d   : > { %v5025_v46 = vand.u32 2147483647, %v12390_v2  ;;  %v12439_v13 = vadd.s32 3, %v11999_v3  ;;  %v4999_v21 = vsel %vm12378_vm11, %v4998_v40, %v4994_v55  ;;  %v5013_v45 = vor.u32 1.1754944e-38, %v5012_v47  ;;  %vm12471_vm11 = vmand %vm12433_vm8, %vm5354_vm14  ;;  %5528 = vst [vmem:[#allocation1] ss:$4 sm:$0xff] %v5265_v58 }
 0x54e   : > { %v12429_v44 = vadd.f32 %v12363_v51, %v4722_v9  ;;  %v5004_v12 = vmul.f32 %v12395_v18, %v5003_v19  ;;  %v5027_v10 = vand.u32 2147483648, %v12390_v2  ;;  %vm5021_vm10 = vweird.f32 %v12390_v2  ;;  %5529 = vst [vmem:[#allocation1 + $0x1] ss:$4 sm:$0xff] %v12383_v60 }
 0x54f   : > { %v6384_v48 = vld [vmem:[#allocation4 + $0xc] sm:$0xe]  ;;  %v5644_v27 = vsel %vm12433_vm8, %v12400_v8, 0.0  ;;  %v12479_v1 = vmul.f32 %v4999_v21, %v12209_v36  ;;  %vm12483_vm12 = vcmp.eq.f32.partialorder %v5025_v46, 8.507059e+37  ;;  %vm5327_vm15 = vcmp.ge.s32.totalorder %v12439_v13, 0 }
 0x550   : > { %v10387_v23 = vpop.eup %10386  ;;  %v5005_v49 = vadd.f32 %v12395_v18, %v5004_v12  ;;  %v10155_v20 = vld [vmem:[#allocation4 + $0xc] sm:$0xff]  ;;  %v9517_v40 = vmul.f32 -1.442695, %v12429_v44  ;;  %v5028_v62 = vor.u32 1.1754944e-38, %v5027_v10  ;;  %v9641_v42 = vrot.slane %v6384_v48, 9 }
 0x551   : > { %v12459_v54 = vadd.f32 1.0, %v10387_v23  ;;  %v4612_v11 = vpop.f32.mrf.mxu0  ;;  %v12461_v22 = vpop.eup %10388  ;;  %v6385_v26 = vld [vmem:[#allocation4 + $0x10] sm:$0xf]  ;;  %v5971_v32 = vld [vmem:[#allocation4 + $0xc] sm:$0xf]  ;;  %5900 = vmatmul.bf16.gmra.mxu1 %v10155_v20  ;;  %v12511_v39 = vsel %vm12492_vm13, %v5522_v52, 0.0 }
 0x552   : > { %v12465_v41 = vadd.f32 %v4612_v11, %v4494_v17  ;;  %v5017_v53 = vmul.f32 %v12461_v22, %v12390_v2  ;;  %v5009_v36 = vsel %vm12454_vm9, %v12395_v18, %v5005_v49  ;;  %v6386_v4 = vld [vmem:[#allocation4 + $0x14] sm:$0x1]  ;;  %v6441_v47 = vrot.slane %v6385_v26, 5  ;;  %v5972_v61 = vld [vmem:[#allocation4 + $0x10] sm:$0xf] }
 0x553   : > { %10390 = vrcp.f32 %v12459_v54  ;;  %v5014_v33 = vsel %vm12423_vm7, %v5013_v45, %v5009_v36  ;;  %v6444_v59 = vrot.slane %v6386_v4, 5  ;;  %vm5022_vm0 = vweird.f32 %v12461_v22  ;;  %5530 = vst [vmem:[#allocation1 + $0x2] ss:$4 sm:$0xff] %v5266_v34  ;;  %v5527_v63 = vld.sshfl [vmem:[#allocation1 + $0x20] sm:$0xff pattern:$0x73625140] }
 0x554   : > { %10392 = vpow2.f32 %v9517_v40  ;;  %4673 = vst [vmem:[#allocation3 + $0x70] sm:$0xff] %v12465_v41  ;;  %v5018_v31 = vsub.f32 1.0, %v5017_v53  ;;  %v6020_v56 = vshrl.u32 %v5971_v32, 16  ;;  %v5643_v18 = vsel %vm12471_vm11, %v12318_v29, 0.0  ;;  %vm5023_vm5 = vmor %vm5021_vm10, %vm5022_vm0 }
 0x555   : > { %v6442_v9 = vsel %vm12177_vm2, %v9641_v42, %v6441_v47  ;;  %v6443_v19 = vrot.slane %v6441_v47, 4  ;;  %v6023_v6 = vshll.u32 %v5971_v32, 16  ;;  %v12520_v46 = vmul.f32 %v5014_v33, %v12247_v38  ;;  %5531 = vst [vmem:[#allocation1 + $0x3] ss:$4 sm:$0xff] %v5267_v57 }
 0x556   : > { %v5019_v55 = vmul.f32 %v12461_v22, %v5018_v31  ;;  %v5040_v29 = vand.u32 2147483647, %v12459_v54  ;;  %v5042_v23 = vand.u32 2147483648, %v12459_v54  ;;  %vm5337_vm4 = vcmp.lt.s32.totalorder %v12439_v13, 16  ;;  %5532 = vst [vmem:[#allocation1 + $0x20] ss:$4 sm:$0xff] %v5268_v16 }
 0x557   : > { %v6445_v21 = vsel %vm12177_vm2, %v6443_v19, %v6444_v59  ;;  %v6022_v12 = vrot.slane %v6020_v56, 4  ;;  %v6025_v45 = vrot.slane %v6023_v6, 5  ;;  %v6523_v10 = vunpack.c.l.b16 %v6442_v9  ;;  %v5973_v16 = vld [vmem:[#allocation4 + $0x14] sm:$0x1]  ;;  %vm12557_vm7 = vmand %vm5327_vm15, %vm5337_vm4  ;;  %v4495_v19 = vld [vmem:[#allocation3 + $0xa0] sm:$0xff] }
 0x558   : > { %v5020_v58 = vadd.f32 %v12461_v22, %v5019_v55  ;;  %v6524_v25 = vunpack.c.l.b16 %v6445_v21  ;;  %v6029_v17 = vshll.u32 %v5972_v61, 16  ;;  %v6033_v49 = vshrl.u32 %v5972_v61, 16  ;;  %vm12584_vm11 = vmand %vm12557_vm7, %vm5354_vm14 }
 0x559   : > { %v12527_v5 = vpop.eup %10390  ;;  %v6026_v52 = vor.u32 %v6025_v45, %v6022_v12  ;;  %v5269_v26 = vrot.slane %v12479_v1, 2  ;;  %v5270_v0 = vrot.slane %v12479_v1, 4  ;;  %v5271_v53 = vrot.slane %v12479_v1, 6  ;;  %v4614_v47 = vpop.f32.mrf.mxu0 }
 0x55a   : > { %v10393_v38 = vpop.eup %10392  ;;  %v5032_v34 = vmul.f32 %v12527_v5, %v12459_v54  ;;  %v5024_v48 = vsel %vm5023_vm5, %v12461_v22, %v5020_v58  ;;  %v6538_v20 = vpack.c.b16 %v6524_v25, %v6523_v10  ;;  %v6031_v40 = vrot.slane %v6029_v17, 5 }
 0x55b   : > { %v12541_v11 = vadd.f32 1.0, %v10393_v38  ;;  %v5029_v2 = vsel %vm12483_vm12, %v5028_v62, %v5024_v48  ;;  %vm5036_vm6 = vweird.f32 %v12459_v54  ;;  %v5043_v60 = vor.u32 1.1754944e-38, %v5042_v23  ;;  %vm12629_vm12 = vmand %vm12557_vm7, %vm5389_vm3 }
 0x55c   : > { %v5033_v57 = vsub.f32 1.0, %v5032_v34  ;;  %6614 = vmatmul.bf16.gmra.mxu3 %v6538_v20  ;;  %v6035_v50 = vrot.slane %v6033_v49, 4  ;;  %v5272_v15 = vrot.slane %v12520_v46, 2  ;;  %v5273_v36 = vrot.slane %v12520_v46, 4 }
 0x55d   : > { %10394 = vrcp.f32 %v12541_v11  ;;  %v5274_v62 = vrot.slane %v12520_v46, 6  ;;  %v12565_v4 = vmul.f32 %v5029_v2, %v12291_v43  ;;  %vm12567_vm9 = vcmp.eq.f32.partialorder %v5040_v29, 8.507059e+37  ;;  %v5533_v59 = vld.sshfl [vmem:[#allocation1] sm:$0xff pattern:$0x73625140]  ;;  %v10200_v2 = vld [vmem:[%s13931_s2 + $0xf0] sm:$0xff] }
 0x55e   : > { %v5034_v22 = vmul.f32 %v12527_v5, %v5033_v57  ;;  %vm5037_vm10 = vweird.f32 %v12527_v5  ;;  %v5055_v13 = vand.u32 2147483647, %v12541_v11  ;;  %v6027_v33 = vrot.slane %v6026_v52, 4  ;;  %5535 = vst [vmem:[#allocation1] ss:$4 sm:$0xff] %v12479_v1  ;;  %v10208_v1 = vld [vmem:[%s13931_s2 + $0x130] sm:$0xff]  ;;  %6829 = vmatpush.bf16.msrb.mxu1 %v10200_v2 }
 0x55f   : > { %v6036_v31 = vor.u32 %v6035_v50, %v6031_v40  ;;  %v6039_v55 = vshll.u32 %v5973_v16, 16  ;;  %v4723_v9 = vmul.f32 %v12348_v37, %v12465_v41  ;;  %v10258_v43 = vpack.c.bf16 %v5644_v27, %v5643_v18  ;;  %5536 = vst [vmem:[#allocation1 + $0x1] ss:$4 sm:$0xff] %v5269_v26  ;;  %vm12608_vm8 = vmor %vm5036_vm6, %vm5037_vm10  ;;  %7239 = vmatpush.bf16.msrb.mxu2 %v10208_v1 }
 0x560   : > { %v5035_v56 = vadd.f32 %v12527_v5, %v5034_v22  ;;  %v5057_v6 = vand.u32 2147483648, %v12541_v11  ;;  %v4651_v41 = vadd.f32 %v4614_v47, %v4495_v19  ;;  %v5675_v35 = vpack.c.bf16 %v12511_v39, %v12511_v39  ;;  %5537 = vst [vmem:[#allocation1 + $0x2] ss:$4 sm:$0xff] %v5270_v0  ;;  %v4496_v22 = vld [vmem:[#allocation3 + $0xa8] sm:$0xff] }
 0x561   : > { %v6037_v29 = vrot.slane %v6036_v31, 4  ;;  %v5275_v27 = vrot.slane %v12565_v4, 2  ;;  %v6032_v18 = vsel %vm12268_vm1, %v6027_v33, %v6031_v40  ;;  %v6041_v23 = vrot.slane %v6039_v55, 5  ;;  %10275 = vst [vmem:[#allocation4 + $0x18] sm:$0xff] %v10258_v43   ;;  %v4617_v0 = vpop.f32.mrf.mxu0 }
 0x562   : > { %v12598_v58 = vadd.f32 %v12363_v51, %v4723_v9  ;;  %v5276_v21 = vrot.slane %v12565_v4, 4  ;;  %4674 = vst [vmem:[#allocation3 + $0xa0] sm:$0xff] %v4651_v41  ;;  %v4724_v45 = vmul.f32 %v12348_v37, %v4651_v41  ;;  %v5646_v38 = vsel %vm12584_vm11, %v5527_v63, 0.0 }
 0x563   : > { %v12592_v8 = vpop.eup %10394  ;;  %v5039_v34 = vsel %vm12608_vm8, %v12527_v5, %v5035_v56  ;;  %v6042_v54 = vsel %vm12268_vm1, %v6037_v29, %v6041_v23  ;;  %5705 = vst [vmem:[#allocation4 + $0x20] sm:$0x1] %v5675_v35  ;;  %v5647_v25 = vsel %vm12557_vm7, %v5533_v59, 0.0  ;;  %v6222_v48 = vunpack.c.l.b16 %v6032_v18  ;;  %v5534_v5 = vld.sshfl [vmem:[#allocation1 + $0x20] sm:$0xff pattern:$0x73625140] }
 0x564   : > { %v5047_v12 = vmul.f32 %v12592_v8, %v12541_v11  ;;  %v9518_v10 = vmul.f32 -1.442695, %v12598_v58  ;;  %v6223_v52 = vunpack.c.l.b16 %v6042_v54  ;;  %v12634_v49 = vadd.f32 %v12363_v51, %v4724_v45  ;;  %5538 = vst [vmem:[#allocation1 + $0x3] ss:$4 sm:$0xff] %v5271_v53 }
 0x565   : > { %v5676_v57 = vpack.c.bf16 %v5646_v38, %v5646_v38  ;;  %v5277_v20 = vrot.slane %v12565_v4, 6  ;;  %v5044_v40 = vsel %vm12567_vm9, %v5043_v60, %v5039_v34  ;;  %v5677_v16 = vpack.c.bf16 %v5647_v25, %v5647_v25  ;;  %5539 = vst [vmem:[#allocation1 + $0x20] ss:$4 sm:$0xff] %v12520_v46 }
 0x566   : > { %v5048_v17 = vsub.f32 1.0, %v5047_v12  ;;  %10396 = vpow2.f32 %v9518_v10  ;;  %v6237_v50 = vpack.c.b16 %v6223_v52, %v6222_v48  ;;  %v9519_v32 = vmul.f32 -1.442695, %v12634_v49  ;;  %5540 = vst [vmem:[#allocation1 + $0x21] ss:$4 sm:$0xff] %v5272_v15 }
 0x567   : > { %v4652_v33 = vadd.f32 %v4617_v0, %v4496_v22  ;;  %v5648_v53 = vsel %vm12629_vm12, %v5534_v5, 0.0  ;;  %5706 = vst [vmem:[#allocation4 + $0x24] sm:$0xf] %v5676_v57  ;;  %vm5052_vm13 = vweird.f32 %v12592_v8  ;;  %v12650_v9 = vmul.f32 %v5044_v40, %v12366_v30 }
 0x568   : > { %v5049_v26 = vmul.f32 %v12592_v8, %v5048_v17  ;;  %v10156_v60 = vld [vmem:[#allocation4 + $0x18] sm:$0xff]  ;;  %5707 = vst [vmem:[#allocation4 + $0x28] sm:$0xf] %v5677_v16  ;;  %6313 = vmatmul.bf16.gmra.mxu2 %v6237_v50  ;;  %10398 = vpow2.f32 %v9519_v32  ;;  %vm5051_vm15 = vweird.f32 %v12541_v11  ;;  %vm12661_vm4 = vcmp.eq.f32.partialorder %v5055_v13, 8.507059e+37  ;;  %v10207_v50 = vld [vmem:[%s13931_s2 + $0x128] sm:$0xff] }
 0x569   : > { %v10218_v42 = vld [vmem:[#allocation4 + $0x18] sm:$0xff]  ;;  %4675 = vst [vmem:[#allocation3 + $0xa8] sm:$0xff] %v4652_v33  ;;  %5905 = vmatmul.bf16.gmra.mxu1 %v10156_v60  ;;  %vm12655_vm0 = vmor %vm5051_vm15, %vm5052_vm13  ;;  %v5058_v18 = vor.u32 1.1754944e-38, %v5057_v6  ;;  %v5678_v1 = vpack.c.bf16 %v5648_v53, %v5648_v53  ;;  %v4725_v38 = vmul.f32 %v12348_v37, %v4652_v33  ;;  %v5278_v11 = vrot.slane %v12650_v9, 2  ;;  %v4619_v22 = vpop.f32.mrf.mxu0  ;;  %7240 = vmatpush.bf16.msrb.mxu2 %v10207_v50 }
 0x56a   : > { %v5050_v31 = vadd.f32 %v12592_v8, %v5049_v26  ;;  %v6387_v47 = vld [vmem:[#allocation4 + $0x18] sm:$0xe]  ;;  %v6388_v59 = vld [vmem:[#allocation4 + $0x1c] sm:$0xf]  ;;  %7771 = vmatmul.bf16.vlgmr.msrb.gmra.mxu0 %v10218_v42  ;;  %v6389_v43 = vld [vmem:[#allocation4 + $0x20] sm:$0x1] }
 0x56b   : > { %v9642_v56 = vrot.slane %v6387_v47, 9  ;;  %v5974_v55 = vld [vmem:[#allocation4 + $0x18] sm:$0xf]  ;;  %v6448_v19 = vrot.slane %v6388_v59, 5  ;;  %v5975_v61 = vld [vmem:[#allocation4 + $0x1c] sm:$0xf]  ;;  %v12694_v26 = vadd.f32 %v12363_v51, %v4725_v38 }
 0x56c   : > { %v6044_v29 = vshrl.u32 %v5974_v55, 16  ;;  %v10397_v41 = vpop.eup %10396  ;;  %v6047_v23 = vshll.u32 %v5974_v55, 16  ;;  %v5054_v39 = vsel %vm12655_vm0, %v12592_v8, %v5050_v31  ;;  %v6451_v13 = vrot.slane %v6389_v43, 5  ;;  %5541 = vst [vmem:[#allocation1 + $0x22] ss:$4 sm:$0xff] %v5273_v36  ;;  %v4497_v42 = vld [vmem:[#allocation3 + $0x68] sm:$0xff] }
 0x56d   : > { %v12670_v12 = vadd.f32 1.0, %v10397_v41  ;;  %v6450_v45 = vrot.slane %v6448_v19, 4  ;;  %v6053_v10 = vshll.u32 %v5975_v61, 16  ;;  %v5279_v6 = vrot.slane %v12650_v9, 4  ;;  %5542 = vst [vmem:[#allocation1 + $0x23] ss:$4 sm:$0xff] %v5274_v62 }
 0x56e   : > { %v6046_v34 = vrot.slane %v6044_v29, 4  ;;  %v6049_v54 = vrot.slane %v6047_v23, 5  ;;  %v6449_v8 = vsel %vm12177_vm2, %v9642_v56, %v6448_v19  ;;  %v10399_v15 = vpop.eup %10398  ;;  %v5280_v25 = vrot.slane %v12650_v9, 6  ;;  %v5976_v63 = vld [vmem:[#allocation4 + $0x20] sm:$0x1] }
 0x56f   : > { %10400 = vrcp.f32 %v12670_v12  ;;  %v5059_v17 = vsel %vm12661_vm4, %v5058_v18, %v5054_v39  ;;  %v5072_v36 = vand.u32 2147483648, %v12670_v12  ;;  %v6452_v48 = vsel %vm12177_vm2, %v6450_v45, %v6451_v13  ;;  %5708 = vst [vmem:[#allocation4 + $0x2c] sm:$0x1] %v5678_v1  ;;  %v6391_v47 = vld [vmem:[#allocation4 + $0x28] sm:$0xf] }
 0x570   : > { %v12690_v5 = vadd.f32 1.0, %v10399_v15  ;;  %v6526_v52 = vunpack.c.l.b16 %v6452_v48  ;;  %v6050_v2 = vor.u32 %v6049_v54, %v6046_v34  ;;  %v6057_v57 = vshrl.u32 %v5975_v61, 16  ;;  %v5977_v43 = vld [vmem:[#allocation4 + $0x24] sm:$0xf]  ;;  %v10199_v48 = vld [vmem:[%s13931_s2 + $0xe8] sm:$0xff] }
 0x571   : > { %v5070_v46 = vand.u32 2147483647, %v12670_v12  ;;  %v6525_v62 = vunpack.c.l.b16 %v6449_v8  ;;  %v6055_v40 = vrot.slane %v6053_v10, 5  ;;  %v12697_v0 = vmul.f32 %v5059_v17, %v12429_v44  ;;  %v10157_v30 = vld [vmem:[#allocation4 + $0x24] sm:$0xff]  ;;  %6830 = vmatpush.bf16.msrb.mxu1 %v10199_v48 }
 0x572   : > { %10402 = vrcp.f32 %v12690_v5  ;;  %v6063_v16 = vshll.u32 %v5976_v63, 16  ;;  %v12704_v32 = vadd.s32 4, %v11999_v3  ;;  %v12706_v33 = vor.u32 1.1754944e-38, %v5072_v36  ;;  %v6390_v18 = vld [vmem:[#allocation4 + $0x24] sm:$0xe] }
 0x573   : > { %v6539_v53 = vpack.c.b16 %v6526_v52, %v6525_v62  ;;  %v6051_v31 = vrot.slane %v6050_v2, 4  ;;  %v6059_v60 = vrot.slane %v6057_v57, 4  ;;  %vm5066_vm5 = vweird.f32 %v12670_v12  ;;  %v10219_v1 = vld [vmem:[#allocation4 + $0x24] sm:$0xff] }
 0x574   : > { %v5085_v44 = vand.u32 2147483647, %v12690_v5  ;;  %v9520_v56 = vmul.f32 -1.442695, %v12694_v26  ;;  %v4653_v55 = vadd.f32 %v4619_v22, %v4497_v42  ;;  %vm12715_vm6 = vcmp.eq.f32.partialorder %v5070_v46, 8.507059e+37 }
 0x575   : > { %v12708_v59 = vpop.eup %10400  ;;  %v5087_v29 = vand.u32 2147483648, %v12690_v5  ;;  %6619 = vmatmul.bf16.gmra.mxu3 %v6539_v53  ;;  %v6056_v41 = vsel %vm12268_vm1, %v6051_v31, %v6055_v40  ;;  %v6060_v35 = vor.u32 %v6059_v60, %v6055_v40  ;;  %v6065_v23 = vrot.slane %v6063_v16, 5  ;;  %v12724_v45 = vld.sshfl [vmem:[#allocation1 + $0x20] sm:$0xff pattern:$0x73625140] }
 0x576   : > { %v5062_v19 = vmul.f32 %v12708_v59, %v12670_v12  ;;  %vm5067_vm7 = vweird.f32 %v12708_v59  ;;  %10404 = vpow2.f32 %v9520_v56  ;;  %4676 = vst [vmem:[#allocation3 + $0x68] sm:$0xff] %v4653_v55  ;;  %v4726_v39 = vmul.f32 %v12348_v37, %v4653_v55  ;;  %v6392_v34 = vld [vmem:[#allocation4 + $0x2c] sm:$0x1]  ;;  %v12735_v52 = vld.sshfl [vmem:[#allocation1] sm:$0xff pattern:$0x73625140] }
 0x577   : > { %vm5081_vm9 = vweird.f32 %v12690_v5  ;;  %v6061_v13 = vrot.slane %v6060_v35, 4  ;;  %v6455_v54 = vrot.slane %v6391_v47, 5  ;;  %v6068_v10 = vshrl.u32 %v5977_v43, 16  ;;  %5545 = vst [vmem:[#allocation1] ss:$4 sm:$0xff] %v12565_v4  ;;  %vm5068_vm11 = vmor %vm5066_vm5, %vm5067_vm7 }
 0x578   : > { %v5063_v38 = vsub.f32 1.0, %v5062_v19  ;;  %v12727_v8 = vpop.eup %10402  ;;  %v6224_v15 = vunpack.c.l.b16 %v6056_v41  ;;  %v12730_v17 = vadd.f32 %v12363_v51, %v4726_v39  ;;  %v9643_v36 = vrot.slane %v6390_v18, 9  ;;  %5547 = vst [vmem:[#allocation1 + $0x20] ss:$4 sm:$0xff] %v5275_v27  ;;  %v5978_v60 = vld [vmem:[#allocation4 + $0x28] sm:$0xf] }
 0x579   : > { %v6071_v63 = vshll.u32 %v5977_v43, 16  ;;  %v5077_v57 = vmul.f32 %v12727_v8, %v12690_v5  ;;  %v6066_v46 = vsel %vm12268_vm1, %v6061_v13, %v6065_v23  ;;  %v6458_v62 = vrot.slane %v6392_v34, 5  ;;  %5910 = vmatmul.bf16.gmra.mxu1 %v10157_v30  ;;  %5548 = vst [vmem:[#allocation1 + $0x21] ss:$4 sm:$0xff] %v5276_v21  ;;  %v4622_v23 = vpop.f32.mrf.mxu0 }
 0x57a   : > { %v5064_v2 = vmul.f32 %v12708_v59, %v5063_v38  ;;  %vm5082_vm10 = vweird.f32 %v12727_v8  ;;  %v6225_v40 = vunpack.c.l.b16 %v6066_v46  ;;  %7776 = vmatmul.bf16.gmra.mxu0 %v10219_v1  ;;  %v9521_v22 = vmul.f32 -1.442695, %v12730_v17  ;;  %5549 = vst [vmem:[#allocation1 + $0x22] ss:$4 sm:$0xff] %v5277_v20 }
 0x57b   : > { %v6457_v16 = vrot.slane %v6455_v54, 4  ;;  %v5078_v53 = vsub.f32 1.0, %v5077_v57  ;;  %v6456_v31 = vsel %vm12177_vm2, %v9643_v36, %v6455_v54  ;;  %v6070_v42 = vrot.slane %v6068_v10, 4  ;;  %5550 = vst [vmem:[#allocation1 + $0x23] ss:$4 sm:$0xff] %v12650_v9  ;;  %vm12780_vm8 = vmor %vm5081_vm9, %vm5082_vm10  ;;  %v4498_v10 = vld [vmem:[#allocation3 + $0x30] sm:$0xff] }
 0x57c   : > { %v5065_v50 = vadd.f32 %v12708_v59, %v5064_v2  ;;  %v10405_v47 = vpop.eup %10404  ;;  %v6238_v56 = vpack.c.b16 %v6225_v40, %v6224_v15  ;;  %10406 = vpow2.f32 %v9521_v22  ;;  %v6073_v55 = vrot.slane %v6071_v63, 5  ;;  %v5979_v54 = vld [vmem:[#allocation4 + $0x2c] sm:$0x1] }
 0x57d   : > { %v6459_v27 = vsel %vm12177_vm2, %v6457_v16, %v6458_v62  ;;  %v5079_v19 = vmul.f32 %v12727_v8, %v5078_v53  ;;  %v12762_v21 = vadd.f32 1.0, %v10405_v47  ;;  %v6527_v35 = vunpack.c.l.b16 %v6456_v31 }
 0x57e   : > { %v5069_v43 = vsel %vm5068_vm11, %v12708_v59, %v5065_v50  ;;  %v6528_v41 = vunpack.c.l.b16 %v6459_v27  ;;  %6318 = vmatmul.bf16.gmra.mxu2 %v6238_v56  ;;  %v6074_v30 = vor.u32 %v6073_v55, %v6070_v42  ;;  %v6077_v18 = vshll.u32 %v5978_v60, 16  ;;  %v5546_v15 = vld.sshfl [vmem:[#allocation1] sm:$0xff pattern:$0x73625140] }
 0x57f   : > { %v5074_v12 = vsel %vm12715_vm6, %v12706_v33, %v5069_v43  ;;  %v5080_v20 = vadd.f32 %v12727_v8, %v5079_v19  ;;  %10408 = vrcp.f32 %v12762_v21  ;;  %v6081_v59 = vshrl.u32 %v5978_v60, 16  ;;  %5552 = vst [vmem:[#allocation1] ss:$4 sm:$0xff] %v5278_v11  ;;  %v10206_v19 = vld [vmem:[%s13931_s2 + $0x120] sm:$0xff] }
 0x580   : > { %v12769_v4 = vmul.f32 %v5074_v12, %v12598_v58  ;;  %v5281_v1 = vrot.slane %v12697_v0, 2  ;;  %v5282_v39 = vrot.slane %v12697_v0, 4  ;;  %v5283_v61 = vrot.slane %v12697_v0, 6  ;;  %5553 = vst [vmem:[#allocation1 + $0x1] ss:$4 sm:$0xff] %v5279_v6  ;;  %7241 = vmatpush.bf16.msrb.mxu2 %v10206_v19 }
 0x581   : > { %vm12786_vm12 = vcmp.eq.f32.partialorder %v5085_v44, 8.507059e+37  ;;  %v5084_v38 = vsel %vm12780_vm8, %v12727_v8, %v5080_v20  ;;  %v5088_v13 = vor.u32 1.1754944e-38, %v5087_v29  ;;  %v6540_v34 = vpack.c.b16 %v6528_v41, %v6527_v35  ;;  %5554 = vst [vmem:[#allocation1 + $0x2] ss:$4 sm:$0xff] %v5280_v25  ;;  %v4499_v41 = vld [vmem:[#allocation3 + $0x58] sm:$0xff]  ;;  %v4624_v12 = vpop.f32.mrf.mxu0 }
 0x582   : > { %v10407_v36 = vpop.eup %10406  ;;  %v5100_v48 = vand.u32 2147483647, %v12762_v21  ;;  %v5102_v63 = vand.u32 2147483648, %v12762_v21  ;;  %v6079_v44 = vrot.slane %v6077_v18, 5  ;;  %v5284_v2 = vrot.slane %v12769_v4, 2 }
 0x583   : > { %v12800_v57 = vadd.f32 1.0, %v10407_v36  ;;  %v6075_v8 = vrot.slane %v6074_v30, 4  ;;  %v6083_v5 = vrot.slane %v6081_v59, 4  ;;  %v5089_v29 = vsel %vm12786_vm12, %v5088_v13, %v5084_v38  ;;  %5555 = vst [vmem:[#allocation1 + $0x3] ss:$4 sm:$0xff] %v12697_v0 }
 0x584   : > { %v4654_v46 = vadd.f32 %v4622_v23, %v4498_v10  ;;  %vm5328_vm13 = vcmp.ge.s32.totalorder %v12704_v32, 0  ;;  %vm5338_vm15 = vcmp.lt.s32.totalorder %v12704_v32, 16  ;;  %v5285_v62 = vrot.slane %v12769_v4, 4  ;;  %v5551_v16 = vld.sshfl [vmem:[#allocation1 + $0x20] sm:$0xff pattern:$0x73625140] }
 0x585   : > { %v12810_v11 = vpop.eup %10408  ;;  %v5286_v40 = vrot.slane %v12769_v4, 6  ;;  %10410 = vrcp.f32 %v12800_v57  ;;  %6624 = vmatmul.bf16.gmra.mxu3 %v6540_v34  ;;  %v6087_v6 = vshll.u32 %v5979_v54, 16  ;;  %vm12815_vm0 = vmand %vm5328_vm13, %vm5338_vm15  ;;  %vm5096_vm4 = vweird.f32 %v12762_v21  ;;  %5556 = vst [vmem:[#allocation1 + $0x20] ss:$4 sm:$0xff] %v5281_v1 }
 0x586   : > { %v5092_v9 = vmul.f32 %v12810_v11, %v12762_v21  ;;  %vm12823_vm5 = vcmp.eq.f32.partialorder %v5100_v48, 8.507059e+37  ;;  %v5103_v32 = vor.u32 1.1754944e-38, %v5102_v63  ;;  %4677 = vst [vmem:[#allocation3 + $0x30] sm:$0xff] %v4654_v46  ;;  %vm5369_vm6 = vmand %vm12815_vm0, %vm5354_vm14  ;;  %v12832_v50 = vmul.f32 %v5089_v29, %v12634_v49  ;;  %v10198_v29 = vld [vmem:[%s13931_s2 + $0xe0] sm:$0xff] }
 0x587   : > { %v6080_v53 = vsel %vm12268_vm1, %v6075_v8, %v6079_v44  ;;  %v6084_v31 = vor.u32 %v6083_v5, %v6079_v44  ;;  %v4727_v60 = vmul.f32 %v12348_v37, %v4654_v46  ;;  %vm5097_vm7 = vweird.f32 %v12810_v11  ;;  %vm5404_vm9 = vmand %vm12815_vm0, %vm5389_vm3  ;;  %v4500_v46 = vld [vmem:[#allocation3 + $0x80] sm:$0xff]  ;;  %6831 = vmatpush.bf16.msrb.mxu1 %v10198_v29 }
 0x588   : > { %v5093_v42 = vsub.f32 1.0, %v5092_v9  ;;  %v5649_v47 = vsel %vm5369_vm6, %v12735_v52, 0.0  ;;  %v5650_v49 = vsel %vm12815_vm0, %v12724_v45, 0.0  ;;  %v6089_v27 = vrot.slane %v6087_v6, 5  ;;  %vm5098_vm10 = vmor %vm5096_vm4, %vm5097_vm7 }
 0x589   : > { %v6085_v56 = vrot.slane %v6084_v31, 4  ;;  %v12847_v55 = vadd.f32 %v12363_v51, %v4727_v60  ;;  %v10263_v43 = vpack.c.bf16 %v5650_v49, %v5649_v47  ;;  %v4655_v30 = vadd.f32 %v4624_v12, %v4499_v41  ;;  %v4627_v25 = vpop.f32.mrf.mxu0 }
 0x58a   : > { %v5094_v35 = vmul.f32 %v12810_v11, %v5093_v42  ;;  %v5651_v52 = vsel %vm5404_vm9, %v5546_v15, 0.0  ;;  %v5315_v18 = vadd.s32 5, %v11999_v3  ;;  %v6226_v59 = vunpack.c.l.b16 %v6080_v53  ;;  %v5557_v34 = vld.sshfl [vmem:[#allocation1] sm:$0xff pattern:$0x73625140] }
 0x58b   : > { %v12854_v20 = vpop.eup %10410  ;;  %v6090_v45 = vsel %vm12268_vm1, %v6085_v56, %v6089_v27  ;;  %v9522_v23 = vmul.f32 -1.442695, %v12847_v55  ;;  %10276 = vst [vmem:[#allocation4 + $0x30] sm:$0xff] %v10263_v43   ;;  %v5681_v1 = vpack.c.bf16 %v5651_v52, %v5651_v52  ;;  %v5115_v38 = vand.u32 2147483647, %v12800_v57 }
 0x58c   : > { %v5095_v33 = vadd.f32 %v12810_v11, %v5094_v35  ;;  %v5107_v58 = vmul.f32 %v12854_v20, %v12800_v57  ;;  %v6227_v13 = vunpack.c.l.b16 %v6090_v45  ;;  %4678 = vst [vmem:[#allocation3 + $0x58] sm:$0xff] %v4655_v30  ;;  %v4728_v54 = vmul.f32 %v12348_v37, %v4655_v30 }
 0x58d   : > { %10412 = vpow2.f32 %v9522_v23  ;;  %5711 = vst [vmem:[#allocation4 + $0x38] sm:$0x1] %v5681_v1  ;;  %vm5329_vm11 = vcmp.ge.s32.totalorder %v5315_v18, 0  ;;  %vm5339_vm8 = vcmp.lt.s32.totalorder %v5315_v18, 16  ;;  %v5117_v36 = vand.u32 2147483648, %v12800_v57 }
 0x58e   : > { %v5099_v10 = vsel %vm5098_vm10, %v12810_v11, %v5095_v33  ;;  %v5108_v15 = vsub.f32 1.0, %v5107_v58  ;;  %v6239_v48 = vpack.c.b16 %v6227_v13, %v6226_v59  ;;  %vm12870_vm12 = vmand %vm5329_vm11, %vm5339_vm8  ;;  %5559 = vst [vmem:[#allocation1] ss:$4 sm:$0xff] %v5282_v39  ;;  %v5287_v21 = vrot.slane %v12832_v50, 2 }
 0x58f   : > { %v5288_v44 = vrot.slane %v12832_v50, 4  ;;  %v5104_v8 = vsel %vm12823_vm5, %v5103_v32, %v5099_v10  ;;  %v12881_v5 = vadd.f32 %v12363_v51, %v4728_v54  ;;  %vm5372_vm13 = vmand %vm12870_vm12, %vm5354_vm14  ;;  %5560 = vst [vmem:[#allocation1 + $0x1] ss:$4 sm:$0xff] %v5283_v61  ;;  %vm5112_vm15 = vweird.f32 %v12854_v20  ;;  %v5558_v11 = vld.sshfl [vmem:[#allocation1 + $0x20] sm:$0xff pattern:$0x73625140] }
 0x590   : > { %v5109_v39 = vmul.f32 %v12854_v20, %v5108_v15  ;;  %6323 = vmatmul.bf16.gmra.mxu2 %v6239_v48  ;;  %v5652_v6 = vsel %vm5372_vm13, %v5551_v16, 0.0  ;;  %v5653_v22 = vsel %vm12870_vm12, %v5557_v34, 0.0  ;;  %5561 = vst [vmem:[#allocation1 + $0x2] ss:$4 sm:$0xff] %v12769_v4  ;;  %v5289_v9 = vrot.slane %v12832_v50, 6  ;;  %vm12914_vm5 = vmand %vm12870_vm12, %vm5389_vm3 }
 0x591   : > { %vm5111_vm0 = vweird.f32 %v12800_v57  ;;  %vm12899_vm4 = vcmp.eq.f32.partialorder %v5115_v38, 8.507059e+37  ;;  %v9523_v61 = vmul.f32 -1.442695, %v12881_v5  ;;  %5562 = vst [vmem:[#allocation1 + $0x3] ss:$4 sm:$0xff] %v5284_v2  ;;  %v12907_v32 = vmul.f32 %v5104_v8, %v12694_v26  ;;  %v4629_v8 = vpop.f32.mrf.mxu0 }
 0x592   : > { %v5110_v16 = vadd.f32 %v12854_v20, %v5109_v39  ;;  %v5118_v53 = vor.u32 1.1754944e-38, %v5117_v36  ;;  %v10158_v31 = vld [vmem:[#allocation4 + $0x30] sm:$0xff]  ;;  %v5682_v42 = vpack.c.bf16 %v5652_v6, %v5652_v6  ;;  %vm5113_vm6 = vmor %vm5111_vm0, %vm5112_vm15  ;;  %v4656_v49 = vadd.f32 %v4627_v25, %v4500_v46  ;;  %5563 = vst [vmem:[#allocation1 + $0x20] ss:$4 sm:$0xff] %v5285_v62 }
 0x593   : > { %v10220_v60 = vld [vmem:[#allocation4 + $0x30] sm:$0xff]  ;;  %v10413_v47 = vpop.eup %10412  ;;  %10414 = vpow2.f32 %v9523_v61  ;;  %v5683_v56 = vpack.c.bf16 %v5653_v22, %v5653_v22  ;;  %v12921_v27 = vadd.s32 6, %v11999_v3  ;;  %5915 = vmatmul.bf16.gmra.mxu1 %v10158_v31  ;;  %v5654_v45 = vsel %vm12914_vm5, %v5558_v11, 0.0  ;;  %5564 = vst [vmem:[#allocation1 + $0x21] ss:$4 sm:$0xff] %v5286_v40 }
 0x594   : > { %v6393_v26 = vld [vmem:[#allocation4 + $0x30] sm:$0xe]  ;;  %v6394_v2 = vld [vmem:[#allocation4 + $0x34] sm:$0xf]  ;;  %v5114_v43 = vsel %vm5113_vm6, %v12854_v20, %v5110_v16  ;;  %v12924_v19 = vadd.f32 1.0, %v10413_v47  ;;  %7781 = vmatmul.bf16.gmra.mxu0 %v10220_v60  ;;  %4679 = vst [vmem:[#allocation3 + $0x80] sm:$0xff] %v4656_v49  ;;  %v4729_v18 = vmul.f32 %v12348_v37, %v4656_v49  ;;  %v5684_v10 = vpack.c.bf16 %v5654_v45, %v5654_v45 }
 0x595   : > { %v6395_v41 = vld [vmem:[#allocation4 + $0x38] sm:$0x1]  ;;  %v9644_v12 = vrot.slane %v6393_v26, 9  ;;  %v6462_v35 = vrot.slane %v6394_v2, 5  ;;  %v5119_v30 = vsel %vm12899_vm4, %v5118_v53, %v5114_v43  ;;  %v5290_v59 = vrot.slane %v12907_v32, 2  ;;  %v4501_v60 = vld [vmem:[#allocation3 + $0x20] sm:$0xff] }
 0x596   : > { %v6465_v52 = vrot.slane %v6395_v41, 5  ;;  %v5291_v20 = vrot.slane %v12907_v32, 4  ;;  %v12934_v23 = vmul.f32 %v5119_v30, %v12730_v17  ;;  %10416 = vrcp.f32 %v12924_v19  ;;  %v5980_v1 = vld [vmem:[#allocation4 + $0x30] sm:$0xf]  ;;  %5712 = vst [vmem:[#allocation4 + $0x3c] sm:$0xf] %v5682_v42 }
 0x597   : > { %v6464_v33 = vrot.slane %v6462_v35, 4  ;;  %v12938_v58 = vadd.f32 %v12363_v51, %v4729_v18  ;;  %v5981_v38 = vld [vmem:[#allocation4 + $0x34] sm:$0xf]  ;;  %v10205_v37 = vld [vmem:[%s13931_s2 + $0x118] sm:$0xff]  ;;  %5713 = vst [vmem:[#allocation4 + $0x40] sm:$0xf] %v5683_v56  ;;  %v6463_v17 = vsel %vm12177_vm2, %v9644_v12, %v6462_v35  ;;  %vm5126_vm9 = vweird.f32 %v12924_v19 }
 0x598   : > { %v5130_v13 = vand.u32 2147483647, %v12924_v19  ;;  %v5132_v34 = vand.u32 2147483648, %v12924_v19  ;;  %v5982_v54 = vld [vmem:[#allocation4 + $0x38] sm:$0x1]  ;;  %v5292_v15 = vrot.slane %v12907_v32, 6  ;;  %7242 = vmatpush.bf16.msrb.mxu2 %v10205_v37  ;;  %v6529_v11 = vunpack.c.l.b16 %v6463_v17 }
 0x599   : > { %v10415_v51 = vpop.eup %10414  ;;  %v5293_v36 = vrot.slane %v12934_v23, 2  ;;  %v6466_v48 = vsel %vm12177_vm2, %v6464_v33, %v6465_v52  ;;  %v9524_v63 = vmul.f32 -1.442695, %v12938_v58  ;;  %v6092_v62 = vshrl.u32 %v5980_v1, 16  ;;  %5565 = vst [vmem:[#allocation1 + $0x22] ss:$4 sm:$0xff] %v12832_v50 }
 0x59a   : > { %v12956_v29 = vadd.f32 1.0, %v10415_v51  ;;  %v6530_v39 = vunpack.c.l.b16 %v6466_v48  ;;  %v6095_v46 = vshll.u32 %v5980_v1, 16  ;;  %v6101_v6 = vshll.u32 %v5981_v38, 16  ;;  %5566 = vst [vmem:[#allocation1 + $0x23] ss:$4 sm:$0xff] %v5287_v21  ;;  %v10197_v16 = vld [vmem:[%s13931_s2 + $0xd8] sm:$0xff] }
 0x59b   : > { %10418 = vpow2.f32 %v9524_v63  ;;  %v6105_v22 = vshrl.u32 %v5981_v38, 16  ;;  %v5294_v61 = vrot.slane %v12934_v23, 4  ;;  %v5295_v4 = vrot.slane %v12934_v23, 6  ;;  %5714 = vst [vmem:[#allocation4 + $0x44] sm:$0x1] %v5684_v10  ;;  %6832 = vmatpush.bf16.msrb.mxu1 %v10197_v16 }
 0x59c   : > { %v12961_v0 = vpop.eup %10416  ;;  %v5133_v40 = vor.u32 1.1754944e-38, %v5132_v34  ;;  %10420 = vrcp.f32 %v12956_v29  ;;  %vm12968_vm7 = vcmp.eq.f32.partialorder %v5130_v13, 8.507059e+37  ;;  %v6541_v53 = vpack.c.b16 %v6530_v39, %v6529_v11  ;;  %v12979_v13 = vld.sshfl [vmem:[#allocation1] sm:$0xff pattern:$0x73625140] }
 0x59d   : > { %v5122_v25 = vmul.f32 %v12961_v0, %v12924_v19  ;;  %v6094_v31 = vrot.slane %v6092_v62, 4  ;;  %v6111_v21 = vshll.u32 %v5982_v54, 16  ;;  %v5145_v57 = vand.u32 2147483647, %v12956_v29  ;;  %v6396_v26 = vld [vmem:[#allocation4 + $0x3c] sm:$0xe] }
 0x59e   : > { %v6097_v42 = vrot.slane %v6095_v46, 5  ;;  %v6103_v47 = vrot.slane %v6101_v6, 5  ;;  %6629 = vmatmul.bf16.gmra.mxu3 %v6541_v53  ;;  %v6107_v49 = vrot.slane %v6105_v22, 4  ;;  %v4657_v56 = vadd.f32 %v4629_v8, %v4501_v60  ;;  %v6397_v43 = vld [vmem:[#allocation4 + $0x40] sm:$0xf]  ;;  %v4632_v46 = vpop.f32.mrf.mxu0 }
 0x59f   : > { %v5123_v2 = vsub.f32 1.0, %v5122_v25  ;;  %v12974_v41 = vld [vmem:[#allocation4 + $0x3c] sm:$0xf]  ;;  %vm5127_vm10 = vweird.f32 %v12961_v0  ;;  %v5147_v12 = vand.u32 2147483648, %v12956_v29  ;;  %v6469_v18 = vrot.slane %v6397_v43, 5 }
 0x5a0   : > { %v6098_v35 = vor.u32 %v6097_v42, %v6094_v31  ;;  %v10159_v30 = vld [vmem:[#allocation4 + $0x3c] sm:$0xff]  ;;  %v6108_v33 = vor.u32 %v6107_v49, %v6103_v47  ;;  %v6113_v38 = vrot.slane %v6111_v21, 5  ;;  %4680 = vst [vmem:[#allocation3 + $0x20] sm:$0xff] %v4657_v56  ;;  %v9645_v37 = vrot.slane %v6396_v26, 9  ;;  %vm13002_vm8 = vmor %vm5126_vm9, %vm5127_vm10 }
 0x5a1   : > { %v10221_v52 = vld [vmem:[#allocation4 + $0x3c] sm:$0xff]  ;;  %v10419_v45 = vpop.eup %10418  ;;  %v5124_v1 = vmul.f32 %v12961_v0, %v5123_v2  ;;  %vm5141_vm11 = vweird.f32 %v12956_v29  ;;  %v6116_v10 = vshrl.u32 %v12974_v41, 16  ;;  %vm13006_vm12 = vcmp.eq.f32.partialorder %v5145_v57, 8.507059e+37  ;;  %5569 = vst [vmem:[#allocation1] ss:$4 sm:$0xff] %v5288_v44 }
 0x5a2   : > { %v12981_v34 = vpop.eup %10420  ;;  %v12984_v17 = vadd.f32 1.0, %v10419_v45  ;;  %v6099_v54 = vrot.slane %v6098_v35, 4  ;;  %v12987_v51 = vld.sshfl [vmem:[#allocation1 + $0x20] sm:$0xff pattern:$0x73625140]  ;;  %v6109_v8 = vrot.slane %v6108_v33, 4  ;;  %v6470_v25 = vsel %vm12177_vm2, %v9645_v37, %v6469_v18 }
 0x5a3   : > { %v5125_v48 = vadd.f32 %v12961_v0, %v5124_v1  ;;  %v5137_v63 = vmul.f32 %v12981_v34, %v12956_v29  ;;  %v12995_v39 = vld [vmem:[%s13932_s3] ss:$0 sm:$0xff]  ;;  %5920 = vmatmul.bf16.gmra.mxu1 %v10159_v30  ;;  %v6119_v53 = vshll.u32 %v12974_v41, 16  ;;  %vm5330_vm13 = vcmp.ge.s32.totalorder %v12921_v27, 0  ;;  %v6398_v57 = vld [vmem:[#allocation4 + $0x44] sm:$0x1] }
 0x5a4   : > { %v4730_v62 = vmul.f32 %v12995_v39, %v4657_v56  ;;  %10422 = vrcp.f32 %v12984_v17  ;;  %v5162_v22 = vand.u32 2147483648, %v12984_v17  ;;  %7786 = vmatmul.bf16.gmra.mxu0 %v10221_v52  ;;  %v6104_v21 = vsel %vm12268_vm1, %v6099_v54, %v6103_v47  ;;  %5571 = vst [vmem:[#allocation1 + $0x20] ss:$4 sm:$0xff] %v5289_v9  ;;  %v13036_v49 = vld [vmem:[%s13933_s4] ss:$0 sm:$0xff] }
 0x5a5   : > { %v5129_v19 = vsel %vm13002_vm8, %v12961_v0, %v5125_v48  ;;  %v5138_v31 = vsub.f32 1.0, %v5137_v63  ;;  %v6114_v60 = vsel %vm12268_vm1, %v6109_v8, %v6113_v38  ;;  %vm5142_vm15 = vweird.f32 %v12981_v34  ;;  %5572 = vst [vmem:[#allocation1 + $0x21] ss:$4 sm:$0xff] %v12907_v32  ;;  %v4502_v9 = vld [vmem:[#allocation3 + $0x8] sm:$0xf] }
 0x5a6   : > { %v5134_v42 = vsel %vm12968_vm7, %v5133_v40, %v5129_v19  ;;  %v5160_v44 = vand.u32 2147483647, %v12984_v17  ;;  %v6471_v26 = vrot.slane %v6469_v18, 4  ;;  %v6228_v47 = vunpack.c.l.b16 %v6104_v21  ;;  %5573 = vst [vmem:[#allocation1 + $0x22] ss:$4 sm:$0xff] %v5290_v59  ;;  %vm13061_vm4 = vmor %vm5141_vm11, %vm5142_vm15  ;;  %v4634_v63 = vpop.f32.mrf.mxu0  ;;  %v10194_v18 = vld [vmem:[%s13931_s2 + $0xc0] sm:$0xff] }
 0x5a7   : > { %v5139_v0 = vmul.f32 %v12981_v34, %v5138_v31  ;;  %v6229_v2 = vunpack.c.l.b16 %v6114_v60  ;;  %v13039_v50 = vadd.f32 %v13036_v49, %v4730_v62  ;;  %v13044_v40 = vmul.f32 %v5134_v42, %v12847_v55  ;;  %5574 = vst [vmem:[#allocation1 + $0x23] ss:$4 sm:$0xff] %v5291_v20  ;;  %v5984_v59 = vld [vmem:[#allocation4 + $0x40] sm:$0xf] }
 0x5a8   : > { %v4658_v56 = vadd.f32 %v4632_v46, %v4502_v9  ;;  %v6472_v43 = vrot.slane %v6398_v57, 5  ;;  %v6118_v41 = vrot.slane %v6116_v10, 4  ;;  %v5148_v30 = vor.u32 1.1754944e-38, %v5147_v12  ;;  %v5985_v10 = vld [vmem:[#allocation4 + $0x44] sm:$0x1] }
 0x5a9   : > { %v5140_v35 = vadd.f32 %v12981_v34, %v5139_v0  ;;  %vm5156_vm0 = vweird.f32 %v12984_v17  ;;  %v13053_v52 = vor.u32 1.1754944e-38, %v5162_v22  ;;  %v6240_v45 = vpack.c.b16 %v6229_v2, %v6228_v47  ;;  %v5570_v48 = vld.sshfl [vmem:[#allocation1] sm:$0xff pattern:$0x73625140]  ;;  %v10216_v47 = vld [vmem:[%s13931_s2 + $0x170] sm:$0xff] }
 0x5aa   : > { %v13055_v55 = vpop.eup %10422  ;;  %v9525_v20 = vmul.f32 -1.442695, %v13039_v50  ;;  %4681 = vst [vmem:[#allocation3 + $0x8] sm:$0xf] %v4658_v56  ;;  %v6473_v12 = vsel %vm12177_vm2, %v6471_v26, %v6472_v43  ;;  %v6121_v1 = vrot.slane %v6119_v53, 5  ;;  %vm13073_vm5 = vcmp.eq.f32.partialorder %v5160_v44, 8.507059e+37 }
 0x5ab   : > { %v5144_v33 = vsel %vm13061_vm4, %v12981_v34, %v5140_v35  ;;  %v5152_v29 = vmul.f32 %v13055_v55, %v12984_v17  ;;  %v6531_v37 = vunpack.c.l.b16 %v6470_v25  ;;  %v6532_v54 = vunpack.c.l.b16 %v6473_v12  ;;  %6328 = vmatmul.bf16.gmra.mxu2 %v6240_v45  ;;  %5576 = vst [vmem:[#allocation1] ss:$4 sm:$0xff] %v5292_v15  ;;  %v10217_v25 = vld [vmem:[%s13931_s2 + $0x178] sm:$0xff]  ;;  %v10215_v45 = vld [vmem:[%s13931_s2 + $0x168] sm:$0xff] }
 0x5ac   : > { %v5296_v8 = vrot.slane %v13044_v40, 2  ;;  %10424 = vpow2.f32 %v9525_v20  ;;  %v6122_v62 = vor.u32 %v6121_v1, %v6118_v41  ;;  %v6125_v46 = vshll.u32 %v5984_v59, 16  ;;  %5577 = vst [vmem:[#allocation1 + $0x1] ss:$4 sm:$0xff] %v12934_v23  ;;  %7536 = vmatpush.bf16.msrb.mxu3 %v10217_v25  ;;  %v10196_v23 = vld [vmem:[%s13931_s2 + $0xd0] sm:$0xff]  ;;  %v10195_v12 = vld [vmem:[%s13931_s2 + $0xc8] sm:$0xff] }
 0x5ad   : > { %v5149_v34 = vsel %vm13006_vm12, %v5148_v30, %v5144_v33  ;;  %v5153_v11 = vsub.f32 1.0, %v5152_v29  ;;  %v6542_v22 = vpack.c.b16 %v6532_v54, %v6531_v37  ;;  %v6129_v53 = vshrl.u32 %v5984_v59, 16  ;;  %5578 = vst [vmem:[#allocation1 + $0x2] ss:$4 sm:$0xff] %v5293_v36  ;;  %v10204_v59 = vld [vmem:[%s13931_s2 + $0x110] sm:$0xff]  ;;  %6833 = vmatpush.bf16.msrb.mxu1 %v10196_v23 }
 0x5ae   : > { %v13086_v19 = vrot.slane %v6122_v62, 4  ;;  %v6127_v31 = vrot.slane %v6125_v46, 5  ;;  %v6135_v21 = vshll.u32 %v5985_v10, 16  ;;  %vm5340_vm6 = vcmp.lt.s32.totalorder %v12921_v27, 16  ;;  %5579 = vst [vmem:[#allocation1 + $0x3] ss:$4 sm:$0xff] %v5294_v61  ;;  %7243 = vmatpush.bf16.msrb.mxu2 %v10204_v59 }
 0x5af   : > { %v5297_v32 = vrot.slane %v13044_v40, 4  ;;  %v5298_v15 = vrot.slane %v13044_v40, 6  ;;  %v5154_v6 = vmul.f32 %v13055_v55, %v5153_v11  ;;  %vm5157_vm7 = vweird.f32 %v13055_v55  ;;  %6634 = vmatmul.bf16.gmra.mxu3 %v6542_v22  ;;  %vm13097_vm9 = vmand %vm5330_vm13, %vm5340_vm6  ;;  %v5575_v44 = vld.sshfl [vmem:[#allocation1 + $0x20] sm:$0xff pattern:$0x73625140] }
 0x5b0   : > { %v13104_v36 = vmul.f32 %v5149_v34, %v12881_v5  ;;  %v6128_v57 = vsel %vm12268_vm1, %v13086_v19, %v6127_v31  ;;  %v6131_v42 = vrot.slane %v6129_v53, 4  ;;  %vm5375_vm10 = vmand %vm13097_vm9, %vm5354_vm14  ;;  %v5656_v27 = vsel %vm13097_vm9, %v12987_v51, 0.0  ;;  %5580 = vst [vmem:[#allocation1 + $0x20] ss:$4 sm:$0xff] %v5295_v4  ;;  %7537 = vmatpush.bf16.msrb.mxu3 %v10216_v47  ;;  %v10214_v62 = vld [vmem:[%s13931_s2 + $0x160] sm:$0xff]  ;;  %v10213_v19 = vld [vmem:[%s13931_s2 + $0x158] sm:$0xff] }
 0x5b1   : > { %v5155_v61 = vadd.f32 %v13055_v55, %v5154_v6  ;;  %v4704_v5 = vld [vmem:[#allocation3 + $0x8] sm:$0xf]  ;;  %v6137_v26 = vrot.slane %v6135_v21, 5  ;;  %vm5410_vm11 = vmand %vm13097_vm9, %vm5389_vm3  ;;  %v5655_v0 = vsel %vm5375_vm10, %v12979_v13, 0.0  ;;  %v5317_v2 = vadd.s32 7, %v11999_v3  ;;  %6834 = vmatpush.bf16.msrb.mxu1 %v10195_v12 }
 0x5b2   : > { %v10425_v51 = vpop.eup %10424  ;;  %vm5158_vm8 = vmor %vm5156_vm0, %vm5157_vm7  ;;  %v4731_v9 = vmul.f32 %v12995_v39, %v4704_v5  ;;  %v6132_v16 = vor.u32 %v6131_v42, %v6127_v31  ;;  %v10268_v56 = vpack.c.bf16 %v5656_v27, %v5655_v0  ;;  %v5657_v43 = vsel %vm5410_vm11, %v5570_v48, 0.0 }
 0x5b3   : > { %v5159_v13 = vsel %vm5158_vm8, %v13055_v55, %v5155_v61  ;;  %v13134_v41 = vadd.f32 1.0, %v10425_v51  ;;  %v5687_v35 = vpack.c.bf16 %v5657_v43, %v5657_v43  ;;  %vm5331_vm12 = vcmp.ge.s32.totalorder %v5317_v2, 0 }
 0x5b4   : > { %v5164_v30 = vsel %vm13073_vm5, %v13053_v52, %v5159_v13  ;;  %v13140_v17 = vadd.f32 %v13036_v49, %v4731_v9  ;;  %v6133_v39 = vrot.slane %v6132_v16, 4  ;;  %10277 = vst [vmem:[#allocation4 + $0x48] sm:$0xff] %v10268_v56   ;;  %vm5341_vm13 = vcmp.lt.s32.totalorder %v5317_v2, 16  ;;  %v10203_v49 = vld [vmem:[%s13931_s2 + $0x108] sm:$0xff]  ;;  %7538 = vmatpush.bf16.msrb.mxu3 %v10215_v45 }
 0x5b5   : > { %v5299_v4 = vrot.slane %v13104_v36, 2  ;;  %v5300_v55 = vrot.slane %v13104_v36, 4  ;;  %v13151_v52 = vmul.f32 %v5164_v30, %v12938_v58  ;;  %10426 = vrcp.f32 %v13134_v41  ;;  %5717 = vst [vmem:[#allocation4 + $0x50] sm:$0x1] %v5687_v35  ;;  %vm13158_vm15 = vmand %vm5331_vm12, %vm5341_vm13  ;;  %7244 = vmatpush.bf16.msrb.mxu2 %v10203_v49  ;;  %v10202_v35 = vld [vmem:[%s13931_s2 + $0x100] sm:$0xff]  ;;  %v10212_v49 = vld [vmem:[%s13931_s2 + $0x150] sm:$0xff]  ;;  %6835 = vmatpush.bf16.msrb.mxu1 %v10194_v18 }
 0x5b6   : > { %v9526_v20 = vmul.f32 -1.442695, %v13140_v17  ;;  %v6138_v58 = vsel %vm12268_vm1, %v6133_v39, %v6137_v26  ;;  %vm5378_vm0 = vmand %vm13158_vm15, %vm5354_vm14  ;;  %v5581_v1 = vld.sshfl [vmem:[#allocation1] sm:$0xff pattern:$0x73625140]  ;;  %v5301_v33 = vrot.slane %v13104_v36, 6  ;;  %v6230_v37 = vunpack.c.l.b16 %v6128_v57 }
 0x5b7   : > { %v5175_v29 = vand.u32 2147483647, %v13134_v41  ;;  %v5177_v38 = vand.u32 2147483648, %v13134_v41  ;;  %vm13182_vm4 = vmand %vm13158_vm15, %vm5389_vm3  ;;  %5583 = vst [vmem:[#allocation1] ss:$4 sm:$0xff] %v13044_v40  ;;  %v5302_v10 = vrot.slane %v13151_v52, 2  ;;  %v6231_v48 = vunpack.c.l.b16 %v6138_v58 }
 0x5b8   : > { %10428 = vpow2.f32 %v9526_v20  ;;  %v5658_v63 = vsel %vm5378_vm0, %v5575_v44, 0.0  ;;  %5584 = vst [vmem:[#allocation1 + $0x1] ss:$4 sm:$0xff] %v5296_v8  ;;  %v5582_v46 = vld.sshfl [vmem:[#allocation1 + $0x20] sm:$0xff pattern:$0x73625140]  ;;  %7539 = vmatpush.bf16.msrb.mxu3 %v10214_v62  ;;  %vm5171_vm6 = vweird.f32 %v13134_v41 }
 0x5b9   : > { %v5659_v34 = vsel %vm13158_vm15, %v5581_v1, 0.0  ;;  %v5688_v11 = vpack.c.bf16 %v5658_v63, %v5658_v63  ;;  %5585 = vst [vmem:[#allocation1 + $0x2] ss:$4 sm:$0xff] %v5297_v32  ;;  %v5303_v22 = vrot.slane %v13151_v52, 4  ;;  %v5304_v53 = vrot.slane %v13151_v52, 6  ;;  %7245 = vmatpush.bf16.msrb.mxu2 %v10202_v35 }
 0x5ba   : > { %v6241_v25 = vpack.c.b16 %v6231_v48, %v6230_v37  ;;  %v13201_v8 = vsel %vm13182_vm4, %v5582_v46, 0.0  ;;  %5586 = vst [vmem:[#allocation1 + $0x3] ss:$4 sm:$0xff] %v5298_v15  ;;  %v5689_v60 = vpack.c.bf16 %v5659_v34, %v5659_v34  ;;  %v13213_v40 = vadd.s32 8, %v11999_v3 }
 0x5bb   : > { %v13208_v31 = vpop.eup %10426  ;;  %v10160_v21 = vld [vmem:[#allocation4 + $0x48] sm:$0xff]  ;;  %5718 = vst [vmem:[#allocation4 + $0x54] sm:$0xf] %v5688_v11  ;;  %v5690_v0 = vpack.c.bf16 %v13201_v8, %v13201_v8  ;;  %vm13236_vm7 = vcmp.eq.f32.partialorder %v5175_v29, 8.507059e+37  ;;  %v5178_v20 = vor.u32 1.1754944e-38, %v5177_v38 }
 0x5bc   : > { %v10222_v32 = vld [vmem:[#allocation4 + $0x48] sm:$0xff]  ;;  %v5167_v57 = vmul.f32 %v13208_v31, %v13134_v41  ;;  %6333 = vmatmul.bf16.gmra.mxu2 %v6241_v25  ;;  %v6401_v27 = vld [vmem:[#allocation4 + $0x50] sm:$0x1]  ;;  %5925 = vmatmul.bf16.gmra.mxu1 %v10160_v21  ;;  %vm5172_vm5 = vweird.f32 %v13208_v31  ;;  %5719 = vst [vmem:[#allocation4 + $0x58] sm:$0xf] %v5689_v60  ;;  %vm5332_vm10 = vcmp.ge.s32.totalorder %v13213_v40, 0 }
 0x5bd   : > { %v6399_v6 = vld [vmem:[#allocation4 + $0x48] sm:$0xe]  ;;  %v6400_v42 = vld [vmem:[#allocation4 + $0x4c] sm:$0xf]  ;;  %7791 = vmatmul.bf16.gmra.mxu0 %v10222_v32  ;;  %v6479_v61 = vrot.slane %v6401_v27, 5  ;;  %7540 = vmatpush.bf16.msrb.mxu3 %v10213_v19  ;;  %vm5173_vm9 = vmor %vm5171_vm6, %vm5172_vm5  ;;  %vm5342_vm11 = vcmp.lt.s32.totalorder %v13213_v40, 16 }
 0x5be   : > { %v9646_v44 = vrot.slane %v6399_v6, 9  ;;  %v6476_v15 = vrot.slane %v6400_v42, 5  ;;  %v5986_v5 = vld [vmem:[#allocation4 + $0x48] sm:$0xf]  ;;  %v5987_v26 = vld [vmem:[#allocation4 + $0x4c] sm:$0xf]  ;;  %v10429_v47 = vpop.eup %10428  ;;  %vm13272_vm8 = vmand %vm5332_vm10, %vm5342_vm11 }
 0x5bf   : > { %v5168_v2 = vsub.f32 1.0, %v5167_v57  ;;  %v6140_v51 = vshrl.u32 %v5986_v5, 16  ;;  %v6143_v9 = vshll.u32 %v5986_v5, 16  ;;  %v6149_v16 = vshll.u32 %v5987_v26, 16  ;;  %5587 = vst [vmem:[#allocation1 + $0x20] ss:$4 sm:$0xff] %v13104_v36  ;;  %vm13292_vm15 = vmand %vm13272_vm8, %vm5354_vm14 }
 0x5c0   : > { %v13218_v56 = vadd.f32 1.0, %v10429_v47  ;;  %v6478_v43 = vrot.slane %v6476_v15, 4  ;;  %v6153_v13 = vshrl.u32 %v5987_v26, 16  ;;  %v6477_v39 = vsel %vm12177_vm2, %v9646_v44, %v6476_v15  ;;  %v5988_v58 = vld [vmem:[#allocation4 + $0x50] sm:$0x1]  ;;  %v10210_v40 = vld [vmem:[%s13931_s2 + $0x140] sm:$0xff]  ;;  %vm5416_vm10 = vmand %vm13272_vm8, %vm5389_vm3 }
 0x5c1   : > { %v5169_v30 = vmul.f32 %v13208_v31, %v5168_v2  ;;  %v6142_v59 = vrot.slane %v6140_v51, 4  ;;  %v6145_v23 = vrot.slane %v6143_v9, 5  ;;  %5588 = vst [vmem:[#allocation1 + $0x21] ss:$4 sm:$0xff] %v5299_v4  ;;  %v6151_v29 = vrot.slane %v6149_v16, 5  ;;  %7541 = vmatpush.bf16.msrb.mxu3 %v10212_v49 }
 0x5c2   : > { %10430 = vrcp.f32 %v13218_v56  ;;  %v6480_v1 = vsel %vm12177_vm2, %v6478_v43, %v6479_v61  ;;  %5589 = vst [vmem:[#allocation1 + $0x22] ss:$4 sm:$0xff] %v5300_v55  ;;  %v5190_v41 = vand.u32 2147483647, %v13218_v56  ;;  %v6533_v38 = vunpack.c.l.b16 %v6477_v39  ;;  %v10211_v55 = vld [vmem:[%s13931_s2 + $0x148] sm:$0xff]  ;;  %v5896_v43 = vpop.f32.mrf.mxu1 }
 0x5c3   : > { %v5170_v12 = vadd.f32 %v13208_v31, %v5169_v30  ;;  %v6146_v37 = vor.u32 %v6145_v23, %v6142_v59  ;;  %v6534_v54 = vunpack.c.l.b16 %v6480_v1  ;;  %v6155_v4 = vrot.slane %v6153_v13, 4  ;;  %5590 = vst [vmem:[#allocation1 + $0x23] ss:$4 sm:$0xff] %v5301_v33  ;;  %v6402_v25 = vld [vmem:[#allocation4 + $0x54] sm:$0xe] }
 0x5c4   : > { %v6159_v62 = vshll.u32 %v5988_v58, 16  ;;  %5720 = vst [vmem:[#allocation4 + $0x5c] sm:$0x1] %v5690_v0  ;;  %v5989_v36 = vld [vmem:[#allocation4 + $0x54] sm:$0xf]  ;;  %vm5186_vm12 = vweird.f32 %v13218_v56  ;;  %v5192_v44 = vand.u32 2147483648, %v13218_v56 }
 0x5c5   : > { %v5174_v48 = vsel %vm5173_vm9, %v13208_v31, %v5170_v12  ;;  %v6147_v63 = vrot.slane %v6146_v37, 4  ;;  %v6543_v34 = vpack.c.b16 %v6534_v54, %v6533_v38  ;;  %v6156_v11 = vor.u32 %v6155_v4, %v6151_v29  ;;  %v6403_v19 = vld [vmem:[#allocation4 + $0x58] sm:$0xf]  ;;  %v5591_v21 = vld.sshfl [vmem:[#allocation1] sm:$0xff pattern:$0x73625140]  ;;  %7542 = vmatpush.bf16.msrb.mxu3 %v10211_v55 }
 0x5c6   : > { %v5179_v46 = vsel %vm13236_vm7, %v5178_v20, %v5174_v48  ;;  %v6164_v31 = vshrl.u32 %v5989_v36, 16  ;;  %v6161_v60 = vrot.slane %v6159_v62, 5  ;;  %v6483_v57 = vrot.slane %v6403_v19, 5  ;;  %v5990_v61 = vld [vmem:[#allocation4 + $0x58] sm:$0xf] }
 0x5c7   : > { %v13264_v33 = vmul.f32 %v5179_v46, %v13039_v50  ;;  %v6152_v8 = vsel %vm12268_vm1, %v6147_v63, %v6151_v29  ;;  %6639 = vmatmul.bf16.gmra.mxu3 %v6543_v34  ;;  %v6157_v6 = vrot.slane %v6156_v11, 4  ;;  %v6167_v42 = vshll.u32 %v5989_v36, 16  ;;  %v6309_v5 = vpop.f32.mrf.mxu2  ;;  %5593 = vst [vmem:[#allocation1] ss:$4 sm:$0xff] %v13151_v52  ;;  %v10161_v47 = vld [vmem:[#allocation4 + $0x54] sm:$0xff] }
 0x5c8   : > { %v13268_v32 = vpop.eup %10430  ;;  %v6232_v15 = vunpack.c.l.b16 %v6152_v8  ;;  %v10223_v2 = vld [vmem:[#allocation4 + $0x54] sm:$0xff]  ;;  %v9647_v51 = vrot.slane %v6402_v25, 9  ;;  %v6485_v13 = vrot.slane %v6483_v57, 4  ;;  %v6166_v35 = vrot.slane %v6164_v31, 4  ;;  %v13330_v8 = vld [vmem:[#allocation4 + $0x10] sm:$0xf] }
 0x5c9   : > { %v5182_v50 = vmul.f32 %v13268_v32, %v13218_v56  ;;  %v5305_v26 = vrot.slane %v13264_v33, 2  ;;  %vm5187_vm13 = vweird.f32 %v13268_v32  ;;  %v6162_v0 = vsel %vm12268_vm1, %v6157_v6, %v6161_v60  ;;  %7543 = vmatpush.bf16.msrb.mxu3 %v10210_v40  ;;  %v10249_v55 = vld [vmem:[%s13931_s2 + $0x238] sm:$0xff]  ;;  %v6910_v6 = vld [vmem:[#allocation4 + $0x10] sm:$0xf] }
 0x5ca   : > { %v6233_v16 = vunpack.c.l.b16 %v6162_v0  ;;  %v5592_v39 = vld.sshfl [vmem:[#allocation1 + $0x20] sm:$0xff pattern:$0x73625140]  ;;  %v6484_v23 = vsel %vm12177_vm2, %v9647_v51, %v6483_v57  ;;  %v6169_v18 = vrot.slane %v6167_v42, 5  ;;  %v6173_v45 = vshll.u32 %v5990_v61, 16  ;;  %vm5188_vm0 = vmor %vm5186_vm12, %vm5187_vm13  ;;  %8471 = vmatpush.bf16.msra.mxu2 %v10249_v55 }
 0x5cb   : > { %v5183_v9 = vsub.f32 1.0, %v5182_v50  ;;  %v6404_v59 = vld [vmem:[#allocation4 + $0x5c] sm:$0x1]  ;;  %v13298_v20 = vadd.f32 %v6309_v5, %v5896_v43  ;;  %v6177_v37 = vshrl.u32 %v5990_v61, 16  ;;  %5595 = vst [vmem:[#allocation1 + $0x20] ss:$4 sm:$0xff] %v5302_v10  ;;  %v6535_v31 = vunpack.c.l.b16 %v6484_v23 }
 0x5cc   : > { %v5991_v49 = vld [vmem:[#allocation4 + $0x5c] sm:$0x1]  ;;  %v6242_v12 = vpack.c.b16 %v6233_v16, %v6232_v15  ;;  %v6486_v1 = vrot.slane %v6404_v59, 5  ;;  %5930 = vmatmul.bf16.gmra.mxu1 %v10161_v47  ;;  %v6170_v29 = vor.u32 %v6169_v18, %v6166_v35  ;;  %v6175_v38 = vrot.slane %v6173_v45, 5  ;;  %5596 = vst [vmem:[#allocation1 + $0x21] ss:$4 sm:$0xff] %v5303_v22 }
 0x5cd   : > { %v5184_v58 = vmul.f32 %v13268_v32, %v5183_v9  ;;  %7796 = vmatmul.bf16.gmra.mxu0 %v10223_v2  ;;  %v6183_v54 = vshll.u32 %v5991_v49, 16  ;;  %v5661_v4 = vsel %vm13292_vm15, %v5591_v21, 0.0  ;;  %v6179_v62 = vrot.slane %v6177_v37, 4  ;;  %5597 = vst [vmem:[#allocation1 + $0x22] ss:$4 sm:$0xff] %v5304_v53  ;;  %v10241_v22 = vld [vmem:[%s13931_s2 + $0x1f8] sm:$0xff] }
 0x5ce   : > { %6338 = vmatmul.bf16.gmra.mxu2 %v6242_v12  ;;  %v6487_v63 = vsel %vm12177_vm2, %v6485_v13, %v6486_v1  ;;  %v5662_v10 = vsel %vm13272_vm8, %v5592_v39, 0.0  ;;  %v5306_v46 = vrot.slane %v13264_v33, 4  ;;  %v5193_v34 = vor.u32 1.1754944e-38, %v5192_v44  ;;  %5598 = vst [vmem:[#allocation1 + $0x23] ss:$4 sm:$0xff] %v13264_v33  ;;  %8173 = vmatpush.bf16.msra.mxu1 %v10241_v22  ;;  %v10186_v23 = vld [vmem:[#allocation4 + $0xc] sm:$0xff] }
 0x5cf   : > { %v5185_v48 = vadd.f32 %v13268_v32, %v5184_v58  ;;  %v6536_v11 = vunpack.c.l.b16 %v6487_v63  ;;  %v10273_v25 = vpack.c.bf16 %v5662_v10, %v5661_v4  ;;  %v5307_v52 = vrot.slane %v13264_v33, 6  ;;  %v13332_v21 = vld.sshfl [vmem:[#allocation1] sm:$0xff pattern:$0x73625140]  ;;  %v13335_v33 = vpop.f32.mrf.mxu1  ;;  %v6911_v49 = vld [vmem:[#allocation4 + $0x14] sm:$0x1] }
 0x5d0   : > { %vm5191_vm4 = vcmp.eq.f32.partialorder %v5190_v41, 8.507059e+37  ;;  %v6180_v36 = vor.u32 %v6179_v62, %v6175_v38  ;;  %v6171_v57 = vrot.slane %v6170_v29, 4  ;;  %v6185_v42 = vrot.slane %v6183_v54, 5  ;;  %5600 = vst [vmem:[#allocation1] ss:$4 sm:$0xff] %v5305_v26  ;;  %v10240_v63 = vld [vmem:[%s13931_s2 + $0x1f0] sm:$0xff] }
 0x5d1   : > { %v5189_v53 = vsel %vm5188_vm0, %v13268_v32, %v5185_v48  ;;  %10278 = vst [vmem:[#allocation4 + $0x60] sm:$0xff] %v10273_v25   ;;  %v6544_v56 = vpack.c.b16 %v6536_v11, %v6535_v31  ;;  %v7369_v15 = vrot.slane %v13330_v8, 5  ;;  %v6943_v61 = vshll.u32 %v6910_v6, 16  ;;  %v7321_v26 = vld [vmem:[#allocation4 + $0x14] sm:$0x1] }
 0x5d2   : > { %v5194_v19 = vsel %vm5191_vm4, %v5193_v34, %v5189_v53  ;;  %v6181_v32 = vrot.slane %v6180_v36, 4  ;;  %5601 = vst [vmem:[#allocation1 + $0x1] ss:$4 sm:$0xff] %v5306_v46  ;;  %v6176_v50 = vsel %vm12268_vm1, %v6171_v57, %v6175_v38  ;;  %v6947_v5 = vshrl.u32 %v6910_v6, 16  ;;  %v10248_v48 = vld [vmem:[%s13931_s2 + $0x230] sm:$0xff]  ;;  %8174 = vmatpush.bf16.msra.mxu1 %v10240_v63  ;;  %v13372_v6 = vpop.f32.mrf.mxu2 }
 0x5d3   : > { %v5218_v60 = vmul.f32 %v5194_v19, %v13140_v17  ;;  %5602 = vst [vmem:[#allocation1 + $0x2] ss:$4 sm:$0xff] %v5307_v52  ;;  %v6909_v17 = vld [vmem:[#allocation4 + $0xc] sm:$0xf]  ;;  %v5319_v0 = vadd.s32 9, %v11999_v3  ;;  %v6234_v47 = vunpack.c.l.b16 %v6176_v50  ;;  %v7371_v43 = vrot.slane %v7369_v15, 4  ;;  %8472 = vmatpush.bf16.msra.mxu2 %v10248_v48 }
 0x5d4   : > { %v6186_v44 = vsel %vm12268_vm1, %v6181_v32, %v6185_v42  ;;  %v6934_v51 = vshrl.u32 %v6909_v17, 16  ;;  %v6937_v9 = vshll.u32 %v6909_v17, 16  ;;  %v7372_v13 = vrot.slane %v7321_v26, 5  ;;  %v7319_v3 = vld [vmem:[#allocation4 + $0xc] sm:$0xe] }
 0x5d5   : > { %v5308_v41 = vrot.slane %v5218_v60, 2  ;;  %5603 = vst [vmem:[#allocation1 + $0x3] ss:$4 sm:$0xff] %v5218_v60  ;;  %v6235_v40 = vunpack.c.l.b16 %v6186_v44  ;;  %v5599_v2 = vld.sshfl [vmem:[#allocation1 + $0x20] sm:$0xff pattern:$0x73625140] }
 0x5d6   : > { %vm5333_vm5 = vcmp.ge.s32.totalorder %v5319_v0, 0  ;;  %vm5343_vm6 = vcmp.lt.s32.totalorder %v5319_v0, 16  ;;  %v13343_v35 = vrot.slane %v6943_v61, 5  ;;  %v6949_v30 = vrot.slane %v6947_v5, 4  ;;  %v7323_v52 = vld [vmem:[#allocation4 + $0x1c] sm:$0xf] }
 0x5d7   : > { %6644 = vmatmul.bf16.gmra.mxu3 %v6544_v56  ;;  %5604 = vst [vmem:[#allocation1 + $0x20] ss:$4 sm:$0xff] %v5308_v41  ;;  %vm13345_vm7 = vmand %vm5333_vm5, %vm5343_vm6  ;;  %v6243_v59 = vpack.c.b16 %v6235_v40, %v6234_v47  ;;  %v13353_v45 = vpop.f32.mrf.mxu1  ;;  %v6936_v58 = vrot.slane %v6934_v51, 4  ;;  %v6939_v12 = vrot.slane %v6937_v9, 5  ;;  %v9824_v29 = vrot.slane %v7319_v3, 9 }
 0x5d8   : > { %v10224_v16 = vld [vmem:[#allocation4 + $0x60] sm:$0xff]  ;;  %vm5384_vm9 = vmand %vm13345_vm7, %vm5354_vm14  ;;  %v7373_v38 = vsel %vm12177_vm2, %v7371_v43, %v7372_v13  ;;  %v6950_v24 = vor.u32 %v6949_v30, %v13343_v35  ;;  %v6953_v10 = vshll.u32 %v6911_v49, 16  ;;  %v6912_v53 = vld [vmem:[#allocation4 + $0x18] sm:$0xf]  ;;  %v7376_v57 = vrot.slane %v7323_v52, 5 }
 0x5d9   : > { %v5664_v18 = vsel %vm5384_vm9, %v5599_v2, 0.0  ;;  %vm5419_vm14 = vmand %vm13345_vm7, %vm5389_vm3  ;;  %v7370_v62 = vsel %vm12177_vm2, %v9824_v29, %v7369_v15  ;;  %v7457_v22 = vunpack.c.l.b16 %v7373_v38  ;;  %v6940_v46 = vor.u32 %v6939_v12, %v6936_v58  ;;  %v6913_v8 = vld [vmem:[#allocation4 + $0x1c] sm:$0xf]  ;;  %v7324_v17 = vld [vmem:[#allocation4 + $0x20] sm:$0x1] }
 0x5da   : > { %v5694_v37 = vpack.c.bf16 %v5664_v18, %v5664_v18  ;;  %v6951_v11 = vrot.slane %v6950_v24, 4  ;;  %v7456_v36 = vunpack.c.l.b16 %v7370_v62  ;;  %v6955_v19 = vrot.slane %v6953_v10, 5  ;;  %v7322_v5 = vld [vmem:[#allocation4 + $0x18] sm:$0xe]  ;;  %v6914_v3 = vld [vmem:[#allocation4 + $0x20] sm:$0x1] }
 0x5db   : > { %v6941_v60 = vrot.slane %v6940_v46, 4  ;;  %v6958_v32 = vshrl.u32 %v6912_v53, 16  ;;  %v6961_v56 = vshll.u32 %v6912_v53, 16  ;;  %v6967_v41 = vshll.u32 %v6913_v8, 16  ;;  %v10187_v43 = vld [vmem:[#allocation4 + $0x18] sm:$0xff]  ;;  %v10247_v58 = vld [vmem:[%s13931_s2 + $0x228] sm:$0xff] }
 0x5dc   : > { %v5605_v1 = vld.sshfl [vmem:[#allocation1] sm:$0xff pattern:$0x73625140]  ;;  %6836 = vmatmul.bf16.vlgmr.msrb.gmra.mxu1 %v10186_v23  ;;  %5724 = vst [vmem:[#allocation4 + $0x6c] sm:$0xf] %v5694_v37  ;;  %v7472_v31 = vpack.c.b16 %v7457_v22, %v7456_v36  ;;  %v6956_v42 = vsel %vm12268_vm1, %v6951_v11, %v6955_v19  ;;  %v6971_v50 = vshrl.u32 %v6913_v8, 16  ;;  %8473 = vmatpush.bf16.msra.mxu2 %v10247_v58 }
 0x5dd   : > { %7801 = vmatmul.bf16.gmra.mxu0 %v10224_v16  ;;  %v5665_v54 = vsel %vm13345_vm7, %v5605_v1, 0.0  ;;  %v6946_v15 = vsel %vm12268_vm1, %v6941_v60, %v13343_v35  ;;  %v7159_v61 = vunpack.c.l.b16 %v6956_v42  ;;  %v7378_v40 = vrot.slane %v7376_v57, 4  ;;  %v10239_v12 = vld [vmem:[%s13931_s2 + $0x1e8] sm:$0xff]  ;;  %v7325_v42 = vld [vmem:[#allocation4 + $0x24] sm:$0xe] }
 0x5de   : > { %6343 = vmatmul.bf16.gmra.mxu2 %v6243_v59  ;;  %v5695_v4 = vpack.c.bf16 %v5665_v54, %v5665_v54  ;;  %v5606_v55 = vld.sshfl [vmem:[#allocation1 + $0x20] sm:$0xff pattern:$0x73625140]  ;;  %v6960_v0 = vrot.slane %v6958_v32, 4  ;;  %v6963_v47 = vrot.slane %v6961_v56, 5  ;;  %v6969_v2 = vrot.slane %v6967_v41, 5  ;;  %8175 = vmatpush.bf16.msra.mxu1 %v10239_v12 }
 0x5df   : > { %v5666_v34 = vsel %vm5419_vm14, %v5606_v55, 0.0  ;;  %v13376_v44 = vpop.f32.mrf.mxu1  ;;  %v6973_v51 = vrot.slane %v6971_v50, 4  ;;  %v7158_v9 = vunpack.c.l.b16 %v6946_v15  ;;  %v7379_v16 = vrot.slane %v7324_v17, 5  ;;  %v6916_v54 = vld [vmem:[#allocation4 + $0x28] sm:$0xf] }
 0x5e0   : > { %5725 = vst [vmem:[#allocation4 + $0x70] sm:$0xf] %v5695_v4  ;;  %v5696_v25 = vpack.c.bf16 %v5666_v34, %v5666_v34  ;;  %v9825_v13 = vrot.slane %v7322_v5, 9  ;;  %v6964_v23 = vor.u32 %v6963_v47, %v6960_v0  ;;  %v6977_v37 = vshll.u32 %v6914_v3, 16  ;;  %v7326_v48 = vld [vmem:[#allocation4 + $0x28] sm:$0xf] }
 0x5e1   : > { %v7174_v30 = vpack.c.b16 %v7159_v61, %v7158_v9  ;;  %v7380_v59 = vsel %vm12177_vm2, %v7378_v40, %v7379_v16  ;;  %v6974_v49 = vor.u32 %v6973_v51, %v6969_v2  ;;  %v6991_v55 = vshll.u32 %v6916_v54, 16  ;;  %v6915_v34 = vld [vmem:[#allocation4 + $0x24] sm:$0xf]  ;;  %v7327_v36 = vld [vmem:[#allocation4 + $0x2c] sm:$0x1] }
 0x5e2   : > { %5726 = vst [vmem:[#allocation4 + $0x74] sm:$0x1] %v5696_v25  ;;  %v7377_v1 = vsel %vm12177_vm2, %v9825_v13, %v7376_v57  ;;  %v7459_v29 = vunpack.c.l.b16 %v7380_v59  ;;  %v6979_v4 = vrot.slane %v6977_v37, 5  ;;  %v6995_v22 = vshrl.u32 %v6916_v54, 16  ;;  %v10188_v32 = vld [vmem:[#allocation4 + $0x24] sm:$0xff] }
 0x5e3   : > { %v6975_v38 = vrot.slane %v6974_v49, 4  ;;  %v7458_v24 = vunpack.c.l.b16 %v7377_v1  ;;  %v7383_v46 = vrot.slane %v7326_v48, 5  ;;  %v6982_v8 = vshrl.u32 %v6915_v34, 16  ;;  %v6917_v50 = vld [vmem:[#allocation4 + $0x2c] sm:$0x1]  ;;  %v10238_v0 = vld [vmem:[%s13931_s2 + $0x1e0] sm:$0xff] }
 0x5e4   : > { %v6985_v19 = vshll.u32 %v6915_v34, 16  ;;  %v6997_v60 = vrot.slane %v6995_v22, 4  ;;  %v7386_v41 = vrot.slane %v7327_v36, 5  ;;  %v9826_v5 = vrot.slane %v7325_v42, 9  ;;  %8176 = vmatpush.bf16.msra.mxu1 %v10238_v0  ;;  %v6919_v3 = vld [vmem:[#allocation4 + $0x34] sm:$0xf] }
 0x5e5   : > { %v7473_v63 = vpack.c.b16 %v7459_v29, %v7458_v24  ;;  %v6980_v10 = vsel %vm12268_vm1, %v6975_v38, %v6979_v4  ;;  %v7385_v57 = vrot.slane %v7383_v46, 4  ;;  %v6984_v15 = vrot.slane %v6982_v8, 4  ;;  %v7329_v1 = vld [vmem:[#allocation4 + $0x34] sm:$0xf]  ;;  %v7330_v38 = vld [vmem:[#allocation4 + $0x38] sm:$0x1] }
 0x5e6   : > { %v7161_v25 = vunpack.c.l.b16 %v6980_v10  ;;  %v6987_v17 = vrot.slane %v6985_v19, 5  ;;  %v7001_v47 = vshll.u32 %v6917_v50, 16  ;;  %v7015_v37 = vshll.u32 %v6919_v3, 16  ;;  %v10189_v34 = vld [vmem:[#allocation4 + $0x30] sm:$0xff]  ;;  %v10245_v50 = vld [vmem:[%s13931_s2 + $0x218] sm:$0xff] }
 0x5e7   : > { %7544 = vmatmul.bf16.vlgmr.msrb.gmra.mxu3 %v7472_v31  ;;  %v10225_v26 = vld [vmem:[#allocation4 + $0x6c] sm:$0xff]  ;;  %v5906_v18 = vpop.f32.mrf.mxu1  ;;  %v6993_v31 = vrot.slane %v6991_v55, 5  ;;  %v7387_v40 = vsel %vm12177_vm2, %v7385_v57, %v7386_v41  ;;  %v7019_v29 = vshrl.u32 %v6919_v3, 16  ;;  %v7390_v4 = vrot.slane %v7329_v1, 5  ;;  %v6921_v3 = vld [vmem:[#allocation4 + $0x3c] sm:$0xf] }
 0x5e8   : > { %v7461_v9 = vunpack.c.l.b16 %v7387_v40  ;;  %v6988_v16 = vor.u32 %v6987_v17, %v6984_v15  ;;  %v7003_v59 = vrot.slane %v7001_v47, 5  ;;  %v7393_v55 = vrot.slane %v7330_v38, 5  ;;  %v10237_v15 = vld [vmem:[%s13931_s2 + $0x1d8] sm:$0xff]  ;;  %v7332_v40 = vld [vmem:[#allocation4 + $0x40] sm:$0xf] }
 0x5e9   : > { %v6998_v61 = vor.u32 %v6997_v60, %v6993_v31  ;;  %v7017_v22 = vrot.slane %v7015_v37, 5  ;;  %8177 = vmatpush.bf16.msra.mxu1 %v10237_v15  ;;  %v7033_v1 = vshll.u32 %v6921_v3, 16  ;;  %v6925_v15 = vld [vmem:[#allocation4 + $0x4c] sm:$0xf] }
 0x5ea   : > { %v6989_v58 = vrot.slane %v6988_v16, 4 }
 0x5eb   : > { %v6314_v39 = vpop.f32.mrf.mxu2 }
 0x5ec   : > { %6841 = vmatmul.bf16.gmra.mxu1 %v10187_v43  ;;  %v13384_v35 = vadd.f32 %v6314_v39, %v13353_v45  ;;  %v6965_v45 = vrot.slane %v6964_v23, 4  ;;  %v6999_v43 = vrot.slane %v6998_v61, 4  ;;  %v6918_v23 = vld [vmem:[#allocation4 + $0x30] sm:$0xf]  ;;  %v6922_v61 = vld [vmem:[#allocation4 + $0x40] sm:$0xf] }
 0x5ed   : > { %7806 = vmatmul.bf16.gmra.mxu0 %v10225_v26  ;;  %v10246_v26 = vld [vmem:[%s13931_s2 + $0x220] sm:$0xff]  ;;  %v7006_v24 = vshrl.u32 %v6918_v23, 16  ;;  %v7043_v16 = vshrl.u32 %v6922_v61, 16 }
 0x5ee   : > { %7246 = vmatmul.bf16.vlgmr.msrb.gmra.mxu2 %v7174_v30  ;;  %v6970_v62 = vsel %vm12268_vm1, %v6965_v45, %v6969_v2  ;;  %v7384_v2 = vsel %vm12177_vm2, %v9826_v5, %v7383_v46  ;;  %v7004_v12 = vsel %vm12268_vm1, %v6999_v43, %v7003_v59  ;;  %v6994_v45 = vsel %vm12268_vm1, %v6989_v58, %v6993_v31  ;;  %v13436_v43 = vpop.f32.mrf.mxu3 }
 0x5ef   : > { %v7160_v11 = vunpack.c.l.b16 %v6970_v62  ;;  %v13398_v52 = vpop.f32.mrf.mxu1  ;;  %8474 = vmatpush.bf16.msra.mxu2 %v10246_v26  ;;  %v7460_v39 = vunpack.c.l.b16 %v7384_v2  ;;  %v7163_v54 = vunpack.c.l.b16 %v7004_v12  ;;  %v6920_v62 = vld [vmem:[#allocation4 + $0x38] sm:$0x1]  ;;  %v7162_v10 = vunpack.c.l.b16 %v6994_v45 }
 0x5f0   : > { %v7021_v46 = vrot.slane %v7019_v29, 4  ;;  %v7392_v31 = vrot.slane %v7390_v4, 4  ;;  %v7025_v60 = vshll.u32 %v6920_v62, 16  ;;  %v7397_v59 = vrot.slane %v7332_v40, 5 }
 0x5f1   : > { %v7175_v56 = vpack.c.b16 %v7161_v25, %v7160_v11  ;;  %v7474_v49 = vpack.c.b16 %v7461_v9, %v7460_v39  ;;  %v7008_v11 = vrot.slane %v7006_v24, 4  ;;  %v7176_v36 = vpack.c.b16 %v7163_v54, %v7162_v10  ;;  %v10190_v54 = vld [vmem:[#allocation4 + $0x3c] sm:$0xff] }
 0x5f2   : > { %v7394_v57 = vsel %vm12177_vm2, %v7392_v31, %v7393_v55  ;;  %v7027_v41 = vrot.slane %v7025_v60, 5  ;;  %v7039_v9 = vshll.u32 %v6922_v61, 16  ;;  %v7045_v29 = vrot.slane %v7043_v16, 4 }
 0x5f3   : > { %v13400_v53 = vpop.f32.mrf.mxu2  ;;  %v7463_v17 = vunpack.c.l.b16 %v7394_v57  ;;  %8475 = vmatpush.bf16.msra.mxu2 %v10245_v50  ;;  %v7399_v45 = vrot.slane %v7397_v59, 4  ;;  %v7035_v10 = vrot.slane %v7033_v1, 5  ;;  %v6924_v50 = vld [vmem:[#allocation4 + $0x48] sm:$0xf] }
 0x5f4   : > { %v7041_v37 = vrot.slane %v7039_v9, 5 }
 0x5f6   : > { %v7046_v55 = vor.u32 %v7045_v29, %v7041_v37 }
 0x5f7   : > { %7549 = vmatmul.bf16.gmra.mxu3 %v7473_v63  ;;  %v5911_v13 = vpop.f32.mrf.mxu1  ;;  %v7328_v63 = vld [vmem:[#allocation4 + $0x30] sm:$0xe] }
 0x5f8   : > { %v9827_v19 = vrot.slane %v7328_v63, 9  ;;  %v7047_v57 = vrot.slane %v7046_v55, 4  ;;  %v10243_v55 = vld [vmem:[%s13931_s2 + $0x208] sm:$0xff] }
 0x5fc   : > { %6846 = vmatmul.bf16.gmra.mxu1 %v10188_v32  ;;  %v7022_v32 = vor.u32 %v7021_v46, %v7017_v22 }
 0x5fe   : > { %7251 = vmatmul.bf16.gmra.mxu2 %v7175_v56  ;;  %v7391_v56 = vsel %vm12177_vm2, %v9827_v19, %v7390_v4  ;;  %v7023_v5 = vrot.slane %v7022_v32, 4  ;;  %v6923_v4 = vld [vmem:[#allocation4 + $0x44] sm:$0x1]  ;;  %v10236_v32 = vld [vmem:[%s13931_s2 + $0x1d0] sm:$0xff] }
 0x5ff   : > { %v13420_v8 = vpop.f32.mrf.mxu1  ;;  %v7462_v0 = vunpack.c.l.b16 %v7391_v56  ;;  %8178 = vmatpush.bf16.msra.mxu1 %v10236_v32 }
 0x601   : > { %v6319_v51 = vpop.f32.mrf.mxu2  ;;  %v7475_v39 = vpack.c.b16 %v7463_v17, %v7462_v0  ;;  %v7057_v0 = vshll.u32 %v6924_v50, 16 }
 0x602   : > { %v13412_v30 = vadd.f32 %v6319_v51, %v5906_v18  ;;  %v7009_v18 = vshll.u32 %v6918_v23, 16  ;;  %v7028_v51 = vsel %vm12268_vm1, %v7023_v5, %v7027_v41 }
 0x603   : > { %v7165_v12 = vunpack.c.l.b16 %v7028_v51  ;;  %v7067_v51 = vshrl.u32 %v6925_v15, 16  ;;  %v7059_v1 = vrot.slane %v7057_v0, 5 }
 0x604   : > { %v7011_v25 = vrot.slane %v7009_v18, 5  ;;  %v7331_v18 = vld [vmem:[#allocation4 + $0x3c] sm:$0xe] }
 0x605   : > { %v9828_v46 = vrot.slane %v7331_v18, 9 }
 0x606   : > { %v7012_v42 = vor.u32 %v7011_v25, %v7008_v11  ;;  %v10244_v11 = vld [vmem:[%s13931_s2 + $0x210] sm:$0xff]  ;;  %v13447_v25 = vpop.f32.mrf.mxu3 }
 0x607   : > { %7554 = vmatmul.bf16.gmra.mxu3 %v7474_v49  ;;  %v7333_v49 = vld [vmem:[#allocation4 + $0x44] sm:$0x1]  ;;  %8476 = vmatpush.bf16.msra.mxu2 %v10244_v11  ;;  %v5663_v11 = vsel %vm5416_vm10, %v13332_v21, 0.0 }
 0x608   : > { %v7013_v47 = vrot.slane %v7012_v42, 4  ;;  %v7400_v38 = vrot.slane %v7333_v49, 5  ;;  %v7335_v42 = vld [vmem:[#allocation4 + $0x4c] sm:$0xf]  ;;  %v7334_v49 = vld [vmem:[#allocation4 + $0x48] sm:$0xe] }
 0x609   : > { %v13418_v48 = vpop.f32.mrf.mxu2  ;;  %v7404_v40 = vrot.slane %v7335_v42, 5  ;;  %v9829_v18 = vrot.slane %v7334_v49, 9 }
 0x60a   : > { %v7018_v58 = vsel %vm12268_vm1, %v7013_v47, %v7017_v22  ;;  %v7401_v22 = vsel %vm12177_vm2, %v7399_v45, %v7400_v38  ;;  %v7063_v47 = vshll.u32 %v6925_v15, 16  ;;  %v7069_v45 = vrot.slane %v7067_v51, 4 }
 0x60b   : > { %v7164_v24 = vunpack.c.l.b16 %v7018_v58  ;;  %v7465_v31 = vunpack.c.l.b16 %v7401_v22  ;;  %v7336_v58 = vld [vmem:[#allocation4 + $0x50] sm:$0x1]  ;;  %v7405_v22 = vsel %vm12177_vm2, %v9829_v18, %v7404_v40  ;;  %8477 = vmatpush.bf16.msra.mxu2 %v10243_v55  ;;  %v10242_v55 = vld [vmem:[%s13931_s2 + $0x200] sm:$0xff] }
 0x60c   : > { %6851 = vmatmul.bf16.gmra.mxu1 %v10189_v34  ;;  %v7049_v34 = vshll.u32 %v6923_v4, 16  ;;  %v7065_v29 = vrot.slane %v7063_v47, 5  ;;  %v7466_v42 = vunpack.c.l.b16 %v7405_v22 }
 0x60d   : > { %v7177_v63 = vpack.c.b16 %v7165_v12, %v7164_v24  ;;  %v7406_v12 = vrot.slane %v7404_v40, 4  ;;  %v10191_v24 = vld [vmem:[#allocation4 + $0x48] sm:$0xff] }
 0x60e   : > { %7256 = vmatmul.bf16.gmra.mxu2 %v7176_v36  ;;  %v7398_v36 = vsel %vm12177_vm2, %v9828_v46, %v7397_v59  ;;  %v7051_v41 = vrot.slane %v7049_v34, 5  ;;  %v13458_v9 = vpop.f32.mrf.mxu3 }
 0x60f   : > { %v7464_v56 = vunpack.c.l.b16 %v7398_v36  ;;  %8478 = vmatpush.bf16.msra.mxu2 %v10242_v55 }
 0x610   : > { %v13438_v23 = vpop.f32.mrf.mxu1  ;;  %v7052_v5 = vsel %vm12268_vm1, %v7047_v57, %v7051_v41  ;;  %v5693_v57 = vpack.c.bf16 %v5663_v11, %v5663_v11  ;;  %v10235_v41 = vld [vmem:[%s13931_s2 + $0x1c8] sm:$0xff]  ;;  %v7845_v11 = vld [vmem:[#allocation4 + $0x1c] sm:$0xf] }
 0x611   : > { %v7476_v17 = vpack.c.b16 %v7465_v31, %v7464_v56  ;;  %v6928_v56 = vld [vmem:[#allocation4 + $0x58] sm:$0xf]  ;;  %8179 = vmatpush.bf16.msra.mxu1 %v10235_v41 }
 0x612   : > { %5723 = vst [vmem:[#allocation4 + $0x68] sm:$0x1] %v5693_v57  ;;  %v7091_v40 = vshrl.u32 %v6928_v56, 16 }
 0x613   : > { %v6324_v26 = vpop.f32.mrf.mxu2 }
 0x614   : > { %v13432_v2 = vadd.f32 %v6324_v26, %v5911_v13  ;;  %v7030_v13 = vshrl.u32 %v6921_v3, 16  ;;  %v7054_v26 = vshrl.u32 %v6924_v50, 16  ;;  %v7167_v3 = vunpack.c.l.b16 %v7052_v5 }
 0x615   : > { %v7087_v5 = vshll.u32 %v6928_v56, 16 }
 0x616   : > { %v7032_v62 = vrot.slane %v7030_v13, 4  ;;  %v7056_v13 = vrot.slane %v7054_v26, 4  ;;  %v13481_v36 = vpop.f32.mrf.mxu3 }
 0x617   : > { %7559 = vmatmul.bf16.gmra.mxu3 %v7475_v39 }
 0x618   : > { %v13451_v19 = vpop.f32.mrf.mxu1  ;;  %v7036_v60 = vor.u32 %v7035_v10, %v7032_v62  ;;  %v7060_v62 = vor.u32 %v7059_v1, %v7056_v13  ;;  %v7070_v10 = vor.u32 %v7069_v45, %v7065_v29  ;;  %v7089_v13 = vrot.slane %v7087_v5, 5 }
 0x619   : > { %v7093_v1 = vrot.slane %v7091_v40, 4  ;;  %v6931_v40 = vld [vmem:[#allocation4 + $0x64] sm:$0xf] }
 0x61a   : > { %v7037_v61 = vrot.slane %v7036_v60, 4  ;;  %v7061_v31 = vrot.slane %v7060_v62, 4  ;;  %v7071_v60 = vrot.slane %v7070_v10, 4 }
 0x61b   : > { %v13460_v16 = vpop.f32.mrf.mxu2 }
 0x61c   : > { %6856 = vmatmul.bf16.gmra.mxu1 %v10190_v54  ;;  %v7042_v39 = vsel %vm12268_vm1, %v7037_v61, %v7041_v37  ;;  %v7407_v54 = vrot.slane %v7336_v58, 5  ;;  %v7066_v21 = vsel %vm12268_vm1, %v7061_v31, %v7065_v29 }
 0x61d   : > { %v7166_v38 = vunpack.c.l.b16 %v7042_v39  ;;  %v7168_v39 = vunpack.c.l.b16 %v7066_v21 }
 0x61e   : > { %7261 = vmatmul.bf16.gmra.mxu2 %v7177_v63  ;;  %v6926_v63 = vld [vmem:[#allocation4 + $0x50] sm:$0x1]  ;;  %v7408_v37 = vsel %vm12177_vm2, %v7406_v12, %v7407_v54  ;;  %v13495_v58 = vpop.f32.mrf.mxu3  ;;  %v7339_v12 = vld [vmem:[#allocation4 + $0x5c] sm:$0x1] }
 0x61f   : > { %v7178_v4 = vpack.c.b16 %v7167_v3, %v7166_v38  ;;  %v7073_v34 = vshll.u32 %v6926_v63, 16  ;;  %v7467_v27 = vunpack.c.l.b16 %v7408_v37  ;;  %v10192_v38 = vld [vmem:[#allocation4 + $0x54] sm:$0xff]  ;;  %v7414_v54 = vrot.slane %v7339_v12, 5 }
 0x620   : > { %v13464_v59 = vpop.f32.mrf.mxu1 }
 0x621   : > { %v7075_v50 = vrot.slane %v7073_v34, 5  ;;  %v7477_v15 = vpack.c.b16 %v7467_v27, %v7466_v42  ;;  %v7844_v27 = vld [vmem:[#allocation4 + $0x18] sm:$0xf] }
 0x623   : > { %v7076_v61 = vsel %vm12268_vm1, %v7071_v60, %v7075_v50  ;;  %v7869_v50 = vshrl.u32 %v7844_v27, 16 }
 0x624   : > { %v7169_v3 = vunpack.c.l.b16 %v7076_v61 }
 0x626   : > { %v7179_v18 = vpack.c.b16 %v7169_v3, %v7168_v39  ;;  %v7341_v39 = vld [vmem:[#allocation4 + $0x64] sm:$0xf] }
 0x627   : > { %7564 = vmatmul.bf16.gmra.mxu3 %v7476_v17  ;;  %v6927_v17 = vld [vmem:[#allocation4 + $0x54] sm:$0xf] }
 0x628   : > { %v13483_v32 = vpop.f32.mrf.mxu1  ;;  %v7078_v47 = vshrl.u32 %v6927_v17, 16  ;;  %v7081_v49 = vshll.u32 %v6927_v17, 16  ;;  %v13514_v17 = vpop.f32.mrf.mxu3 }
 0x62a   : > { %v7080_v63 = vrot.slane %v7078_v47, 4  ;;  %v7083_v37 = vrot.slane %v7081_v49, 5  ;;  %v7871_v49 = vrot.slane %v7869_v50, 4 }
 0x62c   : > { %6861 = vmatmul.bf16.gmra.mxu1 %v10191_v24  ;;  %v7337_v24 = vld [vmem:[#allocation4 + $0x54] sm:$0xe]  ;;  %v7084_v57 = vor.u32 %v7083_v37, %v7080_v63 }
 0x62d   : > { %v9830_v62 = vrot.slane %v7337_v24, 9 }
 0x62e   : > { %7266 = vmatmul.bf16.gmra.mxu2 %v7178_v4  ;;  %v6329_v46 = vpop.f32.mrf.mxu2  ;;  %v6929_v4 = vld [vmem:[#allocation4 + $0x5c] sm:$0x1]  ;;  %v7085_v5 = vrot.slane %v7084_v57, 4 }
 0x62f   : > { %v13478_v7 = vadd.f32 %v6329_v46, %v13438_v23  ;;  %v7338_v23 = vld [vmem:[#allocation4 + $0x58] sm:$0xf]  ;;  %v10234_v46 = vld [vmem:[%s13931_s2 + $0x1c0] sm:$0xff]  ;;  %v7097_v34 = vshll.u32 %v6929_v4, 16  ;;  %v7115_v4 = vshrl.u32 %v6931_v40, 16 }
 0x630   : > { %v7411_v26 = vrot.slane %v7338_v23, 5  ;;  %8180 = vmatpush.bf16.msra.mxu1 %v10234_v46  ;;  %v7872_v23 = vshll.u32 %v7844_v27, 16  ;;  %v7090_v3 = vsel %vm12268_vm1, %v7085_v5, %v7089_v13 }
 0x631   : > { %v7099_v61 = vrot.slane %v7097_v34, 5  ;;  %v7170_v55 = vunpack.c.l.b16 %v7090_v3  ;;  %v7846_v34 = vld [vmem:[#allocation4 + $0x20] sm:$0x1] }
 0x632   : > { %v7413_v45 = vrot.slane %v7411_v26, 4  ;;  %v7412_v60 = vsel %vm12177_vm2, %v9830_v62, %v7411_v26  ;;  %v7874_v12 = vrot.slane %v7872_v23, 5 }
 0x633   : > { %v7468_v21 = vunpack.c.l.b16 %v7412_v60 }
 0x634   : > { %v7415_v10 = vsel %vm12177_vm2, %v7413_v45, %v7414_v54  ;;  %v7111_v54 = vshll.u32 %v6931_v40, 16  ;;  %v7875_v27 = vor.u32 %v7874_v12, %v7871_v49 }
 0x635   : > { %v7469_v42 = vunpack.c.l.b16 %v7415_v10  ;;  %v7340_v10 = vld [vmem:[#allocation4 + $0x60] sm:$0xe] }
 0x636   : > { %v6331_v0 = vpop.f32.mrf.mxu2  ;;  %v9831_v23 = vrot.slane %v7340_v10, 9  ;;  %v7847_v10 = vld [vmem:[#allocation4 + $0x24] sm:$0xf] }
 0x637   : > { %7569 = vmatmul.bf16.gmra.mxu3 %v7477_v15  ;;  %v13493_v51 = vadd.f32 %v6331_v0, %v13451_v19  ;;  %v7094_v19 = vor.u32 %v7093_v1, %v7089_v13  ;;  %v7878_v15 = vshll.u32 %v7845_v11, 16  ;;  %v7882_v0 = vshrl.u32 %v7845_v11, 16  ;;  %v10193_v11 = vld [vmem:[#allocation4 + $0x60] sm:$0xff] }
 0x638   : > { %v7478_v47 = vpack.c.b16 %v7469_v42, %v7468_v21  ;;  %v7113_v42 = vrot.slane %v7111_v54, 5  ;;  %v13525_v21 = vpop.f32.mrf.mxu3 }
 0x639   : > { %v13497_v29 = vpop.f32.mrf.mxu1  ;;  %v7095_v56 = vrot.slane %v7094_v19, 4  ;;  %v7880_v1 = vrot.slane %v7878_v15, 5  ;;  %v7418_v19 = vrot.slane %v7341_v39, 5  ;;  %v7884_v62 = vrot.slane %v7882_v0, 4 }
 0x63b   : > { %v7100_v26 = vsel %vm12268_vm1, %v7095_v56, %v7099_v61  ;;  %v7117_v56 = vrot.slane %v7115_v4, 4  ;;  %v7885_v15 = vor.u32 %v7884_v62, %v7880_v1 }
 0x63c   : > { %6866 = vmatmul.bf16.gmra.mxu1 %v10192_v38  ;;  %v7342_v38 = vld [vmem:[#allocation4 + $0x68] sm:$0x1]  ;;  %v7171_v37 = vunpack.c.l.b16 %v7100_v26  ;;  %v7876_v26 = vrot.slane %v7875_v27, 4 }
 0x63d   : > { %v7421_v13 = vrot.slane %v7342_v38, 5  ;;  %v7118_v0 = vor.u32 %v7117_v56, %v7113_v42  ;;  %v7886_v39 = vrot.slane %v7885_v15, 4  ;;  %v7896_v56 = vshll.u32 %v7847_v10, 16 }
 0x63e   : > { %7271 = vmatmul.bf16.gmra.mxu2 %v7179_v18  ;;  %v7180_v50 = vpack.c.b16 %v7171_v37, %v7170_v55  ;;  %v7881_v62 = vsel %vm12268_vm1, %v7876_v26, %v7880_v1  ;;  %v6650_v15 = vadd.f32 %v13436_v43, %v13298_v20 }
 0x63f   : > { %v6334_v22 = vpop.f32.mrf.mxu2  ;;  %v7119_v37 = vrot.slane %v7118_v0, 4 }
 0x640   : > { %v13508_v31 = vadd.f32 %v6334_v22, %v13464_v59  ;;  %v6930_v59 = vld [vmem:[#allocation4 + $0x60] sm:$0xf]  ;;  %v6932_v22 = vld [vmem:[#allocation4 + $0x68] sm:$0x1] }
 0x641   : > { %v13512_v41 = vpop.f32.mrf.mxu1  ;;  %v7102_v24 = vshrl.u32 %v6930_v59, 16  ;;  %v7105_v18 = vshll.u32 %v6930_v59, 16  ;;  %v7121_v61 = vshll.u32 %v6932_v22, 16  ;;  %v7888_v59 = vshll.u32 %v7846_v34, 16  ;;  %v13542_v34 = vpop.f32.mrf.mxu3 }
 0x643   : > { %v7104_v60 = vrot.slane %v7102_v24, 4  ;;  %v7107_v57 = vrot.slane %v7105_v18, 5  ;;  %v7123_v12 = vrot.slane %v7121_v61, 5  ;;  %v7890_v18 = vrot.slane %v7888_v59, 5 }
 0x645   : > { %v7108_v40 = vor.u32 %v7107_v57, %v7104_v60  ;;  %v7893_v57 = vshrl.u32 %v7847_v10, 16 }
 0x647   : > { %v6336_v45 = vpop.f32.mrf.mxu2  ;;  %7574 = vmatmul.bf16.gmra.mxu3 %v7478_v47  ;;  %v7419_v47 = vsel %vm12177_vm2, %v9831_v23, %v7418_v19  ;;  %v7109_v4 = vrot.slane %v7108_v40, 4  ;;  %v8255_v40 = vld [vmem:[#allocation4 + $0x1c] sm:$0xf] }
 0x648   : > { %v13521_v63 = vadd.f32 %v6336_v45, %v13483_v32  ;;  %v7420_v32 = vrot.slane %v7418_v19, 4  ;;  %v7848_v45 = vld [vmem:[#allocation4 + $0x28] sm:$0xf]  ;;  %v7470_v54 = vunpack.c.l.b16 %v7419_v47  ;;  %v7891_v19 = vsel %vm12268_vm1, %v7886_v39, %v7890_v18 }
 0x649   : > { %v13523_v46 = vpop.f32.mrf.mxu1  ;;  %v7902_v55 = vshll.u32 %v7848_v45, 16  ;;  %v7114_v27 = vsel %vm12268_vm1, %v7109_v4, %v7113_v42  ;;  %v8094_v60 = vunpack.c.l.b16 %v7891_v19  ;;  %v7849_v42 = vld [vmem:[#allocation4 + $0x2c] sm:$0x1]  ;;  %v7895_v39 = vrot.slane %v7893_v57, 4 }
 0x64a   : > { %v7422_v5 = vsel %vm12177_vm2, %v7420_v32, %v7421_v13  ;;  %v7906_v13 = vshrl.u32 %v7848_v45, 16  ;;  %v8254_v45 = vld [vmem:[#allocation4 + $0x18] sm:$0xe]  ;;  %v7912_v18 = vshll.u32 %v7849_v42, 16  ;;  %v7852_v42 = vld [vmem:[#allocation4 + $0x38] sm:$0x1] }
 0x64b   : > { %v7471_v49 = vunpack.c.l.b16 %v7422_v5  ;;  %v7172_v5 = vunpack.c.l.b16 %v7114_v27  ;;  %v10008_v4 = vrot.slane %v8254_v45, 9 }
 0x64c   : > { %6871 = vmatmul.bf16.gmra.mxu1 %v10193_v11  ;;  %v8093_v11 = vunpack.c.l.b16 %v7881_v62  ;;  %v7908_v23 = vrot.slane %v7906_v13, 4  ;;  %v7914_v10 = vrot.slane %v7912_v18, 5 }
 0x64d   : > { %v7479_v22 = vpack.c.b16 %v7471_v49, %v7470_v54  ;;  %v8256_v54 = vld [vmem:[#allocation4 + $0x20] sm:$0x1] }
 0x64e   : > { %7276 = vmatmul.bf16.gmra.mxu2 %v7180_v50  ;;  %v7904_v50 = vrot.slane %v7902_v55, 5  ;;  %v8109_v47 = vpack.c.b16 %v8094_v60, %v8093_v11  ;;  %v7850_v55 = vld [vmem:[#allocation4 + $0x30] sm:$0xf]  ;;  %v8307_v13 = vrot.slane %v8256_v54, 5 }
 0x64f   : > { %v7917_v57 = vshrl.u32 %v7850_v55, 16 }
 0x650   : > { %v7909_v49 = vor.u32 %v7908_v23, %v7904_v50 }
 0x651   : > { %v6339_v3 = vpop.f32.mrf.mxu2  ;;  %v13534_v24 = vpop.f32.mrf.mxu1 }
 0x652   : > { %v13532_v38 = vadd.f32 %v6339_v3, %v13497_v29  ;;  %v7124_v29 = vsel %vm12268_vm1, %v7119_v37, %v7123_v12  ;;  %v7898_v3 = vrot.slane %v7896_v56, 5  ;;  %v8304_v12 = vrot.slane %v8255_v40, 5 }
 0x653   : > { %v7173_v1 = vunpack.c.l.b16 %v7124_v29  ;;  %v7910_v43 = vrot.slane %v7909_v49, 4  ;;  %v6652_v40 = vadd.f32 %v13458_v9, %v13384_v35  ;;  %v8258_v49 = vld [vmem:[#allocation4 + $0x28] sm:$0xf] }
 0x654   : > { %v7899_v20 = vor.u32 %v7898_v3, %v7895_v39  ;;  %v8306_v37 = vrot.slane %v8304_v12, 4  ;;  %v8305_v11 = vsel %vm12177_vm2, %v10008_v4, %v8304_v12  ;;  %v8259_v4 = vld [vmem:[#allocation4 + $0x2c] sm:$0x1] }
 0x655   : > { %v7181_v26 = vpack.c.b16 %v7173_v1, %v7172_v5  ;;  %v7915_v27 = vsel %vm12268_vm1, %v7910_v43, %v7914_v10  ;;  %v7920_v1 = vshll.u32 %v7850_v55, 16  ;;  %v7936_v43 = vshll.u32 %v7852_v42, 16  ;;  %v7854_v55 = vld [vmem:[#allocation4 + $0x40] sm:$0xf] }
 0x656   : > { %v7900_v29 = vrot.slane %v7899_v20, 4  ;;  %v8308_v60 = vsel %vm12177_vm2, %v8306_v37, %v8307_v13  ;;  %v6350_v13 = vadd.f32 %v13372_v6, %v13335_v33 }
 0x657   : > { %7579 = vmatmul.bf16.gmra.mxu3 %v7479_v22  ;;  %v7851_v22 = vld [vmem:[#allocation4 + $0x34] sm:$0xf]  ;;  %v7922_v12 = vrot.slane %v7920_v1, 5  ;;  %v7938_v37 = vrot.slane %v7936_v43, 5  ;;  %v7853_v1 = vld [vmem:[#allocation4 + $0x3c] sm:$0xf] }
 0x658   : > { %v7926_v56 = vshll.u32 %v7851_v22, 16  ;;  %v7930_v23 = vshrl.u32 %v7851_v22, 16  ;;  %v6651_v33 = vadd.f32 %v13447_v25, %v6350_v13  ;;  %v8260_v13 = vld [vmem:[#allocation4 + $0x30] sm:$0xe] }
 0x659   : > { %v6341_v32 = vpop.f32.mrf.mxu2  ;;  %v6837_v59 = vpop.f32.mrf.mxu1 }
 0x65a   : > { %v13549_v61 = vadd.f32 %v6341_v32, %v13512_v41  ;;  %v6877_v0 = vadd.f32 %v6837_v59, %v6650_v15  ;;  %v8096_v32 = vunpack.c.l.b16 %v7915_v27  ;;  %v8392_v15 = vunpack.c.l.b16 %v8308_v60  ;;  %v8257_v27 = vld [vmem:[#allocation4 + $0x24] sm:$0xe] }
 0x65b   : > { %v8391_v59 = vunpack.c.l.b16 %v8305_v11  ;;  %v7932_v45 = vrot.slane %v7930_v23, 4  ;;  %v7954_v23 = vshrl.u32 %v7854_v55, 16 }
 0x65c   : > { %8181 = vmatmul.bf16.vlgmr.msra.gmra.mxu1 %v8109_v47 }
 0x65d   : > { %v8407_v20 = vpack.c.b16 %v8392_v15, %v8391_v59  ;;  %v7941_v59 = vshrl.u32 %v7853_v1, 16 }
 0x65e   : > { %7281 = vmatmul.bf16.gmra.mxu2 %v7181_v26  ;;  %v7919_v26 = vrot.slane %v7917_v57, 4  ;;  %v8314_v57 = vrot.slane %v8259_v4, 5 }
 0x660   : > { %v7923_v35 = vor.u32 %v7922_v12, %v7919_v26  ;;  %v6654_v12 = vadd.f32 %v13495_v58, %v13412_v30 }
 0x661   : > { %v6344_v41 = vpop.f32.mrf.mxu2  ;;  %v6839_v19 = vpop.f32.mrf.mxu1 }
 0x662   : > { %v13552_v62 = vadd.f32 %v6344_v41, %v13523_v46  ;;  %v7905_v46 = vsel %vm12268_vm1, %v7900_v29, %v7904_v50  ;;  %v7928_v50 = vrot.slane %v7926_v56, 5  ;;  %v8311_v41 = vrot.slane %v8258_v49, 5 }
 0x663   : > { %v8095_v47 = vunpack.c.l.b16 %v7905_v46  ;;  %v7924_v11 = vrot.slane %v7923_v35, 4  ;;  %v7950_v56 = vshll.u32 %v7854_v55, 16  ;;  %v7855_v35 = vld [vmem:[#allocation4 + $0x44] sm:$0x1] }
 0x664   : > { %v7933_v9 = vor.u32 %v7932_v45, %v7928_v50  ;;  %v7960_v55 = vshll.u32 %v7855_v35, 16 }
 0x665   : > { %v8110_v54 = vpack.c.b16 %v8096_v32, %v8095_v47  ;;  %v10009_v32 = vrot.slane %v8257_v27, 9  ;;  %v7929_v6 = vsel %vm12268_vm1, %v7924_v11, %v7928_v50  ;;  %v6878_v47 = vadd.f32 %v6839_v19, %v6651_v33  ;;  %v8261_v50 = vld [vmem:[#allocation4 + $0x34] sm:$0xf]  ;;  %v7856_v11 = vld [vmem:[#allocation4 + $0x48] sm:$0xf] }
 0x666   : > { %v7934_v60 = vrot.slane %v7933_v9, 4  ;;  %v7952_v26 = vrot.slane %v7950_v56, 5  ;;  %v8097_v45 = vunpack.c.l.b16 %v7929_v6  ;;  %v7943_v9 = vrot.slane %v7941_v59, 4 }
 0x668   : > { %v7939_v46 = vsel %vm12268_vm1, %v7934_v60, %v7938_v37  ;;  %v8262_v37 = vld [vmem:[#allocation4 + $0x38] sm:$0x1] }
 0x669   : > { %v6346_v5 = vpop.f32.mrf.mxu2  ;;  %v6842_v3 = vpop.f32.mrf.mxu1  ;;  %v8321_v30 = vrot.slane %v8262_v37, 5 }
 0x66a   : > { %v13565_v39 = vadd.f32 %v6346_v5, %v13534_v24  ;;  %v13567_v18 = vadd.f32 %v6842_v3, %v6652_v40  ;;  %v8313_v24 = vrot.slane %v8311_v41, 4  ;;  %v8098_v5 = vunpack.c.l.b16 %v7939_v46  ;;  %v7857_v46 = vld [vmem:[#allocation4 + $0x4c] sm:$0xf] }
 0x66b   : > { %v7944_v40 = vshll.u32 %v7853_v1, 16  ;;  %v7956_v3 = vrot.slane %v7954_v23, 4  ;;  %v6352_v1 = vadd.f32 %v13400_v53, %v13376_v44  ;;  %v7978_v44 = vshrl.u32 %v7857_v46, 16 }
 0x66c   : > { %8186 = vmatmul.bf16.gmra.mxu1 %v8110_v54  ;;  %v8315_v15 = vsel %vm12177_vm2, %v8313_v24, %v8314_v57  ;;  %v8318_v24 = vrot.slane %v8261_v50, 5 }
 0x66d   : > { %v8394_v42 = vunpack.c.l.b16 %v8315_v15  ;;  %v7946_v4 = vrot.slane %v7944_v40, 5  ;;  %v10010_v15 = vrot.slane %v8260_v13, 9  ;;  %v7968_v40 = vshll.u32 %v7856_v11, 16 }
 0x66e   : > { %8479 = vmatmul.bf16.vlgmr.msra.gmra.mxu2 %v8407_v20  ;;  %v8320_v57 = vrot.slane %v8318_v24, 4  ;;  %v6653_v53 = vadd.f32 %v13481_v36, %v6352_v1 }
 0x66f   : > { %v7947_v58 = vor.u32 %v7946_v4, %v7943_v9  ;;  %v6656_v9 = vadd.f32 %v13525_v21, %v13432_v2 }
 0x670   : > { %v8322_v33 = vsel %vm12177_vm2, %v8320_v57, %v8321_v30  ;;  %v8263_v57 = vld [vmem:[#allocation4 + $0x3c] sm:$0xe] }
 0x671   : > { %v7247_v10 = vpop.f32.mrf.mxu2  ;;  %v13573_v29 = vpop.f32.mrf.mxu1  ;;  %v7948_v6 = vrot.slane %v7947_v58, 4 }
 0x672   : > { %v13571_v22 = vadd.f32 %v7247_v10, %v6877_v0  ;;  %v8312_v0 = vsel %vm12177_vm2, %v10009_v32, %v8311_v41  ;;  %v8111_v41 = vpack.c.b16 %v8098_v5, %v8097_v45  ;;  %v7957_v10 = vor.u32 %v7956_v3, %v7952_v26  ;;  %v13599_v5 = vpop.f32.mrf.mxu3 }
 0x673   : > { %v8393_v25 = vunpack.c.l.b16 %v8312_v0  ;;  %v7962_v32 = vrot.slane %v7960_v55, 5  ;;  %v7965_v0 = vshrl.u32 %v7856_v11, 16  ;;  %v8396_v3 = vunpack.c.l.b16 %v8322_v33  ;;  %v7858_v55 = vld [vmem:[#allocation4 + $0x50] sm:$0x1]  ;;  %v7860_v33 = vld [vmem:[#allocation4 + $0x58] sm:$0xf] }
 0x674   : > { %v7958_v27 = vrot.slane %v7957_v10, 4  ;;  %v6880_v45 = vadd.f32 %v13573_v29, %v6653_v53  ;;  %v8265_v29 = vld [vmem:[#allocation4 + $0x44] sm:$0x1]  ;;  %v7984_v2 = vshll.u32 %v7858_v55, 16  ;;  %v7859_v53 = vld [vmem:[#allocation4 + $0x54] sm:$0xf] }
 0x675   : > { %v8408_v19 = vpack.c.b16 %v8394_v42, %v8393_v25  ;;  %v8319_v42 = vsel %vm12177_vm2, %v10010_v15, %v8318_v24  ;;  %v8264_v25 = vld [vmem:[#allocation4 + $0x40] sm:$0xf]  ;;  %v7861_v55 = vld [vmem:[#allocation4 + $0x5c] sm:$0x1] }
 0x676   : > { %v7963_v59 = vsel %vm12268_vm1, %v7958_v27, %v7962_v32  ;;  %v8325_v24 = vrot.slane %v8264_v25, 5  ;;  %v6356_v27 = vadd.f32 %v13460_v16, %v13420_v8  ;;  %v7986_v16 = vrot.slane %v7984_v2, 5 }
 0x677   : > { %v8008_v2 = vshll.u32 %v7861_v55, 16 }
 0x678   : > { %v8327_v21 = vrot.slane %v8325_v24, 4  ;;  %v6657_v15 = vadd.f32 %v13542_v34, %v6356_v27  ;;  %v8266_v27 = vld [vmem:[#allocation4 + $0x48] sm:$0xe] }
 0x679   : > { %v7249_v49 = vpop.f32.mrf.mxu2  ;;  %v6847_v20 = vpop.f32.mrf.mxu1 }
 0x67a   : > { %v13586_v54 = vadd.f32 %v7249_v49, %v6878_v47  ;;  %v13588_v43 = vadd.f32 %v6847_v20, %v6654_v12  ;;  %v7974_v47 = vshll.u32 %v7857_v46, 16  ;;  %v8100_v49 = vunpack.c.l.b16 %v7963_v59  ;;  %v6632_v11 = vpop.f32.mrf.mxu3 }
 0x67b   : > { %v7967_v12 = vrot.slane %v7965_v0, 4  ;;  %v7970_v20 = vrot.slane %v7968_v40, 5  ;;  %v10011_v40 = vrot.slane %v8263_v57, 9 }
 0x67c   : > { %8191 = vmatmul.bf16.gmra.mxu1 %v8111_v41  ;;  %v7976_v50 = vrot.slane %v7974_v47, 5  ;;  %v7980_v41 = vrot.slane %v7978_v44, 4 }
 0x67d   : > { %v7971_v58 = vor.u32 %v7970_v20, %v7967_v12  ;;  %v7992_v20 = vshll.u32 %v7859_v53, 16 }
 0x67e   : > { %8484 = vmatmul.bf16.gmra.mxu2 %v8408_v19  ;;  %v7981_v13 = vor.u32 %v7980_v41, %v7976_v50 }
 0x67f   : > { %v7972_v46 = vrot.slane %v7971_v58, 4  ;;  %v7994_v58 = vrot.slane %v7992_v20, 5 }
 0x680   : > { %v7982_v1 = vrot.slane %v7981_v13, 4 }
 0x681   : > { %v7252_v60 = vpop.f32.mrf.mxu2  ;;  %v13595_v23 = vpop.f32.mrf.mxu1  ;;  %v7977_v44 = vsel %vm12268_vm1, %v7972_v46, %v7976_v50  ;;  %v6659_v46 = vadd.f32 %v6632_v11, %v13493_v51 }
 0x682   : > { %v13593_v56 = vadd.f32 %v7252_v60, %v13567_v18  ;;  %v7953_v18 = vsel %vm12268_vm1, %v7948_v6, %v7952_v26  ;;  %v8395_v26 = vunpack.c.l.b16 %v8319_v42  ;;  %v8328_v60 = vrot.slane %v8265_v29, 5 }
 0x683   : > { %v8099_v36 = vunpack.c.l.b16 %v7953_v18  ;;  %v6354_v6 = vadd.f32 %v13418_v48, %v13398_v52  ;;  %v7987_v34 = vsel %vm12268_vm1, %v7982_v1, %v7986_v16  ;;  %v7998_v18 = vshll.u32 %v7860_v33, 16  ;;  %v6635_v48 = vpop.f32.mrf.mxu3 }
 0x684   : > { %v8409_v30 = vpack.c.b16 %v8396_v3, %v8395_v26  ;;  %v8329_v47 = vsel %vm12177_vm2, %v8327_v21, %v8328_v60  ;;  %v8002_v52 = vshrl.u32 %v7860_v33, 16  ;;  %v8326_v42 = vsel %vm12177_vm2, %v10011_v40, %v8325_v24 }
 0x685   : > { %v8112_v10 = vpack.c.b16 %v8100_v49, %v8099_v36  ;;  %v8398_v3 = vunpack.c.l.b16 %v8329_v47  ;;  %v8101_v49 = vunpack.c.l.b16 %v7977_v44  ;;  %v8102_v12 = vunpack.c.l.b16 %v7987_v34  ;;  %v7863_v47 = vld [vmem:[#allocation4 + $0x64] sm:$0xf] }
 0x686   : > { %v8000_v50 = vrot.slane %v7998_v18, 5  ;;  %v8004_v41 = vrot.slane %v8002_v52, 4  ;;  %v8397_v26 = vunpack.c.l.b16 %v8326_v42  ;;  %v10012_v1 = vrot.slane %v8266_v27, 9 }
 0x687   : > { %v8113_v24 = vpack.c.b16 %v8102_v12, %v8101_v49  ;;  %v8022_v52 = vshll.u32 %v7863_v47, 16 }
 0x689   : > { %v7254_v35 = vpop.f32.mrf.mxu2  ;;  %v6852_v19 = vpop.f32.mrf.mxu1 }
 0x68a   : > { %v13611_v4 = vadd.f32 %v7254_v35, %v6880_v45  ;;  %v13613_v37 = vadd.f32 %v6852_v19, %v6656_v9  ;;  %v7989_v45 = vshrl.u32 %v7859_v53, 16  ;;  %v6658_v9 = vadd.f32 %v13599_v5, %v13478_v7  ;;  %v8267_v19 = vld [vmem:[#allocation4 + $0x4c] sm:$0xf]  ;;  %v8268_v7 = vld [vmem:[#allocation4 + $0x50] sm:$0x1] }
 0x68b   : > { %v8332_v13 = vrot.slane %v8267_v19, 5  ;;  %v6637_v21 = vpop.f32.mrf.mxu3  ;;  %v8335_v40 = vrot.slane %v8268_v7, 5 }
 0x68c   : > { %8196 = vmatmul.bf16.gmra.mxu1 %v8112_v10  ;;  %v7991_v29 = vrot.slane %v7989_v45, 4 }
 0x68d   : > { %v8333_v53 = vsel %vm12177_vm2, %v10012_v1, %v8332_v13  ;;  %v8269_v1 = vld [vmem:[#allocation4 + $0x54] sm:$0xe] }
 0x68e   : > { %8489 = vmatmul.bf16.gmra.mxu2 %v8409_v30  ;;  %v8410_v30 = vpack.c.b16 %v8398_v3, %v8397_v26  ;;  %v7995_v5 = vor.u32 %v7994_v58, %v7991_v29  ;;  %v8399_v45 = vunpack.c.l.b16 %v8333_v53 }
 0x690   : > { %v7996_v44 = vrot.slane %v7995_v5, 4  ;;  %v7866_v5 = vld [vmem:[#allocation4 + $0x70] sm:$0xf] }
 0x691   : > { %v7257_v32 = vpop.f32.mrf.mxu2  ;;  %v6854_v8 = vpop.f32.mrf.mxu1 }
 0x692   : > { %v13621_v0 = vadd.f32 %v7257_v32, %v13588_v43  ;;  %v13623_v59 = vadd.f32 %v6854_v8, %v6657_v15  ;;  %v6655_v43 = vadd.f32 %v13514_v17, %v6354_v6  ;;  %v8334_v32 = vrot.slane %v8332_v13, 4  ;;  %v7862_v8 = vld [vmem:[#allocation4 + $0x60] sm:$0xf]  ;;  %v8271_v13 = vld [vmem:[#allocation4 + $0x5c] sm:$0x1] }
 0x693   : > { %v8010_v6 = vrot.slane %v8008_v2, 5  ;;  %v8013_v11 = vshrl.u32 %v7862_v8, 16  ;;  %v8016_v18 = vshll.u32 %v7862_v8, 16  ;;  %v6640_v3 = vpop.f32.mrf.mxu3 }
 0x694   : > { %v6882_v25 = vadd.f32 %v13595_v23, %v6655_v43  ;;  %v8005_v23 = vor.u32 %v8004_v41, %v8000_v50  ;;  %v8336_v51 = vsel %vm12177_vm2, %v8334_v32, %v8335_v40  ;;  %v8026_v43 = vshrl.u32 %v7863_v47, 16  ;;  %v8270_v41 = vld [vmem:[#allocation4 + $0x58] sm:$0xf] }
 0x695   : > { %v8400_v49 = vunpack.c.l.b16 %v8336_v51  ;;  %v8018_v19 = vrot.slane %v8016_v18, 5  ;;  %v8339_v58 = vrot.slane %v8270_v41, 5  ;;  %v8342_v32 = vrot.slane %v8271_v13, 5 }
 0x696   : > { %v8006_v60 = vrot.slane %v8005_v23, 4 }
 0x697   : > { %v8411_v29 = vpack.c.b16 %v8400_v49, %v8399_v45  ;;  %v8341_v27 = vrot.slane %v8339_v58, 4  ;;  %v6662_v49 = vadd.f32 %v6640_v3, %v13532_v38  ;;  %v8272_v3 = vld [vmem:[#allocation4 + $0x60] sm:$0xe] }
 0x698   : > { %v8011_v34 = vsel %vm12268_vm1, %v8006_v60, %v8010_v6 }
 0x699   : > { %v7259_v35 = vpop.f32.mrf.mxu2  ;;  %v6857_v17 = vpop.f32.mrf.mxu1  ;;  %v8104_v42 = vunpack.c.l.b16 %v8011_v34  ;;  %v8343_v40 = vsel %vm12177_vm2, %v8341_v27, %v8342_v32  ;;  %v8050_v34 = vshrl.u32 %v7866_v5, 16 }
 0x69a   : > { %v13637_v36 = vadd.f32 %v7259_v35, %v6882_v25  ;;  %v13639_v10 = vadd.f32 %v6857_v17, %v6658_v9  ;;  %v6660_v25 = vadd.f32 %v6635_v48, %v13508_v31  ;;  %v7864_v35 = vld [vmem:[#allocation4 + $0x68] sm:$0x1]  ;;  %v8015_v9 = vrot.slane %v8013_v11, 4 }
 0x69b   : > { %v8032_v23 = vshll.u32 %v7864_v35, 16  ;;  %v6642_v60 = vpop.f32.mrf.mxu3  ;;  %v8402_v51 = vunpack.c.l.b16 %v8343_v40 }
 0x69c   : > { %8201 = vmatmul.bf16.gmra.mxu1 %v8113_v24  ;;  %v8028_v24 = vrot.slane %v8026_v43, 4  ;;  %v8019_v31 = vor.u32 %v8018_v19, %v8015_v9  ;;  %v8052_v43 = vrot.slane %v8050_v34, 4  ;;  %v7867_v9 = vld [vmem:[#allocation4 + $0x74] sm:$0x1]  ;;  %v6663_v13 = vadd.f32 %v6642_v60, %v13549_v61 }
 0x69d   : > { %v8034_v2 = vrot.slane %v8032_v23, 5  ;;  %v8056_v23 = vshll.u32 %v7867_v9, 16 }
 0x69e   : > { %8494 = vmatmul.bf16.gmra.mxu2 %v8410_v30 }
 0x6a1   : > { %v7262_v57 = vpop.f32.mrf.mxu2  ;;  %v6859_v33 = vpop.f32.mrf.mxu1 }
 0x6a2   : > { %v13643_v15 = vadd.f32 %v7262_v57, %v13613_v37  ;;  %v13645_v16 = vadd.f32 %v6859_v33, %v6659_v46  ;;  %v8001_v37 = vsel %vm12268_vm1, %v7996_v44, %v8000_v50  ;;  %v8024_v50 = vrot.slane %v8022_v52, 5 }
 0x6a3   : > { %v8103_v20 = vunpack.c.l.b16 %v8001_v37  ;;  %v8020_v33 = vrot.slane %v8019_v31, 4  ;;  %v8046_v44 = vshll.u32 %v7866_v5, 16 }
 0x6a4   : > { %v8029_v48 = vor.u32 %v8028_v24, %v8024_v50 }
 0x6a5   : > { %v8114_v30 = vpack.c.b16 %v8104_v42, %v8103_v20  ;;  %v8048_v52 = vrot.slane %v8046_v44, 5 }
 0x6a6   : > { %v8030_v6 = vrot.slane %v8029_v48, 4 }
 0x6a8   : > { %v8035_v47 = vsel %vm12268_vm1, %v8030_v6, %v8034_v2 }
 0x6a9   : > { %v7264_v12 = vpop.f32.mrf.mxu2  ;;  %v6862_v17 = vpop.f32.mrf.mxu1  ;;  %v8106_v11 = vunpack.c.l.b16 %v8035_v47 }
 0x6aa   : > { %v13657_v26 = vadd.f32 %v7264_v12, %v13623_v59  ;;  %v13659_v55 = vadd.f32 %v6862_v17, %v6660_v25  ;;  %v6661_v59 = vadd.f32 %v6637_v21, %v13521_v63  ;;  %v10013_v63 = vrot.slane %v8269_v1, 9  ;;  %v7865_v21 = vld [vmem:[#allocation4 + $0x6c] sm:$0xf]  ;;  %v6645_v17 = vpop.f32.mrf.mxu3 }
 0x6ab   : > { %v8037_v37 = vshrl.u32 %v7865_v21, 16  ;;  %v8040_v18 = vshll.u32 %v7865_v21, 16  ;;  %v6664_v34 = vadd.f32 %v6645_v17, %v13552_v62 }
 0x6ac   : > { %8206 = vmatmul.bf16.gmra.mxu1 %v8114_v30  ;;  %v8340_v53 = vsel %vm12177_vm2, %v10013_v63, %v8339_v58  ;;  %v8274_v58 = vld [vmem:[#allocation4 + $0x68] sm:$0x1] }
 0x6ad   : > { %v8401_v25 = vunpack.c.l.b16 %v8340_v53  ;;  %v8039_v24 = vrot.slane %v8037_v37, 4  ;;  %v8042_v30 = vrot.slane %v8040_v18, 5  ;;  %v8349_v27 = vrot.slane %v8274_v58, 5 }
 0x6ae   : > { %8499 = vmatmul.bf16.gmra.mxu2 %v8411_v29  ;;  %v8053_v29 = vor.u32 %v8052_v43, %v8048_v52 }
 0x6af   : > { %v8412_v19 = vpack.c.b16 %v8402_v51, %v8401_v25  ;;  %v8043_v31 = vor.u32 %v8042_v30, %v8039_v24  ;;  %v8276_v51 = vld [vmem:[#allocation4 + $0x70] sm:$0xf]  ;;  %v7772_v24 = vpop.f32.mrf.mxu0 }
 0x6b0   : > { %v8353_v28 = vrot.slane %v8276_v51, 5 }
 0x6b1   : > { %v7267_v7 = vpop.f32.mrf.mxu2  ;;  %v6864_v46 = vpop.f32.mrf.mxu1  ;;  %v8044_v32 = vrot.slane %v8043_v31, 4 }
 0x6b2   : > { %v13663_v57 = vadd.f32 %v7267_v7, %v13639_v10  ;;  %v6888_v8 = vadd.f32 %v6864_v46, %v6661_v59  ;;  %v8025_v10 = vsel %vm12268_vm1, %v8020_v33, %v8024_v50  ;;  %v8273_v50 = vld [vmem:[#allocation4 + $0x64] sm:$0xf]  ;;  %v8058_v59 = vrot.slane %v8056_v23, 5  ;;  %v6647_v40 = vpop.f32.mrf.mxu3 }
 0x6b3   : > { %v8105_v12 = vunpack.c.l.b16 %v8025_v10  ;;  %v8346_v38 = vrot.slane %v8273_v50, 5  ;;  %v10014_v46 = vrot.slane %v8272_v3, 9  ;;  %v8049_v61 = vsel %vm12268_vm1, %v8044_v32, %v8048_v52  ;;  %v8277_v52 = vld [vmem:[#allocation4 + $0x74] sm:$0x1]  ;;  %v13709_v32 = vld [vmem:[%s13934_s5] ss:$0 sm:$0xff] }
 0x6b4   : > { %v8107_v63 = vunpack.c.l.b16 %v8049_v61  ;;  %v8356_v25 = vrot.slane %v8277_v52, 5 }
 0x6b5   : > { %v8115_v35 = vpack.c.b16 %v8106_v11, %v8105_v12  ;;  %v8348_v1 = vrot.slane %v8346_v38, 4  ;;  %v8355_v12 = vrot.slane %v8353_v28, 4 }
 0x6b7   : > { %v8350_v6 = vsel %vm12177_vm2, %v8348_v1, %v8349_v27  ;;  %v8357_v17 = vsel %vm12177_vm2, %v8355_v12, %v8356_v25  ;;  %v7774_v31 = vpop.f32.mrf.mxu0 }
 0x6b8   : > { %v8404_v47 = vunpack.c.l.b16 %v8350_v6  ;;  %v8406_v50 = vunpack.c.l.b16 %v8357_v17 }
 0x6b9   : > { %v7269_v42 = vpop.f32.mrf.mxu2  ;;  %v6867_v20 = vpop.f32.mrf.mxu1 }
 0x6ba   : > { %v13675_v45 = vadd.f32 %v7269_v42, %v13645_v16  ;;  %v6889_v41 = vadd.f32 %v6867_v20, %v6662_v49  ;;  %v8054_v16 = vrot.slane %v8053_v29, 4  ;;  %v7545_v43 = vpop.f32.mrf.mxu3  ;;  %v6665_v49 = vadd.f32 %v6647_v40, %v13565_v39  ;;  %v8275_v20 = vld [vmem:[#allocation4 + $0x6c] sm:$0xe] }
 0x6bb   : > { %v10015_v9 = vrot.slane %v8275_v20, 9  ;;  %v7585_v14 = vadd.f32 %v7545_v43, %v13571_v22  ;;  %v13715_v22 = vld [vmem:[%s13935_s6] ss:$0 sm:$0xff] }
 0x6bc   : > { %8211 = vmatmul.bf16.gmra.mxu1 %v8115_v35  ;;  %v8059_v33 = vsel %vm12268_vm1, %v8054_v16, %v8058_v59 }
 0x6bd   : > { %v8108_v60 = vunpack.c.l.b16 %v8059_v33 }
 0x6be   : > { %8504 = vmatmul.bf16.gmra.mxu2 %v8412_v19  ;;  %v8354_v19 = vsel %vm12177_vm2, %v10015_v9, %v8353_v28 }
 0x6bf   : > { %v8116_v37 = vpack.c.b16 %v8108_v60, %v8107_v63  ;;  %v8405_v39 = vunpack.c.l.b16 %v8354_v19 }
 0x6c1   : > { %v7272_v48 = vpop.f32.mrf.mxu2  ;;  %v6869_v7 = vpop.f32.mrf.mxu1 }
 0x6c2   : > { %v13679_v2 = vadd.f32 %v7272_v48, %v13659_v55  ;;  %v6890_v5 = vadd.f32 %v6869_v7, %v6663_v13  ;;  %v8347_v55 = vsel %vm12177_vm2, %v10014_v46, %v8346_v38  ;;  %v7547_v29 = vpop.f32.mrf.mxu3  ;;  %v7777_v7 = vpop.f32.mrf.mxu0  ;;  %v7812_v46 = vadd.f32 %v7772_v24, %v7585_v14 }
 0x6c3   : > { %v8403_v10 = vunpack.c.l.b16 %v8347_v55  ;;  %v7586_v6 = vadd.f32 %v7547_v29, %v13586_v54 }
 0x6c5   : > { %v8413_v18 = vpack.c.b16 %v8404_v47, %v8403_v10  ;;  %v7813_v55 = vadd.f32 %v7774_v31, %v7586_v6 }
 0x6c9   : > { %v7274_v44 = vpop.f32.mrf.mxu2  ;;  %v6872_v53 = vpop.f32.mrf.mxu1 }
 0x6ca   : > { %v13690_v21 = vadd.f32 %v7274_v44, %v6888_v8  ;;  %v6891_v11 = vadd.f32 %v6872_v53, %v6664_v34  ;;  %v7550_v16 = vpop.f32.mrf.mxu3  ;;  %v7779_v47 = vpop.f32.mrf.mxu0 }
 0x6cb   : > { %v7587_v54 = vadd.f32 %v7550_v16, %v13593_v56 }
 0x6cc   : > { %8216 = vmatmul.bf16.gmra.mxu1 %v8116_v37 }
 0x6cd   : > { %v7814_v37 = vadd.f32 %v7777_v7, %v7587_v54 }
 0x6ce   : > { %8509 = vmatmul.bf16.gmra.mxu2 %v8413_v18 }
 0x6d1   : > { %v7277_v42 = vpop.f32.mrf.mxu2  ;;  %v6874_v8 = vpop.f32.mrf.mxu1 }
 0x6d2   : > { %v13693_v62 = vadd.f32 %v7277_v42, %v6889_v41  ;;  %v6892_v35 = vadd.f32 %v6874_v8, %v6665_v49  ;;  %v8414_v41 = vpack.c.b16 %v8406_v50, %v8405_v39  ;;  %v7552_v59 = vpop.f32.mrf.mxu3  ;;  %v7782_v25 = vpop.f32.mrf.mxu0 }
 0x6d3   : > { %v7588_v8 = vadd.f32 %v7552_v59, %v13611_v4 }
 0x6d5   : > { %v7815_v9 = vadd.f32 %v7779_v47, %v7588_v8 }
 0x6d9   : > { %v7279_v30 = vpop.f32.mrf.mxu2  ;;  %v8182_v23 = vpop.f32.mrf.mxu1 }
 0x6da   : > { %v13699_v58 = vadd.f32 %v7279_v30, %v6890_v5  ;;  %v8222_v1 = vadd.f32 %v8182_v23, %v7812_v46  ;;  %v7555_v44 = vpop.f32.mrf.mxu3  ;;  %v7784_v31 = vpop.f32.mrf.mxu0 }
 0x6de   : > { %8514 = vmatmul.bf16.gmra.mxu2 %v8414_v41 }
 0x6e1   : > { %v7282_v38 = vpop.f32.mrf.mxu2  ;;  %v8184_v48 = vpop.f32.mrf.mxu1 }
 0x6e2   : > { %v13701_v3 = vadd.f32 %v7282_v38, %v6891_v11  ;;  %v8223_v34 = vadd.f32 %v8184_v48, %v7813_v55  ;;  %v7557_v20 = vpop.f32.mrf.mxu3  ;;  %v7589_v38 = vadd.f32 %v7555_v44, %v13621_v0  ;;  %v7787_v54 = vpop.f32.mrf.mxu0 }
 0x6e9   : > { %v7284_v13 = vpop.f32.mrf.mxu2  ;;  %v8187_v5 = vpop.f32.mrf.mxu1 }
 0x6ea   : > { %v13704_v27 = vadd.f32 %v7284_v13, %v6892_v35  ;;  %v8224_v52 = vadd.f32 %v8187_v5, %v7814_v37  ;;  %v13737_v16 = vpop.f32.mrf.mxu3  ;;  %v7816_v5 = vadd.f32 %v7782_v25, %v7589_v38 }
 0x6f1   : > { %v8480_v33 = vpop.f32.mrf.mxu2  ;;  %v8189_v10 = vpop.f32.mrf.mxu1 }
 0x6f2   : > { %v8520_v40 = vadd.f32 %v8480_v33, %v8222_v1  ;;  %v8225_v50 = vadd.f32 %v8189_v10, %v7815_v9 }
 0x6f4   : > { %v8572_v61 = vmul.f32 %v13709_v32, %v8520_v40 }
 0x6f6   : > { %v13719_v60 = vadd.f32 %v13715_v22, %v8572_v61 }
 0x6f8   : > { %v10064_v63 = vmul.f32 -1.442695, %v13719_v60 }
 0x6f9   : > { %v8482_v53 = vpop.f32.mrf.mxu2  ;;  %v8192_v42 = vpop.f32.mrf.mxu1 }
 0x6fa   : > { %10432 = vpow2.f32 %v10064_v63  ;;  %v8521_v51 = vadd.f32 %v8482_v53, %v8223_v34  ;;  %v8226_v55 = vadd.f32 %v8192_v42, %v7816_v5  ;;  %v8928_v53 = vld [vmem:[#allocation2 + $0x32] sm:$0xff]  ;;  %v13751_v42 = vpop.f32.mrf.mxu3 }
 0x6fc   : > { %v8573_v11 = vmul.f32 %v13709_v32, %v8521_v51 }
 0x6fe   : > { %v13725_v18 = vadd.f32 %v13715_v22, %v8573_v11 }
 0x700   : > { %v10433_v28 = vpop.eup %10432  ;;  %v10065_v43 = vmul.f32 -1.442695, %v13725_v18 }
 0x701   : > { %v8656_v49 = vadd.f32 1.0, %v10433_v28  ;;  %v8485_v12 = vpop.f32.mrf.mxu2  ;;  %v13734_v30 = vpop.f32.mrf.mxu1  ;;  %v7590_v28 = vadd.f32 %v7557_v20, %v13637_v36 }
 0x702   : > { %10434 = vpow2.f32 %v10065_v43  ;;  %v8522_v56 = vadd.f32 %v8485_v12, %v8224_v52 }
 0x703   : > { %10436 = vrcp.f32 %v8656_v49  ;;  %v8683_v14 = vand.u32 2147483648, %v8656_v49  ;;  %v8681_v59 = vand.u32 2147483647, %v8656_v49  ;;  %vm8677_vm2 = vweird.f32 %v8656_v49 }
 0x704   : > { %v8574_v35 = vmul.f32 %v13709_v32, %v8522_v56  ;;  %v7817_v36 = vadd.f32 %v7784_v31, %v7590_v28 }
 0x705   : > { %v8684_v61 = vor.u32 1.1754944e-38, %v8683_v14  ;;  %vm8682_vm11 = vcmp.eq.f32.partialorder %v8681_v59, 8.507059e+37  ;;  %v7789_v14 = vpop.f32.mrf.mxu0 }
 0x706   : > { %v13731_v17 = vadd.f32 %v13715_v22, %v8574_v35 }
 0x708   : > { %v10435_v19 = vpop.eup %10434  ;;  %v10066_v24 = vmul.f32 -1.442695, %v13731_v17 }
 0x709   : > { %v10437_v29 = vpop.eup %10436  ;;  %v8657_v39 = vadd.f32 1.0, %v10435_v19  ;;  %v8487_v23 = vpop.f32.mrf.mxu2 }
 0x70a   : > { %v8673_v4 = vmul.f32 %v10437_v29, %v8656_v49  ;;  %10438 = vpow2.f32 %v10066_v24  ;;  %v8523_v41 = vadd.f32 %v8487_v23, %v8225_v50  ;;  %vm8678_vm3 = vweird.f32 %v10437_v29  ;;  %v13744_v6 = vpop.f32.mrf.mxu1 }
 0x70b   : > { %10440 = vrcp.f32 %v8657_v39  ;;  %vm8679_vm1 = vmor %vm8677_vm2, %vm8678_vm3  ;;  %v8696_v52 = vand.u32 2147483647, %v8657_v39  ;;  %v8698_v43 = vand.u32 2147483648, %v8657_v39  ;;  %vm8692_vm12 = vweird.f32 %v8657_v39 }
 0x70c   : > { %v8674_v48 = vsub.f32 1.0, %v8673_v4  ;;  %v8575_v13 = vmul.f32 %v13709_v32, %v8523_v41  ;;  %v8227_v41 = vadd.f32 %v13734_v30, %v7817_v36 }
 0x70d   : > { %v8699_v9 = vor.u32 1.1754944e-38, %v8698_v43  ;;  %vm8697_vm15 = vcmp.eq.f32.partialorder %v8696_v52, 8.507059e+37 }
 0x70e   : > { %v8675_v7 = vmul.f32 %v10437_v29, %v8674_v48  ;;  %v13741_v46 = vadd.f32 %v13715_v22, %v8575_v13 }
 0x710   : > { %v10439_v1 = vpop.eup %10438  ;;  %v8676_v33 = vadd.f32 %v10437_v29, %v8675_v7  ;;  %v10067_v0 = vmul.f32 -1.442695, %v13741_v46 }
 0x711   : > { %v10441_v40 = vpop.eup %10440  ;;  %v13746_v47 = vadd.f32 1.0, %v10439_v1  ;;  %v8490_v44 = vpop.f32.mrf.mxu2  ;;  %v7591_v1 = vadd.f32 %v13737_v16, %v13643_v15  ;;  %v8930_v15 = vld [vmem:[#allocation2 + $0x4a] sm:$0xff] }
 0x712   : > { %v8680_v34 = vsel %vm8679_vm1, %v10437_v29, %v8676_v33  ;;  %v8688_v63 = vmul.f32 %v10441_v40, %v8657_v39  ;;  %10442 = vpow2.f32 %v10067_v0  ;;  %v8524_v37 = vadd.f32 %v8490_v44, %v8226_v55  ;;  %v13762_v29 = vpop.f32.mrf.mxu1  ;;  %v8929_v39 = vld [vmem:[#allocation2 + $0x3a] sm:$0xff]  ;;  %v7565_v33 = vpop.f32.mrf.mxu3 }
 0x713   : > { %v8685_v10 = vsel %vm8682_vm11, %v8684_v61, %v8680_v34  ;;  %10444 = vrcp.f32 %v13746_v47  ;;  %vm8693_vm8 = vweird.f32 %v10441_v40  ;;  %v8713_v48 = vand.u32 2147483648, %v13746_v47 }
 0x714   : > { %v8912_v51 = vmul.f32 %v8685_v10, %v13719_v60  ;;  %v8689_v11 = vsub.f32 1.0, %v8688_v63  ;;  %v8576_v25 = vmul.f32 %v13709_v32, %v8524_v37  ;;  %vm8694_vm13 = vmor %vm8692_vm12, %vm8693_vm8  ;;  %v8711_v5 = vand.u32 2147483647, %v13746_v47 }
 0x715   : > { %vm8707_vm4 = vweird.f32 %v13746_v47  ;;  %v7818_v16 = vadd.f32 %v7787_v54, %v7591_v1 }
 0x716   : > { %v8944_v49 = vadd.f32 %v8928_v53, %v8912_v51  ;;  %v8690_v12 = vmul.f32 %v10441_v40, %v8689_v11  ;;  %v13756_v35 = vadd.f32 %v13715_v22, %v8576_v25  ;;  %vm8712_vm6 = vcmp.eq.f32.partialorder %v8711_v5, 8.507059e+37 }
 0x717   : > { %v8228_v43 = vadd.f32 %v13744_v6, %v7818_v16 }
 0x718   : > { %v10443_v8 = vpop.eup %10442  ;;  %8960 = vst [vmem:[%s10623_s17] sm:$0xff] %v8944_v49  ;;  %v8691_v56 = vadd.f32 %v10441_v40, %v8690_v12  ;;  %v10068_v24 = vmul.f32 -1.442695, %v13756_v35  ;;  %v7792_v49 = vpop.f32.mrf.mxu0 }
 0x719   : > { %v10445_v60 = vpop.eup %10444  ;;  %v13758_v20 = vadd.f32 1.0, %v10443_v8  ;;  %v8492_v23 = vpop.f32.mrf.mxu2  ;;  %v7592_v8 = vadd.f32 %v13751_v42, %v13657_v26 }
 0x71a   : > { %v8695_v19 = vsel %vm8694_vm13, %v10441_v40, %v8691_v56  ;;  %v8703_v50 = vmul.f32 %v10445_v60, %v13746_v47  ;;  %v8525_v13 = vadd.f32 %v8492_v23, %v8227_v41  ;;  %vm8708_vm0 = vweird.f32 %v10445_v60  ;;  %v8202_v11 = vpop.f32.mrf.mxu1 }
 0x71b   : > { %v8700_v4 = vsel %vm8697_vm15, %v8699_v9, %v8695_v19  ;;  %10446 = vrcp.f32 %v13758_v20  ;;  %vm8709_vm5 = vmor %vm8707_vm4, %vm8708_vm0  ;;  %v8714_v40 = vor.u32 1.1754944e-38, %v8713_v48  ;;  %v8726_v28 = vand.u32 2147483647, %v13758_v20  ;;  %v7567_v9 = vpop.f32.mrf.mxu3 }
 0x71c   : > { %v8913_v38 = vmul.f32 %v8700_v4, %v13725_v18  ;;  %v8704_v31 = vsub.f32 1.0, %v8703_v50  ;;  %10448 = vpow2.f32 %v10068_v24  ;;  %v8577_v30 = vmul.f32 %v13709_v32, %v8525_v13  ;;  %v8931_v50 = vld [vmem:[#allocation2 + $0x52] sm:$0xff] }
 0x71d   : > { %v8728_v52 = vand.u32 2147483648, %v13758_v20  ;;  %vm8722_vm9 = vweird.f32 %v13758_v20  ;;  %vm8727_vm10 = vcmp.eq.f32.partialorder %v8726_v28, 8.507059e+37  ;;  %v7819_v4 = vadd.f32 %v7789_v14, %v7592_v8 }
 0x71e   : > { %v8945_v7 = vadd.f32 %v8929_v39, %v8913_v38  ;;  %v8705_v59 = vmul.f32 %v10445_v60, %v8704_v31  ;;  %v13775_v61 = vadd.f32 %v13715_v22, %v8577_v30 }
 0x71f   : > { %v8729_v56 = vor.u32 1.1754944e-38, %v8728_v52  ;;  %v8229_v31 = vadd.f32 %v13762_v29, %v7819_v4  ;;  %v8933_v4 = vld [vmem:[#allocation2 + $0x6a] sm:$0xff] }
 0x720   : > { %8961 = vst [vmem:[%s10623_s17 + $0x8] sm:$0xff] %v8945_v7  ;;  %v8706_v0 = vadd.f32 %v10445_v60, %v8705_v59  ;;  %v10069_v53 = vmul.f32 -1.442695, %v13775_v61  ;;  %v7593_v7 = vadd.f32 %v7565_v33, %v13663_v57  ;;  %v7794_v1 = vpop.f32.mrf.mxu0 }
 0x721   : > { %v10447_v18 = vpop.eup %10446  ;;  %v8495_v37 = vpop.f32.mrf.mxu2 }
 0x722   : > { %v10449_v55 = vpop.eup %10448  ;;  %v8710_v44 = vsel %vm8709_vm5, %v10445_v60, %v8706_v0  ;;  %v8718_v34 = vmul.f32 %v10447_v18, %v13758_v20  ;;  %vm8723_vm7 = vweird.f32 %v10447_v18  ;;  %v8526_v54 = vadd.f32 %v8495_v37, %v8228_v43  ;;  %v8204_v48 = vpop.f32.mrf.mxu1 }
 0x723   : > { %v8715_v63 = vsel %vm8712_vm6, %v8714_v40, %v8710_v44  ;;  %v8660_v10 = vadd.f32 1.0, %v10449_v55  ;;  %vm8724_vm14 = vmor %vm8722_vm9, %vm8723_vm7  ;;  %v7820_v29 = vadd.f32 %v7792_v49, %v7593_v7  ;;  %v7570_v40 = vpop.f32.mrf.mxu3 }
 0x724   : > { %v8914_v47 = vmul.f32 %v8715_v63, %v13731_v17  ;;  %v8719_v51 = vsub.f32 1.0, %v8718_v34  ;;  %v8578_v60 = vmul.f32 %v13709_v32, %v8526_v54  ;;  %v8932_v34 = vld [vmem:[#allocation2 + $0x62] sm:$0xff] }
 0x725   : > { %10450 = vrcp.f32 %v8660_v10  ;;  %v8741_v59 = vand.u32 2147483647, %v8660_v10  ;;  %v8743_v5 = vand.u32 2147483648, %v8660_v10  ;;  %vm8737_vm2 = vweird.f32 %v8660_v10 }
 0x726   : > { %v8946_v12 = vadd.f32 %v8930_v15, %v8914_v47  ;;  %v8720_v25 = vmul.f32 %v10447_v18, %v8719_v51  ;;  %10452 = vpow2.f32 %v10069_v53  ;;  %v13789_v24 = vadd.f32 %v13715_v22, %v8578_v60 }
 0x727   : > { %vm8742_vm11 = vcmp.eq.f32.partialorder %v8741_v59, 8.507059e+37  ;;  %v8230_v63 = vadd.f32 %v8202_v11, %v7820_v29  ;;  %v7594_v51 = vadd.f32 %v7567_v9, %v13675_v45 }
 0x728   : > { %8962 = vst [vmem:[%s10623_s17 + $0x10] sm:$0xff] %v8946_v12  ;;  %v8721_v17 = vadd.f32 %v10447_v18, %v8720_v25  ;;  %v10070_v39 = vmul.f32 -1.442695, %v13789_v24  ;;  %v7797_v11 = vpop.f32.mrf.mxu0 }
 0x729   : > { %v8497_v13 = vpop.f32.mrf.mxu2  ;;  %v7821_v8 = vadd.f32 %v7794_v1, %v7594_v51 }
 0x72a   : > { %v8725_v6 = vsel %vm8724_vm14, %v10447_v18, %v8721_v17  ;;  %v8744_v18 = vor.u32 1.1754944e-38, %v8743_v5  ;;  %v8207_v49 = vpop.f32.mrf.mxu1 }
 0x72b   : > { %v10451_v36 = vpop.eup %10450  ;;  %v8730_v19 = vsel %vm8727_vm10, %v8729_v56, %v8725_v6  ;;  %v8231_v60 = vadd.f32 %v8204_v48, %v7821_v8  ;;  %v7572_v6 = vpop.f32.mrf.mxu3 }
 0x72c   : > { %v10453_v23 = vpop.eup %10452  ;;  %v8915_v26 = vmul.f32 %v8730_v19, %v13741_v46  ;;  %v8733_v42 = vmul.f32 %v10451_v36, %v8660_v10  ;;  %vm8738_vm3 = vweird.f32 %v10451_v36  ;;  %v8527_v46 = vadd.f32 %v8497_v13, %v8229_v31 }
 0x72d   : > { %v8661_v20 = vadd.f32 1.0, %v10453_v23  ;;  %vm8739_vm1 = vmor %vm8737_vm2, %vm8738_vm3 }
 0x72e   : > { %v8947_v41 = vadd.f32 %v8931_v50, %v8915_v26  ;;  %v8734_v38 = vsub.f32 1.0, %v8733_v42  ;;  %v8579_v0 = vmul.f32 %v13709_v32, %v8527_v46  ;;  %v7595_v26 = vadd.f32 %v7570_v40, %v13679_v2 }
 0x72f   : > { %10454 = vrcp.f32 %v8661_v20  ;;  %v8758_v12 = vand.u32 2147483648, %v8661_v20  ;;  %vm8752_vm12 = vweird.f32 %v8661_v20 }
 0x730   : > { %8963 = vst [vmem:[%s10623_s17 + $0x18] sm:$0xff] %v8947_v41  ;;  %v8735_v30 = vmul.f32 %v10451_v36, %v8734_v38  ;;  %10456 = vpow2.f32 %v10070_v39  ;;  %v13798_v57 = vadd.f32 %v13715_v22, %v8579_v0  ;;  %v7822_v59 = vadd.f32 %v7797_v11, %v7595_v26  ;;  %v7799_v5 = vpop.f32.mrf.mxu0  ;;  %v8935_v26 = vld [vmem:[#allocation2 + $0x82] sm:$0xff] }
 0x731   : > { %v8500_v47 = vpop.f32.mrf.mxu2  ;;  %v8759_v56 = vor.u32 1.1754944e-38, %v8758_v12 }
 0x732   : > { %v8736_v14 = vadd.f32 %v10451_v36, %v8735_v30  ;;  %v10071_v53 = vmul.f32 -1.442695, %v13798_v57  ;;  %v8528_v28 = vadd.f32 %v8500_v47, %v8230_v63  ;;  %v8209_v13 = vpop.f32.mrf.mxu1  ;;  %v8232_v46 = vadd.f32 %v8207_v49, %v7822_v59 }
 0x733   : > { %v7575_v63 = vpop.f32.mrf.mxu3 }
 0x734   : > { %v8740_v55 = vsel %vm8739_vm1, %v10451_v36, %v8736_v14  ;;  %10458 = vpow2.f32 %v10071_v53  ;;  %v8580_v54 = vmul.f32 %v13709_v32, %v8528_v28  ;;  %v8934_v53 = vld [vmem:[#allocation2 + $0x7a] sm:$0xff] }
 0x735   : > { %v10455_v33 = vpop.eup %10454  ;;  %v8745_v44 = vsel %vm8742_vm11, %v8744_v18, %v8740_v55  ;;  %v7596_v55 = vadd.f32 %v7572_v6, %v13690_v21 }
 0x736   : > { %v10457_v15 = vpop.eup %10456  ;;  %v8916_v16 = vmul.f32 %v8745_v44, %v13756_v35  ;;  %v8748_v10 = vmul.f32 %v10455_v33, %v8661_v20  ;;  %vm8753_vm8 = vweird.f32 %v10455_v33  ;;  %v8756_v35 = vand.u32 2147483647, %v8661_v20 }
 0x737   : > { %v13803_v37 = vadd.f32 1.0, %v10457_v15  ;;  %v13809_v45 = vadd.f32 %v13715_v22, %v8580_v54  ;;  %vm8754_vm13 = vmor %vm8752_vm12, %vm8753_vm8 }
 0x738   : > { %v8948_v52 = vadd.f32 %v8932_v34, %v8916_v16  ;;  %v8749_v43 = vsub.f32 1.0, %v8748_v10  ;;  %vm8757_vm15 = vcmp.eq.f32.partialorder %v8756_v35, 8.507059e+37  ;;  %v7802_v54 = vpop.f32.mrf.mxu0 }
 0x739   : > { %10460 = vrcp.f32 %v13803_v37  ;;  %v10072_v19 = vmul.f32 -1.442695, %v13809_v45  ;;  %v8502_v50 = vpop.f32.mrf.mxu2  ;;  %v8773_v2 = vand.u32 2147483648, %v13803_v37  ;;  %v8771_v30 = vand.u32 2147483647, %v13803_v37 }
 0x73a   : > { %8964 = vst [vmem:[%s10623_s17 + $0x20] sm:$0xff] %v8948_v52  ;;  %v8750_v25 = vmul.f32 %v10455_v33, %v8749_v43  ;;  %v10459_v9 = vpop.eup %10458  ;;  %v8529_v39 = vadd.f32 %v8502_v50, %v8231_v60  ;;  %vm8767_vm4 = vweird.f32 %v13803_v37  ;;  %v7823_v52 = vadd.f32 %v7799_v5, %v7596_v55  ;;  %v8212_v12 = vpop.f32.mrf.mxu1 }
 0x73b   : > { %v13813_v20 = vadd.f32 1.0, %v10459_v9  ;;  %10462 = vpow2.f32 %v10072_v19  ;;  %vm8772_vm6 = vcmp.eq.f32.partialorder %v8771_v30, 8.507059e+37  ;;  %v7597_v60 = vadd.f32 %v7575_v63, %v13693_v62 }
 0x73c   : > { %v8751_v17 = vadd.f32 %v10455_v33, %v8750_v25  ;;  %v8581_v7 = vmul.f32 %v13709_v32, %v8529_v39  ;;  %v8233_v25 = vadd.f32 %v8209_v13, %v7823_v52 }
 0x73d   : > { %10464 = vrcp.f32 %v13813_v20  ;;  %v8788_v28 = vand.u32 2147483648, %v13813_v20  ;;  %vm8782_vm9 = vweird.f32 %v13813_v20 }
 0x73e   : > { %v8755_v36 = vsel %vm8754_vm13, %v10455_v33, %v8751_v17  ;;  %v8774_v33 = vor.u32 1.1754944e-38, %v8773_v2 }
 0x73f   : > { %v10461_v23 = vpop.eup %10460  ;;  %v8760_v42 = vsel %vm8757_vm15, %v8759_v56, %v8755_v36  ;;  %v8789_v9 = vor.u32 1.1754944e-38, %v8788_v28 }
 0x740   : > { %v8917_v41 = vmul.f32 %v8760_v42, %v13775_v61  ;;  %v8763_v38 = vmul.f32 %v10461_v23, %v13803_v37  ;;  %vm8768_vm0 = vweird.f32 %v10461_v23  ;;  %v13823_v61 = vadd.f32 %v13715_v22, %v8581_v7  ;;  %v7577_v42 = vpop.f32.mrf.mxu3 }
 0x741   : > { %v10463_v14 = vpop.eup %10462  ;;  %v8505_v29 = vpop.f32.mrf.mxu2  ;;  %vm8769_vm5 = vmor %vm8767_vm4, %vm8768_vm0  ;;  %v8786_v37 = vand.u32 2147483647, %v13813_v20 }
 0x742   : > { %v8949_v31 = vadd.f32 %v8933_v4, %v8917_v41  ;;  %v8764_v48 = vsub.f32 1.0, %v8763_v38  ;;  %v10073_v18 = vmul.f32 -1.442695, %v13823_v61  ;;  %v13828_v44 = vadd.f32 1.0, %v10463_v14 }
 0x743   : > { %v10465_v40 = vpop.eup %10464  ;;  %v8530_v34 = vadd.f32 %v8505_v29, %v8232_v46  ;;  %vm8787_vm10 = vcmp.eq.f32.partialorder %v8786_v37, 8.507059e+37  ;;  %v7824_v38 = vadd.f32 %v7802_v54, %v7597_v60  ;;  %v7598_v46 = vadd.f32 %v7577_v42, %v13699_v58  ;;  %v7804_v29 = vpop.f32.mrf.mxu0 }
 0x744   : > { %8965 = vst [vmem:[%s10623_s17 + $0x28] sm:$0xff] %v8949_v31  ;;  %v8765_v1 = vmul.f32 %v10461_v23, %v8764_v48  ;;  %v8778_v16 = vmul.f32 %v10465_v40, %v13813_v20  ;;  %10466 = vpow2.f32 %v10073_v18  ;;  %vm8783_vm7 = vweird.f32 %v10465_v40 }
 0x745   : > { %10468 = vrcp.f32 %v13828_v44  ;;  %v8582_v21 = vmul.f32 %v13709_v32, %v8530_v34  ;;  %vm8784_vm14 = vmor %vm8782_vm9, %vm8783_vm7  ;;  %v8801_v39 = vand.u32 2147483647, %v13828_v44  ;;  %v8803_v41 = vand.u32 2147483648, %v13828_v44 }
 0x746   : > { %v8766_v0 = vadd.f32 %v10461_v23, %v8765_v1  ;;  %v8779_v51 = vsub.f32 1.0, %v8778_v16  ;;  %v8234_v7 = vadd.f32 %v8212_v12, %v7824_v38  ;;  %vm8797_vm2 = vweird.f32 %v13828_v44 }
 0x747   : > { %v13837_v11 = vadd.f32 %v13715_v22, %v8582_v21  ;;  %v8804_v14 = vor.u32 1.1754944e-38, %v8803_v41  ;;  %vm8802_vm11 = vcmp.eq.f32.partialorder %v8801_v39, 8.507059e+37 }
 0x748   : > { %v8770_v15 = vsel %vm8769_vm5, %v10461_v23, %v8766_v0  ;;  %v8780_v49 = vmul.f32 %v10465_v40, %v8779_v51 }
 0x749   : > { %v8775_v10 = vsel %vm8772_vm6, %v8774_v33, %v8770_v15  ;;  %v10074_v8 = vmul.f32 -1.442695, %v13837_v11  ;;  %v8507_v17 = vpop.f32.mrf.mxu2 }
 0x74a   : > { %v8918_v47 = vmul.f32 %v8775_v10, %v13789_v24  ;;  %v10467_v35 = vpop.eup %10466  ;;  %v8781_v24 = vadd.f32 %v10465_v40, %v8780_v49  ;;  %v8531_v36 = vadd.f32 %v8507_v17, %v8233_v25  ;;  %v7825_v10 = vadd.f32 %v7804_v29, %v7598_v46 }
 0x74b   : > { %v10469_v56 = vpop.eup %10468  ;;  %v13843_v6 = vadd.f32 1.0, %v10467_v35  ;;  %10470 = vpow2.f32 %v10074_v8 }
 0x74c   : > { %v8950_v43 = vadd.f32 %v8934_v53, %v8918_v47  ;;  %v8785_v19 = vsel %vm8784_vm14, %v10465_v40, %v8781_v24  ;;  %v8793_v50 = vmul.f32 %v10469_v56, %v13828_v44  ;;  %v8583_v62 = vmul.f32 %v13709_v32, %v8531_v36  ;;  %v8936_v44 = vld [vmem:[#allocation2 + $0x92] sm:$0xff]  ;;  %v7580_v53 = vpop.f32.mrf.mxu3  ;;  %v7807_v24 = vpop.f32.mrf.mxu0 }
 0x74d   : > { %v8790_v23 = vsel %vm8787_vm10, %v8789_v9, %v8785_v19  ;;  %10472 = vrcp.f32 %v13843_v6  ;;  %vm8798_vm3 = vweird.f32 %v10469_v56  ;;  %v8816_v15 = vand.u32 2147483647, %v13843_v6  ;;  %v8937_v9 = vld [vmem:[#allocation2 + $0x9a] sm:$0xff] }
 0x74e   : > { %8966 = vst [vmem:[%s10623_s17 + $0x30] sm:$0xff] %v8950_v43  ;;  %v8919_v4 = vmul.f32 %v8790_v23, %v13798_v57  ;;  %v8794_v20 = vsub.f32 1.0, %v8793_v50  ;;  %v13852_v13 = vadd.f32 %v13715_v22, %v8583_v62  ;;  %v8214_v57 = vpop.f32.mrf.mxu1  ;;  %vm8799_vm1 = vmor %vm8797_vm2, %vm8798_vm3  ;;  %v8818_v16 = vand.u32 2147483648, %v13843_v6 }
 0x74f   : > { %v8235_v37 = vadd.f32 %v8214_v57, %v7825_v10  ;;  %vm8812_vm12 = vweird.f32 %v13843_v6  ;;  %v7599_v12 = vadd.f32 %v7580_v53, %v13701_v3  ;;  %vm8817_vm15 = vcmp.eq.f32.partialorder %v8816_v15, 8.507059e+37 }
 0x750   : > { %v8951_v31 = vadd.f32 %v8935_v26, %v8919_v4  ;;  %v8795_v48 = vmul.f32 %v10469_v56, %v8794_v20  ;;  %v10075_v5 = vmul.f32 -1.442695, %v13852_v13  ;;  %v8819_v25 = vor.u32 1.1754944e-38, %v8818_v16 }
 0x751   : > { %v10471_v2 = vpop.eup %10470  ;;  %v8510_v1 = vpop.f32.mrf.mxu2  ;;  %v7826_v23 = vadd.f32 %v7807_v24, %v7599_v12 }
 0x752   : > { %8967 = vst [vmem:[%s10623_s17 + $0x38] sm:$0xff] %v8951_v31  ;;  %v8796_v59 = vadd.f32 %v10469_v56, %v8795_v48  ;;  %v13858_v0 = vadd.f32 1.0, %v10471_v2  ;;  %v8532_v18 = vadd.f32 %v8510_v1, %v8234_v7  ;;  %10474 = vpow2.f32 %v10075_v5 }
 0x753   : > { %v10473_v30 = vpop.eup %10472 }
 0x754   : > { %v8800_v40 = vsel %vm8799_vm1, %v10469_v56, %v8796_v59  ;;  %v8808_v55 = vmul.f32 %v10473_v30, %v13843_v6  ;;  %10476 = vrcp.f32 %v13858_v0  ;;  %v8584_v58 = vmul.f32 %v13709_v32, %v8532_v18  ;;  %v7582_v39 = vpop.f32.mrf.mxu3  ;;  %v7809_v46 = vpop.f32.mrf.mxu0 }
 0x755   : > { %v8805_v33 = vsel %vm8802_vm11, %v8804_v14, %v8800_v40  ;;  %vm8813_vm8 = vweird.f32 %v10473_v30  ;;  %v8831_v19 = vand.u32 2147483647, %v13858_v0  ;;  %v8833_v50 = vand.u32 2147483648, %v13858_v0 }
 0x756   : > { %v8920_v34 = vmul.f32 %v8805_v33, %v13809_v45  ;;  %v8809_v63 = vsub.f32 1.0, %v8808_v55  ;;  %v13867_v21 = vadd.f32 %v13715_v22, %v8584_v58  ;;  %vm8814_vm13 = vmor %vm8812_vm12, %vm8813_vm8  ;;  %v8217_v56 = vpop.f32.mrf.mxu1  ;;  %vm8827_vm4 = vweird.f32 %v13858_v0 }
 0x757   : > { %v8236_v20 = vadd.f32 %v8217_v56, %v7826_v23  ;;  %v7600_v48 = vadd.f32 %v7582_v39, %v13704_v27  ;;  %v8834_v7 = vor.u32 1.1754944e-38, %v8833_v50  ;;  %vm8832_vm6 = vcmp.eq.f32.partialorder %v8831_v19, 8.507059e+37  ;;  %v8940_v19 = vld [vmem:[#allocation2 + $0xc2] sm:$0xff] }
 0x758   : > { %v8952_v47 = vadd.f32 %v8936_v44, %v8920_v34  ;;  %v8810_v51 = vmul.f32 %v10473_v30, %v8809_v63  ;;  %v10475_v28 = vpop.eup %10474  ;;  %v10076_v45 = vmul.f32 -1.442695, %v13867_v21 }
 0x759   : > { %v8512_v43 = vpop.f32.mrf.mxu2  ;;  %v13873_v35 = vadd.f32 1.0, %v10475_v28  ;;  %v7827_v55 = vadd.f32 %v7809_v46, %v7600_v48 }
 0x75a   : > { %8968 = vst [vmem:[%s10623_s17 + $0x40] sm:$0xff] %v8952_v47  ;;  %v8811_v52 = vadd.f32 %v10473_v30, %v8810_v51  ;;  %v10477_v49 = vpop.eup %10476  ;;  %v8533_v54 = vadd.f32 %v8512_v43, %v8235_v37  ;;  %10478 = vpow2.f32 %v10076_v45  ;;  %v8939_v45 = vld [vmem:[#allocation2 + $0xb2] sm:$0xff] }
 0x75b   : > { %v8823_v17 = vmul.f32 %v10477_v49, %v13858_v0  ;;  %10480 = vrcp.f32 %v13873_v35  ;;  %vm8828_vm0 = vweird.f32 %v10477_v49  ;;  %v8846_v29 = vand.u32 2147483647, %v13873_v35 }
 0x75c   : > { %v8815_v8 = vsel %vm8814_vm13, %v10473_v30, %v8811_v52  ;;  %v8585_v36 = vmul.f32 %v13709_v32, %v8533_v54  ;;  %vm8829_vm5 = vmor %vm8827_vm4, %vm8828_vm0  ;;  %v8938_v30 = vld [vmem:[#allocation2 + $0xaa] sm:$0xff]  ;;  %v8848_v40 = vand.u32 2147483648, %v13873_v35  ;;  %vm8842_vm9 = vweird.f32 %v13873_v35 }
 0x75d   : > { %v8820_v60 = vsel %vm8817_vm15, %v8819_v25, %v8815_v8  ;;  %v8824_v3 = vsub.f32 1.0, %v8823_v17  ;;  %vm8847_vm10 = vcmp.eq.f32.partialorder %v8846_v29, 8.507059e+37 }
 0x75e   : > { %v8921_v6 = vmul.f32 %v8820_v60, %v13823_v61  ;;  %v13882_v4 = vadd.f32 %v13715_v22, %v8585_v36  ;;  %v8219_v18 = vpop.f32.mrf.mxu1  ;;  %v8849_v53 = vor.u32 1.1754944e-38, %v8848_v40  ;;  %v8942_v40 = vld [vmem:[#allocation2 + $0xda] sm:$0xff] }
 0x75f   : > { %v8825_v42 = vmul.f32 %v10477_v49, %v8824_v3  ;;  %v8237_v63 = vadd.f32 %v8219_v18, %v7827_v55 }
 0x760   : > { %v8953_v26 = vadd.f32 %v8937_v9, %v8921_v6  ;;  %v10479_v62 = vpop.eup %10478  ;;  %v10077_v61 = vmul.f32 -1.442695, %v13882_v4 }
 0x761   : > { %v8826_v41 = vadd.f32 %v10477_v49, %v8825_v42  ;;  %v8515_v38 = vpop.f32.mrf.mxu2  ;;  %v10481_v31 = vpop.eup %10480  ;;  %v8668_v2 = vadd.f32 1.0, %v10479_v62 }
 0x762   : > { %8969 = vst [vmem:[%s10623_s17 + $0x48] sm:$0xff] %v8953_v26  ;;  %v8534_v59 = vadd.f32 %v8515_v38, %v8236_v20  ;;  %v8838_v5 = vmul.f32 %v10481_v31, %v13873_v35  ;;  %10482 = vpow2.f32 %v10077_v61  ;;  %vm8843_vm7 = vweird.f32 %v10481_v31 }
 0x763   : > { %v8830_v57 = vsel %vm8829_vm5, %v10477_v49, %v8826_v41  ;;  %10484 = vrcp.f32 %v8668_v2  ;;  %vm8844_vm14 = vmor %vm8842_vm9, %vm8843_vm7  ;;  %v8861_v25 = vand.u32 2147483647, %v8668_v2  ;;  %v8863_v35 = vand.u32 2147483648, %v8668_v2 }
 0x764   : > { %v8835_v1 = vsel %vm8832_vm6, %v8834_v7, %v8830_v57  ;;  %v8839_v0 = vsub.f32 1.0, %v8838_v5  ;;  %v8586_v27 = vmul.f32 %v13709_v32, %v8534_v59  ;;  %vm8857_vm2 = vweird.f32 %v8668_v2 }
 0x765   : > { %v8922_v14 = vmul.f32 %v8835_v1, %v13837_v11  ;;  %vm8862_vm11 = vcmp.eq.f32.partialorder %v8861_v25, 8.507059e+37 }
 0x766   : > { %v8840_v44 = vmul.f32 %v10481_v31, %v8839_v0  ;;  %v13894_v34 = vadd.f32 %v13715_v22, %v8586_v27 }
 0x767   : > { %v8954_v33 = vadd.f32 %v8938_v30, %v8922_v14 }
 0x768   : > { %v10483_v58 = vpop.eup %10482  ;;  %v8841_v15 = vadd.f32 %v10481_v31, %v8840_v44  ;;  %v10078_v11 = vmul.f32 -1.442695, %v13894_v34 }
 0x769   : > { %8970 = vst [vmem:[%s10623_s17 + $0x50] sm:$0xff] %v8954_v33  ;;  %v8517_v16 = vpop.f32.mrf.mxu2  ;;  %v10485_v10 = vpop.eup %10484  ;;  %v8669_v47 = vadd.f32 1.0, %v10483_v58 }
 0x76a   : > { %v8535_v51 = vadd.f32 %v8517_v16, %v8237_v63  ;;  %v8845_v37 = vsel %vm8844_vm14, %v10481_v31, %v8841_v15  ;;  %v8853_v28 = vmul.f32 %v10485_v10, %v8668_v2  ;;  %10486 = vpow2.f32 %v10078_v11 }
 0x76b   : > { %v8850_v52 = vsel %vm8847_vm10, %v8849_v53, %v8845_v37  ;;  %10488 = vrcp.f32 %v8669_v47  ;;  %vm8858_vm3 = vweird.f32 %v10485_v10  ;;  %v8878_v23 = vand.u32 2147483648, %v8669_v47  ;;  %v8943_v53 = vld [vmem:[#allocation2 + $0xe2] sm:$0xff] }
 0x76c   : > { %v8923_v43 = vmul.f32 %v8850_v52, %v13852_v13  ;;  %v8854_v49 = vsub.f32 1.0, %v8853_v28  ;;  %v8587_v12 = vmul.f32 %v13709_v32, %v8535_v51  ;;  %vm8859_vm1 = vmor %vm8857_vm2, %vm8858_vm3  ;;  %v8864_v13 = vor.u32 1.1754944e-38, %v8863_v35 }
 0x76d   : > { %v8876_v20 = vand.u32 2147483647, %v8669_v47  ;;  %vm8872_vm12 = vweird.f32 %v8669_v47  ;;  %v8879_v61 = vor.u32 1.1754944e-38, %v8878_v23 }
 0x76e   : > { %v8955_v54 = vadd.f32 %v8939_v45, %v8923_v43  ;;  %v8855_v24 = vmul.f32 %v10485_v10, %v8854_v49  ;;  %v13902_v8 = vadd.f32 %v13715_v22, %v8587_v12 }
 0x76f   : > { %vm8877_vm15 = vcmp.eq.f32.partialorder %v8876_v20, 8.507059e+37 }
 0x770   : > { %v10487_v17 = vpop.eup %10486  ;;  %8971 = vst [vmem:[%s10623_s17 + $0x58] sm:$0xff] %v8955_v54  ;;  %v8856_v56 = vadd.f32 %v10485_v10, %v8855_v24  ;;  %v10079_v60 = vmul.f32 -1.442695, %v13902_v8 }
 0x771   : > { %v10489_v9 = vpop.eup %10488  ;;  %v8670_v6 = vadd.f32 1.0, %v10487_v17 }
 0x772   : > { %v8860_v32 = vsel %vm8859_vm1, %v10485_v10, %v8856_v56  ;;  %v8868_v3 = vmul.f32 %v10489_v9, %v8669_v47  ;;  %10490 = vpow2.f32 %v10079_v60  ;;  %vm8873_vm8 = vweird.f32 %v10489_v9 }
 0x773   : > { %v8865_v36 = vsel %vm8862_vm11, %v8864_v13, %v8860_v32  ;;  %10492 = vrcp.f32 %v8670_v6  ;;  %vm8874_vm13 = vmor %vm8872_vm12, %vm8873_vm8  ;;  %v8893_v57 = vand.u32 2147483648, %v8670_v6  ;;  %v8891_v30 = vand.u32 2147483647, %v8670_v6 }
 0x774   : > { %v8924_v22 = vmul.f32 %v8865_v36, %v13867_v21  ;;  %v8869_v50 = vsub.f32 1.0, %v8868_v3  ;;  %v8941_v21 = vld [vmem:[#allocation2 + $0xca] sm:$0xff]  ;;  %vm8887_vm4 = vweird.f32 %v8670_v6 }
 0x775   : > { %v8894_v0 = vor.u32 1.1754944e-38, %v8893_v57  ;;  %vm8892_vm6 = vcmp.eq.f32.partialorder %v8891_v30, 8.507059e+37 }
 0x776   : > { %v8956_v26 = vadd.f32 %v8940_v19, %v8924_v22  ;;  %v8870_v42 = vmul.f32 %v10489_v9, %v8869_v50 }
 0x778   : > { %v10491_v62 = vpop.eup %10490  ;;  %8972 = vst [vmem:[%s10623_s17 + $0x60] sm:$0xff] %v8956_v26  ;;  %v8871_v39 = vadd.f32 %v10489_v9, %v8870_v42 }
 0x779   : > { %v10493_v41 = vpop.eup %10492  ;;  %v8671_v38 = vadd.f32 1.0, %v10491_v62 }
 0x77a   : > { %v8875_v31 = vsel %vm8874_vm13, %v10489_v9, %v8871_v39  ;;  %v8883_v48 = vmul.f32 %v10493_v41, %v8670_v6  ;;  %vm8888_vm0 = vweird.f32 %v10493_v41 }
 0x77b   : > { %v8880_v7 = vsel %vm8877_vm15, %v8879_v61, %v8875_v31  ;;  %10494 = vrcp.f32 %v8671_v38  ;;  %vm8889_vm5 = vmor %vm8887_vm4, %vm8888_vm0  ;;  %v8908_v33 = vand.u32 2147483648, %v8671_v38  ;;  %v8906_v58 = vand.u32 2147483647, %v8671_v38 }
 0x77c   : > { %v8925_v2 = vmul.f32 %v8880_v7, %v13882_v4  ;;  %v8884_v59 = vsub.f32 1.0, %v8883_v48  ;;  %vm8902_vm9 = vweird.f32 %v8671_v38 }
 0x77d   : > { %v8909_v11 = vor.u32 1.1754944e-38, %v8908_v33  ;;  %vm8907_vm10 = vcmp.eq.f32.partialorder %v8906_v58, 8.507059e+37 }
 0x77e   : > { %v8957_v5 = vadd.f32 %v8941_v21, %v8925_v2  ;;  %v8885_v1 = vmul.f32 %v10493_v41, %v8884_v59 }
 0x780   : > { %8973 = vst [vmem:[%s10623_s17 + $0x68] sm:$0xff] %v8957_v5  ;;  %v8886_v46 = vadd.f32 %v10493_v41, %v8885_v1 }
 0x781   : > { %v10495_v14 = vpop.eup %10494 }
 0x782   : > { %v8890_v18 = vsel %vm8889_vm5, %v10493_v41, %v8886_v46  ;;  %v8898_v27 = vmul.f32 %v10495_v14, %v8671_v38  ;;  %vm8903_vm7 = vweird.f32 %v10495_v14 }
 0x783   : > { %v8895_v29 = vsel %vm8892_vm6, %v8894_v0, %v8890_v18  ;;  %vm8904_vm14 = vmor %vm8902_vm9, %vm8903_vm7 }
 0x784   : > { %v8926_v4 = vmul.f32 %v8895_v29, %v13894_v34  ;;  %v8899_v55 = vsub.f32 1.0, %v8898_v27 }
 0x786   : > { %v8958_v44 = vadd.f32 %v8942_v40, %v8926_v4  ;;  %v8900_v63 = vmul.f32 %v10495_v14, %v8899_v55 }
 0x788   : > { %8974 = vst [vmem:[%s10623_s17 + $0x70] sm:$0xff] %v8958_v44  ;;  %v8901_v15 = vadd.f32 %v10495_v14, %v8900_v63 }
 0x78a   : > { %v8905_v16 = vsel %vm8904_vm14, %v10495_v14, %v8901_v15 }
 0x78b   : > { %v8910_v10 = vsel %vm8907_vm10, %v8909_v11, %v8905_v16 }
 0x78c   : > { %v8927_v47 = vmul.f32 %v8910_v10, %v13902_v8 }
 0x78e   : > { %v8959_v51 = vadd.f32 %v8943_v53, %v8927_v47 }
 0x790   : > { %8975 = vst [vmem:[%s10623_s17 + $0x78] sm:$0xff] %v8959_v51 }
 0x791 PF: > { %s17_s28 = sadd.s32 1, %s10540_s28   ;;  %s14101_s24 = smov %s10532_s26 }
 0x792   : > { %p14_p7 = scmp.ge.s32.totalorder %s17_s28, 6   ;;  %s14102_s25 = smov %s10536_s27 }
 0x793   : > { %s14103_s26 = smov %s14106_s29  ;;  %s14104_s27 = smov %s14110_s30 }
 0x794   :  { %16 = sbr.rel (!%p14_p7) target bundleno = 3 (0x3), region = 195 }

</bundles_post_ra>
